<compile_context>
chip_gen: v7x
topology: tpu7x:2x2x1
jax: 0.10.0
libtpu: 0.0.40
codegen_flags: <defaults>
</compile_context>

<pallas_src>
import jax
import jax.numpy as jnp
from jax.experimental import pallas as pl
from jax.experimental.pallas import tpu as pltpu

# ----------------------------------------------------------------------------
# Geometry.  The module implies (B, 1, 8, 8) inputs (fc1 = 16*2*2).
# ----------------------------------------------------------------------------
G = 8                       # images packed along lanes per grid step
H = W = 8                   # input spatial size

WP8 = W + 2                 # padded row width, 8x8 stage (10)
OFF8 = WP8 + 1              # interior (1,1) offset in the padded grid (11)
M8 = 80                     # "extended" conv-output rows on the 8x8 stage
ROWS8 = 104                 # buffer rows (max read row = 79 + 22 = 101)

H4 = W4 = H // 2            # 4x4 stage
WP4 = W4 + 2                # 6
OFF4 = WP4 + 1              # 7
M4 = 24                     # max read row = 23 + 14 = 37
ROWS4 = 40


# --------------------------------- kernel -----------------------------------

def _net_kernel(x_ref,
                w1, b1, w2, b2, w3, b3, w4, b4, w5, b5,
                fc1w, fc1b, fc2w, fc2b,
                out_ref,
                p1, p2, p3, p4, p5, s8, s4):
    """One grid step = G images lane-packed as lane = img*C + ch."""
    f32 = jnp.float32

    # Re-zero the padding borders/slop every step (steps are fully
    # independent, so the batch grid can be 'parallel'); interior rows are
    # overwritten below, border rows give the conv its 'same' zero padding.
    p1[...] = jnp.zeros(p1.shape, f32)
    p3[...] = jnp.zeros(p3.shape, f32)
    p2[pl.ds(0, OFF8), :] = jnp.zeros((OFF8, p2.shape[1]), f32)
    p2[pl.ds(OFF8 + M8, ROWS8 - OFF8 - M8), :] = jnp.zeros(
        (ROWS8 - OFF8 - M8, p2.shape[1]), f32)
    for pr in (p4, p5):
        pr[pl.ds(0, OFF4), :] = jnp.zeros((OFF4, pr.shape[1]), f32)
        pr[pl.ds(OFF4 + M4, ROWS4 - OFF4 - M4), :] = jnp.zeros(
            (ROWS4 - OFF4 - M4, pr.shape[1]), f32)

    # valid-column masks for the "extended" conv outputs (row q = 10h+w / 6h+w)
    mask8 = (jax.lax.broadcasted_iota(jnp.int32, (M8, 1), 0) % WP8 < W
             ).astype(f32)
    mask4 = (jax.lax.broadcasted_iota(jnp.int32, (M4, 1), 0) % WP4 < W4
             ).astype(f32)

    def conv3x3_relu(p_ref, w_ref, b_ref, m, wp):
        """3x3 'same' conv + bias + ReLU over a zero-padded, row-flattened
        buffer: 9 shifted bf16 MXU matmuls, f32 accumulation."""
        acc = jnp.dot(p_ref[pl.ds(0, m), :].astype(jnp.bfloat16), w_ref[0],
                      preferred_element_type=f32)
        for k in range(1, 9):
            off = (k // 3) * wp + (k % 3)
            acc = acc + jnp.dot(p_ref[pl.ds(off, m), :].astype(jnp.bfloat16),
                                w_ref[k], preferred_element_type=f32)
        return jnp.maximum(acc + b_ref[...], 0.0)

    # -- place the raw (8x8, Cin=1) rows into the zero-padded conv1 buffer --
    for h in range(H):
        p1[pl.ds(OFF8 + WP8 * h, W), :] = x_ref[pl.ds(W * h, W), :]

    # -- conv1, conv2 (8x8, ReLU) --
    e1 = conv3x3_relu(p1, w1, b1, M8, WP8)                 # (M8, G*8)
    p2[pl.ds(OFF8, M8), :] = e1 * mask8
    e2 = conv3x3_relu(p2, w2, b2, M8, WP8)                 # (M8, G*8)

    # -- 2x2 max-pool (8x8 -> 4x4) into the padded conv3 buffer --
    s8[...] = e2
    t = jnp.maximum(
        jnp.maximum(s8[pl.ds(0, 68), :], s8[pl.ds(1, 68), :]),
        jnp.maximum(s8[pl.ds(WP8, 68), :], s8[pl.ds(WP8 + 1, 68), :]))
    s8[pl.ds(0, 68), :] = t
    for ph in range(H4):
        p3[pl.ds(OFF4 + WP4 * ph, W4), :] = s8[
            pl.ds(2 * WP8 * ph, W4, stride=2), :]

    # -- conv3, conv4, conv5 (4x4, ReLU) --
    e3 = conv3x3_relu(p3, w3, b3, M4, WP4)                 # (M4, G*10)
    p4[pl.ds(OFF4, M4), :] = e3 * mask4
    e4 = conv3x3_relu(p4, w4, b4, M4, WP4)                 # (M4, G*16)
    p5[pl.ds(OFF4, M4), :] = e4 * mask4
    e5 = conv3x3_relu(p5, w5, b5, M4, WP4)                 # (M4, G*16)

    # -- 2x2 max-pool (4x4 -> 2x2): one pooled row per spatial position --
    s4[...] = e5
    t = jnp.maximum(
        jnp.maximum(s4[pl.ds(0, 16), :], s4[pl.ds(1, 16), :]),
        jnp.maximum(s4[pl.ds(WP4, 16), :], s4[pl.ds(WP4 + 1, 16), :]))
    s4[pl.ds(0, 16), :] = t
    feats = jnp.concatenate(
        [s4[pl.ds(0, 2, stride=2), :],          # positions (0,0), (0,1)
         s4[pl.ds(2 * WP4, 2, stride=2), :]],   # positions (1,0), (1,1)
        axis=0).astype(jnp.bfloat16)            # (4, G*16), lane = g*16 + c

    # -- fc1 (+ReLU), fc2 directly on the lane-packed features: block-diag
    #    weights avoid any lane->sublane relayout at the flatten boundary --
    acc = jnp.dot(feats[0:1, :], fc1w[0], preferred_element_type=f32)
    for pos in range(1, 4):
        acc = acc + jnp.dot(feats[pos:pos + 1, :], fc1w[pos],
                            preferred_element_type=f32)
    hidden = jnp.maximum(acc + fc1b[...], 0.0).astype(jnp.bfloat16)  # (1, G*100)
    out = jnp.dot(hidden, fc2w[...], preferred_element_type=f32) + fc2b[...]
    out_ref[...] = out.astype(out_ref.dtype)                         # (1, G*10)


# ------------------------------ forward pass --------------------------------

@jax.jit
def net_forward(x_nchw, kp):
    B, cin, h, w = x_nchw.shape
    assert (cin, h, w) == (1, H, W), "Net expects (B, 1, 8, 8) input"
    Bp = -(-B // G) * G
    nG = Bp // G

    # tiny host-side glue: group images and move them onto the lane axis
    x = x_nchw.reshape(B, H * W)
    x = jnp.pad(x, ((0, Bp - B), (0, 0)))
    x = x.reshape(nG, G, H * W).transpose(0, 2, 1)          # (nG, 64, G)

    weights = (kp["w1"], kp["b1"], kp["w2"], kp["b2"], kp["w3"], kp["b3"],
               kp["w4"], kp["b4"], kp["w5"], kp["b5"],
               kp["fc1_w"], kp["fc1_b"], kp["fc2_w"], kp["fc2_b"])

    def resident(a):                     # full block, constant index_map ->
        return pl.BlockSpec(             # stays VMEM-resident across steps
            a.shape, lambda i, _nd=a.ndim: (0,) * _nd)

    out = pl.pallas_call(
        _net_kernel,
        out_shape=jax.ShapeDtypeStruct((nG, 1, G * 10), jnp.float32),
        grid=(nG,),
        in_specs=[pl.BlockSpec((None, H * W, G), lambda i: (i, 0, 0))]
                 + [resident(a) for a in weights],
        out_specs=pl.BlockSpec((None, 1, G * 10), lambda i: (i, 0, 0)),
        scratch_shapes=[
            pltpu.VMEM((ROWS8, G), jnp.float32),            # p1: conv1 input
            pltpu.VMEM((ROWS8, G * 8), jnp.float32),        # p2: conv2 input
            pltpu.VMEM((ROWS4, G * 8), jnp.float32),        # p3: conv3 input
            pltpu.VMEM((ROWS4, G * 10), jnp.float32),       # p4: conv4 input
            pltpu.VMEM((ROWS4, G * 16), jnp.float32),       # p5: conv5 input
            pltpu.VMEM((M8, G * 8), jnp.float32),           # s8: pool1 staging
            pltpu.VMEM((M4, G * 16), jnp.float32),          # s4: pool2 staging
        ],
        compiler_params=pltpu.CompilerParams(
            dimension_semantics=("parallel",)),
    )(x, *weights)

    return out.reshape(Bp, 10)[:B]


# ------------------------------ parameters ----------------------------------

def init_params(key):
    """Parameters in PyTorch-native layouts (conv: OIHW, linear: (out, in))."""
    ks = jax.random.split(key, 14)

    def conv(kw, kb, ci, co):
        s = 1.0 / jnp.sqrt(9.0 * ci)
        return (jax.random.normal(kw, (co, ci, 3, 3), jnp.float32) * s,
                jax.random.normal(kb, (co,), jnp.float32) * 0.01)

    def fc(kw, kb, fin, fout):
        s = 1.0 / jnp.sqrt(float(fin))
        return (jax.random.normal(kw, (fout, fin), jnp.float32) * s,
                jax.random.normal(kb, (fout,), jnp.float32) * 0.01)

    p = {}
    for i, (ci, co) in enumerate([(1, 8), (8, 8), (8, 10), (10, 16), (16, 16)],
                                 start=1):
        p[f"w{i}"], p[f"b{i}"] = conv(ks[2 * i - 2], ks[2 * i - 1], ci, co)
    p["fc1_w"], p["fc1_b"] = fc(ks[10], ks[11], 16 * 2 * 2, 100)
    p["fc2_w"], p["fc2_b"] = fc(ks[12], ks[13], 100, 10)
    return p


def pack_params(p):
    """One-time repack of PyTorch-layout params into the kernel layouts:
    per-tap conv weights and per-position fc1 weights are expanded to
    block-diagonal bf16 matrices kron(I_G, W) (image-major lanes, matching
    lane = img*C + ch); biases are lane-tiled and kept in f32."""
    eye = jnp.eye(G, dtype=jnp.float32)

    def bdiag(w2d):
        return jnp.kron(eye, w2d).astype(jnp.bfloat16)

    kp = {}
    for i in range(1, 6):
        w = p[f"w{i}"]                                       # (cout, cin, 3, 3)
        taps = jnp.transpose(w, (2, 3, 1, 0)).reshape(9, w.shape[1], w.shape[0])
        kp[f"w{i}"] = jnp.stack([bdiag(taps[k]) for k in range(9)], axis=0)
        kp[f"b{i}"] = jnp.tile(p[f"b{i}"], G).reshape(1, -1)

    # fc1: (100, 64) with PyTorch flatten index j = c*4 + pos  ->  (4, 16, 100)
    w1t = p["fc1_w"].T.reshape(16, 4, 100).transpose(1, 0, 2)
    kp["fc1_w"] = jnp.stack([bdiag(w1t[k]) for k in range(4)], axis=0)
    kp["fc1_b"] = jnp.tile(p["fc1_b"], G).reshape(1, -1)
    kp["fc2_w"] = bdiag(p["fc2_w"].T)                        # (G*100, G*10)
    kp["fc2_b"] = jnp.tile(p["fc2_b"], G).reshape(1, -1)
    return kp


# ------------------------------ reference -----------------------------------

def reference_forward(x, p):
    """Pure-JAX (f32) reference of the PyTorch forward pass."""
    def conv(y, w, b):
        y = jax.lax.conv_general_dilated(
            y, w, window_strides=(1, 1), padding="SAME",
            dimension_numbers=("NCHW", "OIHW", "NCHW"))
        return jax.nn.relu(y + b[None, :, None, None])

    def pool(y):
        return jax.lax.reduce_window(y, -jnp.inf, jax.lax.max,
                                     (1, 1, 2, 2), (1, 1, 2, 2), "VALID")

    y = conv(x, p["w1"], p["b1"]); y = conv(y, p["w2"], p["b2"]); y = pool(y)
    y = conv(y, p["w3"], p["b3"]); y = conv(y, p["w4"], p["b4"])
    y = conv(y, p["w5"], p["b5"]); y = pool(y)
    y = y.reshape(y.shape[0], -1)
    y = jax.nn.relu(y @ p["fc1_w"].T + p["fc1_b"])
    return y @ p["fc2_w"].T + p["fc2_b"]


if __name__ == "__main__":
    key = jax.random.PRNGKey(0)
    k_x, k_p = jax.random.split(key)
    # 1 input channel, 8x8 spatial so that after two 2x2 pools the flatten
    # size is 16*2*2 = fc1's input (as the module requires).
    x = jax.random.normal(k_x, (2, 1, 8, 8), jnp.float32)
    params = init_params(k_p)
    kparams = pack_params(params)

    out = jax.block_until_ready(net_forward(x, kparams))
    assert out.shape == (2, 10), out.shape

    ref = reference_forward(x, params)
    err = float(jnp.max(jnp.abs(out - ref)))
    assert err < 0.15, f"kernel/reference mismatch: max abs err {err}"
    print("KERNEL_OK")
</pallas_src>

<mosaic_0001>
module attributes {stable_mosaic.version = 11 : i64} {
  func.func @_net_kernel(%arg0: i32, %arg1: memref<1x64x8xf32, #tpu.memory_space<vmem>>, %arg2: memref<9x8x64xbf16, #tpu.memory_space<vmem>>, %arg3: memref<1x64xf32, #tpu.memory_space<vmem>>, %arg4: memref<9x64x64xbf16, #tpu.memory_space<vmem>>, %arg5: memref<1x64xf32, #tpu.memory_space<vmem>>, %arg6: memref<9x64x80xbf16, #tpu.memory_space<vmem>>, %arg7: memref<1x80xf32, #tpu.memory_space<vmem>>, %arg8: memref<9x80x128xbf16, #tpu.memory_space<vmem>>, %arg9: memref<1x128xf32, #tpu.memory_space<vmem>>, %arg10: memref<9x128x128xbf16, #tpu.memory_space<vmem>>, %arg11: memref<1x128xf32, #tpu.memory_space<vmem>>, %arg12: memref<4x128x800xbf16, #tpu.memory_space<vmem>>, %arg13: memref<1x800xf32, #tpu.memory_space<vmem>>, %arg14: memref<800x80xbf16, #tpu.memory_space<vmem>>, %arg15: memref<1x80xf32, #tpu.memory_space<vmem>>, %arg16: memref<1x1x80xf32, #tpu.memory_space<vmem>>, %arg17: memref<104x8xf32, #tpu.memory_space<vmem>>, %arg18: memref<104x64xf32, #tpu.memory_space<vmem>>, %arg19: memref<40x64xf32, #tpu.memory_space<vmem>>, %arg20: memref<40x80xf32, #tpu.memory_space<vmem>>, %arg21: memref<40x128xf32, #tpu.memory_space<vmem>>, %arg22: memref<80x64xf32, #tpu.memory_space<vmem>>, %arg23: memref<24x128xf32, #tpu.memory_space<vmem>>) attributes {dimension_semantics = [#tpu.dimension_semantics<parallel>], iteration_bounds = array<i64: 1>, scalar_prefetch = 0 : i64, scratch_operands = 7 : i64, tpu.core_type = #tpu.core_type<tc>, window_params = [{transform_indices = @transform_0, window_bounds = array<i64: 1, 64, 8>}, {pipeline_mode = #tpu.pipeline_mode<synchronous>, transform_indices = @transform_1, window_bounds = array<i64: 9, 8, 64>}, {pipeline_mode = #tpu.pipeline_mode<synchronous>, transform_indices = @transform_2, window_bounds = array<i64: 1, 64>}, {pipeline_mode = #tpu.pipeline_mode<synchronous>, transform_indices = @transform_3, window_bounds = array<i64: 9, 64, 64>}, {pipeline_mode = #tpu.pipeline_mode<synchronous>, transform_indices = @transform_4, window_bounds = array<i64: 1, 64>}, {pipeline_mode = #tpu.pipeline_mode<synchronous>, transform_indices = @transform_5, window_bounds = array<i64: 9, 64, 80>}, {pipeline_mode = #tpu.pipeline_mode<synchronous>, transform_indices = @transform_6, window_bounds = array<i64: 1, 80>}, {pipeline_mode = #tpu.pipeline_mode<synchronous>, transform_indices = @transform_7, window_bounds = array<i64: 9, 80, 128>}, {pipeline_mode = #tpu.pipeline_mode<synchronous>, transform_indices = @transform_8, window_bounds = array<i64: 1, 128>}, {pipeline_mode = #tpu.pipeline_mode<synchronous>, transform_indices = @transform_9, window_bounds = array<i64: 9, 128, 128>}, {pipeline_mode = #tpu.pipeline_mode<synchronous>, transform_indices = @transform_10, window_bounds = array<i64: 1, 128>}, {pipeline_mode = #tpu.pipeline_mode<synchronous>, transform_indices = @transform_11, window_bounds = array<i64: 4, 128, 800>}, {pipeline_mode = #tpu.pipeline_mode<synchronous>, transform_indices = @transform_12, window_bounds = array<i64: 1, 800>}, {pipeline_mode = #tpu.pipeline_mode<synchronous>, transform_indices = @transform_13, window_bounds = array<i64: 800, 80>}, {pipeline_mode = #tpu.pipeline_mode<synchronous>, transform_indices = @transform_14, window_bounds = array<i64: 1, 80>}, {transform_indices = @transform_15, window_bounds = array<i64: 1, 1, 80>}]} {
    %cst = arith.constant 0.000000e+00 : f32
    %0 = vector.broadcast %cst : f32 to vector<104x8xf32>
    %c0 = arith.constant 0 : index
    %c0_0 = arith.constant 0 : index
    %1 = vector.load %arg17[%c0, %c0_0] : memref<104x8xf32, #tpu.memory_space<vmem>>, vector<104x8xf32>
    tpu.vector_store %arg17[%c0, %c0_0], %0 {strides = array<i32>} : memref<104x8xf32, #tpu.memory_space<vmem>>, vector<104x8xf32>,
    %cst_1 = arith.constant 0.000000e+00 : f32
    %2 = vector.broadcast %cst_1 : f32 to vector<40x64xf32>
    %c0_2 = arith.constant 0 : index
    %c0_3 = arith.constant 0 : index
    %3 = vector.load %arg19[%c0_2, %c0_3] : memref<40x64xf32, #tpu.memory_space<vmem>>, vector<40x64xf32>
    tpu.vector_store %arg19[%c0_2, %c0_3], %2 {strides = array<i32>} : memref<40x64xf32, #tpu.memory_space<vmem>>, vector<40x64xf32>,
    %cst_4 = arith.constant 0.000000e+00 : f32
    %4 = vector.broadcast %cst_4 : f32 to vector<11x64xf32>
    %c0_5 = arith.constant 0 : index
    %c0_6 = arith.constant 0 : index
    %5 = vector.load %arg18[%c0_5, %c0_6] : memref<104x64xf32, #tpu.memory_space<vmem>>, vector<11x64xf32>
    tpu.vector_store %arg18[%c0_5, %c0_6], %4 {strides = array<i32>} : memref<104x64xf32, #tpu.memory_space<vmem>>, vector<11x64xf32>,
    %cst_7 = arith.constant 0.000000e+00 : f32
    %6 = vector.broadcast %cst_7 : f32 to vector<13x64xf32>
    %c91 = arith.constant 91 : index
    %c0_8 = arith.constant 0 : index
    %7 = vector.load %arg18[%c91, %c0_8] : memref<104x64xf32, #tpu.memory_space<vmem>>, vector<13x64xf32>
    tpu.vector_store %arg18[%c91, %c0_8], %6 {strides = array<i32>} : memref<104x64xf32, #tpu.memory_space<vmem>>, vector<13x64xf32>,
    %cst_9 = arith.constant 0.000000e+00 : f32
    %8 = vector.broadcast %cst_9 : f32 to vector<7x80xf32>
    %c0_10 = arith.constant 0 : index
    %c0_11 = arith.constant 0 : index
    %9 = vector.load %arg20[%c0_10, %c0_11] : memref<40x80xf32, #tpu.memory_space<vmem>>, vector<7x80xf32>
    tpu.vector_store %arg20[%c0_10, %c0_11], %8 {strides = array<i32>} : memref<40x80xf32, #tpu.memory_space<vmem>>, vector<7x80xf32>,
    %cst_12 = arith.constant 0.000000e+00 : f32
    %10 = vector.broadcast %cst_12 : f32 to vector<9x80xf32>
    %c31 = arith.constant 31 : index
    %c0_13 = arith.constant 0 : index
    %11 = vector.load %arg20[%c31, %c0_13] : memref<40x80xf32, #tpu.memory_space<vmem>>, vector<9x80xf32>
    tpu.vector_store %arg20[%c31, %c0_13], %10 {strides = array<i32>} : memref<40x80xf32, #tpu.memory_space<vmem>>, vector<9x80xf32>,
    %cst_14 = arith.constant 0.000000e+00 : f32
    %12 = vector.broadcast %cst_14 : f32 to vector<7x128xf32>
    %c0_15 = arith.constant 0 : index
    %c0_16 = arith.constant 0 : index
    %13 = vector.load %arg21[%c0_15, %c0_16] : memref<40x128xf32, #tpu.memory_space<vmem>>, vector<7x128xf32>
    tpu.vector_store %arg21[%c0_15, %c0_16], %12 {strides = array<i32>} : memref<40x128xf32, #tpu.memory_space<vmem>>, vector<7x128xf32>,
    %cst_17 = arith.constant 0.000000e+00 : f32
    %14 = vector.broadcast %cst_17 : f32 to vector<9x128xf32>
    %c31_18 = arith.constant 31 : index
    %c0_19 = arith.constant 0 : index
    %15 = vector.load %arg21[%c31_18, %c0_19] : memref<40x128xf32, #tpu.memory_space<vmem>>, vector<9x128xf32>
    tpu.vector_store %arg21[%c31_18, %c0_19], %14 {strides = array<i32>} : memref<40x128xf32, #tpu.memory_space<vmem>>, vector<9x128xf32>,
    %16 = tpu.iota {dimensions = array<i32: 0>} : vector<80x1xi32>
    %c10_i32 = arith.constant 10 : i32
    %c0_i32 = arith.constant 0 : i32
    %17 = arith.cmpi eq, %c10_i32, %c0_i32 : i32
    %c1_i32 = arith.constant 1 : i32
    %18 = arith.select %17, %c1_i32, %c10_i32 : i32
    %19 = vector.broadcast %18 : i32 to vector<80x1xi32>
    %20 = arith.remsi %16, %19 : vector<80x1xi32>
    %c0_i32_20 = arith.constant 0 : i32
    %21 = vector.broadcast %c0_i32_20 : i32 to vector<80x1xi32>
    %22 = arith.cmpi ne, %20, %21 : vector<80x1xi32>
    %c0_i32_21 = arith.constant 0 : i32
    %23 = vector.broadcast %c0_i32_21 : i32 to vector<80x1xi32>
    %24 = arith.cmpi slt, %20, %23 : vector<80x1xi32>
    %c0_i32_22 = arith.constant 0 : i32
    %25 = arith.cmpi slt, %18, %c0_i32_22 : i32
    %26 = vector.broadcast %25 : i1 to vector<80x1xi1>
    %27 = vector.broadcast %26 : vector<80x1xi1> to vector<80x1xi1>
    %28 = arith.xori %24, %27 : vector<80x1xi1>
    %29 = arith.andi %28, %22 : vector<80x1xi1>
    %30 = vector.broadcast %18 : i32 to vector<80x1xi32>
    %31 = arith.addi %20, %30 : vector<80x1xi32>
    %32 = arith.select %29, %31, %20 : vector<80x1xi1>, vector<80x1xi32>
    %c8_i32 = arith.constant 8 : i32
    %33 = vector.broadcast %c8_i32 : i32 to vector<80x1xi32>
    %34 = arith.cmpi slt, %32, %33 : vector<80x1xi32>
    %35 = arith.extui %34 : vector<80x1xi1> to vector<80x1xi32>
    %36 = arith.sitofp %35 : vector<80x1xi32> to vector<80x1xf32>
    %37 = tpu.iota {dimensions = array<i32: 0>} : vector<24x1xi32>
    %c6_i32 = arith.constant 6 : i32
    %c0_i32_23 = arith.constant 0 : i32
    %38 = arith.cmpi eq, %c6_i32, %c0_i32_23 : i32
    %c1_i32_24 = arith.constant 1 : i32
    %39 = arith.select %38, %c1_i32_24, %c6_i32 : i32
    %40 = vector.broadcast %39 : i32 to vector<24x1xi32>
    %41 = arith.remsi %37, %40 : vector<24x1xi32>
    %c0_i32_25 = arith.constant 0 : i32
    %42 = vector.broadcast %c0_i32_25 : i32 to vector<24x1xi32>
    %43 = arith.cmpi ne, %41, %42 : vector<24x1xi32>
    %c0_i32_26 = arith.constant 0 : i32
    %44 = vector.broadcast %c0_i32_26 : i32 to vector<24x1xi32>
    %45 = arith.cmpi slt, %41, %44 : vector<24x1xi32>
    %c0_i32_27 = arith.constant 0 : i32
    %46 = arith.cmpi slt, %39, %c0_i32_27 : i32
    %47 = vector.broadcast %46 : i1 to vector<24x1xi1>
    %48 = vector.broadcast %47 : vector<24x1xi1> to vector<24x1xi1>
    %49 = arith.xori %45, %48 : vector<24x1xi1>
    %50 = arith.andi %49, %43 : vector<24x1xi1>
    %51 = vector.broadcast %39 : i32 to vector<24x1xi32>
    %52 = arith.addi %41, %51 : vector<24x1xi32>
    %53 = arith.select %50, %52, %41 : vector<24x1xi1>, vector<24x1xi32>
    %c4_i32 = arith.constant 4 : i32
    %54 = vector.broadcast %c4_i32 : i32 to vector<24x1xi32>
    %55 = arith.cmpi slt, %53, %54 : vector<24x1xi32>
    %56 = arith.extui %55 : vector<24x1xi1> to vector<24x1xi32>
    %57 = arith.sitofp %56 : vector<24x1xi32> to vector<24x1xf32>
    %c0_28 = arith.constant 0 : index
    %c0_29 = arith.constant 0 : index
    %c0_30 = arith.constant 0 : index
    %58 = vector.load %arg1[%c0_28, %c0_29, %c0_30] : memref<1x64x8xf32, #tpu.memory_space<vmem>>, vector<1x8x8xf32>
    %59 = vector.shape_cast %58 : vector<1x8x8xf32> to vector<8x8xf32>
    %c11 = arith.constant 11 : index
    %c0_31 = arith.constant 0 : index
    %60 = vector.load %arg17[%c11, %c0_31] : memref<104x8xf32, #tpu.memory_space<vmem>>, vector<8x8xf32>
    tpu.vector_store %arg17[%c11, %c0_31], %59 {strides = array<i32>} : memref<104x8xf32, #tpu.memory_space<vmem>>, vector<8x8xf32>,
    %c0_32 = arith.constant 0 : index
    %c8 = arith.constant 8 : index
    %c0_33 = arith.constant 0 : index
    %61 = vector.load %arg1[%c0_32, %c8, %c0_33] : memref<1x64x8xf32, #tpu.memory_space<vmem>>, vector<1x8x8xf32>
    %62 = vector.shape_cast %61 : vector<1x8x8xf32> to vector<8x8xf32>
    %c21 = arith.constant 21 : index
    %c0_34 = arith.constant 0 : index
    %63 = vector.load %arg17[%c21, %c0_34] : memref<104x8xf32, #tpu.memory_space<vmem>>, vector<8x8xf32>
    tpu.vector_store %arg17[%c21, %c0_34], %62 {strides = array<i32>} : memref<104x8xf32, #tpu.memory_space<vmem>>, vector<8x8xf32>,
    %c0_35 = arith.constant 0 : index
    %c16 = arith.constant 16 : index
    %c0_36 = arith.constant 0 : index
    %64 = vector.load %arg1[%c0_35, %c16, %c0_36] : memref<1x64x8xf32, #tpu.memory_space<vmem>>, vector<1x8x8xf32>
    %65 = vector.shape_cast %64 : vector<1x8x8xf32> to vector<8x8xf32>
    %c31_37 = arith.constant 31 : index
    %c0_38 = arith.constant 0 : index
    %66 = vector.load %arg17[%c31_37, %c0_38] : memref<104x8xf32, #tpu.memory_space<vmem>>, vector<8x8xf32>
    tpu.vector_store %arg17[%c31_37, %c0_38], %65 {strides = array<i32>} : memref<104x8xf32, #tpu.memory_space<vmem>>, vector<8x8xf32>,
    %c0_39 = arith.constant 0 : index
    %c24 = arith.constant 24 : index
    %c0_40 = arith.constant 0 : index
    %67 = vector.load %arg1[%c0_39, %c24, %c0_40] : memref<1x64x8xf32, #tpu.memory_space<vmem>>, vector<1x8x8xf32>
    %68 = vector.shape_cast %67 : vector<1x8x8xf32> to vector<8x8xf32>
    %c41 = arith.constant 41 : index
    %c0_41 = arith.constant 0 : index
    %69 = vector.load %arg17[%c41, %c0_41] : memref<104x8xf32, #tpu.memory_space<vmem>>, vector<8x8xf32>
    tpu.vector_store %arg17[%c41, %c0_41], %68 {strides = array<i32>} : memref<104x8xf32, #tpu.memory_space<vmem>>, vector<8x8xf32>,
    %c0_42 = arith.constant 0 : index
    %c32 = arith.constant 32 : index
    %c0_43 = arith.constant 0 : index
    %70 = vector.load %arg1[%c0_42, %c32, %c0_43] : memref<1x64x8xf32, #tpu.memory_space<vmem>>, vector<1x8x8xf32>
    %71 = vector.shape_cast %70 : vector<1x8x8xf32> to vector<8x8xf32>
    %c51 = arith.constant 51 : index
    %c0_44 = arith.constant 0 : index
    %72 = vector.load %arg17[%c51, %c0_44] : memref<104x8xf32, #tpu.memory_space<vmem>>, vector<8x8xf32>
    tpu.vector_store %arg17[%c51, %c0_44], %71 {strides = array<i32>} : memref<104x8xf32, #tpu.memory_space<vmem>>, vector<8x8xf32>,
    %c0_45 = arith.constant 0 : index
    %c40 = arith.constant 40 : index
    %c0_46 = arith.constant 0 : index
    %73 = vector.load %arg1[%c0_45, %c40, %c0_46] : memref<1x64x8xf32, #tpu.memory_space<vmem>>, vector<1x8x8xf32>
    %74 = vector.shape_cast %73 : vector<1x8x8xf32> to vector<8x8xf32>
    %c61 = arith.constant 61 : index
    %c0_47 = arith.constant 0 : index
    %75 = vector.load %arg17[%c61, %c0_47] : memref<104x8xf32, #tpu.memory_space<vmem>>, vector<8x8xf32>
    tpu.vector_store %arg17[%c61, %c0_47], %74 {strides = array<i32>} : memref<104x8xf32, #tpu.memory_space<vmem>>, vector<8x8xf32>,
    %c0_48 = arith.constant 0 : index
    %c48 = arith.constant 48 : index
    %c0_49 = arith.constant 0 : index
    %76 = vector.load %arg1[%c0_48, %c48, %c0_49] : memref<1x64x8xf32, #tpu.memory_space<vmem>>, vector<1x8x8xf32>
    %77 = vector.shape_cast %76 : vector<1x8x8xf32> to vector<8x8xf32>
    %c71 = arith.constant 71 : index
    %c0_50 = arith.constant 0 : index
    %78 = vector.load %arg17[%c71, %c0_50] : memref<104x8xf32, #tpu.memory_space<vmem>>, vector<8x8xf32>
    tpu.vector_store %arg17[%c71, %c0_50], %77 {strides = array<i32>} : memref<104x8xf32, #tpu.memory_space<vmem>>, vector<8x8xf32>,
    %c0_51 = arith.constant 0 : index
    %c56 = arith.constant 56 : index
    %c0_52 = arith.constant 0 : index
    %79 = vector.load %arg1[%c0_51, %c56, %c0_52] : memref<1x64x8xf32, #tpu.memory_space<vmem>>, vector<1x8x8xf32>
    %80 = vector.shape_cast %79 : vector<1x8x8xf32> to vector<8x8xf32>
    %c81 = arith.constant 81 : index
    %c0_53 = arith.constant 0 : index
    %81 = vector.load %arg17[%c81, %c0_53] : memref<104x8xf32, #tpu.memory_space<vmem>>, vector<8x8xf32>
    tpu.vector_store %arg17[%c81, %c0_53], %80 {strides = array<i32>} : memref<104x8xf32, #tpu.memory_space<vmem>>, vector<8x8xf32>,
    %c0_54 = arith.constant 0 : index
    %c0_55 = arith.constant 0 : index
    %82 = vector.load %arg17[%c0_54, %c0_55] : memref<104x8xf32, #tpu.memory_space<vmem>>, vector<80x8xf32>
    %83 = arith.truncf %82 : vector<80x8xf32> to vector<80x8xbf16>
    %c0_56 = arith.constant 0 : index
    %c0_57 = arith.constant 0 : index
    %c0_58 = arith.constant 0 : index
    %84 = vector.load %arg2[%c0_56, %c0_57, %c0_58] : memref<9x8x64xbf16, #tpu.memory_space<vmem>>, vector<1x8x64xbf16>
    %85 = vector.shape_cast %84 : vector<1x8x64xbf16> to vector<8x64xbf16>
    %cst_59 = arith.constant dense<0.000000e+00> : vector<80x64xf32>
    %86 = tpu.matmul %83, %85, %cst_59 {dimension_numbers = #tpu.dot_dimension_numbers<[1], [0], [0], [1], [0, 0, 1, 1], [], []>} : vector<80x8xbf16>, vector<8x64xbf16>, vector<80x64xf32> -> vector<80x64xf32>
    %c1 = arith.constant 1 : index
    %c0_60 = arith.constant 0 : index
    %87 = vector.load %arg17[%c1, %c0_60] : memref<104x8xf32, #tpu.memory_space<vmem>>, vector<80x8xf32>
    %88 = arith.truncf %87 : vector<80x8xf32> to vector<80x8xbf16>
    %c1_61 = arith.constant 1 : index
    %c0_62 = arith.constant 0 : index
    %c0_63 = arith.constant 0 : index
    %89 = vector.load %arg2[%c1_61, %c0_62, %c0_63] : memref<9x8x64xbf16, #tpu.memory_space<vmem>>, vector<1x8x64xbf16>
    %90 = vector.shape_cast %89 : vector<1x8x64xbf16> to vector<8x64xbf16>
    %cst_64 = arith.constant dense<0.000000e+00> : vector<80x64xf32>
    %91 = tpu.matmul %88, %90, %cst_64 {dimension_numbers = #tpu.dot_dimension_numbers<[1], [0], [0], [1], [0, 0, 1, 1], [], []>} : vector<80x8xbf16>, vector<8x64xbf16>, vector<80x64xf32> -> vector<80x64xf32>
    %92 = arith.addf %86, %91 : vector<80x64xf32>
    %c2 = arith.constant 2 : index
    %c0_65 = arith.constant 0 : index
    %93 = vector.load %arg17[%c2, %c0_65] : memref<104x8xf32, #tpu.memory_space<vmem>>, vector<80x8xf32>
    %94 = arith.truncf %93 : vector<80x8xf32> to vector<80x8xbf16>
    %c2_66 = arith.constant 2 : index
    %c0_67 = arith.constant 0 : index
    %c0_68 = arith.constant 0 : index
    %95 = vector.load %arg2[%c2_66, %c0_67, %c0_68] : memref<9x8x64xbf16, #tpu.memory_space<vmem>>, vector<1x8x64xbf16>
    %96 = vector.shape_cast %95 : vector<1x8x64xbf16> to vector<8x64xbf16>
    %cst_69 = arith.constant dense<0.000000e+00> : vector<80x64xf32>
    %97 = tpu.matmul %94, %96, %cst_69 {dimension_numbers = #tpu.dot_dimension_numbers<[1], [0], [0], [1], [0, 0, 1, 1], [], []>} : vector<80x8xbf16>, vector<8x64xbf16>, vector<80x64xf32> -> vector<80x64xf32>
    %98 = arith.addf %92, %97 : vector<80x64xf32>
    %c10 = arith.constant 10 : index
    %c0_70 = arith.constant 0 : index
    %99 = vector.load %arg17[%c10, %c0_70] : memref<104x8xf32, #tpu.memory_space<vmem>>, vector<80x8xf32>
    %100 = arith.truncf %99 : vector<80x8xf32> to vector<80x8xbf16>
    %c3 = arith.constant 3 : index
    %c0_71 = arith.constant 0 : index
    %c0_72 = arith.constant 0 : index
    %101 = vector.load %arg2[%c3, %c0_71, %c0_72] : memref<9x8x64xbf16, #tpu.memory_space<vmem>>, vector<1x8x64xbf16>
    %102 = vector.shape_cast %101 : vector<1x8x64xbf16> to vector<8x64xbf16>
    %cst_73 = arith.constant dense<0.000000e+00> : vector<80x64xf32>
    %103 = tpu.matmul %100, %102, %cst_73 {dimension_numbers = #tpu.dot_dimension_numbers<[1], [0], [0], [1], [0, 0, 1, 1], [], []>} : vector<80x8xbf16>, vector<8x64xbf16>, vector<80x64xf32> -> vector<80x64xf32>
    %104 = arith.addf %98, %103 : vector<80x64xf32>
    %c11_74 = arith.constant 11 : index
    %c0_75 = arith.constant 0 : index
    %105 = vector.load %arg17[%c11_74, %c0_75] : memref<104x8xf32, #tpu.memory_space<vmem>>, vector<80x8xf32>
    %106 = arith.truncf %105 : vector<80x8xf32> to vector<80x8xbf16>
    %c4 = arith.constant 4 : index
    %c0_76 = arith.constant 0 : index
    %c0_77 = arith.constant 0 : index
    %107 = vector.load %arg2[%c4, %c0_76, %c0_77] : memref<9x8x64xbf16, #tpu.memory_space<vmem>>, vector<1x8x64xbf16>
    %108 = vector.shape_cast %107 : vector<1x8x64xbf16> to vector<8x64xbf16>
    %cst_78 = arith.constant dense<0.000000e+00> : vector<80x64xf32>
    %109 = tpu.matmul %106, %108, %cst_78 {dimension_numbers = #tpu.dot_dimension_numbers<[1], [0], [0], [1], [0, 0, 1, 1], [], []>} : vector<80x8xbf16>, vector<8x64xbf16>, vector<80x64xf32> -> vector<80x64xf32>
    %110 = arith.addf %104, %109 : vector<80x64xf32>
    %c12 = arith.constant 12 : index
    %c0_79 = arith.constant 0 : index
    %111 = vector.load %arg17[%c12, %c0_79] : memref<104x8xf32, #tpu.memory_space<vmem>>, vector<80x8xf32>
    %112 = arith.truncf %111 : vector<80x8xf32> to vector<80x8xbf16>
    %c5 = arith.constant 5 : index
    %c0_80 = arith.constant 0 : index
    %c0_81 = arith.constant 0 : index
    %113 = vector.load %arg2[%c5, %c0_80, %c0_81] : memref<9x8x64xbf16, #tpu.memory_space<vmem>>, vector<1x8x64xbf16>
    %114 = vector.shape_cast %113 : vector<1x8x64xbf16> to vector<8x64xbf16>
    %cst_82 = arith.constant dense<0.000000e+00> : vector<80x64xf32>
    %115 = tpu.matmul %112, %114, %cst_82 {dimension_numbers = #tpu.dot_dimension_numbers<[1], [0], [0], [1], [0, 0, 1, 1], [], []>} : vector<80x8xbf16>, vector<8x64xbf16>, vector<80x64xf32> -> vector<80x64xf32>
    %116 = arith.addf %110, %115 : vector<80x64xf32>
    %c20 = arith.constant 20 : index
    %c0_83 = arith.constant 0 : index
    %117 = vector.load %arg17[%c20, %c0_83] : memref<104x8xf32, #tpu.memory_space<vmem>>, vector<80x8xf32>
    %118 = arith.truncf %117 : vector<80x8xf32> to vector<80x8xbf16>
    %c6 = arith.constant 6 : index
    %c0_84 = arith.constant 0 : index
    %c0_85 = arith.constant 0 : index
    %119 = vector.load %arg2[%c6, %c0_84, %c0_85] : memref<9x8x64xbf16, #tpu.memory_space<vmem>>, vector<1x8x64xbf16>
    %120 = vector.shape_cast %119 : vector<1x8x64xbf16> to vector<8x64xbf16>
    %cst_86 = arith.constant dense<0.000000e+00> : vector<80x64xf32>
    %121 = tpu.matmul %118, %120, %cst_86 {dimension_numbers = #tpu.dot_dimension_numbers<[1], [0], [0], [1], [0, 0, 1, 1], [], []>} : vector<80x8xbf16>, vector<8x64xbf16>, vector<80x64xf32> -> vector<80x64xf32>
    %122 = arith.addf %116, %121 : vector<80x64xf32>
    %c21_87 = arith.constant 21 : index
    %c0_88 = arith.constant 0 : index
    %123 = vector.load %arg17[%c21_87, %c0_88] : memref<104x8xf32, #tpu.memory_space<vmem>>, vector<80x8xf32>
    %124 = arith.truncf %123 : vector<80x8xf32> to vector<80x8xbf16>
    %c7 = arith.constant 7 : index
    %c0_89 = arith.constant 0 : index
    %c0_90 = arith.constant 0 : index
    %125 = vector.load %arg2[%c7, %c0_89, %c0_90] : memref<9x8x64xbf16, #tpu.memory_space<vmem>>, vector<1x8x64xbf16>
    %126 = vector.shape_cast %125 : vector<1x8x64xbf16> to vector<8x64xbf16>
    %cst_91 = arith.constant dense<0.000000e+00> : vector<80x64xf32>
    %127 = tpu.matmul %124, %126, %cst_91 {dimension_numbers = #tpu.dot_dimension_numbers<[1], [0], [0], [1], [0, 0, 1, 1], [], []>} : vector<80x8xbf16>, vector<8x64xbf16>, vector<80x64xf32> -> vector<80x64xf32>
    %128 = arith.addf %122, %127 : vector<80x64xf32>
    %c22 = arith.constant 22 : index
    %c0_92 = arith.constant 0 : index
    %129 = vector.load %arg17[%c22, %c0_92] : memref<104x8xf32, #tpu.memory_space<vmem>>, vector<80x8xf32>
    %130 = arith.truncf %129 : vector<80x8xf32> to vector<80x8xbf16>
    %c8_93 = arith.constant 8 : index
    %c0_94 = arith.constant 0 : index
    %c0_95 = arith.constant 0 : index
    %131 = vector.load %arg2[%c8_93, %c0_94, %c0_95] : memref<9x8x64xbf16, #tpu.memory_space<vmem>>, vector<1x8x64xbf16>
    %132 = vector.shape_cast %131 : vector<1x8x64xbf16> to vector<8x64xbf16>
    %cst_96 = arith.constant dense<0.000000e+00> : vector<80x64xf32>
    %133 = tpu.matmul %130, %132, %cst_96 {dimension_numbers = #tpu.dot_dimension_numbers<[1], [0], [0], [1], [0, 0, 1, 1], [], []>} : vector<80x8xbf16>, vector<8x64xbf16>, vector<80x64xf32> -> vector<80x64xf32>
    %134 = arith.addf %128, %133 : vector<80x64xf32>
    %c0_97 = arith.constant 0 : index
    %c0_98 = arith.constant 0 : index
    %135 = vector.load %arg3[%c0_97, %c0_98] : memref<1x64xf32, #tpu.memory_space<vmem>>, vector<1x64xf32>
    %136 = vector.broadcast %135 : vector<1x64xf32> to vector<80x64xf32>
    %137 = arith.addf %134, %136 : vector<80x64xf32>
    %cst_99 = arith.constant 0.000000e+00 : f32
    %138 = vector.broadcast %cst_99 : f32 to vector<80x64xf32>
    %139 = arith.maximumf %137, %138 : vector<80x64xf32>
    %140 = vector.broadcast %36 : vector<80x1xf32> to vector<80x64xf32>
    %141 = arith.mulf %139, %140 : vector<80x64xf32>
    %c11_100 = arith.constant 11 : index
    %c0_101 = arith.constant 0 : index
    %142 = vector.load %arg18[%c11_100, %c0_101] : memref<104x64xf32, #tpu.memory_space<vmem>>, vector<80x64xf32>
    tpu.vector_store %arg18[%c11_100, %c0_101], %141 {strides = array<i32>} : memref<104x64xf32, #tpu.memory_space<vmem>>, vector<80x64xf32>,
    %c0_102 = arith.constant 0 : index
    %c0_103 = arith.constant 0 : index
    %143 = vector.load %arg18[%c0_102, %c0_103] : memref<104x64xf32, #tpu.memory_space<vmem>>, vector<80x64xf32>
    %144 = arith.truncf %143 : vector<80x64xf32> to vector<80x64xbf16>
    %c0_104 = arith.constant 0 : index
    %c0_105 = arith.constant 0 : index
    %c0_106 = arith.constant 0 : index
    %145 = vector.load %arg4[%c0_104, %c0_105, %c0_106] : memref<9x64x64xbf16, #tpu.memory_space<vmem>>, vector<1x64x64xbf16>
    %146 = vector.shape_cast %145 : vector<1x64x64xbf16> to vector<64x64xbf16>
    %cst_107 = arith.constant dense<0.000000e+00> : vector<80x64xf32>
    %147 = tpu.matmul %144, %146, %cst_107 {dimension_numbers = #tpu.dot_dimension_numbers<[1], [0], [0], [1], [0, 0, 1, 1], [], []>} : vector<80x64xbf16>, vector<64x64xbf16>, vector<80x64xf32> -> vector<80x64xf32>
    %c1_108 = arith.constant 1 : index
    %c0_109 = arith.constant 0 : index
    %148 = vector.load %arg18[%c1_108, %c0_109] : memref<104x64xf32, #tpu.memory_space<vmem>>, vector<80x64xf32>
    %149 = arith.truncf %148 : vector<80x64xf32> to vector<80x64xbf16>
    %c1_110 = arith.constant 1 : index
    %c0_111 = arith.constant 0 : index
    %c0_112 = arith.constant 0 : index
    %150 = vector.load %arg4[%c1_110, %c0_111, %c0_112] : memref<9x64x64xbf16, #tpu.memory_space<vmem>>, vector<1x64x64xbf16>
    %151 = vector.shape_cast %150 : vector<1x64x64xbf16> to vector<64x64xbf16>
    %cst_113 = arith.constant dense<0.000000e+00> : vector<80x64xf32>
    %152 = tpu.matmul %149, %151, %cst_113 {dimension_numbers = #tpu.dot_dimension_numbers<[1], [0], [0], [1], [0, 0, 1, 1], [], []>} : vector<80x64xbf16>, vector<64x64xbf16>, vector<80x64xf32> -> vector<80x64xf32>
    %153 = arith.addf %147, %152 : vector<80x64xf32>
    %c2_114 = arith.constant 2 : index
    %c0_115 = arith.constant 0 : index
    %154 = vector.load %arg18[%c2_114, %c0_115] : memref<104x64xf32, #tpu.memory_space<vmem>>, vector<80x64xf32>
    %155 = arith.truncf %154 : vector<80x64xf32> to vector<80x64xbf16>
    %c2_116 = arith.constant 2 : index
    %c0_117 = arith.constant 0 : index
    %c0_118 = arith.constant 0 : index
    %156 = vector.load %arg4[%c2_116, %c0_117, %c0_118] : memref<9x64x64xbf16, #tpu.memory_space<vmem>>, vector<1x64x64xbf16>
    %157 = vector.shape_cast %156 : vector<1x64x64xbf16> to vector<64x64xbf16>
    %cst_119 = arith.constant dense<0.000000e+00> : vector<80x64xf32>
    %158 = tpu.matmul %155, %157, %cst_119 {dimension_numbers = #tpu.dot_dimension_numbers<[1], [0], [0], [1], [0, 0, 1, 1], [], []>} : vector<80x64xbf16>, vector<64x64xbf16>, vector<80x64xf32> -> vector<80x64xf32>
    %159 = arith.addf %153, %158 : vector<80x64xf32>
    %c10_120 = arith.constant 10 : index
    %c0_121 = arith.constant 0 : index
    %160 = vector.load %arg18[%c10_120, %c0_121] : memref<104x64xf32, #tpu.memory_space<vmem>>, vector<80x64xf32>
    %161 = arith.truncf %160 : vector<80x64xf32> to vector<80x64xbf16>
    %c3_122 = arith.constant 3 : index
    %c0_123 = arith.constant 0 : index
    %c0_124 = arith.constant 0 : index
    %162 = vector.load %arg4[%c3_122, %c0_123, %c0_124] : memref<9x64x64xbf16, #tpu.memory_space<vmem>>, vector<1x64x64xbf16>
    %163 = vector.shape_cast %162 : vector<1x64x64xbf16> to vector<64x64xbf16>
    %cst_125 = arith.constant dense<0.000000e+00> : vector<80x64xf32>
    %164 = tpu.matmul %161, %163, %cst_125 {dimension_numbers = #tpu.dot_dimension_numbers<[1], [0], [0], [1], [0, 0, 1, 1], [], []>} : vector<80x64xbf16>, vector<64x64xbf16>, vector<80x64xf32> -> vector<80x64xf32>
    %165 = arith.addf %159, %164 : vector<80x64xf32>
    %c11_126 = arith.constant 11 : index
    %c0_127 = arith.constant 0 : index
    %166 = vector.load %arg18[%c11_126, %c0_127] : memref<104x64xf32, #tpu.memory_space<vmem>>, vector<80x64xf32>
    %167 = arith.truncf %166 : vector<80x64xf32> to vector<80x64xbf16>
    %c4_128 = arith.constant 4 : index
    %c0_129 = arith.constant 0 : index
    %c0_130 = arith.constant 0 : index
    %168 = vector.load %arg4[%c4_128, %c0_129, %c0_130] : memref<9x64x64xbf16, #tpu.memory_space<vmem>>, vector<1x64x64xbf16>
    %169 = vector.shape_cast %168 : vector<1x64x64xbf16> to vector<64x64xbf16>
    %cst_131 = arith.constant dense<0.000000e+00> : vector<80x64xf32>
    %170 = tpu.matmul %167, %169, %cst_131 {dimension_numbers = #tpu.dot_dimension_numbers<[1], [0], [0], [1], [0, 0, 1, 1], [], []>} : vector<80x64xbf16>, vector<64x64xbf16>, vector<80x64xf32> -> vector<80x64xf32>
    %171 = arith.addf %165, %170 : vector<80x64xf32>
    %c12_132 = arith.constant 12 : index
    %c0_133 = arith.constant 0 : index
    %172 = vector.load %arg18[%c12_132, %c0_133] : memref<104x64xf32, #tpu.memory_space<vmem>>, vector<80x64xf32>
    %173 = arith.truncf %172 : vector<80x64xf32> to vector<80x64xbf16>
    %c5_134 = arith.constant 5 : index
    %c0_135 = arith.constant 0 : index
    %c0_136 = arith.constant 0 : index
    %174 = vector.load %arg4[%c5_134, %c0_135, %c0_136] : memref<9x64x64xbf16, #tpu.memory_space<vmem>>, vector<1x64x64xbf16>
    %175 = vector.shape_cast %174 : vector<1x64x64xbf16> to vector<64x64xbf16>
    %cst_137 = arith.constant dense<0.000000e+00> : vector<80x64xf32>
    %176 = tpu.matmul %173, %175, %cst_137 {dimension_numbers = #tpu.dot_dimension_numbers<[1], [0], [0], [1], [0, 0, 1, 1], [], []>} : vector<80x64xbf16>, vector<64x64xbf16>, vector<80x64xf32> -> vector<80x64xf32>
    %177 = arith.addf %171, %176 : vector<80x64xf32>
    %c20_138 = arith.constant 20 : index
    %c0_139 = arith.constant 0 : index
    %178 = vector.load %arg18[%c20_138, %c0_139] : memref<104x64xf32, #tpu.memory_space<vmem>>, vector<80x64xf32>
    %179 = arith.truncf %178 : vector<80x64xf32> to vector<80x64xbf16>
    %c6_140 = arith.constant 6 : index
    %c0_141 = arith.constant 0 : index
    %c0_142 = arith.constant 0 : index
    %180 = vector.load %arg4[%c6_140, %c0_141, %c0_142] : memref<9x64x64xbf16, #tpu.memory_space<vmem>>, vector<1x64x64xbf16>
    %181 = vector.shape_cast %180 : vector<1x64x64xbf16> to vector<64x64xbf16>
    %cst_143 = arith.constant dense<0.000000e+00> : vector<80x64xf32>
    %182 = tpu.matmul %179, %181, %cst_143 {dimension_numbers = #tpu.dot_dimension_numbers<[1], [0], [0], [1], [0, 0, 1, 1], [], []>} : vector<80x64xbf16>, vector<64x64xbf16>, vector<80x64xf32> -> vector<80x64xf32>
    %183 = arith.addf %177, %182 : vector<80x64xf32>
    %c21_144 = arith.constant 21 : index
    %c0_145 = arith.constant 0 : index
    %184 = vector.load %arg18[%c21_144, %c0_145] : memref<104x64xf32, #tpu.memory_space<vmem>>, vector<80x64xf32>
    %185 = arith.truncf %184 : vector<80x64xf32> to vector<80x64xbf16>
    %c7_146 = arith.constant 7 : index
    %c0_147 = arith.constant 0 : index
    %c0_148 = arith.constant 0 : index
    %186 = vector.load %arg4[%c7_146, %c0_147, %c0_148] : memref<9x64x64xbf16, #tpu.memory_space<vmem>>, vector<1x64x64xbf16>
    %187 = vector.shape_cast %186 : vector<1x64x64xbf16> to vector<64x64xbf16>
    %cst_149 = arith.constant dense<0.000000e+00> : vector<80x64xf32>
    %188 = tpu.matmul %185, %187, %cst_149 {dimension_numbers = #tpu.dot_dimension_numbers<[1], [0], [0], [1], [0, 0, 1, 1], [], []>} : vector<80x64xbf16>, vector<64x64xbf16>, vector<80x64xf32> -> vector<80x64xf32>
    %189 = arith.addf %183, %188 : vector<80x64xf32>
    %c22_150 = arith.constant 22 : index
    %c0_151 = arith.constant 0 : index
    %190 = vector.load %arg18[%c22_150, %c0_151] : memref<104x64xf32, #tpu.memory_space<vmem>>, vector<80x64xf32>
    %191 = arith.truncf %190 : vector<80x64xf32> to vector<80x64xbf16>
    %c8_152 = arith.constant 8 : index
    %c0_153 = arith.constant 0 : index
    %c0_154 = arith.constant 0 : index
    %192 = vector.load %arg4[%c8_152, %c0_153, %c0_154] : memref<9x64x64xbf16, #tpu.memory_space<vmem>>, vector<1x64x64xbf16>
    %193 = vector.shape_cast %192 : vector<1x64x64xbf16> to vector<64x64xbf16>
    %cst_155 = arith.constant dense<0.000000e+00> : vector<80x64xf32>
    %194 = tpu.matmul %191, %193, %cst_155 {dimension_numbers = #tpu.dot_dimension_numbers<[1], [0], [0], [1], [0, 0, 1, 1], [], []>} : vector<80x64xbf16>, vector<64x64xbf16>, vector<80x64xf32> -> vector<80x64xf32>
    %195 = arith.addf %189, %194 : vector<80x64xf32>
    %c0_156 = arith.constant 0 : index
    %c0_157 = arith.constant 0 : index
    %196 = vector.load %arg5[%c0_156, %c0_157] : memref<1x64xf32, #tpu.memory_space<vmem>>, vector<1x64xf32>
    %197 = vector.broadcast %196 : vector<1x64xf32> to vector<80x64xf32>
    %198 = arith.addf %195, %197 : vector<80x64xf32>
    %cst_158 = arith.constant 0.000000e+00 : f32
    %199 = vector.broadcast %cst_158 : f32 to vector<80x64xf32>
    %200 = arith.maximumf %198, %199 : vector<80x64xf32>
    %c0_159 = arith.constant 0 : index
    %c0_160 = arith.constant 0 : index
    %201 = vector.load %arg22[%c0_159, %c0_160] : memref<80x64xf32, #tpu.memory_space<vmem>>, vector<80x64xf32>
    tpu.vector_store %arg22[%c0_159, %c0_160], %200 {strides = array<i32>} : memref<80x64xf32, #tpu.memory_space<vmem>>, vector<80x64xf32>,
    %c0_161 = arith.constant 0 : index
    %c0_162 = arith.constant 0 : index
    %202 = vector.load %arg22[%c0_161, %c0_162] : memref<80x64xf32, #tpu.memory_space<vmem>>, vector<68x64xf32>
    %c1_163 = arith.constant 1 : index
    %c0_164 = arith.constant 0 : index
    %203 = vector.load %arg22[%c1_163, %c0_164] : memref<80x64xf32, #tpu.memory_space<vmem>>, vector<68x64xf32>
    %204 = arith.maximumf %202, %203 : vector<68x64xf32>
    %c10_165 = arith.constant 10 : index
    %c0_166 = arith.constant 0 : index
    %205 = vector.load %arg22[%c10_165, %c0_166] : memref<80x64xf32, #tpu.memory_space<vmem>>, vector<68x64xf32>
    %c11_167 = arith.constant 11 : index
    %c0_168 = arith.constant 0 : index
    %206 = vector.load %arg22[%c11_167, %c0_168] : memref<80x64xf32, #tpu.memory_space<vmem>>, vector<68x64xf32>
    %207 = arith.maximumf %205, %206 : vector<68x64xf32>
    %208 = arith.maximumf %204, %207 : vector<68x64xf32>
    %c0_169 = arith.constant 0 : index
    %c0_170 = arith.constant 0 : index
    %209 = vector.load %arg22[%c0_169, %c0_170] : memref<80x64xf32, #tpu.memory_space<vmem>>, vector<68x64xf32>
    tpu.vector_store %arg22[%c0_169, %c0_170], %208 {strides = array<i32>} : memref<80x64xf32, #tpu.memory_space<vmem>>, vector<68x64xf32>,
    %c0_171 = arith.constant 0 : index
    %c0_172 = arith.constant 0 : index
    %210 = tpu.strided_load %arg22[%c0_171, %c0_172] {strides = array<i32: 2, 1>} : memref<80x64xf32, #tpu.memory_space<vmem>>, vector<4x64xf32>
    %c7_173 = arith.constant 7 : index
    %c0_174 = arith.constant 0 : index
    %211 = vector.load %arg19[%c7_173, %c0_174] : memref<40x64xf32, #tpu.memory_space<vmem>>, vector<4x64xf32>
    tpu.vector_store %arg19[%c7_173, %c0_174], %210 {strides = array<i32>} : memref<40x64xf32, #tpu.memory_space<vmem>>, vector<4x64xf32>,
    %c20_175 = arith.constant 20 : index
    %c0_176 = arith.constant 0 : index
    %212 = tpu.strided_load %arg22[%c20_175, %c0_176] {strides = array<i32: 2, 1>} : memref<80x64xf32, #tpu.memory_space<vmem>>, vector<4x64xf32>
    %c13 = arith.constant 13 : index
    %c0_177 = arith.constant 0 : index
    %213 = vector.load %arg19[%c13, %c0_177] : memref<40x64xf32, #tpu.memory_space<vmem>>, vector<4x64xf32>
    tpu.vector_store %arg19[%c13, %c0_177], %212 {strides = array<i32>} : memref<40x64xf32, #tpu.memory_space<vmem>>, vector<4x64xf32>,
    %c40_178 = arith.constant 40 : index
    %c0_179 = arith.constant 0 : index
    %214 = tpu.strided_load %arg22[%c40_178, %c0_179] {strides = array<i32: 2, 1>} : memref<80x64xf32, #tpu.memory_space<vmem>>, vector<4x64xf32>
    %c19 = arith.constant 19 : index
    %c0_180 = arith.constant 0 : index
    %215 = vector.load %arg19[%c19, %c0_180] : memref<40x64xf32, #tpu.memory_space<vmem>>, vector<4x64xf32>
    tpu.vector_store %arg19[%c19, %c0_180], %214 {strides = array<i32>} : memref<40x64xf32, #tpu.memory_space<vmem>>, vector<4x64xf32>,
    %c60 = arith.constant 60 : index
    %c0_181 = arith.constant 0 : index
    %216 = tpu.strided_load %arg22[%c60, %c0_181] {strides = array<i32: 2, 1>} : memref<80x64xf32, #tpu.memory_space<vmem>>, vector<4x64xf32>
    %c25 = arith.constant 25 : index
    %c0_182 = arith.constant 0 : index
    %217 = vector.load %arg19[%c25, %c0_182] : memref<40x64xf32, #tpu.memory_space<vmem>>, vector<4x64xf32>
    tpu.vector_store %arg19[%c25, %c0_182], %216 {strides = array<i32>} : memref<40x64xf32, #tpu.memory_space<vmem>>, vector<4x64xf32>,
    %c0_183 = arith.constant 0 : index
    %c0_184 = arith.constant 0 : index
    %218 = vector.load %arg19[%c0_183, %c0_184] : memref<40x64xf32, #tpu.memory_space<vmem>>, vector<24x64xf32>
    %219 = arith.truncf %218 : vector<24x64xf32> to vector<24x64xbf16>
    %c0_185 = arith.constant 0 : index
    %c0_186 = arith.constant 0 : index
    %c0_187 = arith.constant 0 : index
    %220 = vector.load %arg6[%c0_185, %c0_186, %c0_187] : memref<9x64x80xbf16, #tpu.memory_space<vmem>>, vector<1x64x80xbf16>
    %221 = vector.shape_cast %220 : vector<1x64x80xbf16> to vector<64x80xbf16>
    %cst_188 = arith.constant dense<0.000000e+00> : vector<24x80xf32>
    %222 = tpu.matmul %219, %221, %cst_188 {dimension_numbers = #tpu.dot_dimension_numbers<[1], [0], [0], [1], [0, 0, 1, 1], [], []>} : vector<24x64xbf16>, vector<64x80xbf16>, vector<24x80xf32> -> vector<24x80xf32>
    %c1_189 = arith.constant 1 : index
    %c0_190 = arith.constant 0 : index
    %223 = vector.load %arg19[%c1_189, %c0_190] : memref<40x64xf32, #tpu.memory_space<vmem>>, vector<24x64xf32>
    %224 = arith.truncf %223 : vector<24x64xf32> to vector<24x64xbf16>
    %c1_191 = arith.constant 1 : index
    %c0_192 = arith.constant 0 : index
    %c0_193 = arith.constant 0 : index
    %225 = vector.load %arg6[%c1_191, %c0_192, %c0_193] : memref<9x64x80xbf16, #tpu.memory_space<vmem>>, vector<1x64x80xbf16>
    %226 = vector.shape_cast %225 : vector<1x64x80xbf16> to vector<64x80xbf16>
    %cst_194 = arith.constant dense<0.000000e+00> : vector<24x80xf32>
    %227 = tpu.matmul %224, %226, %cst_194 {dimension_numbers = #tpu.dot_dimension_numbers<[1], [0], [0], [1], [0, 0, 1, 1], [], []>} : vector<24x64xbf16>, vector<64x80xbf16>, vector<24x80xf32> -> vector<24x80xf32>
    %228 = arith.addf %222, %227 : vector<24x80xf32>
    %c2_195 = arith.constant 2 : index
    %c0_196 = arith.constant 0 : index
    %229 = vector.load %arg19[%c2_195, %c0_196] : memref<40x64xf32, #tpu.memory_space<vmem>>, vector<24x64xf32>
    %230 = arith.truncf %229 : vector<24x64xf32> to vector<24x64xbf16>
    %c2_197 = arith.constant 2 : index
    %c0_198 = arith.constant 0 : index
    %c0_199 = arith.constant 0 : index
    %231 = vector.load %arg6[%c2_197, %c0_198, %c0_199] : memref<9x64x80xbf16, #tpu.memory_space<vmem>>, vector<1x64x80xbf16>
    %232 = vector.shape_cast %231 : vector<1x64x80xbf16> to vector<64x80xbf16>
    %cst_200 = arith.constant dense<0.000000e+00> : vector<24x80xf32>
    %233 = tpu.matmul %230, %232, %cst_200 {dimension_numbers = #tpu.dot_dimension_numbers<[1], [0], [0], [1], [0, 0, 1, 1], [], []>} : vector<24x64xbf16>, vector<64x80xbf16>, vector<24x80xf32> -> vector<24x80xf32>
    %234 = arith.addf %228, %233 : vector<24x80xf32>
    %c6_201 = arith.constant 6 : index
    %c0_202 = arith.constant 0 : index
    %235 = vector.load %arg19[%c6_201, %c0_202] : memref<40x64xf32, #tpu.memory_space<vmem>>, vector<24x64xf32>
    %236 = arith.truncf %235 : vector<24x64xf32> to vector<24x64xbf16>
    %c3_203 = arith.constant 3 : index
    %c0_204 = arith.constant 0 : index
    %c0_205 = arith.constant 0 : index
    %237 = vector.load %arg6[%c3_203, %c0_204, %c0_205] : memref<9x64x80xbf16, #tpu.memory_space<vmem>>, vector<1x64x80xbf16>
    %238 = vector.shape_cast %237 : vector<1x64x80xbf16> to vector<64x80xbf16>
    %cst_206 = arith.constant dense<0.000000e+00> : vector<24x80xf32>
    %239 = tpu.matmul %236, %238, %cst_206 {dimension_numbers = #tpu.dot_dimension_numbers<[1], [0], [0], [1], [0, 0, 1, 1], [], []>} : vector<24x64xbf16>, vector<64x80xbf16>, vector<24x80xf32> -> vector<24x80xf32>
    %240 = arith.addf %234, %239 : vector<24x80xf32>
    %c7_207 = arith.constant 7 : index
    %c0_208 = arith.constant 0 : index
    %241 = vector.load %arg19[%c7_207, %c0_208] : memref<40x64xf32, #tpu.memory_space<vmem>>, vector<24x64xf32>
    %242 = arith.truncf %241 : vector<24x64xf32> to vector<24x64xbf16>
    %c4_209 = arith.constant 4 : index
    %c0_210 = arith.constant 0 : index
    %c0_211 = arith.constant 0 : index
    %243 = vector.load %arg6[%c4_209, %c0_210, %c0_211] : memref<9x64x80xbf16, #tpu.memory_space<vmem>>, vector<1x64x80xbf16>
    %244 = vector.shape_cast %243 : vector<1x64x80xbf16> to vector<64x80xbf16>
    %cst_212 = arith.constant dense<0.000000e+00> : vector<24x80xf32>
    %245 = tpu.matmul %242, %244, %cst_212 {dimension_numbers = #tpu.dot_dimension_numbers<[1], [0], [0], [1], [0, 0, 1, 1], [], []>} : vector<24x64xbf16>, vector<64x80xbf16>, vector<24x80xf32> -> vector<24x80xf32>
    %246 = arith.addf %240, %245 : vector<24x80xf32>
    %c8_213 = arith.constant 8 : index
    %c0_214 = arith.constant 0 : index
    %247 = vector.load %arg19[%c8_213, %c0_214] : memref<40x64xf32, #tpu.memory_space<vmem>>, vector<24x64xf32>
    %248 = arith.truncf %247 : vector<24x64xf32> to vector<24x64xbf16>
    %c5_215 = arith.constant 5 : index
    %c0_216 = arith.constant 0 : index
    %c0_217 = arith.constant 0 : index
    %249 = vector.load %arg6[%c5_215, %c0_216, %c0_217] : memref<9x64x80xbf16, #tpu.memory_space<vmem>>, vector<1x64x80xbf16>
    %250 = vector.shape_cast %249 : vector<1x64x80xbf16> to vector<64x80xbf16>
    %cst_218 = arith.constant dense<0.000000e+00> : vector<24x80xf32>
    %251 = tpu.matmul %248, %250, %cst_218 {dimension_numbers = #tpu.dot_dimension_numbers<[1], [0], [0], [1], [0, 0, 1, 1], [], []>} : vector<24x64xbf16>, vector<64x80xbf16>, vector<24x80xf32> -> vector<24x80xf32>
    %252 = arith.addf %246, %251 : vector<24x80xf32>
    %c12_219 = arith.constant 12 : index
    %c0_220 = arith.constant 0 : index
    %253 = vector.load %arg19[%c12_219, %c0_220] : memref<40x64xf32, #tpu.memory_space<vmem>>, vector<24x64xf32>
    %254 = arith.truncf %253 : vector<24x64xf32> to vector<24x64xbf16>
    %c6_221 = arith.constant 6 : index
    %c0_222 = arith.constant 0 : index
    %c0_223 = arith.constant 0 : index
    %255 = vector.load %arg6[%c6_221, %c0_222, %c0_223] : memref<9x64x80xbf16, #tpu.memory_space<vmem>>, vector<1x64x80xbf16>
    %256 = vector.shape_cast %255 : vector<1x64x80xbf16> to vector<64x80xbf16>
    %cst_224 = arith.constant dense<0.000000e+00> : vector<24x80xf32>
    %257 = tpu.matmul %254, %256, %cst_224 {dimension_numbers = #tpu.dot_dimension_numbers<[1], [0], [0], [1], [0, 0, 1, 1], [], []>} : vector<24x64xbf16>, vector<64x80xbf16>, vector<24x80xf32> -> vector<24x80xf32>
    %258 = arith.addf %252, %257 : vector<24x80xf32>
    %c13_225 = arith.constant 13 : index
    %c0_226 = arith.constant 0 : index
    %259 = vector.load %arg19[%c13_225, %c0_226] : memref<40x64xf32, #tpu.memory_space<vmem>>, vector<24x64xf32>
    %260 = arith.truncf %259 : vector<24x64xf32> to vector<24x64xbf16>
    %c7_227 = arith.constant 7 : index
    %c0_228 = arith.constant 0 : index
    %c0_229 = arith.constant 0 : index
    %261 = vector.load %arg6[%c7_227, %c0_228, %c0_229] : memref<9x64x80xbf16, #tpu.memory_space<vmem>>, vector<1x64x80xbf16>
    %262 = vector.shape_cast %261 : vector<1x64x80xbf16> to vector<64x80xbf16>
    %cst_230 = arith.constant dense<0.000000e+00> : vector<24x80xf32>
    %263 = tpu.matmul %260, %262, %cst_230 {dimension_numbers = #tpu.dot_dimension_numbers<[1], [0], [0], [1], [0, 0, 1, 1], [], []>} : vector<24x64xbf16>, vector<64x80xbf16>, vector<24x80xf32> -> vector<24x80xf32>
    %264 = arith.addf %258, %263 : vector<24x80xf32>
    %c14 = arith.constant 14 : index
    %c0_231 = arith.constant 0 : index
    %265 = vector.load %arg19[%c14, %c0_231] : memref<40x64xf32, #tpu.memory_space<vmem>>, vector<24x64xf32>
    %266 = arith.truncf %265 : vector<24x64xf32> to vector<24x64xbf16>
    %c8_232 = arith.constant 8 : index
    %c0_233 = arith.constant 0 : index
    %c0_234 = arith.constant 0 : index
    %267 = vector.load %arg6[%c8_232, %c0_233, %c0_234] : memref<9x64x80xbf16, #tpu.memory_space<vmem>>, vector<1x64x80xbf16>
    %268 = vector.shape_cast %267 : vector<1x64x80xbf16> to vector<64x80xbf16>
    %cst_235 = arith.constant dense<0.000000e+00> : vector<24x80xf32>
    %269 = tpu.matmul %266, %268, %cst_235 {dimension_numbers = #tpu.dot_dimension_numbers<[1], [0], [0], [1], [0, 0, 1, 1], [], []>} : vector<24x64xbf16>, vector<64x80xbf16>, vector<24x80xf32> -> vector<24x80xf32>
    %270 = arith.addf %264, %269 : vector<24x80xf32>
    %c0_236 = arith.constant 0 : index
    %c0_237 = arith.constant 0 : index
    %271 = vector.load %arg7[%c0_236, %c0_237] : memref<1x80xf32, #tpu.memory_space<vmem>>, vector<1x80xf32>
    %272 = vector.broadcast %271 : vector<1x80xf32> to vector<24x80xf32>
    %273 = arith.addf %270, %272 : vector<24x80xf32>
    %cst_238 = arith.constant 0.000000e+00 : f32
    %274 = vector.broadcast %cst_238 : f32 to vector<24x80xf32>
    %275 = arith.maximumf %273, %274 : vector<24x80xf32>
    %276 = vector.broadcast %57 : vector<24x1xf32> to vector<24x80xf32>
    %277 = arith.mulf %275, %276 : vector<24x80xf32>
    %c7_239 = arith.constant 7 : index
    %c0_240 = arith.constant 0 : index
    %278 = vector.load %arg20[%c7_239, %c0_240] : memref<40x80xf32, #tpu.memory_space<vmem>>, vector<24x80xf32>
    tpu.vector_store %arg20[%c7_239, %c0_240], %277 {strides = array<i32>} : memref<40x80xf32, #tpu.memory_space<vmem>>, vector<24x80xf32>,
    %c0_241 = arith.constant 0 : index
    %c0_242 = arith.constant 0 : index
    %279 = vector.load %arg20[%c0_241, %c0_242] : memref<40x80xf32, #tpu.memory_space<vmem>>, vector<24x80xf32>
    %280 = arith.truncf %279 : vector<24x80xf32> to vector<24x80xbf16>
    %c0_243 = arith.constant 0 : index
    %c0_244 = arith.constant 0 : index
    %c0_245 = arith.constant 0 : index
    %281 = vector.load %arg8[%c0_243, %c0_244, %c0_245] : memref<9x80x128xbf16, #tpu.memory_space<vmem>>, vector<1x80x128xbf16>
    %282 = vector.shape_cast %281 : vector<1x80x128xbf16> to vector<80x128xbf16>
    %cst_246 = arith.constant dense<0.000000e+00> : vector<24x128xf32>
    %283 = tpu.matmul %280, %282, %cst_246 {dimension_numbers = #tpu.dot_dimension_numbers<[1], [0], [0], [1], [0, 0, 1, 1], [], []>} : vector<24x80xbf16>, vector<80x128xbf16>, vector<24x128xf32> -> vector<24x128xf32>
    %c1_247 = arith.constant 1 : index
    %c0_248 = arith.constant 0 : index
    %284 = vector.load %arg20[%c1_247, %c0_248] : memref<40x80xf32, #tpu.memory_space<vmem>>, vector<24x80xf32>
    %285 = arith.truncf %284 : vector<24x80xf32> to vector<24x80xbf16>
    %c1_249 = arith.constant 1 : index
    %c0_250 = arith.constant 0 : index
    %c0_251 = arith.constant 0 : index
    %286 = vector.load %arg8[%c1_249, %c0_250, %c0_251] : memref<9x80x128xbf16, #tpu.memory_space<vmem>>, vector<1x80x128xbf16>
    %287 = vector.shape_cast %286 : vector<1x80x128xbf16> to vector<80x128xbf16>
    %cst_252 = arith.constant dense<0.000000e+00> : vector<24x128xf32>
    %288 = tpu.matmul %285, %287, %cst_252 {dimension_numbers = #tpu.dot_dimension_numbers<[1], [0], [0], [1], [0, 0, 1, 1], [], []>} : vector<24x80xbf16>, vector<80x128xbf16>, vector<24x128xf32> -> vector<24x128xf32>
    %289 = arith.addf %283, %288 : vector<24x128xf32>
    %c2_253 = arith.constant 2 : index
    %c0_254 = arith.constant 0 : index
    %290 = vector.load %arg20[%c2_253, %c0_254] : memref<40x80xf32, #tpu.memory_space<vmem>>, vector<24x80xf32>
    %291 = arith.truncf %290 : vector<24x80xf32> to vector<24x80xbf16>
    %c2_255 = arith.constant 2 : index
    %c0_256 = arith.constant 0 : index
    %c0_257 = arith.constant 0 : index
    %292 = vector.load %arg8[%c2_255, %c0_256, %c0_257] : memref<9x80x128xbf16, #tpu.memory_space<vmem>>, vector<1x80x128xbf16>
    %293 = vector.shape_cast %292 : vector<1x80x128xbf16> to vector<80x128xbf16>
    %cst_258 = arith.constant dense<0.000000e+00> : vector<24x128xf32>
    %294 = tpu.matmul %291, %293, %cst_258 {dimension_numbers = #tpu.dot_dimension_numbers<[1], [0], [0], [1], [0, 0, 1, 1], [], []>} : vector<24x80xbf16>, vector<80x128xbf16>, vector<24x128xf32> -> vector<24x128xf32>
    %295 = arith.addf %289, %294 : vector<24x128xf32>
    %c6_259 = arith.constant 6 : index
    %c0_260 = arith.constant 0 : index
    %296 = vector.load %arg20[%c6_259, %c0_260] : memref<40x80xf32, #tpu.memory_space<vmem>>, vector<24x80xf32>
    %297 = arith.truncf %296 : vector<24x80xf32> to vector<24x80xbf16>
    %c3_261 = arith.constant 3 : index
    %c0_262 = arith.constant 0 : index
    %c0_263 = arith.constant 0 : index
    %298 = vector.load %arg8[%c3_261, %c0_262, %c0_263] : memref<9x80x128xbf16, #tpu.memory_space<vmem>>, vector<1x80x128xbf16>
    %299 = vector.shape_cast %298 : vector<1x80x128xbf16> to vector<80x128xbf16>
    %cst_264 = arith.constant dense<0.000000e+00> : vector<24x128xf32>
    %300 = tpu.matmul %297, %299, %cst_264 {dimension_numbers = #tpu.dot_dimension_numbers<[1], [0], [0], [1], [0, 0, 1, 1], [], []>} : vector<24x80xbf16>, vector<80x128xbf16>, vector<24x128xf32> -> vector<24x128xf32>
    %301 = arith.addf %295, %300 : vector<24x128xf32>
    %c7_265 = arith.constant 7 : index
    %c0_266 = arith.constant 0 : index
    %302 = vector.load %arg20[%c7_265, %c0_266] : memref<40x80xf32, #tpu.memory_space<vmem>>, vector<24x80xf32>
    %303 = arith.truncf %302 : vector<24x80xf32> to vector<24x80xbf16>
    %c4_267 = arith.constant 4 : index
    %c0_268 = arith.constant 0 : index
    %c0_269 = arith.constant 0 : index
    %304 = vector.load %arg8[%c4_267, %c0_268, %c0_269] : memref<9x80x128xbf16, #tpu.memory_space<vmem>>, vector<1x80x128xbf16>
    %305 = vector.shape_cast %304 : vector<1x80x128xbf16> to vector<80x128xbf16>
    %cst_270 = arith.constant dense<0.000000e+00> : vector<24x128xf32>
    %306 = tpu.matmul %303, %305, %cst_270 {dimension_numbers = #tpu.dot_dimension_numbers<[1], [0], [0], [1], [0, 0, 1, 1], [], []>} : vector<24x80xbf16>, vector<80x128xbf16>, vector<24x128xf32> -> vector<24x128xf32>
    %307 = arith.addf %301, %306 : vector<24x128xf32>
    %c8_271 = arith.constant 8 : index
    %c0_272 = arith.constant 0 : index
    %308 = vector.load %arg20[%c8_271, %c0_272] : memref<40x80xf32, #tpu.memory_space<vmem>>, vector<24x80xf32>
    %309 = arith.truncf %308 : vector<24x80xf32> to vector<24x80xbf16>
    %c5_273 = arith.constant 5 : index
    %c0_274 = arith.constant 0 : index
    %c0_275 = arith.constant 0 : index
    %310 = vector.load %arg8[%c5_273, %c0_274, %c0_275] : memref<9x80x128xbf16, #tpu.memory_space<vmem>>, vector<1x80x128xbf16>
    %311 = vector.shape_cast %310 : vector<1x80x128xbf16> to vector<80x128xbf16>
    %cst_276 = arith.constant dense<0.000000e+00> : vector<24x128xf32>
    %312 = tpu.matmul %309, %311, %cst_276 {dimension_numbers = #tpu.dot_dimension_numbers<[1], [0], [0], [1], [0, 0, 1, 1], [], []>} : vector<24x80xbf16>, vector<80x128xbf16>, vector<24x128xf32> -> vector<24x128xf32>
    %313 = arith.addf %307, %312 : vector<24x128xf32>
    %c12_277 = arith.constant 12 : index
    %c0_278 = arith.constant 0 : index
    %314 = vector.load %arg20[%c12_277, %c0_278] : memref<40x80xf32, #tpu.memory_space<vmem>>, vector<24x80xf32>
    %315 = arith.truncf %314 : vector<24x80xf32> to vector<24x80xbf16>
    %c6_279 = arith.constant 6 : index
    %c0_280 = arith.constant 0 : index
    %c0_281 = arith.constant 0 : index
    %316 = vector.load %arg8[%c6_279, %c0_280, %c0_281] : memref<9x80x128xbf16, #tpu.memory_space<vmem>>, vector<1x80x128xbf16>
    %317 = vector.shape_cast %316 : vector<1x80x128xbf16> to vector<80x128xbf16>
    %cst_282 = arith.constant dense<0.000000e+00> : vector<24x128xf32>
    %318 = tpu.matmul %315, %317, %cst_282 {dimension_numbers = #tpu.dot_dimension_numbers<[1], [0], [0], [1], [0, 0, 1, 1], [], []>} : vector<24x80xbf16>, vector<80x128xbf16>, vector<24x128xf32> -> vector<24x128xf32>
    %319 = arith.addf %313, %318 : vector<24x128xf32>
    %c13_283 = arith.constant 13 : index
    %c0_284 = arith.constant 0 : index
    %320 = vector.load %arg20[%c13_283, %c0_284] : memref<40x80xf32, #tpu.memory_space<vmem>>, vector<24x80xf32>
    %321 = arith.truncf %320 : vector<24x80xf32> to vector<24x80xbf16>
    %c7_285 = arith.constant 7 : index
    %c0_286 = arith.constant 0 : index
    %c0_287 = arith.constant 0 : index
    %322 = vector.load %arg8[%c7_285, %c0_286, %c0_287] : memref<9x80x128xbf16, #tpu.memory_space<vmem>>, vector<1x80x128xbf16>
    %323 = vector.shape_cast %322 : vector<1x80x128xbf16> to vector<80x128xbf16>
    %cst_288 = arith.constant dense<0.000000e+00> : vector<24x128xf32>
    %324 = tpu.matmul %321, %323, %cst_288 {dimension_numbers = #tpu.dot_dimension_numbers<[1], [0], [0], [1], [0, 0, 1, 1], [], []>} : vector<24x80xbf16>, vector<80x128xbf16>, vector<24x128xf32> -> vector<24x128xf32>
    %325 = arith.addf %319, %324 : vector<24x128xf32>
    %c14_289 = arith.constant 14 : index
    %c0_290 = arith.constant 0 : index
    %326 = vector.load %arg20[%c14_289, %c0_290] : memref<40x80xf32, #tpu.memory_space<vmem>>, vector<24x80xf32>
    %327 = arith.truncf %326 : vector<24x80xf32> to vector<24x80xbf16>
    %c8_291 = arith.constant 8 : index
    %c0_292 = arith.constant 0 : index
    %c0_293 = arith.constant 0 : index
    %328 = vector.load %arg8[%c8_291, %c0_292, %c0_293] : memref<9x80x128xbf16, #tpu.memory_space<vmem>>, vector<1x80x128xbf16>
    %329 = vector.shape_cast %328 : vector<1x80x128xbf16> to vector<80x128xbf16>
    %cst_294 = arith.constant dense<0.000000e+00> : vector<24x128xf32>
    %330 = tpu.matmul %327, %329, %cst_294 {dimension_numbers = #tpu.dot_dimension_numbers<[1], [0], [0], [1], [0, 0, 1, 1], [], []>} : vector<24x80xbf16>, vector<80x128xbf16>, vector<24x128xf32> -> vector<24x128xf32>
    %331 = arith.addf %325, %330 : vector<24x128xf32>
    %c0_295 = arith.constant 0 : index
    %c0_296 = arith.constant 0 : index
    %332 = vector.load %arg9[%c0_295, %c0_296] : memref<1x128xf32, #tpu.memory_space<vmem>>, vector<1x128xf32>
    %333 = vector.broadcast %332 : vector<1x128xf32> to vector<24x128xf32>
    %334 = arith.addf %331, %333 : vector<24x128xf32>
    %cst_297 = arith.constant 0.000000e+00 : f32
    %335 = vector.broadcast %cst_297 : f32 to vector<24x128xf32>
    %336 = arith.maximumf %334, %335 : vector<24x128xf32>
    %337 = vector.broadcast %57 : vector<24x1xf32> to vector<24x128xf32>
    %338 = arith.mulf %336, %337 : vector<24x128xf32>
    %c7_298 = arith.constant 7 : index
    %c0_299 = arith.constant 0 : index
    %339 = vector.load %arg21[%c7_298, %c0_299] : memref<40x128xf32, #tpu.memory_space<vmem>>, vector<24x128xf32>
    tpu.vector_store %arg21[%c7_298, %c0_299], %338 {strides = array<i32>} : memref<40x128xf32, #tpu.memory_space<vmem>>, vector<24x128xf32>,
    %c0_300 = arith.constant 0 : index
    %c0_301 = arith.constant 0 : index
    %340 = vector.load %arg21[%c0_300, %c0_301] : memref<40x128xf32, #tpu.memory_space<vmem>>, vector<24x128xf32>
    %341 = arith.truncf %340 : vector<24x128xf32> to vector<24x128xbf16>
    %c0_302 = arith.constant 0 : index
    %c0_303 = arith.constant 0 : index
    %c0_304 = arith.constant 0 : index
    %342 = vector.load %arg10[%c0_302, %c0_303, %c0_304] : memref<9x128x128xbf16, #tpu.memory_space<vmem>>, vector<1x128x128xbf16>
    %343 = vector.shape_cast %342 : vector<1x128x128xbf16> to vector<128x128xbf16>
    %cst_305 = arith.constant dense<0.000000e+00> : vector<24x128xf32>
    %344 = tpu.matmul %341, %343, %cst_305 {dimension_numbers = #tpu.dot_dimension_numbers<[1], [0], [0], [1], [0, 0, 1, 1], [], []>} : vector<24x128xbf16>, vector<128x128xbf16>, vector<24x128xf32> -> vector<24x128xf32>
    %c1_306 = arith.constant 1 : index
    %c0_307 = arith.constant 0 : index
    %345 = vector.load %arg21[%c1_306, %c0_307] : memref<40x128xf32, #tpu.memory_space<vmem>>, vector<24x128xf32>
    %346 = arith.truncf %345 : vector<24x128xf32> to vector<24x128xbf16>
    %c1_308 = arith.constant 1 : index
    %c0_309 = arith.constant 0 : index
    %c0_310 = arith.constant 0 : index
    %347 = vector.load %arg10[%c1_308, %c0_309, %c0_310] : memref<9x128x128xbf16, #tpu.memory_space<vmem>>, vector<1x128x128xbf16>
    %348 = vector.shape_cast %347 : vector<1x128x128xbf16> to vector<128x128xbf16>
    %cst_311 = arith.constant dense<0.000000e+00> : vector<24x128xf32>
    %349 = tpu.matmul %346, %348, %cst_311 {dimension_numbers = #tpu.dot_dimension_numbers<[1], [0], [0], [1], [0, 0, 1, 1], [], []>} : vector<24x128xbf16>, vector<128x128xbf16>, vector<24x128xf32> -> vector<24x128xf32>
    %350 = arith.addf %344, %349 : vector<24x128xf32>
    %c2_312 = arith.constant 2 : index
    %c0_313 = arith.constant 0 : index
    %351 = vector.load %arg21[%c2_312, %c0_313] : memref<40x128xf32, #tpu.memory_space<vmem>>, vector<24x128xf32>
    %352 = arith.truncf %351 : vector<24x128xf32> to vector<24x128xbf16>
    %c2_314 = arith.constant 2 : index
    %c0_315 = arith.constant 0 : index
    %c0_316 = arith.constant 0 : index
    %353 = vector.load %arg10[%c2_314, %c0_315, %c0_316] : memref<9x128x128xbf16, #tpu.memory_space<vmem>>, vector<1x128x128xbf16>
    %354 = vector.shape_cast %353 : vector<1x128x128xbf16> to vector<128x128xbf16>
    %cst_317 = arith.constant dense<0.000000e+00> : vector<24x128xf32>
    %355 = tpu.matmul %352, %354, %cst_317 {dimension_numbers = #tpu.dot_dimension_numbers<[1], [0], [0], [1], [0, 0, 1, 1], [], []>} : vector<24x128xbf16>, vector<128x128xbf16>, vector<24x128xf32> -> vector<24x128xf32>
    %356 = arith.addf %350, %355 : vector<24x128xf32>
    %c6_318 = arith.constant 6 : index
    %c0_319 = arith.constant 0 : index
    %357 = vector.load %arg21[%c6_318, %c0_319] : memref<40x128xf32, #tpu.memory_space<vmem>>, vector<24x128xf32>
    %358 = arith.truncf %357 : vector<24x128xf32> to vector<24x128xbf16>
    %c3_320 = arith.constant 3 : index
    %c0_321 = arith.constant 0 : index
    %c0_322 = arith.constant 0 : index
    %359 = vector.load %arg10[%c3_320, %c0_321, %c0_322] : memref<9x128x128xbf16, #tpu.memory_space<vmem>>, vector<1x128x128xbf16>
    %360 = vector.shape_cast %359 : vector<1x128x128xbf16> to vector<128x128xbf16>
    %cst_323 = arith.constant dense<0.000000e+00> : vector<24x128xf32>
    %361 = tpu.matmul %358, %360, %cst_323 {dimension_numbers = #tpu.dot_dimension_numbers<[1], [0], [0], [1], [0, 0, 1, 1], [], []>} : vector<24x128xbf16>, vector<128x128xbf16>, vector<24x128xf32> -> vector<24x128xf32>
    %362 = arith.addf %356, %361 : vector<24x128xf32>
    %c7_324 = arith.constant 7 : index
    %c0_325 = arith.constant 0 : index
    %363 = vector.load %arg21[%c7_324, %c0_325] : memref<40x128xf32, #tpu.memory_space<vmem>>, vector<24x128xf32>
    %364 = arith.truncf %363 : vector<24x128xf32> to vector<24x128xbf16>
    %c4_326 = arith.constant 4 : index
    %c0_327 = arith.constant 0 : index
    %c0_328 = arith.constant 0 : index
    %365 = vector.load %arg10[%c4_326, %c0_327, %c0_328] : memref<9x128x128xbf16, #tpu.memory_space<vmem>>, vector<1x128x128xbf16>
    %366 = vector.shape_cast %365 : vector<1x128x128xbf16> to vector<128x128xbf16>
    %cst_329 = arith.constant dense<0.000000e+00> : vector<24x128xf32>
    %367 = tpu.matmul %364, %366, %cst_329 {dimension_numbers = #tpu.dot_dimension_numbers<[1], [0], [0], [1], [0, 0, 1, 1], [], []>} : vector<24x128xbf16>, vector<128x128xbf16>, vector<24x128xf32> -> vector<24x128xf32>
    %368 = arith.addf %362, %367 : vector<24x128xf32>
    %c8_330 = arith.constant 8 : index
    %c0_331 = arith.constant 0 : index
    %369 = vector.load %arg21[%c8_330, %c0_331] : memref<40x128xf32, #tpu.memory_space<vmem>>, vector<24x128xf32>
    %370 = arith.truncf %369 : vector<24x128xf32> to vector<24x128xbf16>
    %c5_332 = arith.constant 5 : index
    %c0_333 = arith.constant 0 : index
    %c0_334 = arith.constant 0 : index
    %371 = vector.load %arg10[%c5_332, %c0_333, %c0_334] : memref<9x128x128xbf16, #tpu.memory_space<vmem>>, vector<1x128x128xbf16>
    %372 = vector.shape_cast %371 : vector<1x128x128xbf16> to vector<128x128xbf16>
    %cst_335 = arith.constant dense<0.000000e+00> : vector<24x128xf32>
    %373 = tpu.matmul %370, %372, %cst_335 {dimension_numbers = #tpu.dot_dimension_numbers<[1], [0], [0], [1], [0, 0, 1, 1], [], []>} : vector<24x128xbf16>, vector<128x128xbf16>, vector<24x128xf32> -> vector<24x128xf32>
    %374 = arith.addf %368, %373 : vector<24x128xf32>
    %c12_336 = arith.constant 12 : index
    %c0_337 = arith.constant 0 : index
    %375 = vector.load %arg21[%c12_336, %c0_337] : memref<40x128xf32, #tpu.memory_space<vmem>>, vector<24x128xf32>
    %376 = arith.truncf %375 : vector<24x128xf32> to vector<24x128xbf16>
    %c6_338 = arith.constant 6 : index
    %c0_339 = arith.constant 0 : index
    %c0_340 = arith.constant 0 : index
    %377 = vector.load %arg10[%c6_338, %c0_339, %c0_340] : memref<9x128x128xbf16, #tpu.memory_space<vmem>>, vector<1x128x128xbf16>
    %378 = vector.shape_cast %377 : vector<1x128x128xbf16> to vector<128x128xbf16>
    %cst_341 = arith.constant dense<0.000000e+00> : vector<24x128xf32>
    %379 = tpu.matmul %376, %378, %cst_341 {dimension_numbers = #tpu.dot_dimension_numbers<[1], [0], [0], [1], [0, 0, 1, 1], [], []>} : vector<24x128xbf16>, vector<128x128xbf16>, vector<24x128xf32> -> vector<24x128xf32>
    %380 = arith.addf %374, %379 : vector<24x128xf32>
    %c13_342 = arith.constant 13 : index
    %c0_343 = arith.constant 0 : index
    %381 = vector.load %arg21[%c13_342, %c0_343] : memref<40x128xf32, #tpu.memory_space<vmem>>, vector<24x128xf32>
    %382 = arith.truncf %381 : vector<24x128xf32> to vector<24x128xbf16>
    %c7_344 = arith.constant 7 : index
    %c0_345 = arith.constant 0 : index
    %c0_346 = arith.constant 0 : index
    %383 = vector.load %arg10[%c7_344, %c0_345, %c0_346] : memref<9x128x128xbf16, #tpu.memory_space<vmem>>, vector<1x128x128xbf16>
    %384 = vector.shape_cast %383 : vector<1x128x128xbf16> to vector<128x128xbf16>
    %cst_347 = arith.constant dense<0.000000e+00> : vector<24x128xf32>
    %385 = tpu.matmul %382, %384, %cst_347 {dimension_numbers = #tpu.dot_dimension_numbers<[1], [0], [0], [1], [0, 0, 1, 1], [], []>} : vector<24x128xbf16>, vector<128x128xbf16>, vector<24x128xf32> -> vector<24x128xf32>
    %386 = arith.addf %380, %385 : vector<24x128xf32>
    %c14_348 = arith.constant 14 : index
    %c0_349 = arith.constant 0 : index
    %387 = vector.load %arg21[%c14_348, %c0_349] : memref<40x128xf32, #tpu.memory_space<vmem>>, vector<24x128xf32>
    %388 = arith.truncf %387 : vector<24x128xf32> to vector<24x128xbf16>
    %c8_350 = arith.constant 8 : index
    %c0_351 = arith.constant 0 : index
    %c0_352 = arith.constant 0 : index
    %389 = vector.load %arg10[%c8_350, %c0_351, %c0_352] : memref<9x128x128xbf16, #tpu.memory_space<vmem>>, vector<1x128x128xbf16>
    %390 = vector.shape_cast %389 : vector<1x128x128xbf16> to vector<128x128xbf16>
    %cst_353 = arith.constant dense<0.000000e+00> : vector<24x128xf32>
    %391 = tpu.matmul %388, %390, %cst_353 {dimension_numbers = #tpu.dot_dimension_numbers<[1], [0], [0], [1], [0, 0, 1, 1], [], []>} : vector<24x128xbf16>, vector<128x128xbf16>, vector<24x128xf32> -> vector<24x128xf32>
    %392 = arith.addf %386, %391 : vector<24x128xf32>
    %c0_354 = arith.constant 0 : index
    %c0_355 = arith.constant 0 : index
    %393 = vector.load %arg11[%c0_354, %c0_355] : memref<1x128xf32, #tpu.memory_space<vmem>>, vector<1x128xf32>
    %394 = vector.broadcast %393 : vector<1x128xf32> to vector<24x128xf32>
    %395 = arith.addf %392, %394 : vector<24x128xf32>
    %cst_356 = arith.constant 0.000000e+00 : f32
    %396 = vector.broadcast %cst_356 : f32 to vector<24x128xf32>
    %397 = arith.maximumf %395, %396 : vector<24x128xf32>
    %c0_357 = arith.constant 0 : index
    %c0_358 = arith.constant 0 : index
    %398 = vector.load %arg23[%c0_357, %c0_358] : memref<24x128xf32, #tpu.memory_space<vmem>>, vector<24x128xf32>
    tpu.vector_store %arg23[%c0_357, %c0_358], %397 {strides = array<i32>} : memref<24x128xf32, #tpu.memory_space<vmem>>, vector<24x128xf32>,
    %c0_359 = arith.constant 0 : index
    %c0_360 = arith.constant 0 : index
    %399 = vector.load %arg23[%c0_359, %c0_360] : memref<24x128xf32, #tpu.memory_space<vmem>>, vector<16x128xf32>
    %c1_361 = arith.constant 1 : index
    %c0_362 = arith.constant 0 : index
    %400 = vector.load %arg23[%c1_361, %c0_362] : memref<24x128xf32, #tpu.memory_space<vmem>>, vector<16x128xf32>
    %401 = arith.maximumf %399, %400 : vector<16x128xf32>
    %c6_363 = arith.constant 6 : index
    %c0_364 = arith.constant 0 : index
    %402 = vector.load %arg23[%c6_363, %c0_364] : memref<24x128xf32, #tpu.memory_space<vmem>>, vector<16x128xf32>
    %c7_365 = arith.constant 7 : index
    %c0_366 = arith.constant 0 : index
    %403 = vector.load %arg23[%c7_365, %c0_366] : memref<24x128xf32, #tpu.memory_space<vmem>>, vector<16x128xf32>
    %404 = arith.maximumf %402, %403 : vector<16x128xf32>
    %405 = arith.maximumf %401, %404 : vector<16x128xf32>
    %c0_367 = arith.constant 0 : index
    %c0_368 = arith.constant 0 : index
    %406 = vector.load %arg23[%c0_367, %c0_368] : memref<24x128xf32, #tpu.memory_space<vmem>>, vector<16x128xf32>
    tpu.vector_store %arg23[%c0_367, %c0_368], %405 {strides = array<i32>} : memref<24x128xf32, #tpu.memory_space<vmem>>, vector<16x128xf32>,
    %c0_369 = arith.constant 0 : index
    %c0_370 = arith.constant 0 : index
    %407 = tpu.strided_load %arg23[%c0_369, %c0_370] {strides = array<i32: 2, 1>} : memref<24x128xf32, #tpu.memory_space<vmem>>, vector<2x128xf32>
    %c12_371 = arith.constant 12 : index
    %c0_372 = arith.constant 0 : index
    %408 = tpu.strided_load %arg23[%c12_371, %c0_372] {strides = array<i32: 2, 1>} : memref<24x128xf32, #tpu.memory_space<vmem>>, vector<2x128xf32>
    %409 = tpu.concatenate %407, %408 in 0 : vector<2x128xf32>, vector<2x128xf32> -> vector<4x128xf32>
    %410 = arith.truncf %409 : vector<4x128xf32> to vector<4x128xbf16>
    %411 = vector.extract_strided_slice %410 {offsets = [0, 0], sizes = [1, 128], strides = [1, 1]} : vector<4x128xbf16> to vector<1x128xbf16>
    %c0_373 = arith.constant 0 : index
    %c0_374 = arith.constant 0 : index
    %c0_375 = arith.constant 0 : index
    %412 = vector.load %arg12[%c0_373, %c0_374, %c0_375] : memref<4x128x800xbf16, #tpu.memory_space<vmem>>, vector<1x128x800xbf16>
    %413 = vector.shape_cast %412 : vector<1x128x800xbf16> to vector<128x800xbf16>
    %cst_376 = arith.constant dense<0.000000e+00> : vector<1x800xf32>
    %414 = tpu.matmul %411, %413, %cst_376 {dimension_numbers = #tpu.dot_dimension_numbers<[1], [0], [0], [1], [0, 0, 1, 1], [], []>} : vector<1x128xbf16>, vector<128x800xbf16>, vector<1x800xf32> -> vector<1x800xf32>
    %415 = vector.extract_strided_slice %410 {offsets = [1, 0], sizes = [1, 128], strides = [1, 1]} : vector<4x128xbf16> to vector<1x128xbf16>
    %c1_377 = arith.constant 1 : index
    %c0_378 = arith.constant 0 : index
    %c0_379 = arith.constant 0 : index
    %416 = vector.load %arg12[%c1_377, %c0_378, %c0_379] : memref<4x128x800xbf16, #tpu.memory_space<vmem>>, vector<1x128x800xbf16>
    %417 = vector.shape_cast %416 : vector<1x128x800xbf16> to vector<128x800xbf16>
    %cst_380 = arith.constant dense<0.000000e+00> : vector<1x800xf32>
    %418 = tpu.matmul %415, %417, %cst_380 {dimension_numbers = #tpu.dot_dimension_numbers<[1], [0], [0], [1], [0, 0, 1, 1], [], []>} : vector<1x128xbf16>, vector<128x800xbf16>, vector<1x800xf32> -> vector<1x800xf32>
    %419 = arith.addf %414, %418 : vector<1x800xf32>
    %420 = vector.extract_strided_slice %410 {offsets = [2, 0], sizes = [1, 128], strides = [1, 1]} : vector<4x128xbf16> to vector<1x128xbf16>
    %c2_381 = arith.constant 2 : index
    %c0_382 = arith.constant 0 : index
    %c0_383 = arith.constant 0 : index
    %421 = vector.load %arg12[%c2_381, %c0_382, %c0_383] : memref<4x128x800xbf16, #tpu.memory_space<vmem>>, vector<1x128x800xbf16>
    %422 = vector.shape_cast %421 : vector<1x128x800xbf16> to vector<128x800xbf16>
    %cst_384 = arith.constant dense<0.000000e+00> : vector<1x800xf32>
    %423 = tpu.matmul %420, %422, %cst_384 {dimension_numbers = #tpu.dot_dimension_numbers<[1], [0], [0], [1], [0, 0, 1, 1], [], []>} : vector<1x128xbf16>, vector<128x800xbf16>, vector<1x800xf32> -> vector<1x800xf32>
    %424 = arith.addf %419, %423 : vector<1x800xf32>
    %425 = vector.extract_strided_slice %410 {offsets = [3, 0], sizes = [1, 128], strides = [1, 1]} : vector<4x128xbf16> to vector<1x128xbf16>
    %c3_385 = arith.constant 3 : index
    %c0_386 = arith.constant 0 : index
    %c0_387 = arith.constant 0 : index
    %426 = vector.load %arg12[%c3_385, %c0_386, %c0_387] : memref<4x128x800xbf16, #tpu.memory_space<vmem>>, vector<1x128x800xbf16>
    %427 = vector.shape_cast %426 : vector<1x128x800xbf16> to vector<128x800xbf16>
    %cst_388 = arith.constant dense<0.000000e+00> : vector<1x800xf32>
    %428 = tpu.matmul %425, %427, %cst_388 {dimension_numbers = #tpu.dot_dimension_numbers<[1], [0], [0], [1], [0, 0, 1, 1], [], []>} : vector<1x128xbf16>, vector<128x800xbf16>, vector<1x800xf32> -> vector<1x800xf32>
    %429 = arith.addf %424, %428 : vector<1x800xf32>
    %c0_389 = arith.constant 0 : index
    %c0_390 = arith.constant 0 : index
    %430 = vector.load %arg13[%c0_389, %c0_390] : memref<1x800xf32, #tpu.memory_space<vmem>>, vector<1x800xf32>
    %431 = arith.addf %429, %430 : vector<1x800xf32>
    %cst_391 = arith.constant 0.000000e+00 : f32
    %432 = vector.broadcast %cst_391 : f32 to vector<1x800xf32>
    %433 = arith.maximumf %431, %432 : vector<1x800xf32>
    %434 = arith.truncf %433 : vector<1x800xf32> to vector<1x800xbf16>
    %c0_392 = arith.constant 0 : index
    %c0_393 = arith.constant 0 : index
    %435 = vector.load %arg14[%c0_392, %c0_393] : memref<800x80xbf16, #tpu.memory_space<vmem>>, vector<800x80xbf16>
    %cst_394 = arith.constant dense<0.000000e+00> : vector<1x80xf32>
    %436 = tpu.matmul %434, %435, %cst_394 {dimension_numbers = #tpu.dot_dimension_numbers<[1], [0], [0], [1], [0, 0, 1, 1], [], []>} : vector<1x800xbf16>, vector<800x80xbf16>, vector<1x80xf32> -> vector<1x80xf32>
    %c0_395 = arith.constant 0 : index
    %c0_396 = arith.constant 0 : index
    %437 = vector.load %arg15[%c0_395, %c0_396] : memref<1x80xf32, #tpu.memory_space<vmem>>, vector<1x80xf32>
    %438 = arith.addf %436, %437 : vector<1x80xf32>
    %c0_397 = arith.constant 0 : index
    %c0_398 = arith.constant 0 : index
    %c0_399 = arith.constant 0 : index
    %439 = vector.load %arg16[%c0_397, %c0_398, %c0_399] : memref<1x1x80xf32, #tpu.memory_space<vmem>>, vector<1x1x80xf32>
    %440 = vector.shape_cast %439 : vector<1x1x80xf32> to vector<1x80xf32>
    %441 = vector.shape_cast %438 : vector<1x80xf32> to vector<1x1x80xf32>
    tpu.vector_store %arg16[%c0_397, %c0_398, %c0_399], %441 {strides = array<i32>} : memref<1x1x80xf32, #tpu.memory_space<vmem>>, vector<1x1x80xf32>,
    return
  }
  func.func @transform_0(%arg0: i32) -> (i32, i32, i32) {
    %c0_i32 = arith.constant 0 : i32
    %c0_i32_0 = arith.constant 0 : i32
    %c0_i32_1 = arith.constant 0 : i32
    return %arg0, %c0_i32, %c0_i32_0 : i32, i32, i32
  }
  func.func @transform_1(%arg0: i32) -> (i32, i32, i32) {
    %c0_i32 = arith.constant 0 : i32
    %c0_i32_0 = arith.constant 0 : i32
    %c0_i32_1 = arith.constant 0 : i32
    %c0_i32_2 = arith.constant 0 : i32
    return %c0_i32, %c0_i32_0, %c0_i32_1 : i32, i32, i32
  }
  func.func @transform_2(%arg0: i32) -> (i32, i32) {
    %c0_i32 = arith.constant 0 : i32
    %c0_i32_0 = arith.constant 0 : i32
    %c0_i32_1 = arith.constant 0 : i32
    return %c0_i32, %c0_i32_0 : i32, i32
  }
  func.func @transform_3(%arg0: i32) -> (i32, i32, i32) {
    %c0_i32 = arith.constant 0 : i32
    %c0_i32_0 = arith.constant 0 : i32
    %c0_i32_1 = arith.constant 0 : i32
    %c0_i32_2 = arith.constant 0 : i32
    return %c0_i32, %c0_i32_0, %c0_i32_1 : i32, i32, i32
  }
  func.func @transform_4(%arg0: i32) -> (i32, i32) {
    %c0_i32 = arith.constant 0 : i32
    %c0_i32_0 = arith.constant 0 : i32
    %c0_i32_1 = arith.constant 0 : i32
    return %c0_i32, %c0_i32_0 : i32, i32
  }
  func.func @transform_5(%arg0: i32) -> (i32, i32, i32) {
    %c0_i32 = arith.constant 0 : i32
    %c0_i32_0 = arith.constant 0 : i32
    %c0_i32_1 = arith.constant 0 : i32
    %c0_i32_2 = arith.constant 0 : i32
    return %c0_i32, %c0_i32_0, %c0_i32_1 : i32, i32, i32
  }
  func.func @transform_6(%arg0: i32) -> (i32, i32) {
    %c0_i32 = arith.constant 0 : i32
    %c0_i32_0 = arith.constant 0 : i32
    %c0_i32_1 = arith.constant 0 : i32
    return %c0_i32, %c0_i32_0 : i32, i32
  }
  func.func @transform_7(%arg0: i32) -> (i32, i32, i32) {
    %c0_i32 = arith.constant 0 : i32
    %c0_i32_0 = arith.constant 0 : i32
    %c0_i32_1 = arith.constant 0 : i32
    %c0_i32_2 = arith.constant 0 : i32
    return %c0_i32, %c0_i32_0, %c0_i32_1 : i32, i32, i32
  }
  func.func @transform_8(%arg0: i32) -> (i32, i32) {
    %c0_i32 = arith.constant 0 : i32
    %c0_i32_0 = arith.constant 0 : i32
    %c0_i32_1 = arith.constant 0 : i32
    return %c0_i32, %c0_i32_0 : i32, i32
  }
  func.func @transform_9(%arg0: i32) -> (i32, i32, i32) {
    %c0_i32 = arith.constant 0 : i32
    %c0_i32_0 = arith.constant 0 : i32
    %c0_i32_1 = arith.constant 0 : i32
    %c0_i32_2 = arith.constant 0 : i32
    return %c0_i32, %c0_i32_0, %c0_i32_1 : i32, i32, i32
  }
  func.func @transform_10(%arg0: i32) -> (i32, i32) {
    %c0_i32 = arith.constant 0 : i32
    %c0_i32_0 = arith.constant 0 : i32
    %c0_i32_1 = arith.constant 0 : i32
    return %c0_i32, %c0_i32_0 : i32, i32
  }
  func.func @transform_11(%arg0: i32) -> (i32, i32, i32) {
    %c0_i32 = arith.constant 0 : i32
    %c0_i32_0 = arith.constant 0 : i32
    %c0_i32_1 = arith.constant 0 : i32
    %c0_i32_2 = arith.constant 0 : i32
    return %c0_i32, %c0_i32_0, %c0_i32_1 : i32, i32, i32
  }
  func.func @transform_12(%arg0: i32) -> (i32, i32) {
    %c0_i32 = arith.constant 0 : i32
    %c0_i32_0 = arith.constant 0 : i32
    %c0_i32_1 = arith.constant 0 : i32
    return %c0_i32, %c0_i32_0 : i32, i32
  }
  func.func @transform_13(%arg0: i32) -> (i32, i32) {
    %c0_i32 = arith.constant 0 : i32
    %c0_i32_0 = arith.constant 0 : i32
    %c0_i32_1 = arith.constant 0 : i32
    return %c0_i32, %c0_i32_0 : i32, i32
  }
  func.func @transform_14(%arg0: i32) -> (i32, i32) {
    %c0_i32 = arith.constant 0 : i32
    %c0_i32_0 = arith.constant 0 : i32
    %c0_i32_1 = arith.constant 0 : i32
    return %c0_i32, %c0_i32_0 : i32, i32
  }
  func.func @transform_15(%arg0: i32) -> (i32, i32, i32) {
    %c0_i32 = arith.constant 0 : i32
    %c0_i32_0 = arith.constant 0 : i32
    %c0_i32_1 = arith.constant 0 : i32
    return %arg0, %c0_i32, %c0_i32_0 : i32, i32, i32
  }
}

</mosaic_0001>

<bundles_post_ra>
// kernel: net_forward.1
= control target key start
LH: loop header
LB: loop body
LE: loop exit
PB: predicated region body
PF: predicated region fallthrough
CT: control target
= control target key end

     0   :  { %vm408_vm0 = vcmask 1043456   ;;  %vm51_vm1 = vcmask 64512   ;;  %v11642_v0 = vmov 0.0   ;;  %vm11643_vm2 = vmmov 0   ;;  %s14356_s1 = inlined_call_operand.vmem [shape: bf16[9,8,64], index: 1, kind: input, shape index: {}]   ;;  %s14357_s0 = inlined_call_operand.vmem [shape: f32[1,64,8], index: 0, kind: input, shape index: {}]   ;;  %s14358_s3 = inlined_call_operand.vmem [shape: bf16[9,64,64], index: 3, kind: input, shape index: {}]   ;;  %s14359_s2 = inlined_call_operand.vmem [shape: f32[1,64], index: 2, kind: input, shape index: {}]   ;;  %s14360_s5 = inlined_call_operand.vmem [shape: bf16[9,64,80], index: 5, kind: input, shape index: {}]   ;;  %s14361_s4 = inlined_call_operand.vmem [shape: f32[1,64], index: 4, kind: input, shape index: {}]   ;;  %s14362_s7 = inlined_call_operand.vmem [shape: bf16[9,80,128], index: 7, kind: input, shape index: {}]   ;;  %s14363_s6 = inlined_call_operand.vmem [shape: f32[1,80], index: 6, kind: input, shape index: {}]   ;;  %s14364_s9 = inlined_call_operand.vmem [shape: bf16[9,128,128], index: 9, kind: input, shape index: {}]   ;;  %s14365_s8 = inlined_call_operand.vmem [shape: f32[1,128], index: 8, kind: input, shape index: {}]   ;;  %s14366_s11 = inlined_call_operand.vmem [shape: bf16[4,128,800], index: 11, kind: input, shape index: {}]   ;;  %s14367_s10 = inlined_call_operand.vmem [shape: f32[1,128], index: 10, kind: input, shape index: {}]   ;;  %s14368_s13 = inlined_call_operand.vmem [shape: bf16[800,80], index: 13, kind: input, shape index: {}]   ;;  %s14369_s12 = inlined_call_operand.vmem [shape: f32[1,800], index: 12, kind: input, shape index: {}]   ;;  %s14370_s14 = inlined_call_operand.vmem [shape: f32[1,80], index: 14, kind: input, shape index: {}]   ;;  %s14371_s15 = inlined_call_operand.vmem [shape: f32[1,1,80], index: 15, kind: output, shape index: {}]  }
   0x1   :  { %10097 = vmatprep.subr.bf16.mxu0 %v11642_v0  ;;  %83 = vst [vmem:[#allocation6] sm:$0x7f] %v11642_v0  ;;  %84 = vst [vmem:[#allocation6 + $0x1f] sm:$0xff] %v11642_v0  ;;  %v8519_v1 = vld [vmem:[%s14356_s1 + $0x4] sm:$0xf]  ;;  %10119 = vmatprep.subr.bf16.mxu1 %v11642_v0  ;;  %v346_v6 = vld [vmem:[%s14357_s0 + $0x8] sm:$0xff] }
   0x2   :  { %v375_v2 = vld [vmem:[%s14356_s1] sm:$0xf]  ;;  %52 = vst.msk [vmem:[#allocation2] sm:$0xff] %vm51_vm1, %v11642_v0  ;;  %53 = vst.msk [vmem:[#allocation2 + $0x8] sm:$0xff] %vm51_vm1, %v11642_v0  ;;  %v410_v4 = vsel %vm408_vm0, %v8519_v1, 0  ;;  %10099 = vmatprep.mubr.msk.bf16.mxu0 %vm11643_vm2, %v11642_v0  ;;  %10121 = vmatprep.mubr.msk.bf16.mxu1 %vm11643_vm2, %v11642_v0  ;;  %v348_v7 = vld [vmem:[%s14357_s0 + $0x10] sm:$0xff] }
   0x3   :  { %54 = vst.msk [vmem:[#allocation2 + $0x10] sm:$0xff] %vm51_vm1, %v11642_v0  ;;  %v344_v3 = vld [vmem:[%s14357_s0] sm:$0xff]  ;;  %55 = vst.msk [vmem:[#allocation2 + $0x18] sm:$0xff] %vm51_vm1, %v11642_v0  ;;  %v501_v5 = vsel %vm408_vm0, %v375_v2, 0  ;;  %10098 = vmatpush3.bf16.msra.mxu0 %v410_v4  ;;  %v350_v8 = vld [vmem:[%s14357_s0 + $0x18] sm:$0xff]  ;;  %vm65_vm3 = vcmask 523264  }
   0x4   :  { %56 = vst.msk [vmem:[#allocation2 + $0x20] sm:$0xff] %vm51_vm1, %v11642_v0  ;;  %57 = vst.msk [vmem:[#allocation2 + $0x28] sm:$0xff] %vm51_vm1, %v11642_v0  ;;  %10120 = vmatpush3.bf16.msra.mxu1 %v501_v5  ;;  %v352_v9 = vld [vmem:[%s14357_s0 + $0x20] sm:$0xff]  ;;  %v354_v10 = vld [vmem:[%s14357_s0 + $0x28] sm:$0xff]  ;;  %10141 = vmatprep.subr.bf16.mxu0 %v11642_v0  ;;  %vm72_vm4 = vcmask 518144   ;;  %vm75_vm5 = vcmask 520192  }
   0x5   :  { %58 = vst.msk [vmem:[#allocation2 + $0x30] sm:$0xff] %vm51_vm1, %v11642_v0  ;;  %59 = vst.msk [vmem:[#allocation2 + $0x38] sm:$0xff] %vm51_vm1, %v11642_v0  ;;  %v356_v11 = vld [vmem:[%s14357_s0 + $0x30] sm:$0xff]  ;;  %10163 = vmatprep.subr.bf16.mxu1 %v11642_v0  ;;  %v358_v12 = vld [vmem:[%s14357_s0 + $0x38] sm:$0xff] }
   0x6   :  { %60 = vst.msk [vmem:[#allocation2 + $0x40] sm:$0xff] %vm51_vm1, %v11642_v0  ;;  %61 = vst.msk [vmem:[#allocation2 + $0x48] sm:$0xff] %vm51_vm1, %v11642_v0  ;;  %v8554_v13 = vld [vmem:[%s14356_s1 + $0x18] sm:$0xf]  ;;  %v8560_v14 = vld [vmem:[%s14356_s1 + $0x1c] sm:$0xf] }
   0x7   :  { %62 = vst.msk [vmem:[#allocation2 + $0x50] sm:$0xff] %vm51_vm1, %v11642_v0  ;;  %63 = vst.msk [vmem:[#allocation2 + $0x58] sm:$0xff] %vm51_vm1, %v11642_v0  ;;  %v8530_v15 = vld [vmem:[%s14356_s1 + $0x8] sm:$0xf]  ;;  %v11811_v16 = vsel %vm408_vm0, %v8554_v13, 0  ;;  %v11814_v17 = vsel %vm408_vm0, %v8560_v14, 0 }
   0x8   :  { %64 = vst.msk [vmem:[#allocation2 + $0x60] sm:$0xff] %vm51_vm1, %v11642_v0  ;;  %345 = vst.msk [vmem:[#allocation2 + $0xb] sm:$0xff] %vm51_vm1, %v344_v3  ;;  %v8566_v18 = vld [vmem:[%s14356_s1 + $0x20] sm:$0xf]  ;;  %v8536_v21 = vld [vmem:[%s14356_s1 + $0xc] sm:$0xf] }
   0x9   :  { %347 = vst.msk [vmem:[#allocation2 + $0x15] sm:$0xff] %vm51_vm1, %v346_v6  ;;  %349 = vst.msk [vmem:[#allocation2 + $0x1f] sm:$0xff] %vm51_vm1, %v348_v7  ;;  %v376_v19 = vld [vmem:[#allocation2 + $0x1] sm:$0xff]  ;;  %v11823_v22 = vsel %vm408_vm0, %v8566_v18, 0  ;;  %v609_v27 = vsel %vm408_vm0, %v8530_v15, 0  ;;  %v727_v28 = vsel %vm408_vm0, %v8536_v21, 0 }
   0xa   :  { %351 = vst.msk [vmem:[#allocation2 + $0x29] sm:$0xff] %vm51_vm1, %v350_v8  ;;  %353 = vst.msk [vmem:[#allocation2 + $0x33] sm:$0xff] %vm51_vm1, %v352_v9  ;;  %v360_v20 = vld [vmem:[#allocation2] sm:$0xff]  ;;  %v8542_v56 = vld [vmem:[%s14356_s1 + $0x10] sm:$0xf] }
   0xb   :  { %355 = vst.msk [vmem:[#allocation2 + $0x3d] sm:$0xff] %vm51_vm1, %v354_v10  ;;  %357 = vst.msk [vmem:[#allocation2 + $0x47] sm:$0xff] %vm51_vm1, %v356_v11  ;;  %v576_v53 = vld [vmem:[#allocation2 + $0x2] sm:$0xff]  ;;  %v8548_v59 = vld [vmem:[%s14356_s1 + $0x14] sm:$0xf]  ;;  %v845_v60 = vsel %vm408_vm0, %v8542_v56, 0 }
   0xc   :  { %359 = vst.msk [vmem:[#allocation2 + $0x51] sm:$0xff] %vm51_vm1, %v358_v12  ;;  %v963_v61 = vsel %vm408_vm0, %v8548_v59, 0 }
   0xd   :  { %66 = vst.msk [vmem:[#allocation4] sm:$0xff] %vm65_vm3, %v11642_v0  ;;  %67 = vst.msk [vmem:[#allocation4 + $0x8] sm:$0xff] %vm65_vm3, %v11642_v0 }
   0xe   :  { %68 = vst.msk [vmem:[#allocation4 + $0x10] sm:$0xff] %vm65_vm3, %v11642_v0  ;;  %69 = vst.msk [vmem:[#allocation4 + $0x18] sm:$0xff] %vm65_vm3, %v11642_v0 }
   0xf   :  { %v377_v23 = vld [vmem:[#allocation2 + $0x9] sm:$0xff]  ;;  %70 = vst.msk [vmem:[#allocation4 + $0x20] sm:$0xff] %vm65_vm3, %v11642_v0  ;;  %71 = vst.msk [vmem:[#allocation3] sm:$0xff] %vm65_vm3, %v11642_v0 }
  0x10   :  { %v361_v24 = vld [vmem:[#allocation2 + $0x8] sm:$0xff]  ;;  %v386_v25 = vpack.c.bf16 %v377_v23, %v376_v19  ;;  %v378_v29 = vld [vmem:[#allocation2 + $0x11] sm:$0xff]  ;;  %v379_v30 = vld [vmem:[#allocation2 + $0x19] sm:$0xff]  ;;  %74 = vst.msk [vmem:[#allocation3 + $0x5b] sm:$0xff] %vm65_vm3, %v11642_v0 }
  0x11   :  { %v370_v26 = vpack.c.bf16 %v361_v24, %v360_v20  ;;  %v362_v31 = vld [vmem:[#allocation2 + $0x10] sm:$0xff]  ;;  %v363_v32 = vld [vmem:[#allocation2 + $0x18] sm:$0xff]  ;;  %v387_v33 = vpack.c.bf16 %v379_v30, %v378_v29  ;;  %v380_v35 = vld [vmem:[#allocation2 + $0x21] sm:$0xff]  ;;  %73 = vst.msk [vmem:[#allocation3 + $0x8] sm:$0x7] %vm72_vm4, %v11642_v0 }
  0x12   :  { %10100 = vmatmul.mubr.msk.bf16.vlgmr.msra.gmra.mrb[0].mxu0 %vm51_vm1, %v386_v25  ;;  %v371_v34 = vpack.c.bf16 %v363_v32, %v362_v31  ;;  %v381_v36 = vld [vmem:[#allocation2 + $0x29] sm:$0xff]  ;;  %v364_v37 = vld [vmem:[#allocation2 + $0x20] sm:$0xff]  ;;  %v382_v41 = vld [vmem:[#allocation2 + $0x31] sm:$0xff]  ;;  %76 = vst.msk [vmem:[#allocation3 + $0x63] sm:$0x1f] %vm75_vm5, %v11642_v0 }
  0x13   :  { %10122 = vmatmul.mubr.msk.bf16.vlgmr.msra.gmra.mrb[0].mxu1 %vm51_vm1, %v370_v26  ;;  %10142 = vmatpush3.bf16.msra.mxu0 %v609_v27  ;;  %v365_v38 = vld [vmem:[#allocation2 + $0x28] sm:$0xff]  ;;  %v388_v39 = vpack.c.bf16 %v381_v36, %v380_v35  ;;  %v383_v42 = vld [vmem:[#allocation2 + $0x39] sm:$0xff]  ;;  %v366_v43 = vld [vmem:[#allocation2 + $0x30] sm:$0xff] }
  0x14   :  { %10103 = vmatprep.mubr.msk.bf16.mxu0 %vm11643_vm2, %v11642_v0  ;;  %10125 = vmatprep.mubr.msk.bf16.mxu1 %vm11643_vm2, %v11642_v0  ;;  %v372_v40 = vpack.c.bf16 %v365_v38, %v364_v37  ;;  %v367_v44 = vld [vmem:[#allocation2 + $0x38] sm:$0xff]  ;;  %v389_v45 = vpack.c.bf16 %v383_v42, %v382_v41  ;;  %v384_v47 = vld [vmem:[#allocation2 + $0x41] sm:$0xff]  ;;  %v385_v48 = vld [vmem:[#allocation2 + $0x49] sm:$0xff] }
  0x15   :  { %10164 = vmatpush3.bf16.msra.mxu1 %v727_v28  ;;  %10185 = vmatprep.subr.bf16.mxu0 %v11642_v0  ;;  %v373_v46 = vpack.c.bf16 %v367_v44, %v366_v43  ;;  %v368_v49 = vld [vmem:[#allocation2 + $0x40] sm:$0xff]  ;;  %v369_v50 = vld [vmem:[#allocation2 + $0x48] sm:$0xff]  ;;  %v390_v51 = vpack.c.bf16 %v385_v48, %v384_v47  ;;  %v695_v55 = vld [vmem:[#allocation2 + $0x12] sm:$0xff] }
  0x16   :  { %10207 = vmatprep.subr.bf16.mxu1 %v11642_v0  ;;  %v374_v52 = vpack.c.bf16 %v369_v50, %v368_v49  ;;  %v577_v54 = vld [vmem:[#allocation2 + $0xa] sm:$0xff]  ;;  %v579_v62 = vld [vmem:[#allocation2 + $0x1a] sm:$0xff]  ;;  %v697_v63 = vld [vmem:[#allocation2 + $0x22] sm:$0xff] }
  0x17   :  { %v586_v57 = vpack.c.bf16 %v577_v54, %v576_v53  ;;  %v704_v58 = vpack.c.bf16 %v695_v55, %v577_v54  ;;  %v587_v1 = vpack.c.bf16 %v579_v62, %v695_v55  ;;  %v705_v2 = vpack.c.bf16 %v697_v63, %v579_v62  ;;  %v581_v3 = vld [vmem:[#allocation2 + $0x2a] sm:$0xff]  ;;  %v699_v4 = vld [vmem:[#allocation2 + $0x32] sm:$0xff]  ;;  %v583_v7 = vld [vmem:[#allocation2 + $0x3a] sm:$0xff] }
  0x18   :  { %v588_v5 = vpack.c.bf16 %v581_v3, %v697_v63  ;;  %v706_v6 = vpack.c.bf16 %v699_v4, %v581_v3  ;;  %v701_v8 = vld [vmem:[#allocation2 + $0x42] sm:$0xff]  ;;  %v589_v9 = vpack.c.bf16 %v583_v7, %v699_v4  ;;  %v585_v11 = vld [vmem:[#allocation2 + $0x4a] sm:$0xff]  ;;  %v703_v12 = vld [vmem:[#allocation2 + $0x52] sm:$0xff] }
  0x19   :  { %v707_v10 = vpack.c.bf16 %v701_v8, %v583_v7  ;;  %v590_v13 = vpack.c.bf16 %v585_v11, %v701_v8  ;;  %v708_v14 = vpack.c.bf16 %v703_v12, %v585_v11  ;;  %v812_v15 = vld [vmem:[#allocation2 + $0xb] sm:$0xff]  ;;  %v813_v18 = vld [vmem:[#allocation2 + $0x13] sm:$0xff]  ;;  %v814_v24 = vld [vmem:[#allocation2 + $0x1b] sm:$0xff] }
  0x1a   :  { %10104 = vmatmul.mubr.msk.bf16.gmra.mrb[4].mxu0 %vm51_vm1, %v387_v33  ;;  %v930_v19 = vld [vmem:[#allocation2 + $0xc] sm:$0xff]  ;;  %v931_v20 = vld [vmem:[#allocation2 + $0x14] sm:$0xff]  ;;  %v822_v21 = vpack.c.bf16 %v813_v18, %v812_v15  ;;  %v815_v25 = vld [vmem:[#allocation2 + $0x23] sm:$0xff] }
  0x1b   :  { %10126 = vmatmul.mubr.msk.bf16.gmra.mrb[4].mxu1 %vm51_vm1, %v371_v34  ;;  %10107 = vmatprep.mubr.msk.bf16.mxu0 %vm11643_vm2, %v11642_v0  ;;  %v940_v23 = vpack.c.bf16 %v931_v20, %v930_v19  ;;  %v932_v26 = vld [vmem:[#allocation2 + $0x1c] sm:$0xff]  ;;  %v933_v27 = vld [vmem:[#allocation2 + $0x24] sm:$0xff]  ;;  %v823_v28 = vpack.c.bf16 %v815_v25, %v814_v24  ;;  %v817_v30 = vld [vmem:[#allocation2 + $0x33] sm:$0xff] }
  0x1c   :  { %10129 = vmatprep.mubr.msk.bf16.mxu1 %vm11643_vm2, %v11642_v0  ;;  %v941_v29 = vpack.c.bf16 %v933_v27, %v932_v26  ;;  %v934_v31 = vld [vmem:[#allocation2 + $0x2c] sm:$0xff]  ;;  %v818_v34 = vld [vmem:[#allocation2 + $0x3b] sm:$0xff]  ;;  %v819_v35 = vld [vmem:[#allocation2 + $0x43] sm:$0xff]  ;;  %v1058_v48 = vpack.c.bf16 %v932_v26, %v931_v20 }
  0x1d   :  { %v936_v36 = vld [vmem:[#allocation2 + $0x3c] sm:$0xff]  ;;  %v937_v37 = vld [vmem:[#allocation2 + $0x44] sm:$0xff]  ;;  %v825_v38 = vpack.c.bf16 %v819_v35, %v818_v34  ;;  %v821_v41 = vld [vmem:[#allocation2 + $0x53] sm:$0xff] }
  0x1e   :  { %v938_v42 = vld [vmem:[#allocation2 + $0x4c] sm:$0xff]  ;;  %v939_v43 = vld [vmem:[#allocation2 + $0x54] sm:$0xff]  ;;  %v1167_v47 = vld [vmem:[#allocation2 + $0x1d] sm:$0xff] }
  0x1f   :  { %v1168_v50 = vld [vmem:[#allocation2 + $0x25] sm:$0xff]  ;;  %v1171_v54 = vld [vmem:[#allocation2 + $0x3d] sm:$0xff]  ;;  %v1061_v59 = vpack.c.bf16 %v938_v42, %v937_v37  ;;  %v1174_v62 = vld [vmem:[#allocation2 + $0x55] sm:$0xff] }
  0x20   :  { %v1175_v63 = vld [vmem:[#allocation2 + $0x5d] sm:$0xff]  ;;  %v1287_v7 = vld [vmem:[#allocation2 + $0x2e] sm:$0xff]  ;;  %v1290_v12 = vld [vmem:[#allocation2 + $0x46] sm:$0xff] }
  0x21   :  { %v1284_v3 = vld [vmem:[#allocation2 + $0x16] sm:$0xff]  ;;  %v1285_v4 = vld [vmem:[#allocation2 + $0x1e] sm:$0xff] }
  0x22   :  { %10108 = vmatmul.mubr.msk.bf16.gmra.mrb[8].mxu0 %vm51_vm1, %v388_v39  ;;  %v943_v39 = vpack.c.bf16 %v937_v37, %v936_v36  ;;  %v1292_v15 = vld [vmem:[#allocation2 + $0x56] sm:$0xff]  ;;  %v1293_v18 = vld [vmem:[#allocation2 + $0x5e] sm:$0xff] }
  0x23   :  { %10130 = vmatmul.mubr.msk.bf16.gmra.mrb[8].mxu1 %vm51_vm1, %v372_v40  ;;  %10111 = vmatprep.mubr.msk.bf16.mxu0 %vm11643_vm2, %v11642_v0  ;;  %v820_v40 = vld [vmem:[#allocation2 + $0x4b] sm:$0xff]  ;;  %v1298_v19 = vpack.c.bf16 %v1293_v18, %v1292_v15 }
  0x24   :  { %10133 = vmatprep.mubr.msk.bf16.mxu1 %vm11643_vm2, %v11642_v0  ;;  %v826_v44 = vpack.c.bf16 %v821_v41, %v820_v40 }
  0x2a   :  { %10112 = vmatmul.mubr.msk.bf16.gmra.mrb[12].mxu0 %vm51_vm1, %v389_v45  ;;  %v944_v45 = vpack.c.bf16 %v939_v43, %v938_v42 }
  0x2b   :  { %10134 = vmatmul.mubr.msk.bf16.gmra.mrb[12].mxu1 %vm51_vm1, %v373_v46  ;;  %10115 = vmatprep.mubr.msk.bf16.mxu0 %vm11643_vm2, %v11642_v0  ;;  %v1166_v46 = vld [vmem:[#allocation2 + $0x15] sm:$0xff] }
  0x2c   :  { %10137 = vmatprep.mubr.msk.bf16.mxu1 %vm11643_vm2, %v11642_v0  ;;  %v1176_v49 = vpack.c.bf16 %v1167_v47, %v1166_v46 }
  0x32   :  { %10116 = vmatmul.mubr.msk.bf16.gmra.mrb[16].mxu0 %vm51_vm1, %v390_v51  ;;  %v1169_v51 = vld [vmem:[#allocation2 + $0x2d] sm:$0xff] }
  0x33   :  { %10138 = vmatmul.mubr.msk.bf16.gmra.mrb[16].mxu1 %vm51_vm1, %v374_v52  ;;  %10143 = vmatprep.mubr.msk.bf16.mxu0 %vm11643_vm2, %v11642_v0  ;;  %v1059_v52 = vpack.c.bf16 %v934_v31, %v933_v27  ;;  %v1177_v53 = vpack.c.bf16 %v1169_v51, %v1168_v50  ;;  %v11079_v50 = vld [vmem:[%s14358_s3 + $0x28] sm:$0xff]  }
  0x34   :  { %10165 = vmatprep.mubr.msk.bf16.mxu1 %vm11643_vm2, %v11642_v0 }
  0x3a   :  { %10144 = vmatmul.mubr.msk.bf16.vlgmr.msra.gmra.mrb[20].mxu0 %vm51_vm1, %v586_v57  ;;  %v1172_v57 = vld [vmem:[#allocation2 + $0x45] sm:$0xff] }
  0x3b   :  { %10166 = vmatmul.mubr.msk.bf16.vlgmr.msra.gmra.mrb[20].mxu1 %vm51_vm1, %v704_v58  ;;  %10186 = vmatpush3.bf16.msra.mxu0 %v845_v60  ;;  %v1173_v58 = vld [vmem:[#allocation2 + $0x4d] sm:$0xff] }
  0x3c   :  { %10147 = vmatprep.mubr.msk.bf16.mxu0 %vm11643_vm2, %v11642_v0  ;;  %10169 = vmatprep.mubr.msk.bf16.mxu1 %vm11643_vm2, %v11642_v0  ;;  %v1179_v60 = vpack.c.bf16 %v1173_v58, %v1172_v57 }
  0x3d   :  { %10208 = vmatpush3.bf16.msra.mxu1 %v963_v61  ;;  %10229 = vmatprep.subr.bf16.mxu0 %v11642_v0  ;;  %v1057_v61 = vld [vmem:[#allocation2 + $0x5c] sm:$0xff] }
  0x3e   :  { %10251 = vmatprep.subr.bf16.mxu1 %v11642_v0 }
  0x42   :  { %10148 = vmatmul.mubr.msk.bf16.gmra.mrb[24].mxu0 %vm51_vm1, %v587_v1  ;;  %v1062_v1 = vpack.c.bf16 %v1057_v61, %v939_v43 }
  0x43   :  { %10170 = vmatmul.mubr.msk.bf16.gmra.mrb[24].mxu1 %vm51_vm1, %v705_v2  ;;  %10151 = vmatprep.mubr.msk.bf16.mxu0 %vm11643_vm2, %v11642_v0  ;;  %v1180_v2 = vpack.c.bf16 %v1175_v63, %v1174_v62 }
  0x44   :  { %10173 = vmatprep.mubr.msk.bf16.mxu1 %vm11643_vm2, %v11642_v0 }
  0x4a   :  { %10152 = vmatmul.mubr.msk.bf16.gmra.mrb[28].mxu0 %vm51_vm1, %v588_v5  ;;  %v1294_v5 = vpack.c.bf16 %v1285_v4, %v1284_v3 }
  0x4b   :  { %10174 = vmatmul.mubr.msk.bf16.gmra.mrb[28].mxu1 %vm51_vm1, %v706_v6  ;;  %10155 = vmatprep.mubr.msk.bf16.mxu0 %vm11643_vm2, %v11642_v0  ;;  %v1286_v6 = vld [vmem:[#allocation2 + $0x26] sm:$0xff] }
  0x4c   :  { %10177 = vmatprep.mubr.msk.bf16.mxu1 %vm11643_vm2, %v11642_v0  ;;  %v1295_v8 = vpack.c.bf16 %v1287_v7, %v1286_v6 }
  0x52   :  { %10156 = vmatmul.mubr.msk.bf16.gmra.mrb[32].mxu0 %vm51_vm1, %v589_v9  ;;  %v1288_v9 = vld [vmem:[#allocation2 + $0x36] sm:$0xff] }
  0x53   :  { %10178 = vmatmul.mubr.msk.bf16.gmra.mrb[32].mxu1 %vm51_vm1, %v707_v10  ;;  %10159 = vmatprep.mubr.msk.bf16.mxu0 %vm11643_vm2, %v11642_v0  ;;  %v1289_v10 = vld [vmem:[#allocation2 + $0x3e] sm:$0xff] }
  0x54   :  { %10181 = vmatprep.mubr.msk.bf16.mxu1 %vm11643_vm2, %v11642_v0  ;;  %v1296_v11 = vpack.c.bf16 %v1289_v10, %v1288_v9  ;;  %v11082_v9 = vld [vmem:[%s14358_s3 + $0x8] sm:$0xff]  }
  0x5a   :  { %10160 = vmatmul.mubr.msk.bf16.gmra.mrb[36].mxu0 %vm51_vm1, %v590_v13  ;;  %v1291_v13 = vld [vmem:[#allocation2 + $0x4e] sm:$0xff] }
  0x5b   :  { %10182 = vmatmul.mubr.msk.bf16.gmra.mrb[36].mxu1 %vm51_vm1, %v708_v14  ;;  %10187 = vmatprep.mubr.msk.bf16.mxu0 %vm11643_vm2, %v11642_v0  ;;  %v1297_v14 = vpack.c.bf16 %v1291_v13, %v1290_v12 }
  0x5c   :  { %10209 = vmatprep.mubr.msk.bf16.mxu1 %vm11643_vm2, %v11642_v0 }
  0x62   :  { %10188 = vmatmul.mubr.msk.bf16.vlgmr.msra.gmra.mrb[40].mxu0 %vm51_vm1, %v822_v21 }
  0x63   :  { %10210 = vmatmul.mubr.msk.bf16.vlgmr.msra.gmra.mrb[40].mxu1 %vm51_vm1, %v940_v23  ;;  %10230 = vmatpush3.bf16.msra.mxu0 %v11811_v16  ;;  %v816_v16 = vld [vmem:[#allocation2 + $0x2b] sm:$0xff] }
  0x64   :  { %10191 = vmatprep.mubr.msk.bf16.mxu0 %vm11643_vm2, %v11642_v0  ;;  %10213 = vmatprep.mubr.msk.bf16.mxu1 %vm11643_vm2, %v11642_v0  ;;  %v824_v32 = vpack.c.bf16 %v817_v30, %v816_v16 }
  0x65   :  { %10252 = vmatpush3.bf16.msra.mxu1 %v11814_v17  ;;  %10273 = vmatprep.subr.bf16.mxu0 %v11642_v0  ;;  %v935_v17 = vld [vmem:[#allocation2 + $0x34] sm:$0xff] }
  0x66   :  { %10295 = vmatprep.subr.bf16.mxu1 %v11642_v0  ;;  %v942_v33 = vpack.c.bf16 %v935_v17, %v934_v31  ;;  %v1060_v55 = vpack.c.bf16 %v936_v36, %v935_v17 }
  0x6a   :  { %10192 = vmatmul.mubr.msk.bf16.gmra.mrb[44].mxu0 %vm51_vm1, %v823_v28 }
  0x6b   :  { %10214 = vmatmul.mubr.msk.bf16.gmra.mrb[44].mxu1 %vm51_vm1, %v941_v29  ;;  %10195 = vmatprep.mubr.msk.bf16.mxu0 %vm11643_vm2, %v11642_v0 }
  0x6c   :  { %10217 = vmatprep.mubr.msk.bf16.mxu1 %vm11643_vm2, %v11642_v0 }
  0x72   :  { %10196 = vmatmul.mubr.msk.bf16.gmra.mrb[48].mxu0 %vm51_vm1, %v824_v32 }
  0x73   :  { %10218 = vmatmul.mubr.msk.bf16.gmra.mrb[48].mxu1 %vm51_vm1, %v942_v33  ;;  %10199 = vmatprep.mubr.msk.bf16.mxu0 %vm11643_vm2, %v11642_v0 }
  0x74   :  { %10221 = vmatprep.mubr.msk.bf16.mxu1 %vm11643_vm2, %v11642_v0 }
  0x7a   :  { %10200 = vmatmul.mubr.msk.bf16.gmra.mrb[52].mxu0 %vm51_vm1, %v825_v38 }
  0x7b   :  { %10222 = vmatmul.mubr.msk.bf16.gmra.mrb[52].mxu1 %vm51_vm1, %v943_v39  ;;  %10203 = vmatprep.mubr.msk.bf16.mxu0 %vm11643_vm2, %v11642_v0  ;;  %v11078_v39 = vld [vmem:[%s14358_s3 + $0x20] sm:$0xff]  }
  0x7c   :  { %10225 = vmatprep.mubr.msk.bf16.mxu1 %vm11643_vm2, %v11642_v0 }
  0x82   :  { %10204 = vmatmul.mubr.msk.bf16.gmra.mrb[56].mxu0 %vm51_vm1, %v826_v44 }
  0x83   :  { %10226 = vmatmul.mubr.msk.bf16.gmra.mrb[56].mxu1 %vm51_vm1, %v944_v45  ;;  %10231 = vmatprep.mubr.msk.bf16.mxu0 %vm11643_vm2, %v11642_v0 }
  0x84   :  { %10253 = vmatprep.mubr.msk.bf16.mxu1 %vm11643_vm2, %v11642_v0 }
  0x8a   :  { %10232 = vmatmul.mubr.msk.bf16.vlgmr.msra.gmra.mrb[60].mxu0 %vm51_vm1, %v1058_v48 }
  0x8b   :  { %10254 = vmatmul.mubr.msk.bf16.vlgmr.msra.gmra.mrb[60].mxu1 %vm51_vm1, %v1176_v49  ;;  %10274 = vmatpush3.bf16.msra.mxu0 %v11823_v22  ;;  %v1170_v22 = vld [vmem:[#allocation2 + $0x35] sm:$0xff] }
  0x8c   :  { %10235 = vmatprep.mubr.msk.bf16.mxu0 %vm11643_vm2, %v11642_v0  ;;  %10257 = vmatprep.mubr.msk.bf16.mxu1 %vm11643_vm2, %v11642_v0  ;;  %v1178_v56 = vpack.c.bf16 %v1171_v54, %v1170_v22 }
  0x8d   :  { %10323 = vmatprep.subr.bf16.mxu0 %v11642_v0  ;;  %10296 = vmatpush3.bf16.msra.mxu1 %v11078_v39 }
  0x8e   :  { %10297 = vmatprep.subr.bf16.mxu1 %v11642_v0 }
  0x91   :  { %10298 = vmatpush3.bf16.msra.mxu1 %v11079_v50 }
  0x92   :  { %10236 = vmatmul.mubr.msk.bf16.gmra.mrb[64].mxu0 %vm51_vm1, %v1059_v52  ;;  %10299 = vmatprep.subr.bf16.mxu1 %v11642_v0 }
  0x93   :  { %10258 = vmatmul.mubr.msk.bf16.gmra.mrb[64].mxu1 %vm51_vm1, %v1177_v53  ;;  %10239 = vmatprep.mubr.msk.bf16.mxu0 %vm11643_vm2, %v11642_v0 }
  0x94   :  { %10261 = vmatprep.mubr.msk.bf16.mxu1 %vm11643_vm2, %v11642_v0 }
  0x9a   :  { %10240 = vmatmul.mubr.msk.bf16.gmra.mrb[68].mxu0 %vm51_vm1, %v1060_v55 }
  0x9b   :  { %10262 = vmatmul.mubr.msk.bf16.gmra.mrb[68].mxu1 %vm51_vm1, %v1178_v56  ;;  %10243 = vmatprep.mubr.msk.bf16.mxu0 %vm11643_vm2, %v11642_v0 }
  0x9c   :  { %10265 = vmatprep.mubr.msk.bf16.mxu1 %vm11643_vm2, %v11642_v0 }
  0xa2   :  { %10244 = vmatmul.mubr.msk.bf16.gmra.mrb[72].mxu0 %vm51_vm1, %v1061_v59 }
  0xa3   :  { %10266 = vmatmul.mubr.msk.bf16.gmra.mrb[72].mxu1 %vm51_vm1, %v1179_v60  ;;  %10247 = vmatprep.mubr.msk.bf16.mxu0 %vm11643_vm2, %v11642_v0  ;;  %v11080_v60 = vld [vmem:[%s14358_s3 + $0x30] sm:$0xff]  }
  0xa4   :  { %10269 = vmatprep.mubr.msk.bf16.mxu1 %vm11643_vm2, %v11642_v0  ;;  %10300 = vmatpush3.bf16.msra.mxu1 %v11080_v60 }
  0xa5   :  { %10301 = vmatprep.subr.bf16.mxu1 %v11642_v0 }
  0xaa   :  { %10248 = vmatmul.mubr.msk.bf16.gmra.mrb[76].mxu0 %vm51_vm1, %v1062_v1 }
  0xab   :  { %10270 = vmatmul.mubr.msk.bf16.gmra.mrb[76].mxu1 %vm51_vm1, %v1180_v2  ;;  %10275 = vmatprep.mubr.msk.bf16.mxu0 %vm11643_vm2, %v11642_v0 }
  0xac   :  { %10303 = vmatprep.mubr.msk.bf16.mxu1 %vm11643_vm2, %v11642_v0 }
  0xb2   :  { %10276 = vmatmul.mubr.msk.bf16.vlgmr.msra.gmra.mrb[80].mxu0 %vm51_vm1, %v1294_v5  ;;  %v11081_v5 = vld [vmem:[%s14358_s3] sm:$0xff]  }
  0xb3   :  { %10279 = vmatprep.mubr.msk.bf16.mxu0 %vm11643_vm2, %v11642_v0  ;;  %10324 = vmatpush3.bf16.msra.mxu0 %v11081_v5 }
  0xb4   :  { %10325 = vmatprep.subr.bf16.mxu0 %v11642_v0 }
  0xb7   :  { %10326 = vmatpush3.bf16.msra.mxu0 %v11082_v9 }
  0xb8   :  { %10327 = vmatprep.subr.bf16.mxu0 %v11642_v0 }
  0xba   :  { %10280 = vmatmul.mubr.msk.bf16.gmra.mrb[84].mxu0 %vm51_vm1, %v1295_v8 }
  0xbb   :  { %10283 = vmatprep.mubr.msk.bf16.mxu0 %vm11643_vm2, %v11642_v0 }
  0xc2   :  { %10284 = vmatmul.mubr.msk.bf16.gmra.mrb[88].mxu0 %vm51_vm1, %v1296_v11 }
  0xc3   :  { %10287 = vmatprep.mubr.msk.bf16.mxu0 %vm11643_vm2, %v11642_v0 }
  0xca   :  { %10288 = vmatmul.mubr.msk.bf16.gmra.mrb[92].mxu0 %vm51_vm1, %v1297_v14 }
  0xcb   :  { %10291 = vmatprep.mubr.msk.bf16.mxu0 %vm11643_vm2, %v11642_v0 }
  0xd2   :  { %10292 = vmatmul.mubr.msk.bf16.gmra.mrb[96].mxu0 %vm51_vm1, %v1298_v19  ;;  %v11084_v19 = vld [vmem:[%s14358_s3 + $0x10] sm:$0xff]  }
  0xd3   :  { %10331 = vmatprep.mubr.msk.bf16.mxu0 %vm11643_vm2, %v11642_v0  ;;  %10328 = vmatpush3.bf16.msra.mxu0 %v11084_v19 }
  0xd4   :  { %10329 = vmatprep.subr.bf16.mxu0 %v11642_v0 }
  0xe5   :  { %v446_v20 = vpop.f32.mrb[0].mxu0 }
  0xe6   :  { %v537_v21 = vpop.f32.mrb[0].mxu1  ;;  %v10101_v23 = vpop.f32.mrb[1].mxu0 }
  0xe7   :  { %v10123_v24 = vpop.f32.mrb[1].mxu1  ;;  %v11980_v25 = vadd.f32 %v537_v21, %v446_v20  ;;  %v449_v26 = vpop.f32.mrb[2].mxu0 }
  0xe8   :  { %v540_v27 = vpop.f32.mrb[2].mxu1  ;;  %v10102_v28 = vpop.f32.mrb[3].mxu0 }
  0xe9   :  { %v10124_v29 = vpop.f32.mrb[3].mxu1  ;;  %v11982_v16 = vadd.f32 %v540_v27, %v449_v26  ;;  %v11083_v26 = vld [vmem:[%s14358_s3 + $0x38] sm:$0xff]  }
  0xea   :  { %v11085_v27 = vld [vmem:[%s14358_s3 + $0x18] sm:$0xff]   ;;  %10302 = vmatpush3.bf16.msra.mxu1 %v11083_v26 }
  0xeb   :  { %10330 = vmatpush3.bf16.msra.mxu0 %v11085_v27  ;;  %10351 = vmatprep.subr.bf16.mxu1 %v11642_v0 }
  0xec   :  { %10379 = vmatprep.subr.bf16.mxu0 %v11642_v0 }
  0xed   :  { %v454_v30 = vpop.f32.mrb[4].mxu0 }
  0xee   :  { %v545_v31 = vpop.f32.mrb[4].mxu1  ;;  %v10105_v17 = vpop.f32.mrb[5].mxu0 }
  0xef   :  { %v10127_v32 = vpop.f32.mrb[5].mxu1  ;;  %v11984_v33 = vadd.f32 %v545_v31, %v454_v30  ;;  %v457_v34 = vpop.f32.mrb[6].mxu0 }
  0xf0   :  { %v548_v35 = vpop.f32.mrb[6].mxu1  ;;  %v10106_v36 = vpop.f32.mrb[7].mxu0 }
  0xf1   :  { %v10128_v37 = vpop.f32.mrb[7].mxu1  ;;  %v11986_v38 = vadd.f32 %v548_v35, %v457_v34 }
  0xf5   :  { %v462_v40 = vpop.f32.mrb[8].mxu0 }
  0xf6   :  { %v553_v41 = vpop.f32.mrb[8].mxu1  ;;  %v10109_v42 = vpop.f32.mrb[9].mxu0 }
  0xf7   :  { %v10131_v43 = vpop.f32.mrb[9].mxu1  ;;  %v11992_v44 = vadd.f32 %v553_v41, %v462_v40  ;;  %v465_v45 = vpop.f32.mrb[10].mxu0 }
  0xf8   :  { %v556_v46 = vpop.f32.mrb[10].mxu1  ;;  %v10110_v47 = vpop.f32.mrb[11].mxu0 }
  0xf9   :  { %v10132_v48 = vpop.f32.mrb[11].mxu1  ;;  %v11994_v49 = vadd.f32 %v556_v46, %v465_v45 }
  0xfd   :  { %v470_v51 = vpop.f32.mrb[12].mxu0 }
  0xfe   :  { %v561_v52 = vpop.f32.mrb[12].mxu1  ;;  %v10113_v53 = vpop.f32.mrb[13].mxu0 }
  0xff   :  { %v10135_v22 = vpop.f32.mrb[13].mxu1  ;;  %v12000_v54 = vadd.f32 %v561_v52, %v470_v51  ;;  %v473_v55 = vpop.f32.mrb[14].mxu0 }
 0x100   :  { %v564_v56 = vpop.f32.mrb[14].mxu1  ;;  %v10114_v57 = vpop.f32.mrb[15].mxu0 }
 0x101   :  { %v10136_v58 = vpop.f32.mrb[15].mxu1  ;;  %v12002_v59 = vadd.f32 %v564_v56, %v473_v55 }
 0x105   :  { %v478_v61 = vpop.f32.mrb[16].mxu0 }
 0x106   :  { %v569_v62 = vpop.f32.mrb[16].mxu1  ;;  %v10117_v1 = vpop.f32.mrb[17].mxu0 }
 0x107   :  { %v12022_v63 = vadd.f32 %v569_v62, %v478_v61  ;;  %v10139_v2 = vpop.f32.mrb[17].mxu1  ;;  %v481_v3 = vpop.f32.mrb[18].mxu0 }
 0x108   :  { %v572_v4 = vpop.f32.mrb[18].mxu1  ;;  %v10118_v7 = vpop.f32.mrb[19].mxu0 }
 0x109   :  { %v12027_v6 = vadd.f32 %v572_v4, %v481_v3  ;;  %v10140_v8 = vpop.f32.mrb[19].mxu1 }
 0x10d   :  { %v645_v10 = vpop.f32.mrb[20].mxu0 }
 0x10e   :  { %v763_v11 = vpop.f32.mrb[20].mxu1  ;;  %v684_v12 = vadd.f32 %v645_v10, %v11980_v25  ;;  %v10145_v13 = vpop.f32.mrb[21].mxu0 }
 0x10f   :  { %v10167_v14 = vpop.f32.mrb[21].mxu1  ;;  %v648_v15 = vpop.f32.mrb[22].mxu0 }
 0x110   :  { %v766_v18 = vpop.f32.mrb[22].mxu1  ;;  %v685_v20 = vadd.f32 %v648_v15, %v11982_v16  ;;  %v12040_v21 = vadd.f32 %v763_v11, %v684_v12  ;;  %v10146_v23 = vpop.f32.mrb[23].mxu0 }
 0x111   :  { %v10168_v24 = vpop.f32.mrb[23].mxu1 }
 0x112   :  { %v12042_v25 = vadd.f32 %v766_v18, %v685_v20 }
 0x115   :  { %v653_v28 = vpop.f32.mrb[24].mxu0 }
 0x116   :  { %v771_v29 = vpop.f32.mrb[24].mxu1  ;;  %v686_v16 = vadd.f32 %v653_v28, %v11984_v33  ;;  %v10149_v30 = vpop.f32.mrb[25].mxu0 }
 0x117   :  { %v10171_v31 = vpop.f32.mrb[25].mxu1  ;;  %v656_v17 = vpop.f32.mrb[26].mxu0 }
 0x118   :  { %v774_v32 = vpop.f32.mrb[26].mxu1  ;;  %v687_v34 = vadd.f32 %v656_v17, %v11986_v38  ;;  %v804_v35 = vadd.f32 %v771_v29, %v686_v16  ;;  %v10150_v36 = vpop.f32.mrb[27].mxu0 }
 0x119   :  { %v10172_v37 = vpop.f32.mrb[27].mxu1 }
 0x11a   :  { %v805_v39 = vadd.f32 %v774_v32, %v687_v34 }
 0x11d   :  { %v661_v40 = vpop.f32.mrb[28].mxu0 }
 0x11e   :  { %v779_v41 = vpop.f32.mrb[28].mxu1  ;;  %v688_v42 = vadd.f32 %v661_v40, %v11992_v44  ;;  %v10153_v43 = vpop.f32.mrb[29].mxu0 }
 0x11f   :  { %v10175_v33 = vpop.f32.mrb[29].mxu1  ;;  %v664_v45 = vpop.f32.mrb[30].mxu0 }
 0x120   :  { %v782_v46 = vpop.f32.mrb[30].mxu1  ;;  %v689_v47 = vadd.f32 %v664_v45, %v11994_v49  ;;  %v806_v48 = vadd.f32 %v779_v41, %v688_v42  ;;  %v10154_v50 = vpop.f32.mrb[31].mxu0 }
 0x121   :  { %v10176_v51 = vpop.f32.mrb[31].mxu1 }
 0x122   :  { %v807_v52 = vadd.f32 %v782_v46, %v689_v47 }
 0x125   :  { %v669_v53 = vpop.f32.mrb[32].mxu0 }
 0x126   :  { %v787_v38 = vpop.f32.mrb[32].mxu1  ;;  %v690_v22 = vadd.f32 %v669_v53, %v12000_v54  ;;  %v10157_v55 = vpop.f32.mrb[33].mxu0 }
 0x127   :  { %v10179_v56 = vpop.f32.mrb[33].mxu1  ;;  %v672_v57 = vpop.f32.mrb[34].mxu0 }
 0x128   :  { %v790_v58 = vpop.f32.mrb[34].mxu1  ;;  %v691_v44 = vadd.f32 %v672_v57, %v12002_v59  ;;  %v808_v60 = vadd.f32 %v787_v38, %v690_v22  ;;  %v10158_v61 = vpop.f32.mrb[35].mxu0 }
 0x129   :  { %v10180_v62 = vpop.f32.mrb[35].mxu1 }
 0x12a   :  { %v809_v1 = vadd.f32 %v790_v58, %v691_v44 }
 0x12d   :  { %v677_v2 = vpop.f32.mrb[36].mxu0 }
 0x12e   :  { %v795_v49 = vpop.f32.mrb[36].mxu1  ;;  %v692_v3 = vadd.f32 %v677_v2, %v12022_v63  ;;  %v10161_v4 = vpop.f32.mrb[37].mxu0 }
 0x12f   :  { %v10183_v5 = vpop.f32.mrb[37].mxu1  ;;  %v680_v7 = vpop.f32.mrb[38].mxu0 }
 0x130   :  { %v798_v8 = vpop.f32.mrb[38].mxu1  ;;  %v693_v54 = vadd.f32 %v680_v7, %v12027_v6  ;;  %v810_v9 = vadd.f32 %v795_v49, %v692_v3  ;;  %v10162_v10 = vpop.f32.mrb[39].mxu0 }
 0x131   :  { %v10184_v11 = vpop.f32.mrb[39].mxu1 }
 0x132   :  { %v811_v59 = vadd.f32 %v798_v8, %v693_v54 }
 0x135   :  { %v881_v12 = vpop.f32.mrb[40].mxu0 }
 0x136   :  { %v999_v13 = vpop.f32.mrb[40].mxu1  ;;  %v920_v14 = vadd.f32 %v881_v12, %v12040_v21  ;;  %v10189_v15 = vpop.f32.mrb[41].mxu0 }
 0x137   :  { %v10211_v18 = vpop.f32.mrb[41].mxu1  ;;  %v884_v63 = vpop.f32.mrb[42].mxu0 }
 0x138   :  { %v1002_v19 = vpop.f32.mrb[42].mxu1  ;;  %v921_v20 = vadd.f32 %v884_v63, %v12042_v25  ;;  %v1038_v23 = vadd.f32 %v999_v13, %v920_v14  ;;  %v10190_v24 = vpop.f32.mrb[43].mxu0 }
 0x139   :  { %v10212_v6 = vpop.f32.mrb[43].mxu1 }
 0x13a   :  { %v1039_v26 = vadd.f32 %v1002_v19, %v921_v20 }
 0x13d   :  { %v889_v27 = vpop.f32.mrb[44].mxu0 }
 0x13e   :  { %v1007_v28 = vpop.f32.mrb[44].mxu1  ;;  %v922_v29 = vadd.f32 %v889_v27, %v804_v35  ;;  %v10193_v16 = vpop.f32.mrb[45].mxu0 }
 0x13f   :  { %v10215_v0 = vpop.f32.mrb[45].mxu1  ;;  %v892_v30 = vpop.f32.mrb[46].mxu0 }
 0x140   :  { %v1010_v31 = vpop.f32.mrb[46].mxu1  ;;  %v923_v17 = vadd.f32 %v892_v30, %v805_v39  ;;  %v1040_v32 = vadd.f32 %v1007_v28, %v922_v29  ;;  %v10194_v21 = vpop.f32.mrb[47].mxu0 }
 0x141   :  { %v10216_v34 = vpop.f32.mrb[47].mxu1 }
 0x142   :  { %v1041_v36 = vadd.f32 %v1010_v31, %v923_v17 }
 0x145   :  { %v897_v37 = vpop.f32.mrb[48].mxu0 }
 0x146   :  { %v1015_v40 = vpop.f32.mrb[48].mxu1  ;;  %v924_v41 = vadd.f32 %v897_v37, %v806_v48  ;;  %v10197_v25 = vpop.f32.mrb[49].mxu0 }
 0x147   :  { %v10219_v42 = vpop.f32.mrb[49].mxu1  ;;  %v900_v43 = vpop.f32.mrb[50].mxu0 }
 0x148   :  { %v1018_v33 = vpop.f32.mrb[50].mxu1  ;;  %v925_v45 = vadd.f32 %v900_v43, %v807_v52  ;;  %v1042_v46 = vadd.f32 %v1015_v40, %v924_v41  ;;  %v10198_v47 = vpop.f32.mrb[51].mxu0 }
 0x149   :  { %v10220_v35 = vpop.f32.mrb[51].mxu1 }
 0x14a   :  { %v12064_v50 = vadd.f32 %v1018_v33, %v925_v45 }
 0x14d   :  { %v905_v51 = vpop.f32.mrb[52].mxu0 }
 0x14e   :  { %v1023_v53 = vpop.f32.mrb[52].mxu1  ;;  %v926_v39 = vadd.f32 %v905_v51, %v808_v60  ;;  %v10201_v38 = vpop.f32.mrb[53].mxu0 }
 0x14f   :  { %v10223_v22 = vpop.f32.mrb[53].mxu1  ;;  %v908_v55 = vpop.f32.mrb[54].mxu0 }
 0x150   :  { %v1026_v56 = vpop.f32.mrb[54].mxu1  ;;  %v927_v57 = vadd.f32 %v908_v55, %v809_v1  ;;  %v12066_v58 = vadd.f32 %v1023_v53, %v926_v39  ;;  %v10202_v48 = vpop.f32.mrb[55].mxu0  ;;  %v86_v1 = vlaneseq }
 0x151   :  { %v10224_v44 = vpop.f32.mrb[55].mxu1 }
 0x152   :  { %v12068_v61 = vadd.f32 %v1026_v56, %v927_v57 }
 0x155   :  { %v913_v52 = vpop.f32.mrb[56].mxu0 }
 0x156   :  { %v1031_v62 = vpop.f32.mrb[56].mxu1  ;;  %v928_v2 = vadd.f32 %v913_v52, %v810_v9  ;;  %v10205_v49 = vpop.f32.mrb[57].mxu0  ;;  %v12074_v9 = vshrl.u32 %v86_v1, 7 }
 0x157   :  { %v10227_v3 = vpop.f32.mrb[57].mxu1  ;;  %v916_v4 = vpop.f32.mrb[58].mxu0 }
 0x158   :  { %v1034_v5 = vpop.f32.mrb[58].mxu1  ;;  %v929_v7 = vadd.f32 %v916_v4, %v811_v59  ;;  %v12070_v60 = vadd.f32 %v1031_v62, %v928_v2  ;;  %v10206_v8 = vpop.f32.mrb[59].mxu0  ;;  %v12081_v27 = vadd.s32 8, %v12074_v9  ;;  %v12099_v51 = vadd.s32 24, %v12074_v9 }
 0x159   :  { %v10228_v54 = vpop.f32.mrb[59].mxu1  ;;  %v12084_v17 = vmul.u32.u64.low 3435973837, %v12074_v9  ;;  %v12085_v21 = vmul.u32.u64.high 3435973837, %v12074_v9, %v12084_v17  ;;  %v12117_v49 = vadd.s32 32, %v12074_v9 }
 0x15a   :  { %v12072_v10 = vadd.f32 %v1034_v5, %v929_v7  ;;  %v12113_v52 = vmul.u32.u64.low 3435973837, %v12099_v51  ;;  %v12114_v62 = vmul.u32.u64.high 3435973837, %v12099_v51, %v12113_v52  ;;  %v12121_v54 = vadd.s32 40, %v12074_v9 }
 0x15d   :  { %v1117_v11 = vpop.f32.mrb[60].mxu0 }
 0x15e   :  { %v1235_v12 = vpop.f32.mrb[60].mxu1  ;;  %v1156_v13 = vadd.f32 %v1117_v11, %v1038_v23  ;;  %v10233_v14 = vpop.f32.mrb[61].mxu0 }
 0x15f   :  { %v10255_v15 = vpop.f32.mrb[61].mxu1  ;;  %v1120_v18 = vpop.f32.mrb[62].mxu0 }
 0x160   :  { %v1238_v63 = vpop.f32.mrb[62].mxu1  ;;  %v1157_v19 = vadd.f32 %v1120_v18, %v1039_v26  ;;  %v12076_v20 = vadd.f32 %v1235_v12, %v1156_v13  ;;  %v10234_v59 = vpop.f32.mrb[63].mxu0  ;;  %v12088_v26 = vmul.u32.u64.low 3435973837, %v12081_v27  ;;  %v12089_v34 = vmul.u32.u64.high 3435973837, %v12081_v27, %v12088_v26 }
 0x161   :  { %v10256_v24 = vpop.f32.mrb[63].mxu1  ;;  %v12125_v13 = vmul.u32.u64.low 3435973837, %v12117_v49  ;;  %v12126_v14 = vmul.u32.u64.high 3435973837, %v12117_v49, %v12125_v13 }
 0x162   :  { %v12078_v6 = vadd.f32 %v1238_v63, %v1157_v19  ;;  %v114_v38 = vshrl.u32 %v12089_v34, 3 }
 0x164   :  { %v115_v3 = vmul.u32 10, %v114_v38 }
 0x165   :  { %v1125_v28 = vpop.f32.mrb[64].mxu0 }
 0x166   :  { %v1243_v29 = vpop.f32.mrb[64].mxu1  ;;  %v1158_v16 = vadd.f32 %v1125_v28, %v1040_v32  ;;  %v10237_v23 = vpop.f32.mrb[65].mxu0  ;;  %v12096_v32 = vadd.s32 16, %v12074_v9  ;;  %v136_v28 = vshrl.u32 %v12114_v62, 3 }
 0x167   :  { %v10259_v0 = vpop.f32.mrb[65].mxu1  ;;  %v1128_v30 = vpop.f32.mrb[66].mxu0 }
 0x168   :  { %v1246_v31 = vpop.f32.mrb[66].mxu1  ;;  %v1159_v37 = vadd.f32 %v1128_v30, %v1041_v36  ;;  %v12091_v40 = vadd.f32 %v1243_v29, %v1158_v16  ;;  %v10238_v41 = vpop.f32.mrb[67].mxu0  ;;  %v103_v36 = vshrl.u32 %v12085_v21, 3 }
 0x169   :  { %v10260_v25 = vpop.f32.mrb[67].mxu1  ;;  %v12137_v29 = vmul.u32.u64.low 3435973837, %v12121_v54  ;;  %v12138_v16 = vmul.u32.u64.high 3435973837, %v12121_v54, %v12137_v29  ;;  %v137_v41 = vmul.u32 10, %v136_v28 }
 0x16a   :  { %v12093_v42 = vadd.f32 %v1246_v31, %v1159_v37  ;;  %v104_v2 = vmul.u32 10, %v103_v36  ;;  %v12209_v29 = vld [vmem:[#allocation6 + $0x1f] sm:$0xff] }
 0x16b   :  { %v158_v52 = vshrl.u32 %v12138_v16, 3 }
 0x16c   :  { %v105_v12 = vsub.s32 %v12074_v9, %v104_v2 }
 0x16d   :  { %v1133_v43 = vpop.f32.mrb[68].mxu0 }
 0x16e   :  { %v1251_v33 = vpop.f32.mrb[68].mxu1  ;;  %v1160_v45 = vadd.f32 %v1133_v43, %v1042_v46  ;;  %v10241_v47 = vpop.f32.mrb[69].mxu0  ;;  %v12107_v48 = vmul.u32.u64.low 3435973837, %v12096_v32  ;;  %v12108_v46 = vmul.u32.u64.high 3435973837, %v12096_v32, %v12107_v48  ;;  %vm207_vm6 = vcmp.ne.s32.totalorder %v105_v12, 0 }
 0x16f   :  { %v10263_v35 = vpop.f32.mrb[69].mxu1  ;;  %v1136_v53 = vpop.f32.mrb[70].mxu0  ;;  %vm217_vm7 = vcmp.lt.s32.totalorder %v105_v12, 0  ;;  %v237_v31 = vadd.s32 10, %v105_v12 }
 0x170   :  { %v1254_v39 = vpop.f32.mrb[70].mxu1  ;;  %v1161_v22 = vadd.f32 %v1136_v53, %v12064_v50  ;;  %v12104_v55 = vadd.f32 %v1251_v33, %v1160_v45  ;;  %v10242_v56 = vpop.f32.mrb[71].mxu0  ;;  %v125_v59 = vshrl.u32 %v12108_v46, 3  ;;  %vm12144_vm10 = vmand %vm217_vm7, %vm207_vm6  ;;  %v147_v45 = vshrl.u32 %v12126_v14, 3 }
 0x171   :  { %v10264_v57 = vpop.f32.mrb[71].mxu1  ;;  %v12159_v35 = vadd.s32 56, %v12074_v9  ;;  %v247_v56 = vsel %vm12144_vm10, %v237_v31, %v105_v12  ;;  %v138_v46 = vsub.s32 %v12099_v51, %v137_v41  ;;  %v12187_v51 = vld [vmem:[%s14359_s2] ss:$0 sm:$0xff] }
 0x172   :  { %v12110_v44 = vadd.f32 %v1254_v39, %v1161_v22  ;;  %v126_v23 = vmul.u32 10, %v125_v59  ;;  %v148_v62 = vmul.u32 10, %v147_v45  ;;  %vm12180_vm14 = vcmp.lt.s32.totalorder %v247_v56, 8 }
 0x173   :  { %vm210_vm0 = vcmp.ne.s32.totalorder %v138_v46, 0  ;;  %vm220_vm4 = vcmp.lt.s32.totalorder %v138_v46, 0 }
 0x174   :  { %v127_v38 = vsub.s32 %v12096_v32, %v126_v23  ;;  %v149_v14 = vsub.s32 %v12117_v49, %v148_v62  ;;  %v8506_v49 = vsel %vm12180_vm14, 1.0, %v12209_v29  ;;  %v240_v23 = vadd.s32 10, %v138_v46  ;;  %vm12222_vm5 = vmand %vm220_vm4, %vm210_vm0 }
 0x175   :  { %v1141_v50 = vpop.f32.mrb[72].mxu0 }
 0x176   :  { %v1259_v4 = vpop.f32.mrb[72].mxu1  ;;  %v1162_v5 = vadd.f32 %v1141_v50, %v12066_v58  ;;  %v10245_v7 = vpop.f32.mrb[73].mxu0  ;;  %v116_v58 = vsub.s32 %v12081_v27, %v115_v3  ;;  %vm209_vm12 = vcmp.ne.s32.totalorder %v127_v38, 0  ;;  %vm219_vm13 = vcmp.lt.s32.totalorder %v127_v38, 0 }
 0x177   :  { %v10267_v8 = vpop.f32.mrb[73].mxu1  ;;  %v1144_v1 = vpop.f32.mrb[74].mxu0  ;;  %v12178_v3 = vadd.s32 64, %v12074_v9  ;;  %vm12194_vm1 = vmand %vm219_vm13, %vm209_vm12  ;;  %vm211_vm6 = vcmp.ne.s32.totalorder %v149_v14, 0  ;;  %vm221_vm7 = vcmp.lt.s32.totalorder %v149_v14, 0  ;;  %v250_v33 = vsel %vm12222_vm5, %v240_v23, %v138_v46 }
 0x178   :  { %v1262_v11 = vpop.f32.mrb[74].mxu1  ;;  %v1163_v15 = vadd.f32 %v1144_v1, %v12068_v61  ;;  %v12129_v18 = vadd.f32 %v1259_v4, %v1162_v5  ;;  %v10246_v63 = vpop.f32.mrb[75].mxu0  ;;  %v12141_v61 = vadd.s32 48, %v12074_v9  ;;  %vm208_vm8 = vcmp.ne.s32.totalorder %v116_v58, 0 }
 0x179   :  { %v10268_v19 = vpop.f32.mrb[75].mxu1  ;;  %vm218_vm9 = vcmp.lt.s32.totalorder %v116_v58, 0  ;;  %v238_v37 = vadd.s32 10, %v116_v58  ;;  %v239_v1 = vadd.s32 10, %v127_v38  ;;  %v12201_v63 = vadd.s32 72, %v12074_v9 }
 0x17a   :  { %v12133_v24 = vadd.f32 %v1262_v11, %v1163_v15  ;;  %vm12149_vm11 = vmand %vm218_vm9, %vm208_vm8  ;;  %v159_v11 = vmul.u32 10, %v158_v52  ;;  %v12206_v59 = vmul.u32.u64.low 3435973837, %v12178_v3  ;;  %v12207_v28 = vmul.u32.u64.high 3435973837, %v12178_v3, %v12206_v59 }
 0x17b   :  { %v248_v48 = vsel %vm12149_vm11, %v238_v37, %v116_v58  ;;  %v12231_v34 = vmul.u32.u64.low 3435973837, %v12201_v63  ;;  %v12232_v37 = vmul.u32.u64.high 3435973837, %v12201_v63, %v12231_v34  ;;  %vm12242_vm9 = vmand %vm221_vm7, %vm211_vm6  ;;  %vm12253_vm12 = vcmp.lt.s32.totalorder %v250_v33, 8 }
 0x17c   :  { %vm12189_vm15 = vcmp.lt.s32.totalorder %v248_v48, 8  ;;  %v191_v62 = vshrl.u32 %v12207_v28, 3  ;;  %v8509_v5 = vsel %vm12253_vm12, 1.0, %v12209_v29 }
 0x17d   :  { %v1149_v0 = vpop.f32.mrb[76].mxu0  ;;  %v8507_v16 = vsel %vm12189_vm15, 1.0, %v12209_v29 }
 0x17e   :  { %v1267_v30 = vpop.f32.mrb[76].mxu1  ;;  %v1164_v17 = vadd.f32 %v1149_v0, %v12070_v60  ;;  %v10249_v21 = vpop.f32.mrb[77].mxu0  ;;  %v12155_v47 = vmul.u32.u64.low 3435973837, %v12141_v61  ;;  %v12156_v60 = vmul.u32.u64.high 3435973837, %v12141_v61, %v12155_v47 }
 0x17f   :  { %v10271_v26 = vpop.f32.mrb[77].mxu1  ;;  %v1152_v25 = vpop.f32.mrb[78].mxu0 }
 0x180   :  { %v1270_v43 = vpop.f32.mrb[78].mxu1  ;;  %v1165_v53 = vadd.f32 %v1152_v25, %v12072_v10  ;;  %v12162_v39 = vadd.f32 %v1267_v30, %v1164_v17  ;;  %v10250_v36 = vpop.f32.mrb[79].mxu0  ;;  %v12174_v10 = vmul.u32.u64.low 3435973837, %v12159_v35  ;;  %v12175_v2 = vmul.u32.u64.high 3435973837, %v12159_v35, %v12174_v10 }
 0x181   :  { %v10272_v22 = vpop.f32.mrb[79].mxu1  ;;  %v169_v15 = vshrl.u32 %v12156_v60, 3  ;;  %v12227_v17 = vsub.s32 %v12121_v54, %v159_v11  ;;  %v202_v11 = vshrl.u32 %v12232_v37, 3 }
 0x182   :  { %v12167_v57 = vadd.f32 %v1270_v43, %v1165_v53  ;;  %v180_v26 = vshrl.u32 %v12175_v2, 3  ;;  %v241_v53 = vadd.s32 10, %v149_v14 }
 0x183   :  { %v170_v21 = vmul.u32 10, %v169_v15  ;;  %vm212_vm10 = vcmp.ne.s32.totalorder %v12227_v17, 0  ;;  %vm222_vm11 = vcmp.lt.s32.totalorder %v12227_v17, 0 }
 0x184   :  { %v181_v56 = vmul.u32 10, %v180_v26  ;;  %vm12270_vm13 = vmand %vm222_vm11, %vm212_vm10 }
 0x185   :  { %v1353_v4 = vpop.f32.mrb[80].mxu0  ;;  %v12249_v22 = vsub.s32 %v12141_v61, %v170_v21  ;;  %v242_v61 = vadd.s32 10, %v12227_v17 }
 0x186   :  { %v1392_v7 = vadd.f32 %v1353_v4, %v12076_v20  ;;  %v10277_v8 = vpop.f32.mrb[81].mxu0  ;;  %v251_v4 = vsel %vm12242_vm9, %v241_v53, %v149_v14  ;;  %v192_v14 = vmul.u32 10, %v191_v62  ;;  %v11090_v53 = vld [vmem:[%s14358_s3 + $0x68] sm:$0xff]  }
 0x187   :  { %v1356_v12 = vpop.f32.mrb[82].mxu0  ;;  %v1449_v8 = vld [vmem:[#allocation3] sm:$0xff]  ;;  %vm213_vm14 = vcmp.ne.s32.totalorder %v12249_v22, 0  ;;  %vm223_vm15 = vcmp.lt.s32.totalorder %v12249_v22, 0  ;;  %vm12283_vm0 = vcmp.lt.s32.totalorder %v251_v4, 8  ;;  %v243_v28 = vadd.s32 10, %v12249_v22 }
 0x188   :  { %v1409_v19 = vadd.f32 %v12187_v51, %v1392_v7  ;;  %v1393_v20 = vadd.f32 %v1356_v12, %v12078_v6  ;;  %v10278_v58 = vpop.f32.mrb[83].mxu0  ;;  %v249_v6 = vsel %vm12194_vm1, %v239_v1, %v127_v38  ;;  %v1472_v7 = vld [vmem:[#allocation3 + $0x1] sm:$0xff]  ;;  %v12279_v1 = vsub.s32 %v12159_v35, %v181_v56  ;;  %v11086_v35 = vld [vmem:[%s14358_s3 + $0x40] sm:$0xff]   ;;  %vm12300_vm1 = vmand %vm223_vm15, %vm213_vm14 }
 0x189   :  { %vm12237_vm8 = vcmp.lt.s32.totalorder %v249_v6, 8 }
 0x18a   :  { %v1419_v0 = vmax.f32 %v1409_v19, 0.0  ;;  %v1410_v30 = vadd.f32 %v12187_v51, %v1393_v20  ;;  %v8508_v10 = vsel %vm12237_vm8, 1.0, %v12209_v29  ;;  %v252_v20 = vsel %vm12270_vm13, %v242_v61, %v12227_v17 }
 0x18b   :  { %vm214_vm4 = vcmp.ne.s32.totalorder %v12279_v1, 0  ;;  %vm224_vm5 = vcmp.lt.s32.totalorder %v12279_v1, 0  ;;  %v203_v17 = vmul.u32 10, %v202_v11  ;;  %vm12311_vm6 = vcmp.lt.s32.totalorder %v252_v20, 8  ;;  %v11101_v20 = vld [vmem:[%s14358_s3 + $0xb8] sm:$0xff]  }
 0x18c   :  { %v1429_v41 = vmul.f32 %v8506_v49, %v1419_v0  ;;  %v1420_v25 = vmax.f32 %v1410_v30, 0.0  ;;  %vm12338_vm7 = vmand %vm224_vm5, %vm214_vm4  ;;  %vm2850_vm4 = vcmask 519168   ;;  %vm79_vm5 = vcmask 654336  }
 0x18d   :  { %v1361_v43 = vpop.f32.mrb[84].mxu0 }
 0x18e   :  { %1439 = vst.msk [vmem:[#allocation3 + $0xb] sm:$0xff] %vm65_vm3, %v1429_v41  ;;  %v1430_v45 = vmul.f32 %v8507_v16, %v1420_v25  ;;  %v1394_v47 = vadd.f32 %v1361_v43, %v12091_v40  ;;  %v10281_v60 = vpop.f32.mrb[85].mxu0  ;;  %v12319_v41 = vsub.s32 %v12178_v3, %v192_v14  ;;  %v8510_v25 = vsel %vm12283_vm0, 1.0, %v12209_v29 }
 0x18f   :  { %v1364_v36 = vpop.f32.mrb[86].mxu0  ;;  %v244_v43 = vadd.s32 10, %v12279_v1  ;;  %v253_v3 = vsel %vm12300_vm1, %v243_v28, %v12249_v22  ;;  %v12349_v60 = vsub.s32 %v12201_v63, %v203_v17 }
 0x190   :  { %1440 = vst.msk [vmem:[#allocation3 + $0x13] sm:$0xff] %vm65_vm3, %v1430_v45  ;;  %v1411_v48 = vadd.f32 %v12187_v51, %v1394_v47  ;;  %v1395_v46 = vadd.f32 %v1364_v36, %v12093_v42  ;;  %v10282_v52 = vpop.f32.mrb[87].mxu0  ;;  %v8511_v47 = vsel %vm12311_vm6, 1.0, %v12209_v29  ;;  %vm215_vm8 = vcmp.ne.s32.totalorder %v12319_v41, 0  ;;  %v11088_v42 = vld [vmem:[%s14358_s3 + $0x50] sm:$0xff]  }
 0x191   :  { %vm225_vm9 = vcmp.lt.s32.totalorder %v12319_v41, 0  ;;  %vm12357_vm10 = vcmp.lt.s32.totalorder %v253_v3, 8  ;;  %v245_v62 = vadd.s32 10, %v12319_v41  ;;  %vm216_vm12 = vcmp.ne.s32.totalorder %v12349_v60, 0 }
 0x192   :  { %v1421_v2 = vmax.f32 %v1411_v48, 0.0  ;;  %v1412_v50 = vadd.f32 %v12187_v51, %v1395_v46  ;;  %v254_v48 = vsel %vm12338_vm7, %v244_v43, %v12279_v1  ;;  %vm12375_vm11 = vmand %vm225_vm9, %vm215_vm8  ;;  %vm226_vm13 = vcmp.lt.s32.totalorder %v12349_v60, 0  ;;  %v11098_v1 = vld [vmem:[%s14358_s3 + $0xa8] sm:$0xff]  }
 0x193   :  { %vm12386_vm14 = vcmp.lt.s32.totalorder %v254_v48, 8  ;;  %v246_v14 = vadd.s32 10, %v12349_v60  ;;  %vm12409_vm15 = vmand %vm226_vm13, %vm216_vm12 }
 0x194   :  { %v1431_v12 = vmul.f32 %v8508_v10, %v1421_v2  ;;  %v1422_v13 = vmax.f32 %v1412_v50, 0.0 }
 0x195   :  { %v1369_v19 = vpop.f32.mrb[88].mxu0  ;;  %v1473_v58 = vld [vmem:[#allocation3 + $0x9] sm:$0xff] }
 0x196   :  { %v1450_v59 = vld [vmem:[#allocation3 + $0x8] sm:$0xff]  ;;  %1441 = vst.msk [vmem:[#allocation3 + $0x1b] sm:$0xff] %vm65_vm3, %v1431_v12  ;;  %v1432_v49 = vmul.f32 %v8509_v5, %v1422_v13  ;;  %v1396_v16 = vadd.f32 %v1369_v19, %v12104_v55  ;;  %v10285_v23 = vpop.f32.mrb[89].mxu0  ;;  %v1482_v0 = vpack.c.bf16 %v1473_v58, %v1472_v7  ;;  %v11089_v55 = vld [vmem:[%s14358_s3 + $0x60] sm:$0xff]   ;;  %v8512_v13 = vsel %vm12357_vm10, 1.0, %v12209_v29  ;;  %v11091_v58 = vld [vmem:[%s14358_s3 + $0x58] sm:$0xff]  }
 0x197   :  { %v1459_v30 = vpack.c.bf16 %v1450_v59, %v1449_v8  ;;  %v1372_v6 = vpop.f32.mrb[90].mxu0  ;;  %v1474_v22 = vld [vmem:[#allocation3 + $0x11] sm:$0xff]  ;;  %v255_v19 = vsel %vm12375_vm11, %v245_v62, %v12319_v41  ;;  %v8513_v59 = vsel %vm12386_vm14, 1.0, %v12209_v29  ;;  %v11095_v7 = vld [vmem:[%s14358_s3 + $0x88] sm:$0xff]  }
 0x198   :  { %1442 = vst.msk [vmem:[#allocation3 + $0x23] sm:$0xff] %vm65_vm3, %v1432_v49  ;;  %v1413_v21 = vadd.f32 %v12187_v51, %v1396_v16  ;;  %v1397_v34 = vadd.f32 %v1372_v6, %v12110_v44  ;;  %v10286_v37 = vpop.f32.mrb[91].mxu0  ;;  %10304 = vmatmul.mubr.msk.bf16.vlgmr.msra.gmra.mrb[80].mxu1 %vm65_vm3, %v1482_v0  ;;  %v11087_v44 = vld [vmem:[%s14358_s3 + $0x48] sm:$0xff]   ;;  %v1451_v46 = vld [vmem:[#allocation3 + $0x10] sm:$0xff]  ;;  %vm12425_vm0 = vcmp.lt.s32.totalorder %v255_v19, 8 }
 0x199   :  { %10332 = vmatmul.mubr.msk.bf16.vlgmr.msra.gmra.mrb[100].mxu0 %vm65_vm3, %v1459_v30  ;;  %10352 = vmatpush3.bf16.msra.mxu1 %v11086_v35  ;;  %v11093_v35 = vld [vmem:[%s14358_s3 + $0x78] sm:$0xff]   ;;  %v256_v30 = vsel %vm12409_vm15, %v246_v14, %v12349_v60  ;;  %v11100_v14 = vld [vmem:[%s14358_s3 + $0xb0] sm:$0xff]  }
 0x19a   :  { %10307 = vmatprep.mubr.msk.bf16.mxu1 %vm11643_vm2, %v12209_v29  ;;  %v1423_v33 = vmax.f32 %v1413_v21, 0.0  ;;  %v1414_v45 = vadd.f32 %v12187_v51, %v1397_v34  ;;  %10335 = vmatprep.mubr.msk.bf16.mxu0 %vm11643_vm2, %v12209_v29  ;;  %vm12437_vm1 = vcmp.lt.s32.totalorder %v256_v30, 8 }
 0x19b   :  { %10353 = vmatprep.subr.bf16.mxu1 %v12209_v29  ;;  %10380 = vmatpush3.bf16.msra.mxu0 %v11089_v55 }
 0x19c   :  { %v1433_v36 = vmul.f32 %v8510_v25, %v1423_v33  ;;  %v1424_v38 = vmax.f32 %v1414_v45, 0.0  ;;  %10381 = vmatprep.subr.bf16.mxu0 %v12209_v29 }
 0x19d   :  { %v1377_v63 = vpop.f32.mrb[92].mxu0  ;;  %v1475_v40 = vld [vmem:[#allocation3 + $0x19] sm:$0xff]  ;;  %10354 = vmatpush3.bf16.msra.mxu1 %v11087_v44 }
 0x19e   :  { %v1452_v52 = vld [vmem:[#allocation3 + $0x18] sm:$0xff]  ;;  %1443 = vst.msk [vmem:[#allocation3 + $0x2b] sm:$0xff] %vm65_vm3, %v1433_v36  ;;  %v1434_v10 = vmul.f32 %v8511_v47, %v1424_v38  ;;  %v1398_v61 = vadd.f32 %v1377_v63, %v12129_v18  ;;  %v10289_v2 = vpop.f32.mrb[93].mxu0  ;;  %v1483_v50 = vpack.c.bf16 %v1475_v40, %v1474_v22  ;;  %10355 = vmatprep.subr.bf16.mxu1 %v12209_v29  ;;  %v11092_v18 = vld [vmem:[%s14358_s3 + $0x70] sm:$0xff]  }
 0x19f   :  { %v1460_v4 = vpack.c.bf16 %v1452_v52, %v1451_v46  ;;  %v1380_v5 = vpop.f32.mrb[94].mxu0  ;;  %10382 = vmatpush3.bf16.msra.mxu0 %v11090_v53  ;;  %v1476_v16 = vld [vmem:[#allocation3 + $0x21] sm:$0xff]  ;;  %v1867_v2 = vld [vmem:[#allocation3 + $0x12] sm:$0xff] }
 0x1a0   :  { %1444 = vst.msk [vmem:[#allocation3 + $0x33] sm:$0xff] %vm65_vm3, %v1434_v10  ;;  %v1415_v8 = vadd.f32 %v12187_v51, %v1398_v61  ;;  %v1399_v11 = vadd.f32 %v1380_v5, %v12133_v24  ;;  %v10290_v12 = vpop.f32.mrb[95].mxu0  ;;  %10308 = vmatmul.mubr.msk.bf16.gmra.mrb[84].mxu1 %vm65_vm3, %v1483_v50  ;;  %10383 = vmatprep.subr.bf16.mxu0 %v12209_v29  ;;  %v1453_v31 = vld [vmem:[#allocation3 + $0x20] sm:$0xff]  ;;  %v1721_v61 = vld [vmem:[#allocation3 + $0xa] sm:$0xff]  ;;  %v11094_v50 = vld [vmem:[%s14358_s3 + $0x80] sm:$0xff]  }
 0x1a1   :  { %10336 = vmatmul.mubr.msk.bf16.gmra.mrb[104].mxu0 %vm65_vm3, %v1460_v4  ;;  %10311 = vmatprep.mubr.msk.bf16.mxu1 %vm11643_vm2, %v12209_v29  ;;  %v1720_v10 = vld [vmem:[#allocation3 + $0x2] sm:$0xff]  ;;  %v11097_v5 = vld [vmem:[%s14358_s3 + $0xa0] sm:$0xff]  }
 0x1a2   :  { %10339 = vmatprep.mubr.msk.bf16.mxu0 %vm11643_vm2, %v12209_v29  ;;  %v1425_v15 = vmax.f32 %v1415_v8, 0.0  ;;  %v1416_v24 = vadd.f32 %v12187_v51, %v1399_v11  ;;  %10356 = vmatpush3.bf16.msra.mxu1 %v11088_v42  ;;  %v1730_v4 = vpack.c.bf16 %v1721_v61, %v1720_v10  ;;  %v1876_v42 = vpack.c.bf16 %v1867_v2, %v1721_v61  ;;  %v1869_v8 = vld [vmem:[#allocation3 + $0x22] sm:$0xff] }
 0x1a3   :  { %10357 = vmatprep.subr.bf16.mxu1 %v12209_v29  ;;  %10384 = vmatpush3.bf16.msra.mxu0 %v11092_v18  ;;  %v1723_v18 = vld [vmem:[#allocation3 + $0x1a] sm:$0xff]  ;;  %v2015_v43 = vld [vmem:[#allocation3 + $0x23] sm:$0xff] }
 0x1a4   :  { %v1435_v28 = vmul.f32 %v8512_v13, %v1425_v15  ;;  %v1426_v49 = vmax.f32 %v1416_v24, 0.0  ;;  %10385 = vmatprep.subr.bf16.mxu0 %v12209_v29  ;;  %v1731_v11 = vpack.c.bf16 %v1723_v18, %v1867_v2  ;;  %v1877_v12 = vpack.c.bf16 %v1869_v8, %v1723_v18  ;;  %v11096_v13 = vld [vmem:[%s14358_s3 + $0x90] sm:$0xff]   ;;  %v11099_v15 = vld [vmem:[%s14358_s3 + $0x98] sm:$0xff]  }
 0x1a5   :  { %v1385_v0 = vpop.f32.mrb[96].mxu0  ;;  %v1477_v6 = vld [vmem:[#allocation3 + $0x29] sm:$0xff]  ;;  %v2450_v18 = vld [vmem:[#allocation3 + $0x15] sm:$0xff] }
 0x1a6   :  { %v1454_v17 = vld [vmem:[#allocation3 + $0x28] sm:$0xff]  ;;  %1445 = vst.msk [vmem:[#allocation3 + $0x3b] sm:$0xff] %vm65_vm3, %v1435_v28  ;;  %v1436_v55 = vmul.f32 %v8513_v59, %v1426_v49  ;;  %v1400_v21 = vadd.f32 %v1385_v0, %v12162_v39  ;;  %v10293_v26 = vpop.f32.mrb[97].mxu0  ;;  %v1484_v34 = vpack.c.bf16 %v1477_v6, %v1476_v16  ;;  %10358 = vmatpush3.bf16.msra.mxu1 %v11091_v58  ;;  %v8514_v39 = vsel %vm12425_vm0, 1.0, %v12209_v29 }
 0x1a7   :  { %v1461_v37 = vpack.c.bf16 %v1454_v17, %v1453_v31  ;;  %v1388_v41 = vpop.f32.mrb[98].mxu0  ;;  %10386 = vmatpush3.bf16.msra.mxu0 %v11093_v35  ;;  %10407 = vmatprep.subr.bf16.mxu1 %v12209_v29  ;;  %v1478_v60 = vld [vmem:[#allocation3 + $0x31] sm:$0xff] }
 0x1a8   :  { %1446 = vst.msk [vmem:[#allocation3 + $0x43] sm:$0xff] %vm65_vm3, %v1436_v55  ;;  %v1417_v25 = vadd.f32 %v12187_v51, %v1400_v21  ;;  %v1401_v44 = vadd.f32 %v1388_v41, %v12167_v57  ;;  %v10294_v33 = vpop.f32.mrb[99].mxu0  ;;  %10312 = vmatmul.mubr.msk.bf16.gmra.mrb[88].mxu1 %vm65_vm3, %v1484_v34  ;;  %10435 = vmatprep.subr.bf16.mxu0 %v12209_v29  ;;  %v8515_v57 = vsel %vm12437_vm1, 1.0, %v12209_v29  ;;  %v1455_v36 = vld [vmem:[#allocation3 + $0x30] sm:$0xff]  ;;  %v11102_v26 = vld [vmem:[%s14358_s3 + $0xc0] sm:$0xff]  }
 0x1a9   :  { %10340 = vmatmul.mubr.msk.bf16.gmra.mrb[108].mxu0 %vm65_vm3, %v1461_v37  ;;  %10315 = vmatprep.mubr.msk.bf16.mxu1 %vm11643_vm2, %v12209_v29  ;;  %v1725_v24 = vld [vmem:[#allocation3 + $0x2a] sm:$0xff]  ;;  %v1871_v19 = vld [vmem:[#allocation3 + $0x32] sm:$0xff]  ;;  %v11106_v33 = vld [vmem:[%s14358_s3 + $0xe8] sm:$0xff]  }
 0x1aa   :  { %10343 = vmatprep.mubr.msk.bf16.mxu0 %vm11643_vm2, %v12209_v29  ;;  %v1427_v45 = vmax.f32 %v1417_v25, 0.0  ;;  %v1418_v3 = vadd.f32 %v12187_v51, %v1401_v44  ;;  %v1732_v58 = vpack.c.bf16 %v1725_v24, %v1869_v8  ;;  %v1878_v59 = vpack.c.bf16 %v1871_v19, %v1725_v24  ;;  %v2013_v31 = vld [vmem:[#allocation3 + $0x13] sm:$0xff]  ;;  %v2012_v55 = vld [vmem:[#allocation3 + $0xb] sm:$0xff]  ;;  %v11103_v25 = vld [vmem:[%s14358_s3 + $0xc8] sm:$0xff]  }
 0x1ab   :  { %v12532_v17 = vld [vmem:[#allocation3 + $0x14] sm:$0xff]  ;;  %v2158_v21 = vld [vmem:[#allocation3 + $0xc] sm:$0xff]  ;;  %v2022_v34 = vpack.c.bf16 %v2013_v31, %v2012_v55  ;;  %v12551_v44 = vld [vmem:[#allocation3 + $0x24] sm:$0xff] }
 0x1ac   :  { %v1437_v54 = vmul.f32 %v8514_v39, %v1427_v45  ;;  %v1428_v47 = vmax.f32 %v1418_v3, 0.0  ;;  %v2168_v37 = vpack.c.bf16 %v12532_v17, %v2158_v21  ;;  %v11105_v41 = vld [vmem:[%s14358_s3 + $0xe0] sm:$0xff]  }
 0x1ad   :  { %v1479_v53 = vld [vmem:[#allocation3 + $0x39] sm:$0xff] }
 0x1ae   :  { %v1456_v38 = vld [vmem:[#allocation3 + $0x38] sm:$0xff]  ;;  %1447 = vst.msk [vmem:[#allocation3 + $0x4b] sm:$0xff] %vm65_vm3, %v1437_v54  ;;  %v1438_v22 = vmul.f32 %v8515_v57, %v1428_v47  ;;  %v1485_v56 = vpack.c.bf16 %v1479_v53, %v1478_v60  ;;  %v11104_v54 = vld [vmem:[%s14358_s3 + $0xd0] sm:$0xff]   ;;  %v11107_v60 = vld [vmem:[%s14358_s3 + $0xd8] sm:$0xff]  }
 0x1af   :  { %v1462_v63 = vpack.c.bf16 %v1456_v38, %v1455_v36  ;;  %v1480_v51 = vld [vmem:[#allocation3 + $0x41] sm:$0xff]  ;;  %v2017_v53 = vld [vmem:[#allocation3 + $0x33] sm:$0xff] }
 0x1b0   :  { %1448 = vst.msk [vmem:[#allocation3 + $0x53] sm:$0xff] %vm65_vm3, %v1438_v22  ;;  %10316 = vmatmul.mubr.msk.bf16.gmra.mrb[92].mxu1 %vm65_vm3, %v1485_v56  ;;  %v1457_v40 = vld [vmem:[#allocation3 + $0x40] sm:$0xff]  ;;  %v11108_v47 = vld [vmem:[%s14358_s3 + $0xf0] sm:$0xff]   ;;  %v12575_v36 = vld [vmem:[#allocation3 + $0x34] sm:$0xff] }
 0x1b1   :  { %10344 = vmatmul.mubr.msk.bf16.gmra.mrb[112].mxu0 %vm65_vm3, %v1462_v63  ;;  %10319 = vmatprep.mubr.msk.bf16.mxu1 %vm11643_vm2, %v12209_v29  ;;  %v1727_v35 = vld [vmem:[#allocation3 + $0x3a] sm:$0xff]  ;;  %v1873_v28 = vld [vmem:[#allocation3 + $0x42] sm:$0xff]  ;;  %v11109_v38 = vld [vmem:[%s14358_s3 + $0xf8] sm:$0xff]  }
 0x1b2   :  { %10347 = vmatprep.mubr.msk.bf16.mxu0 %vm11643_vm2, %v12209_v29  ;;  %v1733_v49 = vpack.c.bf16 %v1727_v35, %v1871_v19  ;;  %v1879_v16 = vpack.c.bf16 %v1873_v28, %v1727_v35  ;;  %v2014_v39 = vld [vmem:[#allocation3 + $0x1b] sm:$0xff]  ;;  %v2016_v22 = vld [vmem:[#allocation3 + $0x2b] sm:$0xff] }
 0x1b3   :  { %v2160_v45 = vld [vmem:[#allocation3 + $0x1c] sm:$0xff]  ;;  %v2023_v3 = vpack.c.bf16 %v2015_v43, %v2014_v39  ;;  %v2162_v56 = vld [vmem:[#allocation3 + $0x2c] sm:$0xff]  ;;  %v2024_v63 = vpack.c.bf16 %v2017_v53, %v2016_v22 }
 0x1b4   :  { %v2169_v57 = vpack.c.bf16 %v12551_v44, %v2160_v45  ;;  %v11110_v8 = vld [vmem:[%s14358_s3 + $0x100] sm:$0xff]   ;;  %v11112_v19 = vld [vmem:[%s14358_s3 + $0x110] sm:$0xff]  }
 0x1b5   :  { %v1481_v48 = vld [vmem:[#allocation3 + $0x49] sm:$0xff]  ;;  %v2459_v31 = vld [vmem:[#allocation3 + $0x5d] sm:$0xff] }
 0x1b6   :  { %v1458_v46 = vld [vmem:[#allocation3 + $0x48] sm:$0xff]  ;;  %v1486_v52 = vpack.c.bf16 %v1481_v48, %v1480_v51  ;;  %v2170_v51 = vpack.c.bf16 %v12575_v36, %v2162_v56  ;;  %v2597_v21 = vld [vmem:[#allocation3 + $0x1e] sm:$0xff] }
 0x1b7   :  { %v1463_v62 = vpack.c.bf16 %v1458_v46, %v1457_v40  ;;  %v1729_v23 = vld [vmem:[#allocation3 + $0x4a] sm:$0xff]  ;;  %v1875_v0 = vld [vmem:[#allocation3 + $0x52] sm:$0xff]  ;;  %v2018_v46 = vld [vmem:[#allocation3 + $0x3b] sm:$0xff] }
 0x1b8   :  { %10320 = vmatmul.mubr.msk.bf16.gmra.mrb[96].mxu1 %vm65_vm3, %v1486_v52  ;;  %v1734_v30 = vpack.c.bf16 %v1729_v23, %v1873_v28  ;;  %v1880_v6 = vpack.c.bf16 %v1875_v0, %v1729_v23  ;;  %v2019_v48 = vld [vmem:[#allocation3 + $0x43] sm:$0xff]  ;;  %v2021_v61 = vld [vmem:[#allocation3 + $0x53] sm:$0xff] }
 0x1b9   :  { %10348 = vmatmul.mubr.msk.bf16.gmra.mrb[116].mxu0 %vm65_vm3, %v1463_v62  ;;  %10359 = vmatprep.mubr.msk.bf16.mxu1 %vm11643_vm2, %v12209_v29  ;;  %v2165_v40 = vld [vmem:[#allocation3 + $0x44] sm:$0xff]  ;;  %v2164_v52 = vld [vmem:[#allocation3 + $0x3c] sm:$0xff]  ;;  %v2025_v62 = vpack.c.bf16 %v2019_v48, %v2018_v46  ;;  %v2166_v2 = vld [vmem:[#allocation3 + $0x4c] sm:$0xff] }
 0x1ba   :  { %10387 = vmatprep.mubr.msk.bf16.mxu0 %vm11643_vm2, %v12209_v29  ;;  %v2171_v10 = vpack.c.bf16 %v2165_v40, %v2164_v52  ;;  %v2316_v35 = vpack.c.bf16 %v2164_v52, %v12575_v36  ;;  %v2317_v23 = vpack.c.bf16 %v2166_v2, %v2165_v40  ;;  %v2601_v43 = vld [vmem:[#allocation3 + $0x3e] sm:$0xff]  ;;  %v2603_v39 = vld [vmem:[#allocation3 + $0x4e] sm:$0xff] }
 0x1c0   :  { %10360 = vmatmul.mubr.msk.bf16.vlgmr.msra.gmra.mrb[100].mxu1 %vm65_vm3, %v1730_v4  ;;  %v2020_v4 = vld [vmem:[#allocation3 + $0x4b] sm:$0xff] }
 0x1c1   :  { %10388 = vmatmul.mubr.msk.bf16.vlgmr.msra.gmra.mrb[120].mxu0 %vm65_vm3, %v1876_v42  ;;  %10408 = vmatpush3.bf16.msra.mxu1 %v11094_v50  ;;  %v2167_v50 = vld [vmem:[#allocation3 + $0x54] sm:$0xff]  ;;  %v2026_v42 = vpack.c.bf16 %v2021_v61, %v2020_v4 }
 0x1c2   :  { %10363 = vmatprep.mubr.msk.bf16.mxu1 %vm11643_vm2, %v12209_v29  ;;  %10391 = vmatprep.mubr.msk.bf16.mxu0 %vm11643_vm2, %v12209_v29 }
 0x1c3   :  { %10409 = vmatprep.subr.bf16.mxu1 %v12209_v29  ;;  %10436 = vmatpush3.bf16.msra.mxu0 %v11097_v5  ;;  %v2172_v5 = vpack.c.bf16 %v2167_v50, %v2166_v2 }
 0x1c4   :  { %10437 = vmatprep.subr.bf16.mxu0 %v12209_v29 }
 0x1c5   :  { %10410 = vmatpush3.bf16.msra.mxu1 %v11095_v7  ;;  %v2451_v7 = vld [vmem:[#allocation3 + $0x1d] sm:$0xff] }
 0x1c6   :  { %10411 = vmatprep.subr.bf16.mxu1 %v12209_v29 }
 0x1c7   :  { %10438 = vmatpush3.bf16.msra.mxu0 %v11098_v1  ;;  %v2314_v1 = vpack.c.bf16 %v2160_v45, %v12532_v17  ;;  %v2602_v45 = vld [vmem:[#allocation3 + $0x46] sm:$0xff] }
 0x1c8   :  { %10364 = vmatmul.mubr.msk.bf16.gmra.mrb[104].mxu1 %vm65_vm3, %v1731_v11  ;;  %10439 = vmatprep.subr.bf16.mxu0 %v12209_v29  ;;  %v2460_v11 = vpack.c.bf16 %v2451_v7, %v2450_v18 }
 0x1c9   :  { %10392 = vmatmul.mubr.msk.bf16.gmra.mrb[124].mxu0 %vm65_vm3, %v1877_v12  ;;  %10367 = vmatprep.mubr.msk.bf16.mxu1 %vm11643_vm2, %v12209_v29  ;;  %v11111_v12 = vld [vmem:[%s14358_s3 + $0x108] sm:$0xff]  }
 0x1ca   :  { %10395 = vmatprep.mubr.msk.bf16.mxu0 %vm11643_vm2, %v12209_v29  ;;  %10412 = vmatpush3.bf16.msra.mxu1 %v11096_v13  ;;  %v2453_v13 = vld [vmem:[#allocation3 + $0x2d] sm:$0xff] }
 0x1cb   :  { %10413 = vmatprep.subr.bf16.mxu1 %v12209_v29  ;;  %10440 = vmatpush3.bf16.msra.mxu0 %v11100_v14  ;;  %v2452_v14 = vld [vmem:[#allocation3 + $0x25] sm:$0xff] }
 0x1cc   :  { %10441 = vmatprep.subr.bf16.mxu0 %v12209_v29  ;;  %v2461_v24 = vpack.c.bf16 %v2453_v13, %v2452_v14 }
 0x1ce   :  { %10414 = vmatpush3.bf16.msra.mxu1 %v11099_v15  ;;  %v2315_v15 = vpack.c.bf16 %v2162_v56, %v12551_v44  ;;  %v2600_v44 = vld [vmem:[#allocation3 + $0x36] sm:$0xff] }
 0x1cf   :  { %10442 = vmatpush3.bf16.msra.mxu0 %v11101_v20  ;;  %10463 = vmatprep.subr.bf16.mxu1 %v12209_v29  ;;  %v11113_v20 = vld [vmem:[%s14358_s3 + $0x118] sm:$0xff]  }
 0x1d0   :  { %10368 = vmatmul.mubr.msk.bf16.gmra.mrb[108].mxu1 %vm65_vm3, %v1732_v58  ;;  %10491 = vmatprep.subr.bf16.mxu0 %v12209_v29  ;;  %v2455_v58 = vld [vmem:[#allocation3 + $0x3d] sm:$0xff] }
 0x1d1   :  { %10396 = vmatmul.mubr.msk.bf16.gmra.mrb[128].mxu0 %vm65_vm3, %v1878_v59  ;;  %10371 = vmatprep.mubr.msk.bf16.mxu1 %vm11643_vm2, %v12209_v29  ;;  %v2454_v59 = vld [vmem:[#allocation3 + $0x35] sm:$0xff] }
 0x1d2   :  { %10399 = vmatprep.mubr.msk.bf16.mxu0 %vm11643_vm2, %v12209_v29  ;;  %v2462_v28 = vpack.c.bf16 %v2455_v58, %v2454_v59 }
 0x1d8   :  { %10372 = vmatmul.mubr.msk.bf16.gmra.mrb[112].mxu1 %vm65_vm3, %v1733_v49  ;;  %v2457_v49 = vld [vmem:[#allocation3 + $0x4d] sm:$0xff] }
 0x1d9   :  { %10400 = vmatmul.mubr.msk.bf16.gmra.mrb[132].mxu0 %vm65_vm3, %v1879_v16  ;;  %10375 = vmatprep.mubr.msk.bf16.mxu1 %vm11643_vm2, %v12209_v29  ;;  %v2456_v16 = vld [vmem:[#allocation3 + $0x45] sm:$0xff] }
 0x1da   :  { %10403 = vmatprep.mubr.msk.bf16.mxu0 %vm11643_vm2, %v12209_v29  ;;  %v2463_v0 = vpack.c.bf16 %v2457_v49, %v2456_v16 }
 0x1e0   :  { %10376 = vmatmul.mubr.msk.bf16.gmra.mrb[116].mxu1 %vm65_vm3, %v1734_v30  ;;  %v2313_v30 = vld [vmem:[#allocation3 + $0x5c] sm:$0xff] }
 0x1e1   :  { %10404 = vmatmul.mubr.msk.bf16.gmra.mrb[136].mxu0 %vm65_vm3, %v1880_v6  ;;  %10415 = vmatprep.mubr.msk.bf16.mxu1 %vm11643_vm2, %v12209_v29  ;;  %v2458_v6 = vld [vmem:[#allocation3 + $0x55] sm:$0xff]  ;;  %v2318_v17 = vpack.c.bf16 %v2313_v30, %v2167_v50 }
 0x1e2   :  { %10443 = vmatprep.mubr.msk.bf16.mxu0 %vm11643_vm2, %v12209_v29  ;;  %v2464_v55 = vpack.c.bf16 %v2459_v31, %v2458_v6 }
 0x1e8   :  { %10416 = vmatmul.mubr.msk.bf16.vlgmr.msra.gmra.mrb[120].mxu1 %vm65_vm3, %v2022_v34 }
 0x1e9   :  { %10444 = vmatmul.mubr.msk.bf16.vlgmr.msra.gmra.mrb[140].mxu0 %vm65_vm3, %v2168_v37  ;;  %10464 = vmatpush3.bf16.msra.mxu1 %v11102_v26  ;;  %v2596_v26 = vld [vmem:[#allocation3 + $0x16] sm:$0xff]  ;;  %v2599_v37 = vld [vmem:[#allocation3 + $0x2e] sm:$0xff] }
 0x1ea   :  { %10419 = vmatprep.mubr.msk.bf16.mxu1 %vm11643_vm2, %v12209_v29  ;;  %10447 = vmatprep.mubr.msk.bf16.mxu0 %vm11643_vm2, %v12209_v29  ;;  %v2606_v34 = vpack.c.bf16 %v2597_v21, %v2596_v26 }
 0x1eb   :  { %10465 = vmatprep.subr.bf16.mxu1 %v12209_v29  ;;  %10492 = vmatpush3.bf16.msra.mxu0 %v11105_v41  ;;  %v2598_v41 = vld [vmem:[#allocation3 + $0x26] sm:$0xff] }
 0x1ec   :  { %10493 = vmatprep.subr.bf16.mxu0 %v12209_v29 }
 0x1ed   :  { %10466 = vmatpush3.bf16.msra.mxu1 %v11103_v25  ;;  %v2607_v25 = vpack.c.bf16 %v2599_v37, %v2598_v41 }
 0x1ee   :  { %10467 = vmatprep.subr.bf16.mxu1 %v12209_v29 }
 0x1ef   :  { %10494 = vmatpush3.bf16.msra.mxu0 %v11106_v33  ;;  %v2608_v33 = vpack.c.bf16 %v2601_v43, %v2600_v44 }
 0x1f0   :  { %10420 = vmatmul.mubr.msk.bf16.gmra.mrb[124].mxu1 %vm65_vm3, %v2023_v3  ;;  %10495 = vmatprep.subr.bf16.mxu0 %v12209_v29  ;;  %v2609_v3 = vpack.c.bf16 %v2603_v39, %v2602_v45 }
 0x1f1   :  { %10448 = vmatmul.mubr.msk.bf16.gmra.mrb[144].mxu0 %vm65_vm3, %v2169_v57  ;;  %10423 = vmatprep.mubr.msk.bf16.mxu1 %vm11643_vm2, %v12209_v29  ;;  %v2604_v57 = vld [vmem:[#allocation3 + $0x56] sm:$0xff] }
 0x1f2   :  { %10451 = vmatprep.mubr.msk.bf16.mxu0 %vm11643_vm2, %v12209_v29  ;;  %10468 = vmatpush3.bf16.msra.mxu1 %v11104_v54  ;;  %v2605_v54 = vld [vmem:[#allocation3 + $0x5e] sm:$0xff] }
 0x1f3   :  { %10469 = vmatprep.subr.bf16.mxu1 %v12209_v29  ;;  %10496 = vmatpush3.bf16.msra.mxu0 %v11108_v47  ;;  %v2610_v47 = vpack.c.bf16 %v2605_v54, %v2604_v57 }
 0x1f4   :  { %10497 = vmatprep.subr.bf16.mxu0 %v12209_v29 }
 0x1f6   :  { %10470 = vmatpush3.bf16.msra.mxu1 %v11107_v60 }
 0x1f7   :  { %10498 = vmatpush3.bf16.msra.mxu0 %v11109_v38  ;;  %10519 = vmatprep.subr.bf16.mxu1 %v12209_v29 }
 0x1f8   :  { %10424 = vmatmul.mubr.msk.bf16.gmra.mrb[128].mxu1 %vm65_vm3, %v2024_v63 }
 0x1f9   :  { %10452 = vmatmul.mubr.msk.bf16.gmra.mrb[148].mxu0 %vm65_vm3, %v2170_v51  ;;  %10427 = vmatprep.mubr.msk.bf16.mxu1 %vm11643_vm2, %v12209_v29 }
 0x1fa   :  { %10455 = vmatprep.mubr.msk.bf16.mxu0 %vm11643_vm2, %v12209_v29 }
 0x200   :  { %10428 = vmatmul.mubr.msk.bf16.gmra.mrb[132].mxu1 %vm65_vm3, %v2025_v62 }
 0x201   :  { %10456 = vmatmul.mubr.msk.bf16.gmra.mrb[152].mxu0 %vm65_vm3, %v2171_v10  ;;  %10431 = vmatprep.mubr.msk.bf16.mxu1 %vm11643_vm2, %v12209_v29 }
 0x202   :  { %10459 = vmatprep.mubr.msk.bf16.mxu0 %vm11643_vm2, %v12209_v29 }
 0x208   :  { %10432 = vmatmul.mubr.msk.bf16.gmra.mrb[136].mxu1 %vm65_vm3, %v2026_v42 }
 0x209   :  { %10460 = vmatmul.mubr.msk.bf16.gmra.mrb[156].mxu0 %vm65_vm3, %v2172_v5  ;;  %10471 = vmatprep.mubr.msk.bf16.mxu1 %vm11643_vm2, %v12209_v29 }
 0x20a   :  { %10499 = vmatprep.mubr.msk.bf16.mxu0 %vm11643_vm2, %v12209_v29 }
 0x210   :  { %10472 = vmatmul.mubr.msk.bf16.vlgmr.msra.gmra.mrb[140].mxu1 %vm65_vm3, %v2314_v1 }
 0x211   :  { %10500 = vmatmul.mubr.msk.bf16.vlgmr.msra.gmra.mrb[160].mxu0 %vm65_vm3, %v2460_v11  ;;  %10520 = vmatpush3.bf16.msra.mxu1 %v11110_v8 }
 0x212   :  { %10475 = vmatprep.mubr.msk.bf16.mxu1 %vm11643_vm2, %v12209_v29  ;;  %10503 = vmatprep.mubr.msk.bf16.mxu0 %vm11643_vm2, %v12209_v29 }
 0x213   :  { %10521 = vmatprep.subr.bf16.mxu1 %v12209_v29 }
 0x215   :  { %10522 = vmatpush3.bf16.msra.mxu1 %v11111_v12 }
 0x216   :  { %10523 = vmatprep.subr.bf16.mxu1 %v12209_v29 }
 0x218   :  { %10476 = vmatmul.mubr.msk.bf16.gmra.mrb[144].mxu1 %vm65_vm3, %v2315_v15 }
 0x219   :  { %10504 = vmatmul.mubr.msk.bf16.gmra.mrb[164].mxu0 %vm65_vm3, %v2461_v24  ;;  %10479 = vmatprep.mubr.msk.bf16.mxu1 %vm11643_vm2, %v12209_v29 }
 0x21a   :  { %10507 = vmatprep.mubr.msk.bf16.mxu0 %vm11643_vm2, %v12209_v29  ;;  %10524 = vmatpush3.bf16.msra.mxu1 %v11112_v19 }
 0x21b   :  { %10525 = vmatprep.subr.bf16.mxu1 %v12209_v29 }
 0x21e   :  { %10526 = vmatpush3.bf16.msra.mxu1 %v11113_v20 }
 0x220   :  { %10480 = vmatmul.mubr.msk.bf16.gmra.mrb[148].mxu1 %vm65_vm3, %v2316_v35 }
 0x221   :  { %10508 = vmatmul.mubr.msk.bf16.gmra.mrb[168].mxu0 %vm65_vm3, %v2462_v28  ;;  %10483 = vmatprep.mubr.msk.bf16.mxu1 %vm11643_vm2, %v12209_v29 }
 0x222   :  { %10511 = vmatprep.mubr.msk.bf16.mxu0 %vm11643_vm2, %v12209_v29 }
 0x228   :  { %10484 = vmatmul.mubr.msk.bf16.gmra.mrb[152].mxu1 %vm65_vm3, %v2317_v23 }
 0x229   :  { %10512 = vmatmul.mubr.msk.bf16.gmra.mrb[172].mxu0 %vm65_vm3, %v2463_v0  ;;  %10487 = vmatprep.mubr.msk.bf16.mxu1 %vm11643_vm2, %v12209_v29 }
 0x22a   :  { %10515 = vmatprep.mubr.msk.bf16.mxu0 %vm11643_vm2, %v12209_v29 }
 0x230   :  { %10488 = vmatmul.mubr.msk.bf16.gmra.mrb[156].mxu1 %vm65_vm3, %v2318_v17 }
 0x231   :  { %10516 = vmatmul.mubr.msk.bf16.gmra.mrb[176].mxu0 %vm65_vm3, %v2464_v55  ;;  %10527 = vmatprep.mubr.msk.bf16.mxu1 %vm11643_vm2, %v12209_v29 }
 0x238   :  { %10528 = vmatmul.mubr.msk.bf16.vlgmr.msra.gmra.mrb[160].mxu1 %vm65_vm3, %v2606_v34 }
 0x239   :  { %10531 = vmatprep.mubr.msk.bf16.mxu1 %vm11643_vm2, %v12209_v29 }
 0x240   :  { %10532 = vmatmul.mubr.msk.bf16.gmra.mrb[164].mxu1 %vm65_vm3, %v2607_v25 }
 0x241   :  { %10535 = vmatprep.mubr.msk.bf16.mxu1 %vm11643_vm2, %v12209_v29 }
 0x248   :  { %10536 = vmatmul.mubr.msk.bf16.gmra.mrb[168].mxu1 %vm65_vm3, %v2608_v33 }
 0x249   :  { %10539 = vmatprep.mubr.msk.bf16.mxu1 %vm11643_vm2, %v12209_v29 }
 0x250   :  { %10540 = vmatmul.mubr.msk.bf16.gmra.mrb[172].mxu1 %vm65_vm3, %v2609_v3 }
 0x251   :  { %10543 = vmatprep.mubr.msk.bf16.mxu1 %vm11643_vm2, %v12209_v29 }
 0x258   :  { %10544 = vmatmul.mubr.msk.bf16.gmra.mrb[176].mxu1 %vm65_vm3, %v2610_v47 }
 0x26b   :  { %v1569_v60 = vpop.f32.mrb[80].mxu1 }
 0x26c   :  { %v1681_v53 = vpop.f32.mrb[100].mxu0  ;;  %v10305_v38 = vpop.f32.mrb[81].mxu1 }
 0x26d   :  { %v1682_v36 = vadd.f32 %v1681_v53, %v1569_v60  ;;  %v10333_v22 = vpop.f32.mrb[101].mxu0  ;;  %v1572_v56 = vpop.f32.mrb[82].mxu1 }
 0x26e   :  { %v1684_v63 = vpop.f32.mrb[102].mxu0  ;;  %v10306_v48 = vpop.f32.mrb[83].mxu1 }
 0x26f   :  { %v1685_v51 = vadd.f32 %v1684_v63, %v1572_v56  ;;  %v10334_v40 = vpop.f32.mrb[103].mxu0 }
 0x273   :  { %v1577_v46 = vpop.f32.mrb[84].mxu1 }
 0x274   :  { %v1689_v52 = vpop.f32.mrb[104].mxu0  ;;  %v10309_v10 = vpop.f32.mrb[85].mxu1 }
 0x275   :  { %v1690_v62 = vadd.f32 %v1689_v52, %v1577_v46  ;;  %v10337_v29 = vpop.f32.mrb[105].mxu0  ;;  %v1580_v61 = vpop.f32.mrb[86].mxu1 }
 0x276   :  { %v1692_v2 = vpop.f32.mrb[106].mxu0  ;;  %v10310_v4 = vpop.f32.mrb[87].mxu1 }
 0x277   :  { %v1693_v50 = vadd.f32 %v1692_v2, %v1580_v61  ;;  %v10338_v42 = vpop.f32.mrb[107].mxu0 }
 0x27b   :  { %v1585_v5 = vpop.f32.mrb[88].mxu1 }
 0x27c   :  { %v1697_v7 = vpop.f32.mrb[108].mxu0  ;;  %v10313_v8 = vpop.f32.mrb[89].mxu1 }
 0x27d   :  { %v1698_v18 = vadd.f32 %v1697_v7, %v1585_v5  ;;  %v10341_v1 = vpop.f32.mrb[109].mxu0  ;;  %v1588_v11 = vpop.f32.mrb[90].mxu1 }
 0x27e   :  { %v1700_v12 = vpop.f32.mrb[110].mxu0  ;;  %v10314_v14 = vpop.f32.mrb[91].mxu1 }
 0x27f   :  { %v1701_v13 = vadd.f32 %v1700_v12, %v1588_v11  ;;  %v10342_v15 = vpop.f32.mrb[111].mxu0 }
 0x283   :  { %v1593_v24 = vpop.f32.mrb[92].mxu1 }
 0x284   :  { %v1705_v19 = vpop.f32.mrb[112].mxu0  ;;  %v10317_v58 = vpop.f32.mrb[93].mxu1 }
 0x285   :  { %v1706_v20 = vadd.f32 %v1705_v19, %v1593_v24  ;;  %v10345_v59 = vpop.f32.mrb[113].mxu0  ;;  %v1596_v35 = vpop.f32.mrb[94].mxu1 }
 0x286   :  { %v1708_v28 = vpop.f32.mrb[114].mxu0  ;;  %v10318_v16 = vpop.f32.mrb[95].mxu1 }
 0x287   :  { %v1709_v49 = vadd.f32 %v1708_v28, %v1596_v35  ;;  %v10346_v23 = vpop.f32.mrb[115].mxu0 }
 0x28b   :  { %v1601_v0 = vpop.f32.mrb[96].mxu1 }
 0x28c   :  { %v1713_v30 = vpop.f32.mrb[116].mxu0  ;;  %v10321_v31 = vpop.f32.mrb[97].mxu1 }
 0x28d   :  { %v1714_v6 = vadd.f32 %v1713_v30, %v1601_v0  ;;  %v10349_v17 = vpop.f32.mrb[117].mxu0  ;;  %v1604_v55 = vpop.f32.mrb[98].mxu1 }
 0x28e   :  { %v1716_v21 = vpop.f32.mrb[118].mxu0  ;;  %v10322_v34 = vpop.f32.mrb[99].mxu1 }
 0x28f   :  { %v12661_v26 = vadd.f32 %v1716_v21, %v1604_v55  ;;  %v10350_v37 = vpop.f32.mrb[119].mxu0 }
 0x293   :  { %v1817_v41 = vpop.f32.mrb[100].mxu1 }
 0x294   :  { %v1963_v25 = vpop.f32.mrb[120].mxu0  ;;  %v1856_v43 = vadd.f32 %v1817_v41, %v1682_v36  ;;  %v10361_v44 = vpop.f32.mrb[101].mxu1 }
 0x295   :  { %v10389_v33 = vpop.f32.mrb[121].mxu0  ;;  %v1820_v39 = vpop.f32.mrb[102].mxu1 }
 0x296   :  { %v1966_v45 = vpop.f32.mrb[122].mxu0  ;;  %v2002_v3 = vadd.f32 %v1963_v25, %v1856_v43  ;;  %v1857_v57 = vadd.f32 %v1820_v39, %v1685_v51  ;;  %v10362_v54 = vpop.f32.mrb[103].mxu1 }
 0x297   :  { %v10390_v47 = vpop.f32.mrb[123].mxu0 }
 0x298   :  { %v12663_v60 = vadd.f32 %v1966_v45, %v1857_v57 }
 0x29b   :  { %v1825_v53 = vpop.f32.mrb[104].mxu1 }
 0x29c   :  { %v1971_v38 = vpop.f32.mrb[124].mxu0  ;;  %v1858_v22 = vadd.f32 %v1825_v53, %v1690_v62  ;;  %v10365_v56 = vpop.f32.mrb[105].mxu1 }
 0x29d   :  { %v10393_v63 = vpop.f32.mrb[125].mxu0  ;;  %v1828_v48 = vpop.f32.mrb[106].mxu1 }
 0x29e   :  { %v1974_v40 = vpop.f32.mrb[126].mxu0  ;;  %v12665_v46 = vadd.f32 %v1971_v38, %v1858_v22  ;;  %v1859_v36 = vadd.f32 %v1828_v48, %v1693_v50  ;;  %v10366_v52 = vpop.f32.mrb[107].mxu1  ;;  %v11115_v22 = vld [vmem:[%s14360_s5 + $0x28] sm:$0xff]   ;;  %v11117_v63 = vld [vmem:[%s14360_s5 + $0x30] sm:$0xff]  }
 0x29f   :  { %v10394_v10 = vpop.f32.mrb[127].mxu0  ;;  %v11121_v52 = vld [vmem:[%s14360_s5 + $0x18] sm:$0xff]  }
 0x2a0   :  { %v12667_v29 = vadd.f32 %v1974_v40, %v1859_v36  ;;  %v11119_v36 = vld [vmem:[%s14360_s5 + $0x38] sm:$0xff]  }
 0x2a3   :  { %v1833_v61 = vpop.f32.mrb[108].mxu1 }
 0x2a4   :  { %v1979_v51 = vpop.f32.mrb[128].mxu0  ;;  %v1860_v2 = vadd.f32 %v1833_v61, %v1698_v18  ;;  %v10369_v4 = vpop.f32.mrb[109].mxu1 }
 0x2a5   :  { %v10397_v42 = vpop.f32.mrb[129].mxu0  ;;  %v1836_v5 = vpop.f32.mrb[110].mxu1 }
 0x2a6   :  { %v1982_v7 = vpop.f32.mrb[130].mxu0  ;;  %v12669_v8 = vadd.f32 %v1979_v51, %v1860_v2  ;;  %v1861_v62 = vadd.f32 %v1836_v5, %v1701_v13  ;;  %v10370_v1 = vpop.f32.mrb[111].mxu1  ;;  %v11114_v13 = vld [vmem:[%s14360_s5 + $0x20] sm:$0xff]  }
 0x2a7   :  { %v10398_v11 = vpop.f32.mrb[131].mxu0  ;;  %10547 = vmatprep.subr.bf16.mxu0 %v11114_v13  ;;  %v12715_v42 = vld [vmem:[%s14360_s5 + $0x40] sm:$0xff]  }
 0x2a8   :  { %v12671_v12 = vadd.f32 %v1982_v7, %v1861_v62  ;;  %10548 = vmatpush3.bf16.msra.mxu0 %v11114_v13  ;;  %v12720_v5 = vld [vmem:[%s14360_s5 + $0x60] sm:$0xff]  }
 0x2a9   :  { %10549 = vmatprep.subr.bf16.mxu0 %v11115_v22 }
 0x2ab   :  { %v1841_v14 = vpop.f32.mrb[112].mxu1 }
 0x2ac   :  { %v1987_v50 = vpop.f32.mrb[132].mxu0  ;;  %v1862_v15 = vadd.f32 %v1841_v14, %v1706_v20  ;;  %v10373_v24 = vpop.f32.mrb[113].mxu1  ;;  %10550 = vmatpush3.bf16.msra.mxu0 %v11115_v22 }
 0x2ad   :  { %v10401_v19 = vpop.f32.mrb[133].mxu0  ;;  %v1844_v58 = vpop.f32.mrb[114].mxu1  ;;  %10551 = vmatprep.subr.bf16.mxu0 %v11117_v63 }
 0x2ae   :  { %v1990_v59 = vpop.f32.mrb[134].mxu0  ;;  %v12673_v35 = vadd.f32 %v1987_v50, %v1862_v15  ;;  %v1863_v18 = vadd.f32 %v1844_v58, %v1709_v49  ;;  %v10374_v28 = vpop.f32.mrb[115].mxu1 }
 0x2af   :  { %v10402_v16 = vpop.f32.mrb[135].mxu0 }
 0x2b0   :  { %v12675_v23 = vadd.f32 %v1990_v59, %v1863_v18  ;;  %10552 = vmatpush3.bf16.msra.mxu0 %v11117_v63 }
 0x2b1   :  { %10553 = vmatprep.subr.bf16.mxu0 %v11119_v36 }
 0x2b3   :  { %v1849_v0 = vpop.f32.mrb[116].mxu1 }
 0x2b4   :  { %v1995_v30 = vpop.f32.mrb[136].mxu0  ;;  %v1864_v31 = vadd.f32 %v1849_v0, %v1714_v6  ;;  %v10377_v17 = vpop.f32.mrb[117].mxu1  ;;  %v11116_v6 = vld [vmem:[%s14360_s5] sm:$0xff]   ;;  %10554 = vmatpush3.bf16.msra.mxu0 %v11119_v36 }
 0x2b5   :  { %v10405_v20 = vpop.f32.mrb[137].mxu0  ;;  %v1852_v55 = vpop.f32.mrb[118].mxu1  ;;  %10559 = vmatprep.subr.bf16.mxu1 %v11116_v6  ;;  %10571 = vmatprep.subr.bf16.mxu0 %v12715_v42 }
 0x2b6   :  { %v1998_v21 = vpop.f32.mrb[138].mxu0  ;;  %v12680_v34 = vadd.f32 %v1995_v30, %v1864_v31  ;;  %v1865_v49 = vadd.f32 %v1852_v55, %v12661_v26  ;;  %v10378_v37 = vpop.f32.mrb[119].mxu1  ;;  %10560 = vmatpush3.bf16.msra.mxu1 %v11116_v6 }
 0x2b7   :  { %v10406_v41 = vpop.f32.mrb[139].mxu0 }
 0x2b8   :  { %v12683_v25 = vadd.f32 %v1998_v21, %v1865_v49 }
 0x2bb   :  { %v2109_v43 = vpop.f32.mrb[120].mxu1 }
 0x2bc   :  { %v2255_v44 = vpop.f32.mrb[140].mxu0  ;;  %v2148_v33 = vadd.f32 %v2109_v43, %v2002_v3  ;;  %v10417_v39 = vpop.f32.mrb[121].mxu1  ;;  %v11118_v3 = vld [vmem:[%s14360_s5 + $0x8] sm:$0xff]  }
 0x2bd   :  { %v10445_v45 = vpop.f32.mrb[141].mxu0  ;;  %v2112_v57 = vpop.f32.mrb[122].mxu1  ;;  %10561 = vmatprep.subr.bf16.mxu1 %v11118_v3 }
 0x2be   :  { %v2258_v54 = vpop.f32.mrb[142].mxu0  ;;  %v12688_v47 = vadd.f32 %v2255_v44, %v2148_v33  ;;  %v2149_v26 = vadd.f32 %v2112_v57, %v12663_v60  ;;  %v10418_v53 = vpop.f32.mrb[123].mxu1  ;;  %v11120_v60 = vld [vmem:[%s14360_s5 + $0x10] sm:$0xff]   ;;  %10562 = vmatpush3.bf16.msra.mxu1 %v11118_v3 }
 0x2bf   :  { %v10446_v38 = vpop.f32.mrb[143].mxu0  ;;  %10563 = vmatprep.subr.bf16.mxu1 %v11120_v60 }
 0x2c0   :  { %v12697_v56 = vadd.f32 %v2258_v54, %v2149_v26 }
 0x2c2   :  { %10564 = vmatpush3.bf16.msra.mxu1 %v11120_v60 }
 0x2c3   :  { %v2117_v48 = vpop.f32.mrb[124].mxu1  ;;  %10565 = vmatprep.subr.bf16.mxu1 %v11121_v52 }
 0x2c4   :  { %v2263_v40 = vpop.f32.mrb[144].mxu0  ;;  %v2150_v10 = vadd.f32 %v2117_v48, %v12665_v46  ;;  %v10421_v61 = vpop.f32.mrb[125].mxu1 }
 0x2c5   :  { %v10449_v51 = vpop.f32.mrb[145].mxu0  ;;  %v2120_v2 = vpop.f32.mrb[126].mxu1 }
 0x2c6   :  { %v2266_v4 = vpop.f32.mrb[146].mxu0  ;;  %v12722_v7 = vadd.f32 %v2263_v40, %v2150_v10  ;;  %v2151_v62 = vadd.f32 %v2120_v2, %v12667_v29  ;;  %v10422_v1 = vpop.f32.mrb[127].mxu1  ;;  %10566 = vmatpush3.bf16.msra.mxu1 %v11121_v52 }
 0x2c7   :  { %v10450_v46 = vpop.f32.mrb[147].mxu0  ;;  %10583 = vmatprep.subr.bf16.mxu1 %v12720_v5 }
 0x2c8   :  { %v2297_v11 = vadd.f32 %v2266_v4, %v2151_v62 }
 0x2cb   :  { %v2125_v14 = vpop.f32.mrb[128].mxu1 }
 0x2cc   :  { %v2271_v50 = vpop.f32.mrb[148].mxu0  ;;  %v2152_v15 = vadd.f32 %v2125_v14, %v12669_v8  ;;  %v10425_v24 = vpop.f32.mrb[129].mxu1 }
 0x2cd   :  { %v10453_v19 = vpop.f32.mrb[149].mxu0  ;;  %v2128_v29 = vpop.f32.mrb[130].mxu1 }
 0x2ce   :  { %v2274_v58 = vpop.f32.mrb[150].mxu0  ;;  %v2298_v59 = vadd.f32 %v2271_v50, %v2152_v15  ;;  %v2153_v18 = vadd.f32 %v2128_v29, %v12671_v12  ;;  %v10426_v28 = vpop.f32.mrb[131].mxu1 }
 0x2cf   :  { %v10454_v16 = vpop.f32.mrb[151].mxu0 }
 0x2d0   :  { %v2299_v13 = vadd.f32 %v2274_v58, %v2153_v18 }
 0x2d3   :  { %v2133_v0 = vpop.f32.mrb[132].mxu1 }
 0x2d4   :  { %v2279_v30 = vpop.f32.mrb[152].mxu0  ;;  %v2154_v31 = vadd.f32 %v2133_v0, %v12673_v35  ;;  %v10429_v17 = vpop.f32.mrb[133].mxu1 }
 0x2d5   :  { %v10457_v20 = vpop.f32.mrb[153].mxu0  ;;  %v2136_v55 = vpop.f32.mrb[134].mxu1 }
 0x2d6   :  { %v2282_v21 = vpop.f32.mrb[154].mxu0  ;;  %v2300_v49 = vadd.f32 %v2279_v30, %v2154_v31  ;;  %v2155_v8 = vadd.f32 %v2136_v55, %v12675_v23  ;;  %v10430_v37 = vpop.f32.mrb[135].mxu1 }
 0x2d7   :  { %v10458_v41 = vpop.f32.mrb[155].mxu0 }
 0x2d8   :  { %v2301_v43 = vadd.f32 %v2282_v21, %v2155_v8 }
 0x2db   :  { %v2141_v44 = vpop.f32.mrb[136].mxu1 }
 0x2dc   :  { %v2287_v6 = vpop.f32.mrb[156].mxu0  ;;  %v2156_v12 = vadd.f32 %v2141_v44, %v12680_v34  ;;  %v10433_v33 = vpop.f32.mrb[137].mxu1 }
 0x2dd   :  { %v10461_v39 = vpop.f32.mrb[157].mxu0  ;;  %v2144_v45 = vpop.f32.mrb[138].mxu1 }
 0x2de   :  { %v2290_v57 = vpop.f32.mrb[158].mxu0  ;;  %v2302_v54 = vadd.f32 %v2287_v6, %v2156_v12  ;;  %v2157_v35 = vadd.f32 %v2144_v45, %v12683_v25  ;;  %v10434_v26 = vpop.f32.mrb[139].mxu1 }
 0x2df   :  { %v10462_v53 = vpop.f32.mrb[159].mxu0 }
 0x2e0   :  { %v2303_v38 = vadd.f32 %v2290_v57, %v2157_v35 }
 0x2e3   :  { %v2401_v22 = vpop.f32.mrb[140].mxu1 }
 0x2e4   :  { %v2547_v3 = vpop.f32.mrb[160].mxu0  ;;  %v2440_v23 = vadd.f32 %v2401_v22, %v12688_v47  ;;  %v10473_v63 = vpop.f32.mrb[141].mxu1 }
 0x2e5   :  { %v10501_v60 = vpop.f32.mrb[161].mxu0  ;;  %v2404_v48 = vpop.f32.mrb[142].mxu1 }
 0x2e6   :  { %v2550_v40 = vpop.f32.mrb[162].mxu0  ;;  %v2586_v36 = vadd.f32 %v2547_v3, %v2440_v23  ;;  %v2441_v34 = vadd.f32 %v2404_v48, %v12697_v56  ;;  %v10474_v52 = vpop.f32.mrb[143].mxu1 }
 0x2e7   :  { %v10502_v10 = vpop.f32.mrb[163].mxu0 }
 0x2e8   :  { %v2587_v61 = vadd.f32 %v2550_v40, %v2441_v34 }
 0x2eb   :  { %v2409_v51 = vpop.f32.mrb[144].mxu1 }
 0x2ec   :  { %v2555_v2 = vpop.f32.mrb[164].mxu0  ;;  %v2442_v25 = vadd.f32 %v2409_v51, %v12722_v7  ;;  %v10477_v4 = vpop.f32.mrb[145].mxu1 }
 0x2ed   :  { %v10505_v62 = vpop.f32.mrb[165].mxu0  ;;  %v2412_v1 = vpop.f32.mrb[146].mxu1 }
 0x2ee   :  { %v2558_v46 = vpop.f32.mrb[166].mxu0  ;;  %v2588_v14 = vadd.f32 %v2555_v2, %v2442_v25  ;;  %v2443_v47 = vadd.f32 %v2412_v1, %v2297_v11  ;;  %v10478_v50 = vpop.f32.mrb[147].mxu1 }
 0x2ef   :  { %v10506_v15 = vpop.f32.mrb[167].mxu0 }
 0x2f0   :  { %v2589_v24 = vadd.f32 %v2558_v46, %v2443_v47 }
 0x2f3   :  { %v2417_v19 = vpop.f32.mrb[148].mxu1 }
 0x2f4   :  { %v2563_v29 = vpop.f32.mrb[168].mxu0  ;;  %v2444_v58 = vadd.f32 %v2417_v19, %v2298_v59  ;;  %v10481_v56 = vpop.f32.mrb[149].mxu1 }
 0x2f5   :  { %v10509_v18 = vpop.f32.mrb[169].mxu0  ;;  %v2420_v28 = vpop.f32.mrb[150].mxu1 }
 0x2f6   :  { %v2566_v16 = vpop.f32.mrb[170].mxu0  ;;  %v2590_v0 = vadd.f32 %v2563_v29, %v2444_v58  ;;  %v2445_v30 = vadd.f32 %v2420_v28, %v2299_v13  ;;  %v10482_v31 = vpop.f32.mrb[151].mxu1 }
 0x2f7   :  { %v10510_v7 = vpop.f32.mrb[171].mxu0 }
 0x2f8   :  { %v2591_v17 = vadd.f32 %v2566_v16, %v2445_v30 }
 0x2fb   :  { %v2425_v20 = vpop.f32.mrb[152].mxu1 }
 0x2fc   :  { %v2571_v55 = vpop.f32.mrb[172].mxu0  ;;  %v2446_v21 = vadd.f32 %v2425_v20, %v2300_v49  ;;  %v10485_v8 = vpop.f32.mrb[153].mxu1 }
 0x2fd   :  { %v10513_v11 = vpop.f32.mrb[173].mxu0  ;;  %v2428_v37 = vpop.f32.mrb[154].mxu1 }
 0x2fe   :  { %v2574_v41 = vpop.f32.mrb[174].mxu0  ;;  %v12736_v44 = vadd.f32 %v2571_v55, %v2446_v21  ;;  %v2447_v6 = vadd.f32 %v2428_v37, %v2301_v43  ;;  %v10486_v59 = vpop.f32.mrb[155].mxu1  ;;  %v12747_v43 = vld [vmem:[%s14361_s4] ss:$0 sm:$0xff] }
 0x2ff   :  { %v10514_v12 = vpop.f32.mrb[175].mxu0 }
 0x300   :  { %v12738_v33 = vadd.f32 %v2574_v41, %v2447_v6 }
 0x303   :  { %v2433_v39 = vpop.f32.mrb[156].mxu1 }
 0x304   :  { %v2579_v45 = vpop.f32.mrb[176].mxu0  ;;  %v2448_v13 = vadd.f32 %v2433_v39, %v2302_v54  ;;  %v10489_v57 = vpop.f32.mrb[157].mxu1 }
 0x305   :  { %v10517_v35 = vpop.f32.mrb[177].mxu0  ;;  %v2436_v26 = vpop.f32.mrb[158].mxu1 }
 0x306   :  { %v2582_v53 = vpop.f32.mrb[178].mxu0  ;;  %v12740_v22 = vadd.f32 %v2579_v45, %v2448_v13  ;;  %v2449_v49 = vadd.f32 %v2436_v26, %v2303_v38  ;;  %v10490_v3 = vpop.f32.mrb[159].mxu1 }
 0x307   :  { %v10518_v23 = vpop.f32.mrb[179].mxu0 }
 0x308   :  { %v12742_v63 = vadd.f32 %v2582_v53, %v2449_v49 }
 0x30b   :  { %v2693_v60 = vpop.f32.mrb[160].mxu1 }
 0x30c   :  { %v2732_v48 = vadd.f32 %v2693_v60, %v2586_v36  ;;  %v10529_v40 = vpop.f32.mrb[161].mxu1 }
 0x30d   :  { %v2696_v54 = vpop.f32.mrb[162].mxu1 }
 0x30e   :  { %v2749_v34 = vadd.f32 %v12747_v43, %v2732_v48  ;;  %v2733_v52 = vadd.f32 %v2696_v54, %v2587_v61  ;;  %v10530_v10 = vpop.f32.mrb[163].mxu1 }
 0x310   :  { %v2759_v51 = vmax.f32 %v2749_v34, 0.0  ;;  %v2750_v38 = vadd.f32 %v12747_v43, %v2733_v52 }
 0x312   :  { %2769 = vst.msk [vmem:[#allocation7] sm:$0xff] %vm65_vm3, %v2759_v51  ;;  %v2760_v2 = vmax.f32 %v2750_v38, 0.0 }
 0x313   :  { %v2701_v25 = vpop.f32.mrb[164].mxu1 }
 0x314   :  { %2770 = vst.msk [vmem:[#allocation7 + $0x8] sm:$0xff] %vm65_vm3, %v2760_v2  ;;  %v2734_v4 = vadd.f32 %v2701_v25, %v2588_v14  ;;  %v10533_v62 = vpop.f32.mrb[165].mxu1 }
 0x315   :  { %v2704_v1 = vpop.f32.mrb[166].mxu1 }
 0x316   :  { %v2751_v36 = vadd.f32 %v12747_v43, %v2734_v4  ;;  %v2735_v46 = vadd.f32 %v2704_v1, %v2589_v24  ;;  %v10534_v47 = vpop.f32.mrb[167].mxu1 }
 0x318   :  { %v2761_v50 = vmax.f32 %v2751_v36, 0.0  ;;  %v2752_v61 = vadd.f32 %v12747_v43, %v2735_v46 }
 0x319   :  { %v2779_v7 = vld [vmem:[#allocation7] sm:$0xff] }
 0x31a   :  { %2771 = vst.msk [vmem:[#allocation7 + $0x10] sm:$0xff] %vm65_vm3, %v2761_v50  ;;  %v2762_v15 = vmax.f32 %v2752_v61, 0.0 }
 0x31b   :  { %v2709_v19 = vpop.f32.mrb[168].mxu1  ;;  %v2788_v16 = vld [vmem:[#allocation7 + $0x1] sm:$0xff] }
 0x31c   :  { %2772 = vst.msk [vmem:[#allocation7 + $0x18] sm:$0xff] %vm65_vm3, %v2762_v15  ;;  %v2736_v29 = vadd.f32 %v2709_v19, %v2590_v0  ;;  %v10537_v58 = vpop.f32.mrb[169].mxu1  ;;  %v2797_v8 = vmax.f32 %v2779_v7, %v2788_v16  ;;  %v2780_v41 = vld [vmem:[#allocation7 + $0x8] sm:$0xff] }
 0x31d   :  { %v2712_v56 = vpop.f32.mrb[170].mxu1 }
 0x31e   :  { %v2753_v14 = vadd.f32 %v12747_v43, %v2736_v29  ;;  %v2737_v18 = vadd.f32 %v2712_v56, %v2591_v17  ;;  %v10538_v28 = vpop.f32.mrb[171].mxu1 }
 0x320   :  { %v2763_v30 = vmax.f32 %v2753_v14, 0.0  ;;  %v2754_v24 = vadd.f32 %v12747_v43, %v2737_v18 }
 0x321   :  { %v2806_v31 = vld [vmem:[#allocation7 + $0xa] sm:$0xff] }
 0x322   :  { %v2789_v20 = vld [vmem:[#allocation7 + $0x9] sm:$0xff]  ;;  %2773 = vst.msk [vmem:[#allocation7 + $0x20] sm:$0xff] %vm65_vm3, %v2763_v30  ;;  %v2764_v21 = vmax.f32 %v2754_v24, 0.0 }
 0x323   :  { %v2815_v55 = vld [vmem:[#allocation7 + $0xb] sm:$0xff]  ;;  %v2717_v37 = vpop.f32.mrb[172].mxu1  ;;  %v2816_v6 = vld [vmem:[#allocation7 + $0x13] sm:$0xff]  ;;  %v2798_v12 = vmax.f32 %v2780_v41, %v2789_v20 }
 0x324   :  { %v2824_v11 = vmax.f32 %v2806_v31, %v2815_v55  ;;  %v2807_v0 = vld [vmem:[#allocation7 + $0x12] sm:$0xff]  ;;  %2774 = vst.msk [vmem:[#allocation7 + $0x28] sm:$0xff] %vm65_vm3, %v2764_v21  ;;  %v2738_v17 = vadd.f32 %v2717_v37, %v12736_v44  ;;  %v10541_v59 = vpop.f32.mrb[173].mxu1 }
 0x325   :  { %v2825_v45 = vmax.f32 %v2807_v0, %v2816_v6  ;;  %v2720_v13 = vpop.f32.mrb[174].mxu1  ;;  %v2790_v49 = vld [vmem:[#allocation7 + $0x11] sm:$0xff] }
 0x326   :  { %v2833_v39 = vmax.f32 %v2797_v8, %v2824_v11  ;;  %v2755_v57 = vadd.f32 %v12747_v43, %v2738_v17  ;;  %v2739_v35 = vadd.f32 %v2720_v13, %v12738_v33  ;;  %v10542_v26 = vpop.f32.mrb[175].mxu1  ;;  %v2781_v60 = vld [vmem:[#allocation7 + $0x10] sm:$0xff]  ;;  %v2782_v51 = vld [vmem:[#allocation7 + $0x18] sm:$0xff] }
 0x327   :  { %v2834_v53 = vmax.f32 %v2798_v12, %v2825_v45  ;;  %v2799_v34 = vmax.f32 %v2781_v60, %v2790_v49 }
 0x328   :  { %2842 = vst.msk [vmem:[#allocation7] sm:$0xff] %vm65_vm3, %v2833_v39  ;;  %v2765_v3 = vmax.f32 %v2755_v57, 0.0  ;;  %v2756_v23 = vadd.f32 %v12747_v43, %v2739_v35 }
 0x329   :  { %2843 = vst.msk [vmem:[#allocation7 + $0x8] sm:$0xff] %vm65_vm3, %v2834_v53  ;;  %v2808_v44 = vld [vmem:[#allocation7 + $0x1a] sm:$0xff] }
 0x32a   :  { %v2791_v48 = vld [vmem:[#allocation7 + $0x19] sm:$0xff]  ;;  %2775 = vst.msk [vmem:[#allocation7 + $0x30] sm:$0xff] %vm65_vm3, %v2765_v3  ;;  %v2766_v54 = vmax.f32 %v2756_v23, 0.0 }
 0x32b   :  { %v2817_v40 = vld [vmem:[#allocation7 + $0x1b] sm:$0xff]  ;;  %v2725_v10 = vpop.f32.mrb[176].mxu1  ;;  %v2818_v38 = vld [vmem:[#allocation7 + $0x23] sm:$0xff]  ;;  %v2800_v4 = vmax.f32 %v2782_v51, %v2791_v48 }
 0x32c   :  { %v2826_v52 = vmax.f32 %v2808_v44, %v2817_v40  ;;  %v2809_v33 = vld [vmem:[#allocation7 + $0x22] sm:$0xff]  ;;  %2776 = vst.msk [vmem:[#allocation7 + $0x38] sm:$0xff] %vm65_vm3, %v2766_v54  ;;  %v2740_v2 = vadd.f32 %v2725_v10, %v12740_v22  ;;  %v10545_v25 = vpop.f32.mrb[177].mxu1 }
 0x32d   :  { %v2827_v1 = vmax.f32 %v2809_v33, %v2818_v38  ;;  %v2728_v36 = vpop.f32.mrb[178].mxu1  ;;  %v2792_v19 = vld [vmem:[#allocation7 + $0x21] sm:$0xff] }
 0x32e   :  { %v2835_v62 = vmax.f32 %v2799_v34, %v2826_v52  ;;  %v2757_v46 = vadd.f32 %v12747_v43, %v2740_v2  ;;  %v2741_v47 = vadd.f32 %v2728_v36, %v12742_v63  ;;  %v10546_v50 = vpop.f32.mrb[179].mxu1  ;;  %v2783_v56 = vld [vmem:[#allocation7 + $0x20] sm:$0xff]  ;;  %v2784_v24 = vld [vmem:[#allocation7 + $0x28] sm:$0xff] }
 0x32f   :  { %v2852_v61 = vld [vmem:[#allocation7] ss:$2 sm:$0xf]  ;;  %v2836_v15 = vmax.f32 %v2800_v4, %v2827_v1  ;;  %v2801_v28 = vmax.f32 %v2783_v56, %v2792_v19  ;;  %v11126_v19 = vld [vmem:[%s14360_s5 + $0x50] sm:$0xff]  }
 0x330   :  { %2844 = vst.msk [vmem:[#allocation7 + $0x10] sm:$0xff] %vm65_vm3, %v2835_v62  ;;  %v2767_v29 = vmax.f32 %v2757_v46, 0.0  ;;  %v2758_v22 = vadd.f32 %v12747_v43, %v2741_v47  ;;  %v11124_v50 = vld [vmem:[%s14360_s5 + $0x48] sm:$0xff]  }
 0x331   :  { %2853 = vst.msk [vmem:[#allocation4 + $0x7] sm:$0xf] %vm2850_vm4, %v2852_v61  ;;  %v2810_v58 = vld [vmem:[#allocation7 + $0x2a] sm:$0xff]  ;;  %v11125_v61 = vld [vmem:[%s14360_s5 + $0x68] sm:$0xff]  }
 0x332   :  { %2845 = vst.msk [vmem:[#allocation7 + $0x18] sm:$0xff] %vm65_vm3, %v2836_v15  ;;  %v2793_v14 = vld [vmem:[#allocation7 + $0x29] sm:$0xff]  ;;  %2777 = vst.msk [vmem:[#allocation7 + $0x40] sm:$0xff] %vm65_vm3, %v2767_v29  ;;  %v2768_v63 = vmax.f32 %v2758_v22, 0.0  ;;  %v11130_v22 = vld [vmem:[%s14360_s5 + $0x80] sm:$0xff]  }
 0x333   :  { %v2819_v18 = vld [vmem:[#allocation7 + $0x2b] sm:$0xff]  ;;  %v2820_v31 = vld [vmem:[#allocation7 + $0x33] sm:$0xff]  ;;  %v2802_v7 = vmax.f32 %v2784_v24, %v2793_v14  ;;  %v11132_v24 = vld [vmem:[%s14360_s5 + $0x88] sm:$0xff]  }
 0x334   :  { %v2828_v16 = vmax.f32 %v2810_v58, %v2819_v18  ;;  %v2811_v30 = vld [vmem:[#allocation7 + $0x32] sm:$0xff]  ;;  %2778 = vst.msk [vmem:[#allocation7 + $0x48] sm:$0xff] %vm65_vm3, %v2768_v63  ;;  %v11127_v29 = vld [vmem:[%s14360_s5 + $0x70] sm:$0xff]  }
 0x335   :  { %v2829_v55 = vmax.f32 %v2811_v30, %v2820_v31  ;;  %v2785_v21 = vld [vmem:[#allocation7 + $0x30] sm:$0xff]  ;;  %v2786_v0 = vld [vmem:[#allocation7 + $0x38] sm:$0xff]  ;;  %v11133_v31 = vld [vmem:[%s14360_s5 + $0xa8] sm:$0xff]  }
 0x336   :  { %v2837_v20 = vmax.f32 %v2801_v28, %v2828_v16  ;;  %v2794_v8 = vld [vmem:[#allocation7 + $0x31] sm:$0xff] }
 0x337   :  { %v2838_v43 = vmax.f32 %v2802_v7, %v2829_v55  ;;  %v2803_v12 = vmax.f32 %v2785_v21, %v2794_v8  ;;  %v11131_v58 = vld [vmem:[%s14360_s5 + $0xa0] sm:$0xff]   ;;  %v11135_v55 = vld [vmem:[%s14360_s5 + $0xb0] sm:$0xff]   ;;  %v11137_v21 = vld [vmem:[%s14360_s5 + $0xb8] sm:$0xff]  }
 0x338   :  { %2846 = vst.msk [vmem:[#allocation7 + $0x20] sm:$0xff] %vm65_vm3, %v2837_v20  ;;  %v2876_v48 = vld [vmem:[#allocation4 + $0x1] sm:$0xff]  ;;  %v11138_v8 = vld [vmem:[%s14360_s5 + $0xc0] sm:$0xff]  }
 0x339   :  { %v2855_v11 = vld [vmem:[#allocation7 + $0x14] ss:$2 sm:$0xf]  ;;  %2847 = vst.msk [vmem:[#allocation7 + $0x28] sm:$0xff] %vm65_vm3, %v2838_v43  ;;  %v2787_v37 = vld [vmem:[#allocation7 + $0x40] sm:$0xf] }
 0x33a   :  { %v2795_v41 = vld [vmem:[#allocation7 + $0x39] sm:$0xff]  ;;  %2856 = vst.msk [vmem:[#allocation4 + $0xd] sm:$0xf] %vm2850_vm4, %v2855_v11  ;;  %v2796_v6 = vld [vmem:[#allocation7 + $0x41] sm:$0xf]  ;;  %v2863_v40 = vld [vmem:[#allocation4] sm:$0xff] }
 0x33b   :  { %v2812_v17 = vld [vmem:[#allocation7 + $0x3a] sm:$0xff]  ;;  %v2813_v45 = vld [vmem:[#allocation7 + $0x42] sm:$0xff]  ;;  %v2814_v13 = vld [vmem:[#allocation7 + $0x4a] sm:$0xf]  ;;  %v2804_v35 = vmax.f32 %v2786_v0, %v2795_v41  ;;  %v2805_v49 = vmax.f32 %v2787_v37, %v2796_v6 }
 0x33c   :  { %v2821_v59 = vld [vmem:[#allocation7 + $0x3b] sm:$0xff]  ;;  %v2822_v57 = vld [vmem:[#allocation7 + $0x43] sm:$0xff]  ;;  %v2823_v26 = vld [vmem:[#allocation7 + $0x4b] sm:$0xf] }
 0x33d   :  { %v2830_v39 = vmax.f32 %v2812_v17, %v2821_v59  ;;  %v2831_v53 = vmax.f32 %v2813_v45, %v2822_v57  ;;  %v2832_v23 = vmax.f32 %v2814_v13, %v2823_v26  ;;  %v3046_v47 = vld [vmem:[#allocation4 + $0x2] sm:$0xff]  ;;  %v11139_v0 = vld [vmem:[%s14360_s5 + $0xe0] sm:$0xff]   ;;  %v11140_v45 = vld [vmem:[%s14360_s5 + $0xc8] sm:$0xff]  }
 0x33e   :  { %v11134_v20 = vld [vmem:[%s14360_s5 + $0x90] sm:$0xff]   ;;  %v11136_v43 = vld [vmem:[%s14360_s5 + $0x98] sm:$0xff]  }
 0x33f   :  { %v2839_v3 = vmax.f32 %v2803_v12, %v2830_v39  ;;  %v2840_v44 = vmax.f32 %v2804_v35, %v2831_v53  ;;  %v2841_v60 = vmax.f32 %v2805_v49, %v2832_v23  ;;  %v11141_v35 = vld [vmem:[%s14360_s5 + $0xe8] sm:$0xff]   ;;  %v11142_v26 = vld [vmem:[%s14360_s5 + $0xd0] sm:$0xff]   ;;  %v11144_v49 = vld [vmem:[%s14360_s5 + $0xd8] sm:$0xff]  }
 0x340   :  { %v2858_v52 = vld [vmem:[#allocation7 + $0x28] ss:$2 sm:$0xf]  ;;  %v11146_v23 = vld [vmem:[%s14360_s5 + $0x100] sm:$0xff]  }
 0x341   :  { %2848 = vst.msk [vmem:[#allocation7 + $0x30] sm:$0xff] %vm65_vm3, %v2839_v3  ;;  %2849 = vst.msk [vmem:[#allocation7 + $0x38] sm:$0xff] %vm65_vm3, %v2840_v44  ;;  %v2877_v54 = vld [vmem:[#allocation4 + $0x9] sm:$0xff]  ;;  %v11143_v53 = vld [vmem:[%s14360_s5 + $0xf0] sm:$0xff]  }
 0x342   :  { %v12783_v34 = vld [vmem:[#allocation4 + $0x8] sm:$0xff]  ;;  %2851 = vst.msk [vmem:[#allocation7 + $0x40] sm:$0xf] %vm2850_vm4, %v2841_v60  ;;  %v2879_v33 = vpack.c.bf16 %v2877_v54, %v2876_v48  ;;  %2859 = vst.msk [vmem:[#allocation4 + $0x13] sm:$0xf] %vm2850_vm4, %v2858_v52  ;;  %v3523_v60 = vld [vmem:[#allocation4 + $0x1d] sm:$0xff] }
 0x343   :  { %v2866_v10 = vpack.c.bf16 %v12783_v34, %v2863_v40  ;;  %v3047_v51 = vld [vmem:[#allocation4 + $0xa] sm:$0xff]  ;;  %v3525_v40 = vpack.c.bf16 %v3523_v60, %v3523_v60  ;;  %v11147_v54 = vld [vmem:[%s14360_s5 + $0x108] sm:$0xff]   ;;  %v11148_v52 = vld [vmem:[%s14360_s5 + $0x110] sm:$0xff]  }
 0x344   :  { %10555 = vmatprep.mubr.msk.bf16.mxu0 %vm65_vm3, %v2879_v33  ;;  %v3141_v38 = vld [vmem:[#allocation4 + $0x6] sm:$0xff]  ;;  %v3049_v15 = vpack.c.bf16 %v3047_v51, %v3046_v47 }
 0x345   :  { %10567 = vmatprep.mubr.msk.bf16.mxu1 %vm65_vm3, %v2866_v10  ;;  %v3236_v16 = vld [vmem:[#allocation4 + $0x7] sm:$0xff]  ;;  %v3618_v10 = vld [vmem:[#allocation4 + $0x1e] sm:$0xff] }
 0x346   :  { %v11145_v3 = vld [vmem:[%s14360_s5 + $0xf8] sm:$0xff]   ;;  %v3620_v51 = vpack.c.bf16 %v3618_v10, %v3618_v10 }
 0x347   :  { %v11149_v33 = vld [vmem:[%s14360_s5 + $0x118] sm:$0xff]  }
 0x348   :  { %v11157_v47 = vld [vmem:[%s14362_s7 + $0x18] sm:$0xff]  }
 0x349   :  { %v2878_v2 = vld [vmem:[#allocation4 + $0x11] sm:$0xff] }
 0x34a   :  { %v2865_v25 = vld [vmem:[#allocation4 + $0x10] sm:$0xff]  ;;  %v2880_v62 = vpack.c.bf16 %v2878_v2, %v2878_v2  ;;  %v11150_v2 = vld [vmem:[%s14362_s7 + $0x28] sm:$0xff]  }
 0x34b   :  { %v12790_v4 = vld [vmem:[#allocation4 + $0xe] sm:$0xff]  ;;  %v2867_v1 = vpack.c.bf16 %v2865_v25, %v2865_v25  ;;  %v3334_v7 = vpack.c.bf16 %v2865_v25, %v12783_v34 }
 0x34c   :  { %v3144_v36 = vpack.c.bf16 %v12790_v4, %v3141_v38  ;;  %v2861_v46 = vld [vmem:[#allocation7 + $0x3c] ss:$2 sm:$0xf]  ;;  %10556 = vmatmul.mubr.msk.bf16.vlgmr.msra.gmra.mrb[180].mxu0 %vm65_vm3, %v2880_v62  ;;  %v3426_v12 = vld [vmem:[#allocation4 + $0xc] sm:$0xff] }
 0x34d   :  { %2862 = vst.msk [vmem:[#allocation4 + $0x19] sm:$0xf] %vm2850_vm4, %v2861_v46  ;;  %10568 = vmatmul.mubr.msk.bf16.vlgmr.msra.gmra.mrb[180].mxu1 %vm65_vm3, %v2867_v1  ;;  %10572 = vmatpush3.bf16.msra.mxu0 %v12715_v42  ;;  %v11128_v42 = vld [vmem:[%s14360_s5 + $0x58] sm:$0xff]   ;;  %v11151_v25 = vld [vmem:[%s14362_s7] sm:$0xff]   ;;  %v11153_v62 = vld [vmem:[%s14362_s7 + $0x8] sm:$0xff]   ;;  %vm5789_vm4 = vcmask 1041408  }
 0x34e   :  { %10584 = vmatpush3.bf16.msra.mxu1 %v12720_v5  ;;  %10579 = vmatprep.mubr.msk.bf16.mxu0 %vm65_vm3, %v3049_v15  ;;  %v11129_v5 = vld [vmem:[%s14360_s5 + $0x78] sm:$0xff]   ;;  %v11156_v46 = vld [vmem:[%s14362_s7 + $0x40] sm:$0xff]   ;;  %v12935_v15 = vld [vmem:[%s14362_s7 + $0x50] sm:$0xff]  }
 0x34f   :  { %10591 = vmatprep.mubr.msk.bf16.mxu1 %vm65_vm3, %v3144_v36  ;;  %10573 = vmatprep.subr.bf16.mxu0 %v11124_v50  ;;  %v3237_v18 = vld [vmem:[#allocation4 + $0xf] sm:$0xff]  ;;  %v11155_v36 = vld [vmem:[%s14362_s7 + $0x10] sm:$0xff]  }
 0x350   :  { %10585 = vmatprep.subr.bf16.mxu1 %v11125_v61  ;;  %v3239_v30 = vpack.c.bf16 %v3237_v18, %v3236_v16  ;;  %v3521_v39 = vld [vmem:[#allocation4 + $0xd] sm:$0xff] }
 0x351   :  { %10574 = vmatpush3.bf16.msra.mxu0 %v11124_v50  ;;  %v12897_v38 = vld [vmem:[#allocation6 + $0x1f] sm:$0xff]  ;;  %v11158_v50 = vld [vmem:[%s14362_s7 + $0x48] sm:$0xff]  }
 0x352   :  { %10586 = vmatpush3.bf16.msra.mxu1 %v11125_v61  ;;  %10575 = vmatprep.subr.bf16.mxu0 %v11126_v19  ;;  %80 = vst.msk [vmem:[#allocation5 + $0x1f] sm:$0xff] %vm79_vm5, %v12897_v38  ;;  %v11154_v1 = vld [vmem:[%s14362_s7 + $0x38] sm:$0xff]   ;;  %v11159_v61 = vld [vmem:[%s14362_s7 + $0x20] sm:$0xff]  }
 0x353   :  { %10587 = vmatprep.subr.bf16.mxu1 %v11127_v29 }
 0x354   :  { %v3048_v56 = vld [vmem:[#allocation4 + $0x12] sm:$0xff]  ;;  %v3428_v44 = vld [vmem:[#allocation4 + $0x1c] sm:$0xff] }
 0x355   :  { %10576 = vmatpush3.bf16.msra.mxu0 %v11126_v19  ;;  %v12824_v14 = vld [vmem:[#allocation4 + $0x16] sm:$0xff]  ;;  %v3050_v63 = vpack.c.bf16 %v3048_v56, %v3048_v56  ;;  %v3430_v48 = vpack.c.bf16 %v3428_v44, %v3428_v44  ;;  %v12940_v19 = vld [vmem:[%s14362_s7 + $0x78] sm:$0xff]   ;;  %v12945_v44 = vmul.u32.u64.low 2863311531, %v12096_v32  ;;  %v12946_v60 = vmul.u32.u64.high 2863311531, %v12096_v32, %v12945_v44 }
 0x356   :  { %10588 = vmatpush3.bf16.msra.mxu1 %v11127_v29  ;;  %10577 = vmatprep.subr.bf16.mxu0 %v11128_v42  ;;  %v3145_v28 = vpack.c.bf16 %v12824_v14, %v12824_v14  ;;  %v3238_v11 = vld [vmem:[#allocation4 + $0x17] sm:$0xff]  ;;  %v3619_v34 = vpack.c.bf16 %v12824_v14, %v12790_v4  ;;  %v11152_v4 = vld [vmem:[%s14362_s7 + $0x30] sm:$0xff]  }
 0x357   :  { %10589 = vmatprep.subr.bf16.mxu1 %v11129_v5  ;;  %v3333_v37 = vld [vmem:[#allocation4 + $0x18] sm:$0xff]  ;;  %v3240_v17 = vpack.c.bf16 %v3238_v11, %v3238_v11 }
 0x358   :  { %v3427_v41 = vld [vmem:[#allocation4 + $0x14] sm:$0xff]  ;;  %v3335_v59 = vpack.c.bf16 %v3333_v37, %v3333_v37 }
 0x359   :  { %10578 = vmatpush3.bf16.msra.mxu0 %v11128_v42  ;;  %v3522_v6 = vld [vmem:[#allocation4 + $0x15] sm:$0xff]  ;;  %v3429_v13 = vpack.c.bf16 %v3427_v41, %v3426_v12 }
 0x35a   :  { %10590 = vmatpush3.bf16.msra.mxu1 %v11129_v5  ;;  %10595 = vmatprep.subr.bf16.mxu0 %v11130_v22  ;;  %v3524_v57 = vpack.c.bf16 %v3522_v6, %v3521_v39 }
 0x35b   :  { %10607 = vmatprep.subr.bf16.mxu1 %v11131_v58 }
 0x35c   :  { %10580 = vmatmul.mubr.msk.bf16.vlgmr.msra.gmra.mrb[184].mxu0 %vm65_vm3, %v3050_v63 }
 0x35d   :  { %10592 = vmatmul.mubr.msk.bf16.vlgmr.msra.gmra.mrb[184].mxu1 %vm65_vm3, %v3145_v28  ;;  %10596 = vmatpush3.bf16.msra.mxu0 %v11130_v22 }
 0x35e   :  { %10603 = vmatprep.mubr.msk.bf16.mxu0 %vm65_vm3, %v3239_v30  ;;  %10608 = vmatpush3.bf16.msra.mxu1 %v11131_v58 }
 0x35f   :  { %10615 = vmatprep.mubr.msk.bf16.mxu1 %vm65_vm3, %v3334_v7  ;;  %10597 = vmatprep.subr.bf16.mxu0 %v11132_v24 }
 0x360   :  { %10609 = vmatprep.subr.bf16.mxu1 %v11133_v31 }
 0x361   :  { %10598 = vmatpush3.bf16.msra.mxu0 %v11132_v24 }
 0x362   :  { %10610 = vmatpush3.bf16.msra.mxu1 %v11133_v31  ;;  %10599 = vmatprep.subr.bf16.mxu0 %v11134_v20 }
 0x363   :  { %10611 = vmatprep.subr.bf16.mxu1 %v11135_v55 }
 0x365   :  { %10600 = vmatpush3.bf16.msra.mxu0 %v11134_v20 }
 0x366   :  { %10612 = vmatpush3.bf16.msra.mxu1 %v11135_v55  ;;  %10601 = vmatprep.subr.bf16.mxu0 %v11136_v43 }
 0x367   :  { %10613 = vmatprep.subr.bf16.mxu1 %v11137_v21 }
 0x369   :  { %10602 = vmatpush3.bf16.msra.mxu0 %v11136_v43 }
 0x36a   :  { %10614 = vmatpush3.bf16.msra.mxu1 %v11137_v21  ;;  %10619 = vmatprep.subr.bf16.mxu0 %v11138_v8 }
 0x36b   :  { %10631 = vmatprep.subr.bf16.mxu1 %v11139_v0 }
 0x36c   :  { %10604 = vmatmul.mubr.msk.bf16.vlgmr.msra.gmra.mrb[188].mxu0 %vm65_vm3, %v3240_v17 }
 0x36d   :  { %10616 = vmatmul.mubr.msk.bf16.vlgmr.msra.gmra.mrb[188].mxu1 %vm65_vm3, %v3335_v59  ;;  %10620 = vmatpush3.bf16.msra.mxu0 %v11138_v8 }
 0x36e   :  { %10627 = vmatprep.mubr.msk.bf16.mxu0 %vm65_vm3, %v3429_v13  ;;  %10639 = vmatprep.mubr.msk.bf16.mxu1 %vm65_vm3, %v3524_v57 }
 0x36f   :  { %10632 = vmatpush3.bf16.msra.mxu1 %v11139_v0  ;;  %10621 = vmatprep.subr.bf16.mxu0 %v11140_v45 }
 0x370   :  { %10633 = vmatprep.subr.bf16.mxu1 %v11141_v35 }
 0x371   :  { %10622 = vmatpush3.bf16.msra.mxu0 %v11140_v45 }
 0x372   :  { %10623 = vmatprep.subr.bf16.mxu0 %v11142_v26 }
 0x373   :  { %10634 = vmatpush3.bf16.msra.mxu1 %v11141_v35 }
 0x374   :  { %10635 = vmatprep.subr.bf16.mxu1 %v11143_v53 }
 0x375   :  { %10624 = vmatpush3.bf16.msra.mxu0 %v11142_v26 }
 0x376   :  { %10625 = vmatprep.subr.bf16.mxu0 %v11144_v49 }
 0x377   :  { %10636 = vmatpush3.bf16.msra.mxu1 %v11143_v53 }
 0x378   :  { %10637 = vmatprep.subr.bf16.mxu1 %v11145_v3 }
 0x379   :  { %10626 = vmatpush3.bf16.msra.mxu0 %v11144_v49 }
 0x37a   :  { %10643 = vmatprep.subr.bf16.mxu0 %v11146_v23 }
 0x37b   :  { %10638 = vmatpush3.bf16.msra.mxu1 %v11145_v3 }
 0x37c   :  { %10628 = vmatmul.mubr.msk.bf16.vlgmr.msra.gmra.mrb[192].mxu0 %vm65_vm3, %v3430_v48  ;;  %10655 = vmatprep.subr.bf16.mxu1 %v11150_v2 }
 0x37d   :  { %10644 = vmatpush3.bf16.msra.mxu0 %v11146_v23  ;;  %10651 = vmatprep.mubr.msk.bf16.mxu0 %vm65_vm3, %v3619_v34 }
 0x37e   :  { %10640 = vmatmul.mubr.msk.bf16.vlgmr.msra.gmra.mrb[192].mxu1 %vm65_vm3, %v3525_v40  ;;  %10645 = vmatprep.subr.bf16.mxu0 %v11147_v54  ;;  %v12949_v48 = vmul.u32.u64.low 2863311531, %v12074_v9  ;;  %v12950_v40 = vmul.u32.u64.high 2863311531, %v12074_v9, %v12949_v48 }
 0x37f   :  { %10656 = vmatpush3.bf16.msra.mxu1 %v11150_v2 }
 0x380   :  { %10657 = vmatprep.subr.bf16.mxu1 %v11152_v4  ;;  %v293_v10 = vshrl.u32 %v12950_v40, 2 }
 0x381   :  { %10646 = vmatpush3.bf16.msra.mxu0 %v11147_v54 }
 0x382   :  { %10647 = vmatprep.subr.bf16.mxu0 %v11148_v52 }
 0x383   :  { %10658 = vmatpush3.bf16.msra.mxu1 %v11152_v4 }
 0x384   :  { %10659 = vmatprep.subr.bf16.mxu1 %v11154_v1 }
 0x385   :  { %10648 = vmatpush3.bf16.msra.mxu0 %v11148_v52  ;;  %v12953_v34 = vmul.u32.u64.low 2863311531, %v12081_v27  ;;  %v12954_v52 = vmul.u32.u64.high 2863311531, %v12081_v27, %v12953_v34 }
 0x386   :  { %10649 = vmatprep.subr.bf16.mxu0 %v11149_v33 }
 0x387   :  { %10660 = vmatpush3.bf16.msra.mxu1 %v11154_v1  ;;  %v294_v1 = vmul.u32 6, %v293_v10 }
 0x388   :  { %10661 = vmatprep.subr.bf16.mxu1 %v11156_v46 }
 0x389   :  { %10650 = vmatpush3.bf16.msra.mxu0 %v11149_v33  ;;  %v315_v33 = vshrl.u32 %v12946_v60, 2 }
 0x38a   :  { %10669 = vmatprep.subr.bf16.mxu0 %v11151_v25 }
 0x38b   :  { %10662 = vmatpush3.bf16.msra.mxu1 %v11156_v46 }
 0x38c   :  { %10652 = vmatmul.mubr.msk.bf16.vlgmr.msra.gmra.mrb[196].mxu0 %vm65_vm3, %v3620_v51  ;;  %vm77_vm3 = vcmask 653312   ;;  %10663 = vmatprep.subr.bf16.mxu1 %v11158_v50  ;;  %v304_v51 = vshrl.u32 %v12954_v52, 2 }
 0x38d   :  { %10670 = vmatpush3.bf16.msra.mxu0 %v11151_v25  ;;  %78 = vst.msk [vmem:[#allocation5] sm:$0x7f] %vm77_vm3, %v12897_v38  ;;  %v316_v25 = vmul.u32 6, %v315_v33  ;;  %v11162_v33 = vld [vmem:[%s14362_s7 + $0x58] sm:$0xff]  }
 0x38e   :  { %10671 = vmatprep.subr.bf16.mxu0 %v11153_v62 }
 0x38f   :  { %10664 = vmatpush3.bf16.msra.mxu1 %v11158_v50 }
 0x390   :  { %10683 = vmatprep.subr.bf16.mxu1 %v12935_v15 }
 0x391   :  { %10672 = vmatpush3.bf16.msra.mxu0 %v11153_v62 }
 0x392   :  { %10673 = vmatprep.subr.bf16.mxu0 %v11155_v36 }
 0x395   :  { %10674 = vmatpush3.bf16.msra.mxu0 %v11155_v36 }
 0x396   :  { %10675 = vmatprep.subr.bf16.mxu0 %v11157_v47 }
 0x399   :  { %10676 = vmatpush3.bf16.msra.mxu0 %v11157_v47 }
 0x39a   :  { %10677 = vmatprep.subr.bf16.mxu0 %v11159_v61 }
 0x39d   :  { %10678 = vmatpush3.bf16.msra.mxu0 %v11159_v61 }
 0x39e   :  { %10697 = vmatprep.subr.bf16.mxu0 %v12940_v19 }
 0x41f   :  { %v10557_v29 = vpop.f32.mrb[180].mxu0 }
 0x420   :  { %v10569_v42 = vpop.f32.mrb[180].mxu1  ;;  %v2954_v22 = vpop.f32.mrb[181].mxu0 }
 0x421   :  { %v3041_v5 = vadd.f32 %v10569_v42, %v10557_v29  ;;  %v3032_v58 = vpop.f32.mrb[181].mxu1  ;;  %v10558_v14 = vpop.f32.mrb[182].mxu0  ;;  %v305_v42 = vmul.u32 6, %v304_v51 }
 0x422   :  { %v3033_v56 = vadd.f32 %v3032_v58, %v2954_v22  ;;  %v10570_v18 = vpop.f32.mrb[182].mxu1  ;;  %v2957_v63 = vpop.f32.mrb[183].mxu0 }
 0x423   :  { %v3035_v28 = vpop.f32.mrb[183].mxu1  ;;  %v295_v18 = vsub.s32 %v12074_v9, %v294_v1  ;;  %v11165_v1 = vld [vmem:[%s14362_s7 + $0x88] sm:$0xff]  }
 0x424   :  { %v3036_v16 = vadd.f32 %v3035_v28, %v2957_v63  ;;  %v306_v28 = vsub.s32 %v12081_v27, %v305_v42 }
 0x425   :  { %vm320_vm8 = vcmp.ne.s32.totalorder %v295_v18, 0  ;;  %vm323_vm9 = vcmp.lt.s32.totalorder %v295_v18, 0 }
 0x426   :  { %vm321_vm11 = vcmp.ne.s32.totalorder %v306_v28, 0  ;;  %vm324_vm12 = vcmp.lt.s32.totalorder %v306_v28, 0  ;;  %vm326_vm13 = vmand %vm323_vm9, %vm320_vm8 }
 0x427   :  { %vm327_vm14 = vmand %vm324_vm12, %vm321_vm11 }
 0x42f   :  { %v10581_v30 = vpop.f32.mrb[184].mxu0 }
 0x430   :  { %v10593_v24 = vpop.f32.mrb[184].mxu1  ;;  %v3140_v31 = vadd.f32 %v10581_v30, %v3041_v5  ;;  %v3124_v7 = vpop.f32.mrb[185].mxu0  ;;  %v329_v30 = vadd.s32 6, %v295_v18 }
 0x431   :  { %v3219_v20 = vpop.f32.mrb[185].mxu1  ;;  %v3138_v55 = vadd.f32 %v3124_v7, %v3033_v56  ;;  %v10582_v43 = vpop.f32.mrb[186].mxu0  ;;  %v317_v56 = vsub.s32 %v12096_v32, %v316_v25 }
 0x432   :  { %v10594_v21 = vpop.f32.mrb[186].mxu1  ;;  %v3235_v8 = vadd.f32 %v10593_v24, %v3140_v31  ;;  %v3127_v11 = vpop.f32.mrb[187].mxu0  ;;  %v330_v24 = vadd.s32 6, %v306_v28  ;;  %v332_v32 = vsel %vm326_vm13, %v329_v30, %v295_v18  ;;  %v11173_v18 = vld [vmem:[%s14362_s7 + $0xd0] sm:$0xff]   ;;  %v11176_v30 = vld [vmem:[%s14362_s7 + $0xb8] sm:$0xff]  }
 0x433   :  { %v3222_v0 = vpop.f32.mrb[187].mxu1  ;;  %v3233_v37 = vadd.f32 %v3219_v20, %v3138_v55  ;;  %v3139_v41 = vadd.f32 %v3127_v11, %v3036_v16  ;;  %vm322_vm6 = vcmp.ne.s32.totalorder %v317_v56, 0  ;;  %vm325_vm7 = vcmp.lt.s32.totalorder %v317_v56, 0  ;;  %v8837_v20 = vld [vmem:[%s14363_s6] ss:$0 sm:$0xff] }
 0x434   :  { %v331_v16 = vadd.s32 6, %v317_v56  ;;  %vm328_vm10 = vmand %vm325_vm7, %vm322_vm6  ;;  %v333_v43 = vsel %vm327_vm14, %v330_v24, %v306_v28  ;;  %vm335_vm0 = vcmp.lt.s32.totalorder %v332_v32, 4  ;;  %v11174_v28 = vld [vmem:[%s14362_s7 + $0xb0] sm:$0xff]   ;;  %v11177_v24 = vld [vmem:[%s14362_s7 + $0xe0] sm:$0xff]  }
 0x435   :  { %v3234_v6 = vadd.f32 %v3222_v0, %v3139_v41  ;;  %vm336_vm1 = vcmp.lt.s32.totalorder %v333_v43, 4  ;;  %v11179_v32 = vld [vmem:[%s14362_s7 + $0xe8] sm:$0xff]  }
 0x436   :  { %v334_v31 = vsel %vm328_vm10, %v331_v16, %v317_v56  ;;  %v11175_v16 = vld [vmem:[%s14362_s7 + $0xd8] sm:$0xff]  }
 0x437   :  { %vm337_vm15 = vcmp.lt.s32.totalorder %v334_v31, 4  ;;  %v11178_v31 = vld [vmem:[%s14362_s7 + $0xc0] sm:$0xff]  }
 0x43f   :  { %v10605_v17 = vpop.f32.mrb[188].mxu0 }
 0x440   :  { %v3330_v59 = vadd.f32 %v10605_v17, %v3235_v8  ;;  %v10617_v12 = vpop.f32.mrb[188].mxu1  ;;  %v3314_v39 = vpop.f32.mrb[189].mxu0 }
 0x441   :  { %v3328_v45 = vadd.f32 %v3314_v39, %v3233_v37  ;;  %v3409_v13 = vpop.f32.mrb[189].mxu1  ;;  %v10606_v57 = vpop.f32.mrb[190].mxu0  ;;  %v12966_v37 = vsel %vm337_vm15, 1.0, %v12897_v38 }
 0x442   :  { %v3425_v35 = vadd.f32 %v10617_v12, %v3330_v59  ;;  %v10618_v26 = vpop.f32.mrb[190].mxu1  ;;  %v3317_v53 = vpop.f32.mrb[191].mxu0  ;;  %v12969_v59 = vsel %vm335_vm0, 1.0, %v12897_v38 }
 0x443   :  { %v3423_v49 = vadd.f32 %v3409_v13, %v3328_v45  ;;  %v3329_v3 = vadd.f32 %v3317_v53, %v3234_v6  ;;  %v3412_v23 = vpop.f32.mrb[191].mxu1  ;;  %v12973_v13 = vsel %vm336_vm1, 1.0, %v12897_v38 }
 0x445   :  { %v3424_v54 = vadd.f32 %v3412_v23, %v3329_v3 }
 0x44f   :  { %v10629_v2 = vpop.f32.mrb[192].mxu0 }
 0x450   :  { %v3520_v4 = vadd.f32 %v10629_v2, %v3425_v35  ;;  %v3504_v62 = vpop.f32.mrb[193].mxu0  ;;  %v11163_v2 = vld [vmem:[%s14362_s7 + $0x80] sm:$0xff]  }
 0x451   :  { %v3518_v36 = vadd.f32 %v3504_v62, %v3423_v49  ;;  %v10630_v46 = vpop.f32.mrb[194].mxu0  ;;  %v10641_v47 = vpop.f32.mrb[192].mxu1  ;;  %v11164_v62 = vld [vmem:[%s14362_s7 + $0x60] sm:$0xff]  }
 0x452   :  { %v3615_v50 = vadd.f32 %v10641_v47, %v3520_v4  ;;  %v3507_v61 = vpop.f32.mrb[195].mxu0  ;;  %v3599_v29 = vpop.f32.mrb[193].mxu1  ;;  %v11169_v46 = vld [vmem:[%s14362_s7 + $0x98] sm:$0xff]   ;;  %v11170_v47 = vld [vmem:[%s14362_s7 + $0xa0] sm:$0xff]  }
 0x453   :  { %v3519_v5 = vadd.f32 %v3507_v61, %v3424_v54  ;;  %v3613_v22 = vadd.f32 %v3599_v29, %v3518_v36  ;;  %v10642_v58 = vpop.f32.mrb[194].mxu1  ;;  %v11168_v36 = vld [vmem:[%s14362_s7 + $0x70] sm:$0xff]  }
 0x454   :  { %v3602_v14 = vpop.f32.mrb[195].mxu1 }
 0x455   :  { %v3614_v63 = vadd.f32 %v3602_v14, %v3519_v5  ;;  %v11172_v14 = vld [vmem:[%s14362_s7 + $0xa8] sm:$0xff]  }
 0x45f   :  { %v10653_v7 = vpop.f32.mrb[196].mxu0 }
 0x460   :  { %v3710_v27 = vadd.f32 %v10653_v7, %v3615_v50  ;;  %v3694_v55 = vpop.f32.mrb[197].mxu0  ;;  %v11171_v50 = vld [vmem:[%s14362_s7 + $0xc8] sm:$0xff]   ;;  %v11180_v7 = vld [vmem:[%s14362_s7 + $0xf0] sm:$0xff]  }
 0x461   :  { %v3708_v21 = vadd.f32 %v3694_v55, %v3613_v22  ;;  %v10654_v8 = vpop.f32.mrb[198].mxu0 }
 0x462   :  { %v3720_v11 = vadd.f32 %v8837_v20, %v3710_v27  ;;  %v3697_v0 = vpop.f32.mrb[199].mxu0  ;;  %v11181_v27 = vld [vmem:[%s14362_s7 + $0x118] sm:$0xff]  }
 0x463   :  { %v3718_v41 = vadd.f32 %v8837_v20, %v3708_v21  ;;  %v3709_v6 = vadd.f32 %v3697_v0, %v3614_v63 }
 0x464   :  { %v3723_v17 = vmax.f32 %v3720_v11, 0.0 }
 0x465   :  { %v3721_v12 = vmax.f32 %v3718_v41, 0.0  ;;  %v3719_v39 = vadd.f32 %v8837_v20, %v3709_v6  ;;  %v11182_v6 = vld [vmem:[%s14362_s7 + $0xf8] sm:$0xff]  }
 0x466   :  { %v3726_v45 = vmul.f32 %v12966_v37, %v3723_v17 }
 0x467   :  { %v3724_v57 = vmul.f32 %v12969_v59, %v3721_v12  ;;  %v3722_v35 = vmax.f32 %v3719_v39, 0.0  ;;  %v11183_v12 = vld [vmem:[%s14362_s7 + $0x120] sm:$0xff]  }
 0x468   :  { %3729 = vst.msk [vmem:[#allocation5 + $0x17] sm:$0xff] %vm79_vm5, %v3726_v45  ;;  %v11184_v45 = vld [vmem:[%s14362_s7 + $0x100] sm:$0xff]  }
 0x469   :  { %3727 = vst.msk [vmem:[#allocation5 + $0x7] sm:$0xff] %vm79_vm5, %v3724_v57  ;;  %v3725_v26 = vmul.f32 %v12973_v13, %v3722_v35  ;;  %v11185_v57 = vld [vmem:[%s14362_s7 + $0x128] sm:$0xff]  }
 0x46a   :  { %v11186_v35 = vld [vmem:[%s14362_s7 + $0x108] sm:$0xff]  }
 0x46b   :  { %3728 = vst.msk [vmem:[#allocation5 + $0xf] sm:$0xff] %vm79_vm5, %v3725_v26  ;;  %v11187_v26 = vld [vmem:[%s14362_s7 + $0x130] sm:$0xff]  }
 0x46f   :  { %v4137_v20 = vld [vmem:[#allocation5 + $0x17] sm:$0xff] }
 0x470   :  { %v3745_v53 = vld [vmem:[#allocation5 + $0x1] sm:$0xff]  ;;  %v4240_v55 = vld [vmem:[#allocation5 + $0x18] sm:$0xff]  ;;  %v4139_v8 = vpack.c.bf16 %v4137_v20, %v4137_v20 }
 0x471   :  { %v3730_v49 = vld [vmem:[#allocation5] sm:$0xff]  ;;  %v4242_v41 = vpack.c.bf16 %v4240_v55, %v4240_v55 }
 0x472   :  { %v3746_v3 = vld [vmem:[#allocation5 + $0x9] sm:$0xff]  ;;  %v3747_v44 = vld [vmem:[#allocation5 + $0x11] sm:$0xff] }
 0x473   :  { %v12980_v23 = vld [vmem:[#allocation5 + $0x8] sm:$0xff]  ;;  %v3748_v60 = vpack.c.bf16 %v3746_v3, %v3745_v53  ;;  %v3749_v48 = vpack.c.bf16 %v3747_v44, %v3747_v44  ;;  %v3732_v40 = vld [vmem:[#allocation5 + $0x10] sm:$0xff]  ;;  %v11188_v53 = vld [vmem:[%s14362_s7 + $0x110] sm:$0xff]  }
 0x474   :  { %v3733_v38 = vpack.c.bf16 %v12980_v23, %v3730_v49  ;;  %v3930_v54 = vld [vmem:[#allocation5 + $0xa] sm:$0xff]  ;;  %v3734_v52 = vpack.c.bf16 %v3732_v40, %v3732_v40  ;;  %v3929_v10 = vld [vmem:[#allocation5 + $0x2] sm:$0xff]  ;;  %v3931_v61 = vld [vmem:[#allocation5 + $0x12] sm:$0xff]  ;;  %v4241_v63 = vpack.c.bf16 %v3732_v40, %v12980_v23 }
 0x475   :  { %v12983_v34 = vld [vmem:[#allocation5 + $0xe] sm:$0xff]  ;;  %10665 = vmatprep.mubr.msk.bf16.mxu1 %vm79_vm5, %v3748_v60  ;;  %v4032_v51 = vld [vmem:[#allocation5 + $0x6] sm:$0xff]  ;;  %v3932_v25 = vpack.c.bf16 %v3930_v54, %v3929_v10  ;;  %v13024_v29 = vld [vmem:[#allocation5 + $0x16] sm:$0xff]  ;;  %v3933_v5 = vpack.c.bf16 %v3931_v61, %v3931_v61 }
 0x476   :  { %10679 = vmatprep.mubr.msk.bf16.mxu0 %vm79_vm5, %v3733_v38  ;;  %10666 = vmatmul.mubr.msk.bf16.vlgmr.msra.gmra.mrb[196].mxu1 %vm79_vm5, %v3749_v48  ;;  %v4035_v4 = vpack.c.bf16 %v12983_v34, %v4032_v51  ;;  %v4136_v42 = vld [vmem:[#allocation5 + $0xf] sm:$0xff]  ;;  %v4036_v22 = vpack.c.bf16 %v13024_v29, %v13024_v29  ;;  %v4135_v58 = vld [vmem:[#allocation5 + $0x7] sm:$0xff]  ;;  %v4343_v23 = vld [vmem:[#allocation5 + $0x1c] sm:$0xff]  ;;  %v4550_v40 = vpack.c.bf16 %v13024_v29, %v12983_v34 }
 0x477   :  { %10680 = vmatmul.mubr.msk.bf16.vlgmr.msra.gmra.mrb[200].mxu0 %vm79_vm5, %v3734_v52  ;;  %10684 = vmatpush3.bf16.msra.mxu1 %v12935_v15  ;;  %v11166_v15 = vld [vmem:[%s14362_s7 + $0x68] sm:$0xff]   ;;  %v4138_v56 = vpack.c.bf16 %v4136_v42, %v4135_v58  ;;  %v11189_v49 = vld [vmem:[%s14362_s7 + $0x138] sm:$0xff]   ;;  %v11190_v3 = vld [vmem:[%s14362_s7 + $0x140] sm:$0xff]   ;;  %v4345_v60 = vpack.c.bf16 %v4343_v23, %v4343_v23 }
 0x478   :  { %10698 = vmatpush3.bf16.msra.mxu0 %v12940_v19  ;;  %10693 = vmatprep.mubr.msk.bf16.mxu1 %vm79_vm5, %v3932_v25  ;;  %v11167_v19 = vld [vmem:[%s14362_s7 + $0x90] sm:$0xff]   ;;  %v4341_v43 = vld [vmem:[#allocation5 + $0xc] sm:$0xff]  ;;  %v11193_v52 = vld [vmem:[%s14362_s7 + $0x158] sm:$0xff]  }
 0x479   :  { %10707 = vmatprep.mubr.msk.bf16.mxu0 %vm79_vm5, %v4035_v4  ;;  %10685 = vmatprep.subr.bf16.mxu1 %v11162_v33  ;;  %v4342_v21 = vld [vmem:[#allocation5 + $0x14] sm:$0xff]  ;;  %v4446_v44 = vld [vmem:[#allocation5 + $0x1d] sm:$0xff]  ;;  %v11194_v34 = vld [vmem:[%s14362_s7 + $0x160] sm:$0xff]  }
 0x47a   :  { %10699 = vmatprep.subr.bf16.mxu0 %v11163_v2  ;;  %v4444_v11 = vld [vmem:[#allocation5 + $0xd] sm:$0xff]  ;;  %v4445_v0 = vld [vmem:[#allocation5 + $0x15] sm:$0xff]  ;;  %v4344_v17 = vpack.c.bf16 %v4342_v21, %v4341_v43  ;;  %v4448_v48 = vpack.c.bf16 %v4446_v44, %v4446_v44  ;;  %v11209_v42 = vld [vmem:[%s14364_s9 + $0x78] sm:$0xff]  }
 0x47b   :  { %10686 = vmatpush3.bf16.msra.mxu1 %v11162_v33  ;;  %v4447_v39 = vpack.c.bf16 %v4445_v0, %v4444_v11  ;;  %v11191_v38 = vld [vmem:[%s14362_s7 + $0x148] sm:$0xff]   ;;  %v11192_v54 = vld [vmem:[%s14362_s7 + $0x150] sm:$0xff]   ;;  %v11195_v51 = vld [vmem:[%s14364_s9 + $0x40] sm:$0xff]  }
 0x47c   :  { %10700 = vmatpush3.bf16.msra.mxu0 %v11163_v2  ;;  %10687 = vmatprep.subr.bf16.mxu1 %v11164_v62  ;;  %v4549_v33 = vld [vmem:[#allocation5 + $0x1e] sm:$0xff]  ;;  %v11196_v2 = vld [vmem:[%s14364_s9] sm:$0xff]   ;;  %v11197_v25 = vld [vmem:[%s14364_s9 + $0x48] sm:$0xff]  }
 0x47d   :  { %10701 = vmatprep.subr.bf16.mxu0 %v11165_v1  ;;  %v4551_v10 = vpack.c.bf16 %v4549_v33, %v4549_v33  ;;  %v11198_v4 = vld [vmem:[%s14364_s9 + $0x8] sm:$0xff]   ;;  %v11207_v61 = vld [vmem:[%s14364_s9 + $0x70] sm:$0xff]   ;;  %v13168_v58 = vld [vmem:[%s14364_s9 + $0xc0] sm:$0xff]  }
 0x47e   :  { %v11208_v29 = vld [vmem:[%s14364_s9 + $0x30] sm:$0xff]  }
 0x47f   :  { %10688 = vmatpush3.bf16.msra.mxu1 %v11164_v62  ;;  %v11199_v62 = vld [vmem:[%s14364_s9 + $0x50] sm:$0xff]  }
 0x480   :  { %10702 = vmatpush3.bf16.msra.mxu0 %v11165_v1  ;;  %10689 = vmatprep.subr.bf16.mxu1 %v11166_v15  ;;  %v11200_v1 = vld [vmem:[%s14364_s9 + $0x10] sm:$0xff]  }
 0x481   :  { %10703 = vmatprep.subr.bf16.mxu0 %v11167_v19 }
 0x483   :  { %10690 = vmatpush3.bf16.msra.mxu1 %v11166_v15  ;;  %v11201_v15 = vld [vmem:[%s14364_s9 + $0x58] sm:$0xff]  }
 0x484   :  { %10704 = vmatpush3.bf16.msra.mxu0 %v11167_v19  ;;  %10691 = vmatprep.subr.bf16.mxu1 %v11168_v36  ;;  %v11202_v19 = vld [vmem:[%s14364_s9 + $0x18] sm:$0xff]  }
 0x485   :  { %10705 = vmatprep.subr.bf16.mxu0 %v11169_v46 }
 0x487   :  { %10692 = vmatpush3.bf16.msra.mxu1 %v11168_v36  ;;  %v11203_v36 = vld [vmem:[%s14364_s9 + $0x60] sm:$0xff]  }
 0x488   :  { %10706 = vmatpush3.bf16.msra.mxu0 %v11169_v46  ;;  %10711 = vmatprep.subr.bf16.mxu1 %v11170_v47  ;;  %v11204_v46 = vld [vmem:[%s14364_s9 + $0x20] sm:$0xff]  }
 0x489   :  { %10725 = vmatprep.subr.bf16.mxu0 %v11171_v50 }
 0x48a   :  { %10694 = vmatmul.mubr.msk.bf16.vlgmr.msra.gmra.mrb[200].mxu1 %vm79_vm5, %v3933_v5  ;;  %v11210_v5 = vld [vmem:[%s14364_s9 + $0x38] sm:$0xff]  }
 0x48b   :  { %10708 = vmatmul.mubr.msk.bf16.vlgmr.msra.gmra.mrb[204].mxu0 %vm79_vm5, %v4036_v22  ;;  %10712 = vmatpush3.bf16.msra.mxu1 %v11170_v47  ;;  %v11205_v47 = vld [vmem:[%s14364_s9 + $0x68] sm:$0xff]   ;;  %v13163_v22 = vld [vmem:[%s14364_s9 + $0x80] sm:$0xff]  }
 0x48c   :  { %10721 = vmatprep.mubr.msk.bf16.mxu1 %vm79_vm5, %v4138_v56  ;;  %10726 = vmatpush3.bf16.msra.mxu0 %v11171_v50  ;;  %v11206_v50 = vld [vmem:[%s14364_s9 + $0x28] sm:$0xff]  }
 0x48d   :  { %10735 = vmatprep.mubr.msk.bf16.mxu0 %vm79_vm5, %v4241_v63  ;;  %10713 = vmatprep.subr.bf16.mxu1 %v11172_v14 }
 0x48e   :  { %10727 = vmatprep.subr.bf16.mxu0 %v11173_v18 }
 0x48f   :  { %10714 = vmatpush3.bf16.msra.mxu1 %v11172_v14 }
 0x490   :  { %10728 = vmatpush3.bf16.msra.mxu0 %v11173_v18  ;;  %10715 = vmatprep.subr.bf16.mxu1 %v11174_v28 }
 0x491   :  { %10729 = vmatprep.subr.bf16.mxu0 %v11175_v16 }
 0x493   :  { %10716 = vmatpush3.bf16.msra.mxu1 %v11174_v28 }
 0x494   :  { %10730 = vmatpush3.bf16.msra.mxu0 %v11175_v16  ;;  %10717 = vmatprep.subr.bf16.mxu1 %v11176_v30 }
 0x495   :  { %10731 = vmatprep.subr.bf16.mxu0 %v11177_v24 }
 0x497   :  { %10718 = vmatpush3.bf16.msra.mxu1 %v11176_v30 }
 0x498   :  { %10732 = vmatpush3.bf16.msra.mxu0 %v11177_v24  ;;  %10719 = vmatprep.subr.bf16.mxu1 %v11178_v31 }
 0x499   :  { %10733 = vmatprep.subr.bf16.mxu0 %v11179_v32 }
 0x49b   :  { %10720 = vmatpush3.bf16.msra.mxu1 %v11178_v31 }
 0x49c   :  { %10734 = vmatpush3.bf16.msra.mxu0 %v11179_v32  ;;  %10739 = vmatprep.subr.bf16.mxu1 %v11180_v7 }
 0x49d   :  { %10753 = vmatprep.subr.bf16.mxu0 %v11181_v27 }
 0x49e   :  { %10722 = vmatmul.mubr.msk.bf16.vlgmr.msra.gmra.mrb[204].mxu1 %vm79_vm5, %v4139_v8 }
 0x49f   :  { %10736 = vmatmul.mubr.msk.bf16.vlgmr.msra.gmra.mrb[208].mxu0 %vm79_vm5, %v4242_v41  ;;  %10740 = vmatpush3.bf16.msra.mxu1 %v11180_v7 }
 0x4a0   :  { %10749 = vmatprep.mubr.msk.bf16.mxu1 %vm79_vm5, %v4344_v17  ;;  %10754 = vmatpush3.bf16.msra.mxu0 %v11181_v27 }
 0x4a1   :  { %10763 = vmatprep.mubr.msk.bf16.mxu0 %vm79_vm5, %v4447_v39  ;;  %10741 = vmatprep.subr.bf16.mxu1 %v11182_v6 }
 0x4a2   :  { %10755 = vmatprep.subr.bf16.mxu0 %v11183_v12 }
 0x4a3   :  { %10742 = vmatpush3.bf16.msra.mxu1 %v11182_v6 }
 0x4a4   :  { %10756 = vmatpush3.bf16.msra.mxu0 %v11183_v12  ;;  %10743 = vmatprep.subr.bf16.mxu1 %v11184_v45 }
 0x4a5   :  { %10757 = vmatprep.subr.bf16.mxu0 %v11185_v57 }
 0x4a7   :  { %10744 = vmatpush3.bf16.msra.mxu1 %v11184_v45 }
 0x4a8   :  { %10758 = vmatpush3.bf16.msra.mxu0 %v11185_v57  ;;  %10745 = vmatprep.subr.bf16.mxu1 %v11186_v35 }
 0x4a9   :  { %10759 = vmatprep.subr.bf16.mxu0 %v11187_v26 }
 0x4ab   :  { %10746 = vmatpush3.bf16.msra.mxu1 %v11186_v35 }
 0x4ac   :  { %10760 = vmatpush3.bf16.msra.mxu0 %v11187_v26  ;;  %10747 = vmatprep.subr.bf16.mxu1 %v11188_v53 }
 0x4ad   :  { %10761 = vmatprep.subr.bf16.mxu0 %v11189_v49 }
 0x4af   :  { %10748 = vmatpush3.bf16.msra.mxu1 %v11188_v53 }
 0x4b0   :  { %10762 = vmatpush3.bf16.msra.mxu0 %v11189_v49  ;;  %10767 = vmatprep.subr.bf16.mxu1 %v11190_v3 }
 0x4b1   :  { %10781 = vmatprep.subr.bf16.mxu0 %v11195_v51 }
 0x4b2   :  { %10750 = vmatmul.mubr.msk.bf16.vlgmr.msra.gmra.mrb[208].mxu1 %vm79_vm5, %v4345_v60 }
 0x4b3   :  { %10764 = vmatmul.mubr.msk.bf16.vlgmr.msra.gmra.mrb[212].mxu0 %vm79_vm5, %v4448_v48  ;;  %10768 = vmatpush3.bf16.msra.mxu1 %v11190_v3 }
 0x4b4   :  { %10777 = vmatprep.mubr.msk.bf16.mxu1 %vm79_vm5, %v4550_v40  ;;  %10769 = vmatprep.subr.bf16.mxu1 %v11191_v38 }
 0x4b5   :  { %10782 = vmatpush3.bf16.msra.mxu0 %v11195_v51 }
 0x4b6   :  { %10783 = vmatprep.subr.bf16.mxu0 %v11197_v25 }
 0x4b7   :  { %10770 = vmatpush3.bf16.msra.mxu1 %v11191_v38 }
 0x4b8   :  { %10771 = vmatprep.subr.bf16.mxu1 %v11192_v54 }
 0x4b9   :  { %10784 = vmatpush3.bf16.msra.mxu0 %v11197_v25 }
 0x4ba   :  { %10785 = vmatprep.subr.bf16.mxu0 %v11199_v62 }
 0x4bb   :  { %10772 = vmatpush3.bf16.msra.mxu1 %v11192_v54 }
 0x4bc   :  { %10773 = vmatprep.subr.bf16.mxu1 %v11193_v52 }
 0x4bd   :  { %10786 = vmatpush3.bf16.msra.mxu0 %v11199_v62 }
 0x4be   :  { %10787 = vmatprep.subr.bf16.mxu0 %v11201_v15 }
 0x4bf   :  { %10774 = vmatpush3.bf16.msra.mxu1 %v11193_v52 }
 0x4c0   :  { %10775 = vmatprep.subr.bf16.mxu1 %v11194_v34 }
 0x4c1   :  { %10788 = vmatpush3.bf16.msra.mxu0 %v11201_v15 }
 0x4c2   :  { %10789 = vmatprep.subr.bf16.mxu0 %v11203_v36 }
 0x4c3   :  { %10776 = vmatpush3.bf16.msra.mxu1 %v11194_v34 }
 0x4c4   :  { %10801 = vmatprep.subr.bf16.mxu1 %v11196_v2 }
 0x4c5   :  { %10790 = vmatpush3.bf16.msra.mxu0 %v11203_v36 }
 0x4c6   :  { %10778 = vmatmul.mubr.msk.bf16.vlgmr.msra.gmra.mrb[212].mxu1 %vm79_vm5, %v4551_v10  ;;  %10791 = vmatprep.subr.bf16.mxu0 %v11205_v47  ;;  %vm81_vm5 = vcmask 647168  }
 0x4c7   :  { %10802 = vmatpush3.bf16.msra.mxu1 %v11196_v2 }
 0x4c8   :  { %10803 = vmatprep.subr.bf16.mxu1 %v11198_v4 }
 0x4c9   :  { %10792 = vmatpush3.bf16.msra.mxu0 %v11205_v47 }
 0x4ca   :  { %10793 = vmatprep.subr.bf16.mxu0 %v11207_v61 }
 0x4cb   :  { %10804 = vmatpush3.bf16.msra.mxu1 %v11198_v4 }
 0x4cc   :  { %10805 = vmatprep.subr.bf16.mxu1 %v11200_v1 }
 0x4cd   :  { %10794 = vmatpush3.bf16.msra.mxu0 %v11207_v61  ;;  %v8981_v61 = vld [vmem:[%s14365_s8] ss:$0 sm:$0xff] }
 0x4ce   :  { %10795 = vmatprep.subr.bf16.mxu0 %v11209_v42 }
 0x4cf   :  { %10806 = vmatpush3.bf16.msra.mxu1 %v11200_v1 }
 0x4d0   :  { %10807 = vmatprep.subr.bf16.mxu1 %v11202_v19 }
 0x4d1   :  { %10796 = vmatpush3.bf16.msra.mxu0 %v11209_v42 }
 0x4d2   :  { %10821 = vmatprep.subr.bf16.mxu0 %v13163_v22 }
 0x4d3   :  { %10808 = vmatpush3.bf16.msra.mxu1 %v11202_v19 }
 0x4d4   :  { %10809 = vmatprep.subr.bf16.mxu1 %v11204_v46 }
 0x4d7   :  { %10810 = vmatpush3.bf16.msra.mxu1 %v11204_v46 }
 0x4d8   :  { %10811 = vmatprep.subr.bf16.mxu1 %v11206_v50 }
 0x4db   :  { %10812 = vmatpush3.bf16.msra.mxu1 %v11206_v50 }
 0x4dc   :  { %10813 = vmatprep.subr.bf16.mxu1 %v11208_v29 }
 0x4df   :  { %10814 = vmatpush3.bf16.msra.mxu1 %v11208_v29 }
 0x4e0   :  { %10815 = vmatprep.subr.bf16.mxu1 %v11210_v5 }
 0x4e3   :  { %10816 = vmatpush3.bf16.msra.mxu1 %v11210_v5 }
 0x4e4   :  { %10841 = vmatprep.subr.bf16.mxu1 %v13168_v58 }
 0x549   :  { %v10667_v56 = vpop.f32.mrb[196].mxu1 }
 0x54a   :  { %v10681_v14 = vpop.f32.mrb[200].mxu0  ;;  %v3831_v63 = vpop.f32.mrb[197].mxu1 }
 0x54b   :  { %v3924_v18 = vadd.f32 %v10681_v14, %v10667_v56  ;;  %v3915_v28 = vpop.f32.mrb[201].mxu0  ;;  %v10668_v30 = vpop.f32.mrb[198].mxu1 }
 0x54c   :  { %v3916_v16 = vadd.f32 %v3915_v28, %v3831_v63  ;;  %v10682_v24 = vpop.f32.mrb[202].mxu0  ;;  %v3834_v31 = vpop.f32.mrb[199].mxu1 }
 0x54d   :  { %v3918_v32 = vpop.f32.mrb[203].mxu0 }
 0x54e   :  { %v3919_v7 = vadd.f32 %v3918_v32, %v3834_v31 }
 0x55d   :  { %v10695_v20 = vpop.f32.mrb[200].mxu1 }
 0x55e   :  { %v10709_v27 = vpop.f32.mrb[204].mxu0  ;;  %v4031_v55 = vadd.f32 %v10695_v20, %v3924_v18  ;;  %v4015_v43 = vpop.f32.mrb[201].mxu1 }
 0x55f   :  { %v4118_v21 = vpop.f32.mrb[205].mxu0  ;;  %v4029_v8 = vadd.f32 %v4015_v43, %v3916_v16  ;;  %v10696_v11 = vpop.f32.mrb[202].mxu1 }
 0x560   :  { %v10710_v0 = vpop.f32.mrb[206].mxu0  ;;  %v4134_v41 = vadd.f32 %v10709_v27, %v4031_v55  ;;  %v4018_v6 = vpop.f32.mrb[203].mxu1 }
 0x561   :  { %v4121_v17 = vpop.f32.mrb[207].mxu0  ;;  %v4132_v12 = vadd.f32 %v4118_v21, %v4029_v8  ;;  %v4030_v39 = vadd.f32 %v4018_v6, %v3919_v7 }
 0x563   :  { %v4133_v45 = vadd.f32 %v4121_v17, %v4030_v39 }
 0x571   :  { %v10723_v57 = vpop.f32.mrb[204].mxu1 }
 0x572   :  { %v4237_v35 = vadd.f32 %v10723_v57, %v4134_v41  ;;  %v10737_v26 = vpop.f32.mrb[208].mxu0  ;;  %v4221_v53 = vpop.f32.mrb[205].mxu1 }
 0x573   :  { %v4235_v49 = vadd.f32 %v4221_v53, %v4132_v12  ;;  %v4324_v3 = vpop.f32.mrb[209].mxu0  ;;  %v10724_v23 = vpop.f32.mrb[206].mxu1  ;;  %v11213_v12 = vld [vmem:[%s14364_s9 + $0x88] sm:$0xff]  }
 0x574   :  { %v4340_v44 = vadd.f32 %v10737_v26, %v4237_v35  ;;  %v10738_v60 = vpop.f32.mrb[210].mxu0  ;;  %v4224_v38 = vpop.f32.mrb[207].mxu1  ;;  %v11214_v35 = vld [vmem:[%s14364_s9 + $0xc8] sm:$0xff]   ;;  %v11216_v23 = vld [vmem:[%s14364_s9 + $0xd0] sm:$0xff]  }
 0x575   :  { %v4338_v48 = vadd.f32 %v4324_v3, %v4235_v49  ;;  %v4236_v40 = vadd.f32 %v4224_v38, %v4133_v45  ;;  %v4327_v54 = vpop.f32.mrb[211].mxu0  ;;  %v11215_v3 = vld [vmem:[%s14364_s9 + $0x90] sm:$0xff]   ;;  %v11220_v60 = vld [vmem:[%s14364_s9 + $0xe0] sm:$0xff]   ;;  %v11221_v38 = vld [vmem:[%s14364_s9 + $0xa8] sm:$0xff]  }
 0x577   :  { %v4339_v52 = vadd.f32 %v4327_v54, %v4236_v40  ;;  %v11223_v40 = vld [vmem:[%s14364_s9 + $0xb0] sm:$0xff]  }
 0x578   :  { %v11224_v54 = vld [vmem:[%s14364_s9 + $0xf0] sm:$0xff]  }
 0x585   :  { %v10751_v34 = vpop.f32.mrb[208].mxu1 }
 0x586   :  { %v4443_v33 = vadd.f32 %v10751_v34, %v4340_v44  ;;  %v10765_v10 = vpop.f32.mrb[212].mxu0  ;;  %v4427_v51 = vpop.f32.mrb[209].mxu1  ;;  %v11219_v44 = vld [vmem:[%s14364_s9 + $0xa0] sm:$0xff]   ;;  %v11226_v34 = vld [vmem:[%s14364_s9 + $0xf8] sm:$0xff]  }
 0x587   :  { %v4441_v2 = vadd.f32 %v4427_v51, %v4338_v48  ;;  %v4530_v25 = vpop.f32.mrb[213].mxu0  ;;  %v10752_v4 = vpop.f32.mrb[210].mxu1  ;;  %v11222_v48 = vld [vmem:[%s14364_s9 + $0xe8] sm:$0xff]  }
 0x588   :  { %v4546_v62 = vadd.f32 %v10765_v10, %v4443_v33  ;;  %v10766_v1 = vpop.f32.mrb[214].mxu0  ;;  %v4430_v15 = vpop.f32.mrb[211].mxu1  ;;  %v11227_v33 = vld [vmem:[%s14364_s9 + $0x100] sm:$0xff]   ;;  %v11229_v4 = vld [vmem:[%s14364_s9 + $0x108] sm:$0xff]  }
 0x589   :  { %v4544_v19 = vadd.f32 %v4530_v25, %v4441_v2  ;;  %v4442_v36 = vadd.f32 %v4430_v15, %v4339_v52  ;;  %v4533_v46 = vpop.f32.mrb[215].mxu0  ;;  %v11225_v52 = vld [vmem:[%s14364_s9 + $0xb8] sm:$0xff]   ;;  %v11228_v10 = vld [vmem:[%s14364_s9 + $0x140] sm:$0xff]   ;;  %v11231_v15 = vld [vmem:[%s14364_s9 + $0x110] sm:$0xff]  }
 0x58b   :  { %v4545_v47 = vadd.f32 %v4533_v46, %v4442_v36  ;;  %v11233_v36 = vld [vmem:[%s14364_s9 + $0x118] sm:$0xff]  }
 0x58c   :  { %v11234_v46 = vld [vmem:[%s14364_s9 + $0x158] sm:$0xff]  }
 0x599   :  { %v10779_v50 = vpop.f32.mrb[212].mxu1 }
 0x59a   :  { %v4649_v29 = vadd.f32 %v10779_v50, %v4546_v62  ;;  %v4633_v42 = vpop.f32.mrb[213].mxu1  ;;  %v11230_v62 = vld [vmem:[%s14364_s9 + $0x148] sm:$0xff]   ;;  %v11236_v50 = vld [vmem:[%s14364_s9 + $0x160] sm:$0xff]  }
 0x59b   :  { %v4647_v5 = vadd.f32 %v4633_v42, %v4544_v19  ;;  %v10780_v56 = vpop.f32.mrb[214].mxu1  ;;  %v11232_v19 = vld [vmem:[%s14364_s9 + $0x150] sm:$0xff]  }
 0x59c   :  { %v4659_v14 = vadd.f32 %v8981_v61, %v4649_v29  ;;  %v4636_v18 = vpop.f32.mrb[215].mxu1  ;;  %v11238_v29 = vld [vmem:[%s14364_s9 + $0x168] sm:$0xff]   ;;  %v11239_v42 = vld [vmem:[%s14364_s9 + $0x130] sm:$0xff]   ;;  %v11241_v56 = vld [vmem:[%s14364_s9 + $0x138] sm:$0xff]  }
 0x59d   :  { %v4657_v63 = vadd.f32 %v8981_v61, %v4647_v5  ;;  %v4648_v28 = vadd.f32 %v4636_v18, %v4545_v47  ;;  %v11235_v47 = vld [vmem:[%s14364_s9 + $0x120] sm:$0xff]   ;;  %v11240_v5 = vld [vmem:[%s14364_s9 + $0x170] sm:$0xff]  }
 0x59e   :  { %v4662_v16 = vmax.f32 %v4659_v14, 0.0  ;;  %v11242_v14 = vld [vmem:[%s14364_s9 + $0x178] sm:$0xff]   ;;  %v11243_v18 = vld [vmem:[%s14364_s9 + $0x180] sm:$0xff]  }
 0x59f   :  { %v4660_v30 = vmax.f32 %v4657_v63, 0.0  ;;  %v4658_v24 = vadd.f32 %v8981_v61, %v4648_v28  ;;  %v11237_v61 = vld [vmem:[%s14364_s9 + $0x128] sm:$0xff]   ;;  %v11244_v63 = vld [vmem:[%s14364_s9 + $0x1c0] sm:$0xff]  }
 0x5a0   :  { %v13176_v31 = vmul.f32 %v12966_v37, %v4662_v16 }
 0x5a1   :  { %v13179_v32 = vmul.f32 %v12969_v59, %v4660_v30  ;;  %v4661_v7 = vmax.f32 %v4658_v24, 0.0 }
 0x5a2   :  { %4668 = vst [vmem:[#allocation6 + $0x17] sm:$0xff] %v13176_v31  ;;  %v5150_v24 = vpack.c.bf16 %v13176_v31, %v13176_v31  ;;  %v11247_v31 = vld [vmem:[%s14364_s9 + $0x190] sm:$0xff]  }
 0x5a3   :  { %4666 = vst [vmem:[#allocation6 + $0x7] sm:$0xff] %v13179_v32  ;;  %v13184_v20 = vmul.f32 %v12973_v13, %v4661_v7 }
 0x5a5   :  { %4667 = vst [vmem:[#allocation6 + $0xf] sm:$0xff] %v13184_v20  ;;  %v5149_v27 = vpack.c.bf16 %v13184_v20, %v13179_v32 }
 0x5a9   :  { %v5269_v28 = vld [vmem:[#allocation6 + $0x18] sm:$0xff] }
 0x5aa   :  { %v4690_v55 = vld [vmem:[#allocation6 + $0x1] sm:$0xff]  ;;  %v5271_v20 = vpack.c.bf16 %v5269_v28, %v5269_v28  ;;  %v11288_v28 = vld [vmem:[%s14366_s11 + $0x270] ss:$28 sps:$4 sm:$0xff]  }
 0x5ab   :  { %v4669_v43 = vld [vmem:[#allocation6] sm:$0xff] }
 0x5ac   :  { %v4691_v37 = vld [vmem:[#allocation6 + $0x9] sm:$0xff]  ;;  %v4692_v59 = vld [vmem:[#allocation6 + $0x11] sm:$0xff] }
 0x5ad   :  { %v13189_v21 = vld [vmem:[#allocation6 + $0x8] sm:$0xff]  ;;  %v4693_v8 = vpack.c.bf16 %v4691_v37, %v4690_v55  ;;  %v4694_v0 = vpack.c.bf16 %v4692_v59, %v4692_v59  ;;  %v13192_v41 = vld [vmem:[#allocation6 + $0x10] sm:$0xff]  ;;  %v11249_v59 = vld [vmem:[%s14364_s9 + $0x198] sm:$0xff]  }
 0x5ae   :  { %v4672_v11 = vpack.c.bf16 %v13189_v21, %v4669_v43  ;;  %v4905_v6 = vld [vmem:[#allocation6 + $0xa] sm:$0xff]  ;;  %v4673_v17 = vpack.c.bf16 %v13192_v41, %v13192_v41  ;;  %v13201_v39 = vld [vmem:[#allocation6 + $0x16] sm:$0xff]  ;;  %v4904_v45 = vld [vmem:[#allocation6 + $0x2] sm:$0xff]  ;;  %v5270_v1 = vpack.c.bf16 %v13192_v41, %v13189_v21 }
 0x5af   :  { %v13194_v13 = vld [vmem:[#allocation6 + $0xe] sm:$0xff]  ;;  %10797 = vmatprep.mubr.bf16.mxu0 %v4693_v8  ;;  %v5025_v57 = vld [vmem:[#allocation6 + $0x6] sm:$0xff]  ;;  %v4907_v53 = vpack.c.bf16 %v4905_v6, %v4904_v45  ;;  %v5029_v25 = vpack.c.bf16 %v13201_v39, %v13201_v39  ;;  %v11250_v8 = vld [vmem:[%s14364_s9 + $0x1d8] sm:$0xff]  }
 0x5b0   :  { %10817 = vmatprep.mubr.bf16.mxu1 %v4672_v11  ;;  %v5633_v26 = vpack.c.bf16 %v13201_v39, %v13194_v13  ;;  %10798 = vmatmul.mubr.bf16.vlgmr.msra.gmra.mrb[216].mxu0 %v4694_v0  ;;  %v5028_v49 = vpack.c.bf16 %v13194_v13, %v5025_v57  ;;  %v4906_v51 = vld [vmem:[#allocation6 + $0x12] sm:$0xff]  ;;  %v11246_v43 = vld [vmem:[%s14364_s9 + $0x1c8] sm:$0xff]   ;;  %v11251_v11 = vld [vmem:[%s14364_s9 + $0x1a0] sm:$0xff]  }
 0x5b1   :  { %10818 = vmatmul.mubr.bf16.vlgmr.msra.gmra.mrb[216].mxu1 %v4673_v17  ;;  %10822 = vmatpush3.bf16.msra.mxu0 %v13163_v22  ;;  %v11217_v22 = vld [vmem:[%s14364_s9 + $0x98] sm:$0xff]   ;;  %v4908_v2 = vpack.c.bf16 %v4906_v51, %v4906_v51  ;;  %v5388_v16 = vld [vmem:[#allocation6 + $0xc] sm:$0xff]  ;;  %v11252_v0 = vld [vmem:[%s14364_s9 + $0x1e0] sm:$0xff]  }
 0x5b2   :  { %10842 = vmatpush3.bf16.msra.mxu1 %v13168_v58  ;;  %10837 = vmatprep.mubr.bf16.mxu0 %v4907_v53  ;;  %v11218_v58 = vld [vmem:[%s14364_s9 + $0xd8] sm:$0xff]   ;;  %v5509_v32 = vld [vmem:[#allocation6 + $0xd] sm:$0xff] }
 0x5b3   :  { %10857 = vmatprep.mubr.bf16.mxu1 %v5028_v49  ;;  %10823 = vmatprep.subr.bf16.mxu0 %v11213_v12  ;;  %v5389_v30 = vld [vmem:[#allocation6 + $0x14] sm:$0xff]  ;;  %v11253_v41 = vld [vmem:[%s14364_s9 + $0x1a8] sm:$0xff]   ;;  %v5390_v53 = vld [vmem:[#allocation6 + $0x1c] sm:$0xff] }
 0x5b4   :  { %10843 = vmatprep.subr.bf16.mxu1 %v11214_v35  ;;  %v5510_v7 = vld [vmem:[#allocation6 + $0x15] sm:$0xff]  ;;  %v5391_v55 = vpack.c.bf16 %v5389_v30, %v5388_v16  ;;  %v11254_v6 = vld [vmem:[%s14364_s9 + $0x1e8] sm:$0xff]   ;;  %v5511_v49 = vld [vmem:[#allocation6 + $0x1d] sm:$0xff] }
 0x5b5   :  { %10824 = vmatpush3.bf16.msra.mxu0 %v11213_v12  ;;  %v5512_v37 = vpack.c.bf16 %v5510_v7, %v5509_v32  ;;  %v11248_v21 = vld [vmem:[%s14364_s9 + $0x1d0] sm:$0xff]   ;;  %v11257_v45 = vld [vmem:[%s14364_s9 + $0x1b8] sm:$0xff]   ;;  %v11264_v13 = vld [vmem:[%s14364_s9 + $0x228] sm:$0xff]  }
 0x5b6   :  { %10844 = vmatpush3.bf16.msra.mxu1 %v11214_v35  ;;  %10825 = vmatprep.subr.bf16.mxu0 %v11215_v3  ;;  %v11255_v17 = vld [vmem:[%s14364_s9 + $0x1b0] sm:$0xff]   ;;  %v11258_v57 = vld [vmem:[%s14364_s9 + $0x1f8] sm:$0xff]   ;;  %v11259_v35 = vld [vmem:[%s14364_s9 + $0x200] sm:$0xff]  }
 0x5b7   :  { %10845 = vmatprep.subr.bf16.mxu1 %v11216_v23  ;;  %v11256_v12 = vld [vmem:[%s14364_s9 + $0x1f0] sm:$0xff]   ;;  %v11291_v16 = vld [vmem:[%s14366_s11 + $0x2a0] ss:$28 sps:$4 sm:$0xff]   ;;  %v11296_v32 = vld [vmem:[%s14366_s11 + $0x2ac] ss:$28 sps:$4 sm:$0xff]  }
 0x5b8   :  { %v11265_v39 = vld [vmem:[%s14364_s9 + $0x230] sm:$0xff]   ;;  %v11293_v30 = vld [vmem:[%s14366_s11 + $0x2a4] ss:$28 sps:$4 sm:$0xff]   ;;  %v11299_v7 = vld [vmem:[%s14366_s11 + $0x2dc] ss:$28 sps:$4 sm:$0xff]  }
 0x5b9   :  { %10826 = vmatpush3.bf16.msra.mxu0 %v11215_v3  ;;  %v5392_v3 = vpack.c.bf16 %v5390_v53, %v5390_v53 }
 0x5ba   :  { %10846 = vmatpush3.bf16.msra.mxu1 %v11216_v23  ;;  %10827 = vmatprep.subr.bf16.mxu0 %v11217_v22  ;;  %v11260_v23 = vld [vmem:[%s14364_s9 + $0x208] sm:$0xff]  }
 0x5bb   :  { %10847 = vmatprep.subr.bf16.mxu1 %v11218_v58 }
 0x5bd   :  { %10828 = vmatpush3.bf16.msra.mxu0 %v11217_v22  ;;  %v5513_v22 = vpack.c.bf16 %v5511_v49, %v5511_v49 }
 0x5be   :  { %10848 = vmatpush3.bf16.msra.mxu1 %v11218_v58  ;;  %10829 = vmatprep.subr.bf16.mxu0 %v11219_v44  ;;  %v11261_v58 = vld [vmem:[%s14364_s9 + $0x210] sm:$0xff]  }
 0x5bf   :  { %10849 = vmatprep.subr.bf16.mxu1 %v11220_v60 }
 0x5c1   :  { %10830 = vmatpush3.bf16.msra.mxu0 %v11219_v44  ;;  %v11262_v44 = vld [vmem:[%s14364_s9 + $0x218] sm:$0xff]  }
 0x5c2   :  { %10850 = vmatpush3.bf16.msra.mxu1 %v11220_v60  ;;  %10831 = vmatprep.subr.bf16.mxu0 %v11221_v38  ;;  %v11263_v60 = vld [vmem:[%s14364_s9 + $0x220] sm:$0xff]  }
 0x5c3   :  { %10851 = vmatprep.subr.bf16.mxu1 %v11222_v48 }
 0x5c5   :  { %10832 = vmatpush3.bf16.msra.mxu0 %v11221_v38  ;;  %v5632_v38 = vld [vmem:[#allocation6 + $0x1e] sm:$0xff] }
 0x5c6   :  { %10852 = vmatpush3.bf16.msra.mxu1 %v11222_v48  ;;  %10833 = vmatprep.subr.bf16.mxu0 %v11223_v40  ;;  %v5634_v48 = vpack.c.bf16 %v5632_v38, %v5632_v38 }
 0x5c7   :  { %10853 = vmatprep.subr.bf16.mxu1 %v11224_v54 }
 0x5c9   :  { %10834 = vmatpush3.bf16.msra.mxu0 %v11223_v40 }
 0x5ca   :  { %10854 = vmatpush3.bf16.msra.mxu1 %v11224_v54  ;;  %10835 = vmatprep.subr.bf16.mxu0 %v11225_v52 }
 0x5cb   :  { %10855 = vmatprep.subr.bf16.mxu1 %v11226_v34 }
 0x5cd   :  { %10836 = vmatpush3.bf16.msra.mxu0 %v11225_v52 }
 0x5ce   :  { %10856 = vmatpush3.bf16.msra.mxu1 %v11226_v34  ;;  %10861 = vmatprep.subr.bf16.mxu0 %v11227_v33 }
 0x5cf   :  { %10881 = vmatprep.subr.bf16.mxu1 %v11228_v10 }
 0x5d0   :  { %10838 = vmatmul.mubr.bf16.vlgmr.msra.gmra.mrb[220].mxu0 %v4908_v2 }
 0x5d1   :  { %10858 = vmatmul.mubr.bf16.vlgmr.msra.gmra.mrb[220].mxu1 %v5029_v25  ;;  %10862 = vmatpush3.bf16.msra.mxu0 %v11227_v33 }
 0x5d2   :  { %10877 = vmatprep.mubr.bf16.mxu0 %v5149_v27  ;;  %10882 = vmatpush3.bf16.msra.mxu1 %v11228_v10  ;;  %v11245_v27 = vld [vmem:[%s14364_s9 + $0x188] sm:$0xff]  }
 0x5d3   :  { %10897 = vmatprep.mubr.bf16.mxu1 %v5270_v1  ;;  %10863 = vmatprep.subr.bf16.mxu0 %v11229_v4  ;;  %v11269_v1 = vld [vmem:[%s14366_s11 + $0x1c4] ss:$28 sps:$4 sm:$0xff]  }
 0x5d4   :  { %10883 = vmatprep.subr.bf16.mxu1 %v11230_v62 }
 0x5d5   :  { %10864 = vmatpush3.bf16.msra.mxu0 %v11229_v4 }
 0x5d6   :  { %10884 = vmatpush3.bf16.msra.mxu1 %v11230_v62  ;;  %10865 = vmatprep.subr.bf16.mxu0 %v11231_v15 }
 0x5d7   :  { %10885 = vmatprep.subr.bf16.mxu1 %v11232_v19 }
 0x5d9   :  { %10866 = vmatpush3.bf16.msra.mxu0 %v11231_v15  ;;  %v11267_v15 = vld [vmem:[%s14366_s11 + $0x1c0] ss:$28 sps:$4 sm:$0xff]  }
 0x5da   :  { %10886 = vmatpush3.bf16.msra.mxu1 %v11232_v19  ;;  %10867 = vmatprep.subr.bf16.mxu0 %v11233_v36  ;;  %v11270_v19 = vld [vmem:[%s14366_s11 + $0x1c8] ss:$28 sps:$4 sm:$0xff]  }
 0x5db   :  { %10887 = vmatprep.subr.bf16.mxu1 %v11234_v46 }
 0x5dd   :  { %10868 = vmatpush3.bf16.msra.mxu0 %v11233_v36  ;;  %v11272_v36 = vld [vmem:[%s14366_s11 + $0x1cc] ss:$28 sps:$4 sm:$0xff]  }
 0x5de   :  { %10888 = vmatpush3.bf16.msra.mxu1 %v11234_v46  ;;  %10869 = vmatprep.subr.bf16.mxu0 %v11235_v47  ;;  %v11275_v46 = vld [vmem:[%s14366_s11 + $0x1fc] ss:$28 sps:$4 sm:$0xff]  }
 0x5df   :  { %10889 = vmatprep.subr.bf16.mxu1 %v11236_v50 }
 0x5e1   :  { %10870 = vmatpush3.bf16.msra.mxu0 %v11235_v47  ;;  %v11278_v47 = vld [vmem:[%s14366_s11 + $0x204] ss:$28 sps:$4 sm:$0xff]  }
 0x5e2   :  { %10890 = vmatpush3.bf16.msra.mxu1 %v11236_v50  ;;  %10871 = vmatprep.subr.bf16.mxu0 %v11237_v61  ;;  %v11273_v50 = vld [vmem:[%s14366_s11 + $0x1f8] ss:$28 sps:$4 sm:$0xff]  }
 0x5e3   :  { %10891 = vmatprep.subr.bf16.mxu1 %v11238_v29 }
 0x5e5   :  { %10872 = vmatpush3.bf16.msra.mxu0 %v11237_v61  ;;  %v11276_v61 = vld [vmem:[%s14366_s11 + $0x200] ss:$28 sps:$4 sm:$0xff]  }
 0x5e6   :  { %10892 = vmatpush3.bf16.msra.mxu1 %v11238_v29  ;;  %10873 = vmatprep.subr.bf16.mxu0 %v11239_v42  ;;  %v11281_v29 = vld [vmem:[%s14366_s11 + $0x234] ss:$28 sps:$4 sm:$0xff]  }
 0x5e7   :  { %10893 = vmatprep.subr.bf16.mxu1 %v11240_v5 }
 0x5e9   :  { %10874 = vmatpush3.bf16.msra.mxu0 %v11239_v42  ;;  %v11284_v42 = vld [vmem:[%s14366_s11 + $0x23c] ss:$28 sps:$4 sm:$0xff]  }
 0x5ea   :  { %10894 = vmatpush3.bf16.msra.mxu1 %v11240_v5  ;;  %10875 = vmatprep.subr.bf16.mxu0 %v11241_v56  ;;  %v11279_v5 = vld [vmem:[%s14366_s11 + $0x230] ss:$28 sps:$4 sm:$0xff]  }
 0x5eb   :  { %10895 = vmatprep.subr.bf16.mxu1 %v11242_v14 }
 0x5ed   :  { %10876 = vmatpush3.bf16.msra.mxu0 %v11241_v56  ;;  %v11282_v56 = vld [vmem:[%s14366_s11 + $0x238] ss:$28 sps:$4 sm:$0xff]  }
 0x5ee   :  { %10896 = vmatpush3.bf16.msra.mxu1 %v11242_v14  ;;  %10901 = vmatprep.subr.bf16.mxu0 %v11243_v18  ;;  %v11287_v14 = vld [vmem:[%s14366_s11 + $0x26c] ss:$28 sps:$4 sm:$0xff]  }
 0x5ef   :  { %10921 = vmatprep.subr.bf16.mxu1 %v11244_v63 }
 0x5f0   :  { %10878 = vmatmul.mubr.bf16.vlgmr.msra.gmra.mrb[224].mxu0 %v5150_v24  ;;  %v11294_v24 = vld [vmem:[%s14366_s11 + $0x2a8] ss:$28 sps:$4 sm:$0xff]  }
 0x5f1   :  { %10898 = vmatmul.mubr.bf16.vlgmr.msra.gmra.mrb[224].mxu1 %v5271_v20  ;;  %10902 = vmatpush3.bf16.msra.mxu0 %v11243_v18  ;;  %v11290_v18 = vld [vmem:[%s14366_s11 + $0x274] ss:$28 sps:$4 sm:$0xff]   ;;  %v11302_v20 = vld [vmem:[%s14366_s11 + $0x2e4] ss:$28 sps:$4 sm:$0xff]  }
 0x5f2   :  { %10917 = vmatprep.mubr.bf16.mxu0 %v5391_v55  ;;  %10922 = vmatpush3.bf16.msra.mxu1 %v11244_v63  ;;  %v11285_v63 = vld [vmem:[%s14366_s11 + $0x268] ss:$28 sps:$4 sm:$0xff]   ;;  %v11300_v55 = vld [vmem:[%s14366_s11 + $0x2e0] ss:$28 sps:$4 sm:$0xff]  }
 0x5f3   :  { %10937 = vmatprep.mubr.bf16.mxu1 %v5512_v37  ;;  %10903 = vmatprep.subr.bf16.mxu0 %v11245_v27  ;;  %v11303_v37 = vld [vmem:[%s14366_s11 + $0x310] ss:$28 sps:$4 sm:$0xff]  }
 0x5f4   :  { %10923 = vmatprep.subr.bf16.mxu1 %v11246_v43 }
 0x5f5   :  { %10904 = vmatpush3.bf16.msra.mxu0 %v11245_v27  ;;  %v11297_v27 = vld [vmem:[%s14366_s11 + $0x2d8] ss:$28 sps:$4 sm:$0xff]  }
 0x5f6   :  { %10924 = vmatpush3.bf16.msra.mxu1 %v11246_v43  ;;  %10905 = vmatprep.subr.bf16.mxu0 %v11247_v31  ;;  %v11305_v43 = vld [vmem:[%s14366_s11 + $0x314] ss:$28 sps:$4 sm:$0xff]  }
 0x5f7   :  { %10925 = vmatprep.subr.bf16.mxu1 %v11248_v21 }
 0x5f9   :  { %10906 = vmatpush3.bf16.msra.mxu0 %v11247_v31  ;;  %v11308_v31 = vld [vmem:[%s14366_s11 + $0x31c] ss:$28 sps:$4 sm:$0xff]  }
 0x5fa   :  { %10926 = vmatpush3.bf16.msra.mxu1 %v11248_v21  ;;  %10907 = vmatprep.subr.bf16.mxu0 %v11249_v59  ;;  %v11311_v21 = vld [vmem:[%s14366_s11 + $0x34c] ss:$28 sps:$4 sm:$0xff]  }
 0x5fb   :  { %10927 = vmatprep.subr.bf16.mxu1 %v11250_v8 }
 0x5fd   :  { %10908 = vmatpush3.bf16.msra.mxu0 %v11249_v59  ;;  %v11644_v59 = vmov 0  }
 0x5fe   :  { %10928 = vmatpush3.bf16.msra.mxu1 %v11250_v8  ;;  %10909 = vmatprep.subr.bf16.mxu0 %v11251_v11  ;;  %v11306_v8 = vld [vmem:[%s14366_s11 + $0x318] ss:$28 sps:$4 sm:$0xff]  }
 0x5ff   :  { %10929 = vmatprep.subr.bf16.mxu1 %v11252_v0 }
 0x601   :  { %10910 = vmatpush3.bf16.msra.mxu0 %v11251_v11  ;;  %v11314_v11 = vld [vmem:[%s14366_s11 + $0x354] ss:$28 sps:$4 sm:$0xff]  }
 0x602   :  { %10930 = vmatpush3.bf16.msra.mxu1 %v11252_v0  ;;  %10911 = vmatprep.subr.bf16.mxu0 %v11253_v41 }
 0x603   :  { %10931 = vmatprep.subr.bf16.mxu1 %v11254_v6 }
 0x605   :  { %10912 = vmatpush3.bf16.msra.mxu0 %v11253_v41 }
 0x606   :  { %10932 = vmatpush3.bf16.msra.mxu1 %v11254_v6  ;;  %10913 = vmatprep.subr.bf16.mxu0 %v11255_v17  ;;  %v11309_v6 = vld [vmem:[%s14366_s11 + $0x348] ss:$28 sps:$4 sm:$0xff]  }
 0x607   :  { %10933 = vmatprep.subr.bf16.mxu1 %v11256_v12 }
 0x609   :  { %10914 = vmatpush3.bf16.msra.mxu0 %v11255_v17 }
 0x60a   :  { %10934 = vmatpush3.bf16.msra.mxu1 %v11256_v12  ;;  %10915 = vmatprep.subr.bf16.mxu0 %v11257_v45 }
 0x60b   :  { %10935 = vmatprep.subr.bf16.mxu1 %v11258_v57 }
 0x60d   :  { %10916 = vmatpush3.bf16.msra.mxu0 %v11257_v45 }
 0x60e   :  { %10936 = vmatpush3.bf16.msra.mxu1 %v11258_v57  ;;  %10941 = vmatprep.subr.bf16.mxu0 %v11259_v35  ;;  %v11317_v57 = vld [vmem:[%s14366_s11 + $0x1d4] ss:$28 sps:$4 sm:$0xff]  }
 0x60f   :  { %6213 = vmatprep.subr.bf16.mxu1 %v11269_v1 }
 0x610   :  { %10918 = vmatmul.mubr.bf16.vlgmr.msra.gmra.mrb[228].mxu0 %v5392_v3  ;;  %v11312_v3 = vld [vmem:[%s14366_s11 + $0x350] ss:$28 sps:$4 sm:$0xff]  }
 0x611   :  { %10938 = vmatmul.mubr.bf16.vlgmr.msra.gmra.mrb[228].mxu1 %v5513_v22  ;;  %10942 = vmatpush3.bf16.msra.mxu0 %v11259_v35 }
 0x612   :  { %10957 = vmatprep.mubr.bf16.mxu0 %v5633_v26  ;;  %10943 = vmatprep.subr.bf16.mxu0 %v11260_v23  ;;  %v11266_v26 = vld [vmem:[%s14364_s9 + $0x238] sm:$0xff]  }
 0x613   :  { %6214 = vmatpush1.bf16.msra.mxu1 %v11267_v15  ;;  %6245 = vmatprep.mubr.bf16.mxu1 %v11644_v59 }
 0x614   :  { %6215 = vmatprep.subr.bf16.mxu1 %v11275_v46 }
 0x615   :  { %10944 = vmatpush3.bf16.msra.mxu0 %v11260_v23 }
 0x616   :  { %10945 = vmatprep.subr.bf16.mxu0 %v11261_v58 }
 0x617   :  { %6216 = vmatpush1.bf16.msra.mxu1 %v11273_v50 }
 0x618   :  { %6217 = vmatprep.subr.bf16.mxu1 %v11281_v29 }
 0x619   :  { %10946 = vmatpush3.bf16.msra.mxu0 %v11261_v58 }
 0x61a   :  { %10947 = vmatprep.subr.bf16.mxu0 %v11262_v44 }
 0x61b   :  { %6218 = vmatpush1.bf16.msra.mxu1 %v11279_v5 }
 0x61c   :  { %6219 = vmatprep.subr.bf16.mxu1 %v11287_v14 }
 0x61d   :  { %10948 = vmatpush3.bf16.msra.mxu0 %v11262_v44 }
 0x61e   :  { %10949 = vmatprep.subr.bf16.mxu0 %v11263_v60 }
 0x61f   :  { %6220 = vmatpush1.bf16.msra.mxu1 %v11285_v63  ;;  %v9182_v63 = vld [vmem:[%s14367_s10] ss:$0 sm:$0xff] }
 0x620   :  { %6221 = vmatprep.subr.bf16.mxu1 %v11293_v30 }
 0x621   :  { %10950 = vmatpush3.bf16.msra.mxu0 %v11263_v60 }
 0x622   :  { %10951 = vmatprep.subr.bf16.mxu0 %v11264_v13 }
 0x623   :  { %6222 = vmatpush1.bf16.msra.mxu1 %v11291_v16 }
 0x624   :  { %6223 = vmatprep.subr.bf16.mxu1 %v11299_v7 }
 0x625   :  { %10952 = vmatpush3.bf16.msra.mxu0 %v11264_v13 }
 0x626   :  { %10953 = vmatprep.subr.bf16.mxu0 %v11265_v39 }
 0x627   :  { %6224 = vmatpush1.bf16.msra.mxu1 %v11297_v27 }
 0x628   :  { %6225 = vmatprep.subr.bf16.mxu1 %v11305_v43 }
 0x629   :  { %10954 = vmatpush3.bf16.msra.mxu0 %v11265_v39  ;;  %v13489_v39 = vld [vmem:[#allocation6 + $0x1f] sm:$0xff] }
 0x62a   :  { %10955 = vmatprep.subr.bf16.mxu0 %v11266_v26 }
 0x62b   :  { %6226 = vmatpush1.bf16.msra.mxu1 %v11303_v37 }
 0x62c   :  { %6227 = vmatprep.subr.bf16.mxu1 %v11311_v21 }
 0x62d   :  { %10956 = vmatpush3.bf16.msra.mxu0 %v11266_v26 }
 0x62e   :  { %6254 = vmatprep.subr.bf16.mxu0 %v11272_v36 }
 0x62f   :  { %6228 = vmatpush1.bf16.msra.mxu1 %v11309_v6 }
 0x630   :  { %10958 = vmatmul.mubr.bf16.vlgmr.msra.gmra.mrb[232].mxu0 %v5634_v48  ;;  %6295 = vmatprep.subr.bf16.mxu1 %v11317_v57 }
 0x631   :  { %6255 = vmatpush1.bf16.msra.mxu0 %v11270_v19  ;;  %6286 = vmatprep.mubr.bf16.mxu0 %v11644_v59 }
 0x632   :  { %6256 = vmatprep.subr.bf16.mxu0 %v11278_v47 }
 0x635   :  { %6257 = vmatpush1.bf16.msra.mxu0 %v11276_v61 }
 0x636   :  { %6258 = vmatprep.subr.bf16.mxu0 %v11284_v42 }
 0x639   :  { %6259 = vmatpush1.bf16.msra.mxu0 %v11282_v56 }
 0x63a   :  { %6260 = vmatprep.subr.bf16.mxu0 %v11290_v18 }
 0x63d   :  { %6261 = vmatpush1.bf16.msra.mxu0 %v11288_v28 }
 0x63e   :  { %6262 = vmatprep.subr.bf16.mxu0 %v11296_v32 }
 0x641   :  { %6263 = vmatpush1.bf16.msra.mxu0 %v11294_v24 }
 0x642   :  { %6264 = vmatprep.subr.bf16.mxu0 %v11302_v20 }
 0x645   :  { %6265 = vmatpush1.bf16.msra.mxu0 %v11300_v55 }
 0x646   :  { %6266 = vmatprep.subr.bf16.mxu0 %v11308_v31 }
 0x649   :  { %6267 = vmatpush1.bf16.msra.mxu0 %v11306_v8 }
 0x64a   :  { %6268 = vmatprep.subr.bf16.mxu0 %v11314_v11 }
 0x64d   :  { %6269 = vmatpush1.bf16.msra.mxu0 %v11312_v3 }
 0x64e   :  { %10961 = vmatprep.subr.bf16.mxu0 %v13489_v39 }
 0x683   :  { %v10799_v40 = vpop.f32.mrb[216].mxu0 }
 0x684   :  { %v10819_v54 = vpop.f32.mrb[216].mxu1  ;;  %v4794_v34 = vpop.f32.mrb[217].mxu0 }
 0x685   :  { %v13379_v52 = vadd.f32 %v10819_v54, %v10799_v40  ;;  %v4890_v33 = vpop.f32.mrb[217].mxu1  ;;  %v10800_v51 = vpop.f32.mrb[218].mxu0 }
 0x686   :  { %v13381_v10 = vadd.f32 %v4890_v33, %v4794_v34  ;;  %v10820_v2 = vpop.f32.mrb[218].mxu1  ;;  %v4797_v25 = vpop.f32.mrb[219].mxu0 }
 0x687   :  { %v4893_v4 = vpop.f32.mrb[219].mxu1 }
 0x688   :  { %v13383_v62 = vadd.f32 %v4893_v4, %v4797_v25 }
 0x6a3   :  { %v10839_v0 = vpop.f32.mrb[220].mxu0 }
 0x6a4   :  { %v10859_v41 = vpop.f32.mrb[220].mxu1  ;;  %v5024_v17 = vadd.f32 %v10839_v0, %v13379_v52  ;;  %v5008_v12 = vpop.f32.mrb[221].mxu0 }
 0x6a5   :  { %v5129_v45 = vpop.f32.mrb[221].mxu1  ;;  %v5022_v35 = vadd.f32 %v5008_v12, %v13381_v10  ;;  %v10840_v53 = vpop.f32.mrb[222].mxu0 }
 0x6a6   :  { %v10860_v49 = vpop.f32.mrb[222].mxu1  ;;  %v5145_v23 = vadd.f32 %v10859_v41, %v5024_v17  ;;  %v5011_v22 = vpop.f32.mrb[223].mxu0 }
 0x6a7   :  { %v5132_v58 = vpop.f32.mrb[223].mxu1  ;;  %v5143_v44 = vadd.f32 %v5129_v45, %v5022_v35  ;;  %v5023_v60 = vadd.f32 %v5011_v22, %v13383_v62 }
 0x6a9   :  { %v5144_v13 = vadd.f32 %v5132_v58, %v5023_v60  ;;  %v11315_v60 = vld [vmem:[%s14366_s11 + $0x1d0] ss:$28 sps:$4 sm:$0xff]  }
 0x6c3   :  { %v10879_v26 = vpop.f32.mrb[224].mxu0 }
 0x6c4   :  { %v5266_v38 = vadd.f32 %v10879_v26, %v5145_v23  ;;  %v10899_v48 = vpop.f32.mrb[224].mxu1  ;;  %v5250_v40 = vpop.f32.mrb[225].mxu0 }
 0x6c5   :  { %v5264_v54 = vadd.f32 %v5250_v40, %v5143_v44  ;;  %v5371_v52 = vpop.f32.mrb[225].mxu1  ;;  %v10880_v34 = vpop.f32.mrb[226].mxu0  ;;  %v11322_v40 = vld [vmem:[%s14366_s11 + $0x210] ss:$28 sps:$4 sm:$0xff]  }
 0x6c6   :  { %v5387_v33 = vadd.f32 %v10899_v48, %v5266_v38  ;;  %v10900_v10 = vpop.f32.mrb[226].mxu1  ;;  %v5253_v51 = vpop.f32.mrb[227].mxu0  ;;  %v11321_v38 = vld [vmem:[%s14366_s11 + $0x20c] ss:$28 sps:$4 sm:$0xff]  }
 0x6c7   :  { %v5385_v2 = vadd.f32 %v5371_v52, %v5264_v54  ;;  %v5265_v25 = vadd.f32 %v5253_v51, %v5144_v13  ;;  %v5374_v4 = vpop.f32.mrb[227].mxu1  ;;  %v11318_v13 = vld [vmem:[%s14366_s11 + $0x1d8] ss:$28 sps:$4 sm:$0xff]   ;;  %v11319_v48 = vld [vmem:[%s14366_s11 + $0x208] ss:$28 sps:$4 sm:$0xff]  }
 0x6c8   :  { %v11325_v54 = vld [vmem:[%s14366_s11 + $0x244] ss:$28 sps:$4 sm:$0xff]   ;;  %v11327_v10 = vld [vmem:[%s14366_s11 + $0x278] ss:$28 sps:$4 sm:$0xff]  }
 0x6c9   :  { %v5386_v62 = vadd.f32 %v5374_v4, %v5265_v25  ;;  %v11323_v52 = vld [vmem:[%s14366_s11 + $0x240] ss:$28 sps:$4 sm:$0xff]   ;;  %v11326_v34 = vld [vmem:[%s14366_s11 + $0x248] ss:$28 sps:$4 sm:$0xff]   ;;  %v11331_v25 = vld [vmem:[%s14366_s11 + $0x2b0] ss:$28 sps:$4 sm:$0xff]  }
 0x6ca   :  { %v11330_v51 = vld [vmem:[%s14366_s11 + $0x280] ss:$28 sps:$4 sm:$0xff]   ;;  %v11334_v4 = vld [vmem:[%s14366_s11 + $0x2b8] ss:$28 sps:$4 sm:$0xff]  }
 0x6e3   :  { %v10919_v1 = vpop.f32.mrb[228].mxu0 }
 0x6e4   :  { %v5508_v15 = vadd.f32 %v10919_v1, %v5387_v33  ;;  %v10939_v19 = vpop.f32.mrb[228].mxu1  ;;  %v5492_v36 = vpop.f32.mrb[229].mxu0  ;;  %v11329_v33 = vld [vmem:[%s14366_s11 + $0x27c] ss:$28 sps:$4 sm:$0xff]   ;;  %v11335_v1 = vld [vmem:[%s14366_s11 + $0x2e8] ss:$28 sps:$4 sm:$0xff]  }
 0x6e5   :  { %v5506_v46 = vadd.f32 %v5492_v36, %v5385_v2  ;;  %v5613_v47 = vpop.f32.mrb[229].mxu1  ;;  %v10920_v50 = vpop.f32.mrb[230].mxu0  ;;  %v11333_v2 = vld [vmem:[%s14366_s11 + $0x2b4] ss:$28 sps:$4 sm:$0xff]   ;;  %v11339_v36 = vld [vmem:[%s14366_s11 + $0x320] ss:$28 sps:$4 sm:$0xff]  }
 0x6e6   :  { %v5629_v61 = vadd.f32 %v10939_v19, %v5508_v15  ;;  %v10940_v29 = vpop.f32.mrb[230].mxu1  ;;  %v5495_v42 = vpop.f32.mrb[231].mxu0  ;;  %v11338_v15 = vld [vmem:[%s14366_s11 + $0x2f0] ss:$28 sps:$4 sm:$0xff]   ;;  %v11341_v19 = vld [vmem:[%s14366_s11 + $0x324] ss:$28 sps:$4 sm:$0xff]  }
 0x6e7   :  { %v5627_v5 = vadd.f32 %v5613_v47, %v5506_v46  ;;  %v5507_v56 = vadd.f32 %v5495_v42, %v5386_v62  ;;  %v5616_v14 = vpop.f32.mrb[231].mxu1  ;;  %v11337_v62 = vld [vmem:[%s14366_s11 + $0x2ec] ss:$28 sps:$4 sm:$0xff]   ;;  %v11345_v47 = vld [vmem:[%s14366_s11 + $0x35c] ss:$28 sps:$4 sm:$0xff]  }
 0x6e8   :  { %v11342_v46 = vld [vmem:[%s14366_s11 + $0x328] ss:$28 sps:$4 sm:$0xff]   ;;  %v11343_v50 = vld [vmem:[%s14366_s11 + $0x358] ss:$28 sps:$4 sm:$0xff]  }
 0x6e9   :  { %v5628_v18 = vadd.f32 %v5616_v14, %v5507_v56  ;;  %v11349_v29 = vld [vmem:[%s14366_s11 + $0x4] ss:$28 sps:$4 sm:$0xff]   ;;  %v11352_v42 = vld [vmem:[%s14366_s11 + $0xc] ss:$28 sps:$4 sm:$0xff]   ;;  %v11355_v14 = vld [vmem:[%s14366_s11 + $0x3c] ss:$28 sps:$4 sm:$0xff]  }
 0x6ea   :  { %v11350_v56 = vld [vmem:[%s14366_s11 + $0x8] ss:$28 sps:$4 sm:$0xff]  }
 0x703   :  { %v10959_v28 = vpop.f32.mrb[232].mxu0 }
 0x704   :  { %v5750_v16 = vadd.f32 %v10959_v28, %v5629_v61  ;;  %v5734_v30 = vpop.f32.mrb[233].mxu0  ;;  %v11346_v61 = vld [vmem:[%s14366_s11 + $0x360] ss:$28 sps:$4 sm:$0xff]  }
 0x705   :  { %v5748_v24 = vadd.f32 %v5734_v30, %v5627_v5  ;;  %v10960_v32 = vpop.f32.mrb[234].mxu0  ;;  %v11347_v5 = vld [vmem:[%s14366_s11] ss:$28 sps:$4 sm:$0xff]  }
 0x706   :  { %v5760_v7 = vadd.f32 %v9182_v63, %v5750_v16  ;;  %v5737_v20 = vpop.f32.mrb[235].mxu0  ;;  %v11356_v28 = vld [vmem:[%s14366_s11 + $0x40] ss:$28 sps:$4 sm:$0xff]   ;;  %v11361_v16 = vld [vmem:[%s14366_s11 + $0x74] ss:$28 sps:$4 sm:$0xff]  }
 0x707   :  { %v5758_v27 = vadd.f32 %v9182_v63, %v5748_v24  ;;  %v5749_v55 = vadd.f32 %v5737_v20, %v5628_v18  ;;  %v11358_v18 = vld [vmem:[%s14366_s11 + $0x44] ss:$28 sps:$4 sm:$0xff]   ;;  %v11364_v30 = vld [vmem:[%s14366_s11 + $0x7c] ss:$28 sps:$4 sm:$0xff]   ;;  %v11359_v24 = vld [vmem:[%s14366_s11 + $0x70] ss:$28 sps:$4 sm:$0xff]  }
 0x708   :  { %v5763_v43 = vmax.f32 %v5760_v7, 0.0  ;;  %v11362_v32 = vld [vmem:[%s14366_s11 + $0x78] ss:$28 sps:$4 sm:$0xff]   ;;  %v11367_v7 = vld [vmem:[%s14366_s11 + $0xac] ss:$28 sps:$4 sm:$0xff]  }
 0x709   :  { %v5761_v37 = vmax.f32 %v5758_v27, 0.0  ;;  %v5759_v31 = vadd.f32 %v9182_v63, %v5749_v55  ;;  %v11353_v63 = vld [vmem:[%s14366_s11 + $0x38] ss:$28 sps:$4 sm:$0xff]   ;;  %v11365_v27 = vld [vmem:[%s14366_s11 + $0xa8] ss:$28 sps:$4 sm:$0xff]  }
 0x70a   :  { %5766 = vst [vmem:[#allocation8 + $0x10] sm:$0xff] %v5763_v43  ;;  %v11370_v20 = vld [vmem:[%s14366_s11 + $0xb4] ss:$28 sps:$4 sm:$0xff]   ;;  %v11373_v43 = vld [vmem:[%s14366_s11 + $0xe4] ss:$28 sps:$4 sm:$0xff]  }
 0x70b   :  { %5764 = vst [vmem:[#allocation8] sm:$0xff] %v5761_v37  ;;  %v5762_v21 = vmax.f32 %v5759_v31, 0.0  ;;  %v11368_v55 = vld [vmem:[%s14366_s11 + $0xb0] ss:$28 sps:$4 sm:$0xff]   ;;  %v11371_v31 = vld [vmem:[%s14366_s11 + $0xe0] ss:$28 sps:$4 sm:$0xff]  }
 0x70d   :  { %5765 = vst [vmem:[#allocation8 + $0x8] sm:$0xff] %v5762_v21 }
 0x714   :  { %v5769_v8 = vld [vmem:[#allocation8 + $0x1] sm:$0xff]  ;;  %v5770_v11 = vld [vmem:[#allocation8 + $0x9] sm:$0xff] }
 0x715   :  { %v5773_v0 = vld [vmem:[#allocation8 + $0x6] sm:$0xff]  ;;  %v5771_v41 = vmax.f32 %v5761_v37, %v5769_v8  ;;  %v5772_v6 = vmax.f32 %v5762_v21, %v5770_v11  ;;  %v5774_v17 = vld [vmem:[#allocation8 + $0xe] sm:$0xff] }
 0x716   :  { %v5775_v12 = vld [vmem:[#allocation8 + $0x7] sm:$0xff]  ;;  %v5776_v45 = vld [vmem:[#allocation8 + $0xf] sm:$0xff] }
 0x717   :  { %v5777_v57 = vmax.f32 %v5773_v0, %v5775_v12  ;;  %v5778_v35 = vmax.f32 %v5774_v17, %v5776_v45  ;;  %v11376_v37 = vld [vmem:[%s14366_s11 + $0xec] ss:$28 sps:$4 sm:$0xff]   ;;  %v11379_v8 = vld [vmem:[%s14366_s11 + $0x11c] ss:$28 sps:$4 sm:$0xff]   ;;  %v11382_v11 = vld [vmem:[%s14366_s11 + $0x124] ss:$28 sps:$4 sm:$0xff]  }
 0x718   :  { %v11374_v21 = vld [vmem:[%s14366_s11 + $0xe8] ss:$28 sps:$4 sm:$0xff]   ;;  %v11377_v0 = vld [vmem:[%s14366_s11 + $0x118] ss:$28 sps:$4 sm:$0xff]   ;;  %v11383_v12 = vld [vmem:[%s14366_s11 + $0x150] ss:$28 sps:$4 sm:$0xff]  }
 0x719   :  { %v5779_v53 = vmax.f32 %v5771_v41, %v5777_v57  ;;  %v5780_v49 = vmax.f32 %v5772_v6, %v5778_v35  ;;  %v11380_v41 = vld [vmem:[%s14366_s11 + $0x120] ss:$28 sps:$4 sm:$0xff]   ;;  %v11385_v6 = vld [vmem:[%s14366_s11 + $0x154] ss:$28 sps:$4 sm:$0xff]   ;;  %v11391_v57 = vld [vmem:[%s14366_s11 + $0x18c] ss:$28 sps:$4 sm:$0xff]  }
 0x71a   :  { %v11388_v17 = vld [vmem:[%s14366_s11 + $0x15c] ss:$28 sps:$4 sm:$0xff]   ;;  %v11394_v35 = vld [vmem:[%s14366_s11 + $0x194] ss:$28 sps:$4 sm:$0xff]  }
 0x71b   :  { %5781 = vst [vmem:[#allocation8] sm:$0xff] %v5779_v53  ;;  %5782 = vst [vmem:[#allocation8 + $0x8] sm:$0xff] %v5780_v49  ;;  %v11386_v45 = vld [vmem:[%s14366_s11 + $0x158] ss:$28 sps:$4 sm:$0xff]   ;;  %v11389_v53 = vld [vmem:[%s14366_s11 + $0x188] ss:$28 sps:$4 sm:$0xff]  }
 0x71c   :  { %v11392_v49 = vld [vmem:[%s14366_s11 + $0x190] ss:$28 sps:$4 sm:$0xff]  }
 0x722   :  { %v5785_v3 = vld [vmem:[#allocation8 + $0xc] ss:$2 sm:$0x3]  ;;  %v5783_v22 = vld [vmem:[#allocation8] ss:$2 sm:$0x3] }
 0x723   :  { %v5787_v23 = vrot.slane %v5785_v3, 6  ;;  %v11397_v3 = vld [vmem:[%s14366_s11 + $0x14] ss:$28 sps:$4 sm:$0xff]  }
 0x725   :  { %v5790_v58 = vsel %vm5789_vm4, %v5783_v22, %v5787_v23  ;;  %v11395_v23 = vld [vmem:[%s14366_s11 + $0x10] ss:$28 sps:$4 sm:$0xff]   ;;  %v11398_v22 = vld [vmem:[%s14366_s11 + $0x18] ss:$28 sps:$4 sm:$0xff]  }
 0x726   :  { %v13495_v44 = vpack.c.bf16 %v5790_v58, %v5790_v58  ;;  %v11401_v58 = vld [vmem:[%s14366_s11 + $0x4c] ss:$28 sps:$4 sm:$0xff]  }
 0x728   :  { %v13504_v26 = vshrl.u32 %v13495_v44, 16 }
 0x72a   :  { %6246 = vmatmul.mubr.bf16.vlgmr.msra.gmra.mrb[232].mxu1 %v13504_v26  ;;  %6287 = vmatmul.mubr.bf16.vlgmr.msra.gmra.mrb[236].mxu0 %v13504_v26 }
 0x72b   :  { %6296 = vmatpush1.bf16.msra.mxu1 %v11315_v60  ;;  %10962 = vmatpush3.bf16.msra.mxu0 %v11318_v13  ;;  %v11399_v60 = vld [vmem:[%s14366_s11 + $0x48] ss:$28 sps:$4 sm:$0xff]   ;;  %v11402_v13 = vld [vmem:[%s14366_s11 + $0x50] ss:$28 sps:$4 sm:$0xff]  }
 0x72c   :  { %6297 = vmatprep.subr.bf16.mxu1 %v11321_v38  ;;  %10963 = vmatprep.subr.bf16.mxu0 %v13489_v39  ;;  %v11405_v38 = vld [vmem:[%s14366_s11 + $0x84] ss:$28 sps:$4 sm:$0xff]  }
 0x72d   :  { %6327 = vmatprep.mubr.bf16.mxu1 %v11644_v59  ;;  %10977 = vmatprep.mubr.msk.bf16.mxu0 %vm11643_vm2, %v13489_v39 }
 0x72f   :  { %6298 = vmatpush1.bf16.msra.mxu1 %v11319_v48  ;;  %10964 = vmatpush3.bf16.msra.mxu0 %v11322_v40  ;;  %v11403_v48 = vld [vmem:[%s14366_s11 + $0x80] ss:$28 sps:$4 sm:$0xff]   ;;  %v11406_v40 = vld [vmem:[%s14366_s11 + $0x88] ss:$28 sps:$4 sm:$0xff]  }
 0x730   :  { %6299 = vmatprep.subr.bf16.mxu1 %v11325_v54  ;;  %10965 = vmatprep.subr.bf16.mxu0 %v13489_v39  ;;  %v11409_v54 = vld [vmem:[%s14366_s11 + $0xbc] ss:$28 sps:$4 sm:$0xff]  }
 0x733   :  { %6300 = vmatpush1.bf16.msra.mxu1 %v11323_v52  ;;  %10966 = vmatpush3.bf16.msra.mxu0 %v11326_v34  ;;  %v11407_v52 = vld [vmem:[%s14366_s11 + $0xb8] ss:$28 sps:$4 sm:$0xff]   ;;  %v11410_v34 = vld [vmem:[%s14366_s11 + $0xc0] ss:$28 sps:$4 sm:$0xff]  }
 0x734   :  { %6301 = vmatprep.subr.bf16.mxu1 %v11329_v33  ;;  %10967 = vmatprep.subr.bf16.mxu0 %v13489_v39  ;;  %v11413_v33 = vld [vmem:[%s14366_s11 + $0xf4] ss:$28 sps:$4 sm:$0xff]  }
 0x737   :  { %6302 = vmatpush1.bf16.msra.mxu1 %v11327_v10  ;;  %10968 = vmatpush3.bf16.msra.mxu0 %v11330_v51  ;;  %v11411_v10 = vld [vmem:[%s14366_s11 + $0xf0] ss:$28 sps:$4 sm:$0xff]   ;;  %v11414_v51 = vld [vmem:[%s14366_s11 + $0xf8] ss:$28 sps:$4 sm:$0xff]  }
 0x738   :  { %6303 = vmatprep.subr.bf16.mxu1 %v11333_v2  ;;  %10969 = vmatprep.subr.bf16.mxu0 %v13489_v39  ;;  %v11417_v2 = vld [vmem:[%s14366_s11 + $0x12c] ss:$28 sps:$4 sm:$0xff]  }
 0x73b   :  { %6304 = vmatpush1.bf16.msra.mxu1 %v11331_v25  ;;  %10970 = vmatpush3.bf16.msra.mxu0 %v11334_v4  ;;  %v11415_v25 = vld [vmem:[%s14366_s11 + $0x128] ss:$28 sps:$4 sm:$0xff]   ;;  %v11418_v4 = vld [vmem:[%s14366_s11 + $0x130] ss:$28 sps:$4 sm:$0xff]  }
 0x73c   :  { %6305 = vmatprep.subr.bf16.mxu1 %v11337_v62  ;;  %10971 = vmatprep.subr.bf16.mxu0 %v13489_v39  ;;  %v11421_v62 = vld [vmem:[%s14366_s11 + $0x164] ss:$28 sps:$4 sm:$0xff]  }
 0x73f   :  { %6306 = vmatpush1.bf16.msra.mxu1 %v11335_v1  ;;  %10972 = vmatpush3.bf16.msra.mxu0 %v11338_v15  ;;  %v11419_v1 = vld [vmem:[%s14366_s11 + $0x160] ss:$28 sps:$4 sm:$0xff]   ;;  %v11422_v15 = vld [vmem:[%s14366_s11 + $0x168] ss:$28 sps:$4 sm:$0xff]  }
 0x740   :  { %6307 = vmatprep.subr.bf16.mxu1 %v11341_v19  ;;  %10973 = vmatprep.subr.bf16.mxu0 %v13489_v39  ;;  %v11425_v19 = vld [vmem:[%s14366_s11 + $0x19c] ss:$28 sps:$4 sm:$0xff]  }
 0x743   :  { %6308 = vmatpush1.bf16.msra.mxu1 %v11339_v36  ;;  %10974 = vmatpush3.bf16.msra.mxu0 %v11342_v46  ;;  %v11423_v36 = vld [vmem:[%s14366_s11 + $0x198] ss:$28 sps:$4 sm:$0xff]   ;;  %v11426_v46 = vld [vmem:[%s14366_s11 + $0x1a0] ss:$28 sps:$4 sm:$0xff]  }
 0x744   :  { %6309 = vmatprep.subr.bf16.mxu1 %v11345_v47  ;;  %10975 = vmatprep.subr.bf16.mxu0 %v13489_v39  ;;  %v11429_v47 = vld [vmem:[%s14366_s11 + $0x384] ss:$28 sps:$4 sm:$0xff]  }
 0x747   :  { %6310 = vmatpush1.bf16.msra.mxu1 %v11343_v50  ;;  %10976 = vmatpush3.bf16.msra.mxu0 %v11346_v61  ;;  %v11432_v50 = vld [vmem:[%s14366_s11 + $0x38c] ss:$28 sps:$4 sm:$0xff]   ;;  %v11427_v61 = vld [vmem:[%s14366_s11 + $0x380] ss:$28 sps:$4 sm:$0xff]  }
 0x748   :  { %6664 = vmatprep.subr.bf16.mxu1 %v11349_v29  ;;  %6705 = vmatprep.subr.bf16.mxu0 %v11352_v42  ;;  %v11430_v29 = vld [vmem:[%s14366_s11 + $0x388] ss:$28 sps:$4 sm:$0xff]  }
 0x749   :  { %v11438_v42 = vld [vmem:[%s14366_s11 + $0x3c4] ss:$28 sps:$4 sm:$0xff]  }
 0x74a   :  { %6328 = vmatmul.mubr.bf16.vlgmr.msra.gmra.mrb[236].mxu1 %v13504_v26  ;;  %10978 = vmatmul.mubr.bf16.vlgmr.msra.gmra.mrb[240].mxu0 %v13504_v26 }
 0x74b   :  { %6665 = vmatpush1.bf16.msra.mxu1 %v11347_v5  ;;  %6706 = vmatpush1.bf16.msra.mxu0 %v11350_v56  ;;  %v11433_v5 = vld [vmem:[%s14366_s11 + $0x3b8] ss:$28 sps:$4 sm:$0xff]   ;;  %v11436_v56 = vld [vmem:[%s14366_s11 + $0x3c0] ss:$28 sps:$4 sm:$0xff]  }
 0x74c   :  { %6666 = vmatprep.subr.bf16.mxu1 %v11355_v14  ;;  %6707 = vmatprep.subr.bf16.mxu0 %v11358_v18  ;;  %v11441_v14 = vld [vmem:[%s14366_s11 + $0x3f4] ss:$28 sps:$4 sm:$0xff]   ;;  %v11444_v18 = vld [vmem:[%s14366_s11 + $0x3fc] ss:$28 sps:$4 sm:$0xff]  }
 0x74d   :  { %6696 = vmatprep.mubr.bf16.mxu1 %v11644_v59  ;;  %6737 = vmatprep.mubr.bf16.mxu0 %v11644_v59 }
 0x74f   :  { %6667 = vmatpush1.bf16.msra.mxu1 %v11353_v63  ;;  %6708 = vmatpush1.bf16.msra.mxu0 %v11356_v28  ;;  %v11439_v63 = vld [vmem:[%s14366_s11 + $0x3f0] ss:$28 sps:$4 sm:$0xff]   ;;  %v11442_v28 = vld [vmem:[%s14366_s11 + $0x3f8] ss:$28 sps:$4 sm:$0xff]  }
 0x750   :  { %6668 = vmatprep.subr.bf16.mxu1 %v11361_v16  ;;  %6709 = vmatprep.subr.bf16.mxu0 %v11364_v30  ;;  %v11447_v16 = vld [vmem:[%s14366_s11 + $0x42c] ss:$28 sps:$4 sm:$0xff]   ;;  %v11450_v30 = vld [vmem:[%s14366_s11 + $0x434] ss:$28 sps:$4 sm:$0xff]  }
 0x753   :  { %6669 = vmatpush1.bf16.msra.mxu1 %v11359_v24  ;;  %6710 = vmatpush1.bf16.msra.mxu0 %v11362_v32  ;;  %v11445_v24 = vld [vmem:[%s14366_s11 + $0x428] ss:$28 sps:$4 sm:$0xff]   ;;  %v11448_v32 = vld [vmem:[%s14366_s11 + $0x430] ss:$28 sps:$4 sm:$0xff]  }
 0x754   :  { %6670 = vmatprep.subr.bf16.mxu1 %v11367_v7  ;;  %6711 = vmatprep.subr.bf16.mxu0 %v11370_v20  ;;  %v11453_v7 = vld [vmem:[%s14366_s11 + $0x464] ss:$28 sps:$4 sm:$0xff]   ;;  %v11456_v20 = vld [vmem:[%s14366_s11 + $0x46c] ss:$28 sps:$4 sm:$0xff]  }
 0x757   :  { %6671 = vmatpush1.bf16.msra.mxu1 %v11365_v27  ;;  %6712 = vmatpush1.bf16.msra.mxu0 %v11368_v55  ;;  %v11451_v27 = vld [vmem:[%s14366_s11 + $0x460] ss:$28 sps:$4 sm:$0xff]   ;;  %v11454_v55 = vld [vmem:[%s14366_s11 + $0x468] ss:$28 sps:$4 sm:$0xff]  }
 0x758   :  { %6672 = vmatprep.subr.bf16.mxu1 %v11373_v43  ;;  %6713 = vmatprep.subr.bf16.mxu0 %v11376_v37  ;;  %v11459_v43 = vld [vmem:[%s14366_s11 + $0x49c] ss:$28 sps:$4 sm:$0xff]   ;;  %v11462_v37 = vld [vmem:[%s14366_s11 + $0x4a4] ss:$28 sps:$4 sm:$0xff]  }
 0x75b   :  { %6673 = vmatpush1.bf16.msra.mxu1 %v11371_v31  ;;  %6714 = vmatpush1.bf16.msra.mxu0 %v11374_v21  ;;  %v11457_v31 = vld [vmem:[%s14366_s11 + $0x498] ss:$28 sps:$4 sm:$0xff]   ;;  %v11460_v21 = vld [vmem:[%s14366_s11 + $0x4a0] ss:$28 sps:$4 sm:$0xff]  }
 0x75c   :  { %6674 = vmatprep.subr.bf16.mxu1 %v11379_v8  ;;  %6715 = vmatprep.subr.bf16.mxu0 %v11382_v11  ;;  %v11465_v8 = vld [vmem:[%s14366_s11 + $0x4d4] ss:$28 sps:$4 sm:$0xff]   ;;  %v11468_v11 = vld [vmem:[%s14366_s11 + $0x4dc] ss:$28 sps:$4 sm:$0xff]  }
 0x75f   :  { %6675 = vmatpush1.bf16.msra.mxu1 %v11377_v0  ;;  %6716 = vmatpush1.bf16.msra.mxu0 %v11380_v41  ;;  %v11463_v0 = vld [vmem:[%s14366_s11 + $0x4d0] ss:$28 sps:$4 sm:$0xff]   ;;  %v11466_v41 = vld [vmem:[%s14366_s11 + $0x4d8] ss:$28 sps:$4 sm:$0xff]  }
 0x760   :  { %6676 = vmatprep.subr.bf16.mxu1 %v11385_v6  ;;  %6717 = vmatprep.subr.bf16.mxu0 %v11388_v17  ;;  %v11471_v6 = vld [vmem:[%s14366_s11 + $0x50c] ss:$28 sps:$4 sm:$0xff]   ;;  %v11474_v17 = vld [vmem:[%s14366_s11 + $0x514] ss:$28 sps:$4 sm:$0xff]  }
 0x763   :  { %6677 = vmatpush1.bf16.msra.mxu1 %v11383_v12  ;;  %6718 = vmatpush1.bf16.msra.mxu0 %v11386_v45  ;;  %v11469_v12 = vld [vmem:[%s14366_s11 + $0x508] ss:$28 sps:$4 sm:$0xff]   ;;  %v11472_v45 = vld [vmem:[%s14366_s11 + $0x510] ss:$28 sps:$4 sm:$0xff]  }
 0x764   :  { %6678 = vmatprep.subr.bf16.mxu1 %v11391_v57  ;;  %6719 = vmatprep.subr.bf16.mxu0 %v11394_v35  ;;  %v11477_v57 = vld [vmem:[%s14366_s11 + $0x394] ss:$28 sps:$4 sm:$0xff]  }
 0x765   :  { %v11475_v35 = vld [vmem:[%s14366_s11 + $0x390] ss:$28 sps:$4 sm:$0xff]  }
 0x767   :  { %6679 = vmatpush1.bf16.msra.mxu1 %v11389_v53  ;;  %6720 = vmatpush1.bf16.msra.mxu0 %v11392_v49  ;;  %v11478_v53 = vld [vmem:[%s14366_s11 + $0x398] ss:$28 sps:$4 sm:$0xff]   ;;  %v13876_v49 = vrot.slane %v13495_v44, 1 }
 0x768   :  { %6746 = vmatprep.subr.bf16.mxu1 %v11397_v3  ;;  %10981 = vmatprep.subr.bf16.mxu0 %v13489_v39  ;;  %v13878_v3 = vld [vmem:[#allocation6 + $0x1f] sm:$0xff] }
 0x76a   :  { %6697 = vmatmul.mubr.bf16.vlgmr.msra.gmra.mrb[240].mxu1 %v13495_v44  ;;  %6738 = vmatmul.mubr.bf16.vlgmr.msra.gmra.mrb[244].mxu0 %v13495_v44 }
 0x76b   :  { %6747 = vmatpush1.bf16.msra.mxu1 %v11395_v23  ;;  %10982 = vmatpush3.bf16.msra.mxu0 %v11398_v22  ;;  %v11481_v23 = vld [vmem:[%s14366_s11 + $0x3cc] ss:$28 sps:$4 sm:$0xff]  }
 0x76c   :  { %6748 = vmatprep.subr.bf16.mxu1 %v11401_v58  ;;  %10983 = vmatprep.subr.bf16.mxu0 %v13489_v39  ;;  %v11482_v22 = vld [vmem:[%s14366_s11 + $0x3d0] ss:$28 sps:$4 sm:$0xff]   ;;  %v11485_v58 = vld [vmem:[%s14366_s11 + $0x404] ss:$28 sps:$4 sm:$0xff]  }
 0x76d   :  { %6778 = vmatprep.mubr.bf16.mxu1 %v11644_v59  ;;  %10997 = vmatprep.mubr.msk.bf16.mxu0 %vm11643_vm2, %v13489_v39 }
 0x76f   :  { %6749 = vmatpush1.bf16.msra.mxu1 %v11399_v60  ;;  %10984 = vmatpush3.bf16.msra.mxu0 %v11402_v13  ;;  %v11483_v60 = vld [vmem:[%s14366_s11 + $0x400] ss:$28 sps:$4 sm:$0xff]   ;;  %v11486_v13 = vld [vmem:[%s14366_s11 + $0x408] ss:$28 sps:$4 sm:$0xff]  }
 0x770   :  { %6750 = vmatprep.subr.bf16.mxu1 %v11405_v38  ;;  %10985 = vmatprep.subr.bf16.mxu0 %v13489_v39  ;;  %v11489_v38 = vld [vmem:[%s14366_s11 + $0x43c] ss:$28 sps:$4 sm:$0xff]  }
 0x773   :  { %6751 = vmatpush1.bf16.msra.mxu1 %v11403_v48  ;;  %10986 = vmatpush3.bf16.msra.mxu0 %v11406_v40  ;;  %v11487_v48 = vld [vmem:[%s14366_s11 + $0x438] ss:$28 sps:$4 sm:$0xff]   ;;  %v11490_v40 = vld [vmem:[%s14366_s11 + $0x440] ss:$28 sps:$4 sm:$0xff]  }
 0x774   :  { %6752 = vmatprep.subr.bf16.mxu1 %v11409_v54  ;;  %10987 = vmatprep.subr.bf16.mxu0 %v13489_v39  ;;  %v11493_v54 = vld [vmem:[%s14366_s11 + $0x474] ss:$28 sps:$4 sm:$0xff]  }
 0x777   :  { %6753 = vmatpush1.bf16.msra.mxu1 %v11407_v52  ;;  %10988 = vmatpush3.bf16.msra.mxu0 %v11410_v34  ;;  %v11491_v52 = vld [vmem:[%s14366_s11 + $0x470] ss:$28 sps:$4 sm:$0xff]   ;;  %v11494_v34 = vld [vmem:[%s14366_s11 + $0x478] ss:$28 sps:$4 sm:$0xff]  }
 0x778   :  { %6754 = vmatprep.subr.bf16.mxu1 %v11413_v33  ;;  %10989 = vmatprep.subr.bf16.mxu0 %v13489_v39  ;;  %v11497_v33 = vld [vmem:[%s14366_s11 + $0x4ac] ss:$28 sps:$4 sm:$0xff]  }
 0x77b   :  { %6755 = vmatpush1.bf16.msra.mxu1 %v11411_v10  ;;  %10990 = vmatpush3.bf16.msra.mxu0 %v11414_v51  ;;  %v11495_v10 = vld [vmem:[%s14366_s11 + $0x4a8] ss:$28 sps:$4 sm:$0xff]   ;;  %v11498_v51 = vld [vmem:[%s14366_s11 + $0x4b0] ss:$28 sps:$4 sm:$0xff]  }
 0x77c   :  { %6756 = vmatprep.subr.bf16.mxu1 %v11417_v2  ;;  %10991 = vmatprep.subr.bf16.mxu0 %v13489_v39  ;;  %v11501_v2 = vld [vmem:[%s14366_s11 + $0x4e4] ss:$28 sps:$4 sm:$0xff]  }
 0x77f   :  { %6757 = vmatpush1.bf16.msra.mxu1 %v11415_v25  ;;  %10992 = vmatpush3.bf16.msra.mxu0 %v11418_v4  ;;  %v11499_v25 = vld [vmem:[%s14366_s11 + $0x4e0] ss:$28 sps:$4 sm:$0xff]   ;;  %v11502_v4 = vld [vmem:[%s14366_s11 + $0x4e8] ss:$28 sps:$4 sm:$0xff]  }
 0x780   :  { %6758 = vmatprep.subr.bf16.mxu1 %v11421_v62  ;;  %10993 = vmatprep.subr.bf16.mxu0 %v13489_v39  ;;  %v11505_v62 = vld [vmem:[%s14366_s11 + $0x51c] ss:$28 sps:$4 sm:$0xff]  }
 0x783   :  { %6759 = vmatpush1.bf16.msra.mxu1 %v11419_v1  ;;  %10994 = vmatpush3.bf16.msra.mxu0 %v11422_v15  ;;  %v11503_v1 = vld [vmem:[%s14366_s11 + $0x518] ss:$28 sps:$4 sm:$0xff]   ;;  %v11506_v15 = vld [vmem:[%s14366_s11 + $0x520] ss:$28 sps:$4 sm:$0xff]  }
 0x784   :  { %6760 = vmatprep.subr.bf16.mxu1 %v11425_v19  ;;  %10995 = vmatprep.subr.bf16.mxu0 %v13489_v39  ;;  %v11435_v39 = vld [vmem:[%s14366_s11 + $0x3bc] ss:$28 sps:$4 sm:$0xff]   ;;  %v11509_v19 = vld [vmem:[%s14366_s11 + $0x544] ss:$28 sps:$4 sm:$0xff]  }
 0x787   :  { %6761 = vmatpush1.bf16.msra.mxu1 %v11423_v36  ;;  %10996 = vmatpush3.bf16.msra.mxu0 %v11426_v46  ;;  %v11512_v36 = vld [vmem:[%s14366_s11 + $0x54c] ss:$28 sps:$4 sm:$0xff]   ;;  %v11507_v46 = vld [vmem:[%s14366_s11 + $0x540] ss:$28 sps:$4 sm:$0xff]  }
 0x788   :  { %7183 = vmatprep.subr.bf16.mxu1 %v11429_v47  ;;  %7224 = vmatprep.subr.bf16.mxu0 %v11432_v50  ;;  %v11510_v47 = vld [vmem:[%s14366_s11 + $0x548] ss:$28 sps:$4 sm:$0xff]   ;;  %v11515_v50 = vld [vmem:[%s14366_s11 + $0x57c] ss:$28 sps:$4 sm:$0xff]  }
 0x78a   :  { %6779 = vmatmul.mubr.bf16.vlgmr.msra.gmra.mrb[244].mxu1 %v13495_v44  ;;  %10998 = vmatmul.mubr.bf16.vlgmr.msra.gmra.mrb[248].mxu0 %v13495_v44  ;;  %v11479_v44 = vld [vmem:[%s14366_s11 + $0x3c8] ss:$28 sps:$4 sm:$0xff]  }
 0x78b   :  { %7184 = vmatpush1.bf16.msra.mxu1 %v11427_v61  ;;  %7225 = vmatpush1.bf16.msra.mxu0 %v11430_v29  ;;  %v11518_v61 = vld [vmem:[%s14366_s11 + $0x584] ss:$28 sps:$4 sm:$0xff]   ;;  %v11513_v29 = vld [vmem:[%s14366_s11 + $0x578] ss:$28 sps:$4 sm:$0xff]  }
 0x78c   :  { %7185 = vmatprep.subr.bf16.mxu1 %v11435_v39  ;;  %7226 = vmatprep.subr.bf16.mxu0 %v11438_v42  ;;  %v11516_v39 = vld [vmem:[%s14366_s11 + $0x580] ss:$28 sps:$4 sm:$0xff]   ;;  %v11521_v42 = vld [vmem:[%s14366_s11 + $0x5b4] ss:$28 sps:$4 sm:$0xff]  }
 0x78d   :  { %7215 = vmatprep.mubr.bf16.mxu1 %v11644_v59  ;;  %7256 = vmatprep.mubr.bf16.mxu0 %v11644_v59 }
 0x78f   :  { %7186 = vmatpush1.bf16.msra.mxu1 %v11433_v5  ;;  %7227 = vmatpush1.bf16.msra.mxu0 %v11436_v56  ;;  %v11524_v5 = vld [vmem:[%s14366_s11 + $0x5bc] ss:$28 sps:$4 sm:$0xff]   ;;  %v11519_v56 = vld [vmem:[%s14366_s11 + $0x5b0] ss:$28 sps:$4 sm:$0xff]  }
 0x790   :  { %7187 = vmatprep.subr.bf16.mxu1 %v11441_v14  ;;  %7228 = vmatprep.subr.bf16.mxu0 %v11444_v18  ;;  %v11522_v14 = vld [vmem:[%s14366_s11 + $0x5b8] ss:$28 sps:$4 sm:$0xff]   ;;  %v11527_v18 = vld [vmem:[%s14366_s11 + $0x5ec] ss:$28 sps:$4 sm:$0xff]  }
 0x793   :  { %7188 = vmatpush1.bf16.msra.mxu1 %v11439_v63  ;;  %7229 = vmatpush1.bf16.msra.mxu0 %v11442_v28  ;;  %v11530_v63 = vld [vmem:[%s14366_s11 + $0x5f4] ss:$28 sps:$4 sm:$0xff]   ;;  %v11525_v28 = vld [vmem:[%s14366_s11 + $0x5e8] ss:$28 sps:$4 sm:$0xff]  }
 0x794   :  { %7189 = vmatprep.subr.bf16.mxu1 %v11447_v16  ;;  %7230 = vmatprep.subr.bf16.mxu0 %v11450_v30  ;;  %v11528_v16 = vld [vmem:[%s14366_s11 + $0x5f0] ss:$28 sps:$4 sm:$0xff]   ;;  %v11533_v30 = vld [vmem:[%s14366_s11 + $0x624] ss:$28 sps:$4 sm:$0xff]  }
 0x797   :  { %7190 = vmatpush1.bf16.msra.mxu1 %v11445_v24  ;;  %7231 = vmatpush1.bf16.msra.mxu0 %v11448_v32  ;;  %v11536_v24 = vld [vmem:[%s14366_s11 + $0x62c] ss:$28 sps:$4 sm:$0xff]   ;;  %v11531_v32 = vld [vmem:[%s14366_s11 + $0x620] ss:$28 sps:$4 sm:$0xff]  }
 0x798   :  { %7191 = vmatprep.subr.bf16.mxu1 %v11453_v7  ;;  %7232 = vmatprep.subr.bf16.mxu0 %v11456_v20  ;;  %v11534_v7 = vld [vmem:[%s14366_s11 + $0x628] ss:$28 sps:$4 sm:$0xff]   ;;  %v11539_v20 = vld [vmem:[%s14366_s11 + $0x65c] ss:$28 sps:$4 sm:$0xff]  }
 0x79b   :  { %7192 = vmatpush1.bf16.msra.mxu1 %v11451_v27  ;;  %7233 = vmatpush1.bf16.msra.mxu0 %v11454_v55  ;;  %v11542_v27 = vld [vmem:[%s14366_s11 + $0x664] ss:$28 sps:$4 sm:$0xff]   ;;  %v11537_v55 = vld [vmem:[%s14366_s11 + $0x658] ss:$28 sps:$4 sm:$0xff]  }
 0x79c   :  { %7193 = vmatprep.subr.bf16.mxu1 %v11459_v43  ;;  %7234 = vmatprep.subr.bf16.mxu0 %v11462_v37  ;;  %v11540_v43 = vld [vmem:[%s14366_s11 + $0x660] ss:$28 sps:$4 sm:$0xff]   ;;  %v11545_v37 = vld [vmem:[%s14366_s11 + $0x694] ss:$28 sps:$4 sm:$0xff]  }
 0x79f   :  { %7194 = vmatpush1.bf16.msra.mxu1 %v11457_v31  ;;  %7235 = vmatpush1.bf16.msra.mxu0 %v11460_v21  ;;  %v11548_v31 = vld [vmem:[%s14366_s11 + $0x69c] ss:$28 sps:$4 sm:$0xff]   ;;  %v11543_v21 = vld [vmem:[%s14366_s11 + $0x690] ss:$28 sps:$4 sm:$0xff]  }
 0x7a0   :  { %7195 = vmatprep.subr.bf16.mxu1 %v11465_v8  ;;  %7236 = vmatprep.subr.bf16.mxu0 %v11468_v11  ;;  %v11546_v8 = vld [vmem:[%s14366_s11 + $0x698] ss:$28 sps:$4 sm:$0xff]   ;;  %v11551_v11 = vld [vmem:[%s14366_s11 + $0x6cc] ss:$28 sps:$4 sm:$0xff]  }
 0x7a3   :  { %7196 = vmatpush1.bf16.msra.mxu1 %v11463_v0  ;;  %7237 = vmatpush1.bf16.msra.mxu0 %v11466_v41  ;;  %v11554_v0 = vld [vmem:[%s14366_s11 + $0x6d4] ss:$28 sps:$4 sm:$0xff]   ;;  %v11549_v41 = vld [vmem:[%s14366_s11 + $0x6c8] ss:$28 sps:$4 sm:$0xff]  }
 0x7a4   :  { %7197 = vmatprep.subr.bf16.mxu1 %v11471_v6  ;;  %7238 = vmatprep.subr.bf16.mxu0 %v11474_v17  ;;  %v11552_v6 = vld [vmem:[%s14366_s11 + $0x6d0] ss:$28 sps:$4 sm:$0xff]  }
 0x7a5   :  { %v11557_v17 = vld [vmem:[%s14366_s11 + $0x554] ss:$28 sps:$4 sm:$0xff]  }
 0x7a7   :  { %7198 = vmatpush1.bf16.msra.mxu1 %v11469_v12  ;;  %7239 = vmatpush1.bf16.msra.mxu0 %v11472_v45  ;;  %v11555_v12 = vld [vmem:[%s14366_s11 + $0x550] ss:$28 sps:$4 sm:$0xff]   ;;  %v11558_v45 = vld [vmem:[%s14366_s11 + $0x558] ss:$28 sps:$4 sm:$0xff]  }
 0x7a8   :  { %7265 = vmatprep.subr.bf16.mxu1 %v11477_v57  ;;  %11001 = vmatprep.subr.bf16.mxu0 %v13878_v3  ;;  %v14066_v57 = vrot.slane %v13504_v26, 1  ;;  %v11562_v26 = vld [vmem:[%s14366_s11 + $0x590] ss:$28 sps:$4 sm:$0xff]  }
 0x7aa   :  { %7216 = vmatmul.mubr.bf16.vlgmr.msra.gmra.mrb[248].mxu1 %v13876_v49  ;;  %7257 = vmatmul.mubr.bf16.vlgmr.msra.gmra.mrb[252].mxu0 %v13876_v49 }
 0x7ab   :  { %7266 = vmatpush1.bf16.msra.mxu1 %v11475_v35  ;;  %11002 = vmatpush3.bf16.msra.mxu0 %v11478_v53  ;;  %v11561_v35 = vld [vmem:[%s14366_s11 + $0x58c] ss:$28 sps:$4 sm:$0xff]  }
 0x7ac   :  { %7267 = vmatprep.subr.bf16.mxu1 %v11481_v23  ;;  %11003 = vmatprep.subr.bf16.mxu0 %v13878_v3  ;;  %v11559_v53 = vld [vmem:[%s14366_s11 + $0x588] ss:$28 sps:$4 sm:$0xff]   ;;  %v11563_v23 = vld [vmem:[%s14366_s11 + $0x5c0] ss:$28 sps:$4 sm:$0xff]  }
 0x7ad   :  { %7297 = vmatprep.mubr.bf16.mxu1 %v11644_v59  ;;  %11017 = vmatprep.mubr.msk.bf16.mxu0 %vm11643_vm2, %v13878_v3 }
 0x7af   :  { %7268 = vmatpush1.bf16.msra.mxu1 %v11479_v44  ;;  %11004 = vmatpush3.bf16.msra.mxu0 %v11482_v22  ;;  %v11566_v44 = vld [vmem:[%s14366_s11 + $0x5c8] ss:$28 sps:$4 sm:$0xff]   ;;  %v11567_v22 = vld [vmem:[%s14366_s11 + $0x5f8] ss:$28 sps:$4 sm:$0xff]  }
 0x7b0   :  { %7269 = vmatprep.subr.bf16.mxu1 %v11485_v58  ;;  %11005 = vmatprep.subr.bf16.mxu0 %v13878_v3  ;;  %v11570_v58 = vld [vmem:[%s14366_s11 + $0x600] ss:$28 sps:$4 sm:$0xff]  }
 0x7b3   :  { %7270 = vmatpush1.bf16.msra.mxu1 %v11483_v60  ;;  %11006 = vmatpush3.bf16.msra.mxu0 %v11486_v13  ;;  %v11573_v60 = vld [vmem:[%s14366_s11 + $0x634] ss:$28 sps:$4 sm:$0xff]  }
 0x7b4   :  { %7271 = vmatprep.subr.bf16.mxu1 %v11489_v38  ;;  %11007 = vmatprep.subr.bf16.mxu0 %v13878_v3  ;;  %v11571_v13 = vld [vmem:[%s14366_s11 + $0x630] ss:$28 sps:$4 sm:$0xff]   ;;  %v11574_v38 = vld [vmem:[%s14366_s11 + $0x638] ss:$28 sps:$4 sm:$0xff]  }
 0x7b7   :  { %7272 = vmatpush1.bf16.msra.mxu1 %v11487_v48  ;;  %11008 = vmatpush3.bf16.msra.mxu0 %v11490_v40  ;;  %v11577_v48 = vld [vmem:[%s14366_s11 + $0x66c] ss:$28 sps:$4 sm:$0xff]  }
 0x7b8   :  { %7273 = vmatprep.subr.bf16.mxu1 %v11493_v54  ;;  %11009 = vmatprep.subr.bf16.mxu0 %v13878_v3  ;;  %v11575_v40 = vld [vmem:[%s14366_s11 + $0x668] ss:$28 sps:$4 sm:$0xff]   ;;  %v11578_v54 = vld [vmem:[%s14366_s11 + $0x670] ss:$28 sps:$4 sm:$0xff]  }
 0x7bb   :  { %7274 = vmatpush1.bf16.msra.mxu1 %v11491_v52  ;;  %11010 = vmatpush3.bf16.msra.mxu0 %v11494_v34  ;;  %v11581_v52 = vld [vmem:[%s14366_s11 + $0x6a4] ss:$28 sps:$4 sm:$0xff]  }
 0x7bc   :  { %7275 = vmatprep.subr.bf16.mxu1 %v11497_v33  ;;  %11011 = vmatprep.subr.bf16.mxu0 %v13878_v3 }
 0x7bf   :  { %7276 = vmatpush1.bf16.msra.mxu1 %v11495_v10  ;;  %11012 = vmatpush3.bf16.msra.mxu0 %v11498_v51 }
 0x7c0   :  { %7277 = vmatprep.subr.bf16.mxu1 %v11501_v2  ;;  %11013 = vmatprep.subr.bf16.mxu0 %v13878_v3 }
 0x7c3   :  { %7278 = vmatpush1.bf16.msra.mxu1 %v11499_v25  ;;  %11014 = vmatpush3.bf16.msra.mxu0 %v11502_v4  ;;  %v11579_v4 = vld [vmem:[%s14366_s11 + $0x6a0] ss:$28 sps:$4 sm:$0xff]  }
 0x7c4   :  { %7279 = vmatprep.subr.bf16.mxu1 %v11505_v62  ;;  %11015 = vmatprep.subr.bf16.mxu0 %v13878_v3  ;;  %v11582_v62 = vld [vmem:[%s14366_s11 + $0x6a8] ss:$28 sps:$4 sm:$0xff]  }
 0x7c7   :  { %7280 = vmatpush1.bf16.msra.mxu1 %v11503_v1  ;;  %11016 = vmatpush3.bf16.msra.mxu0 %v11506_v15 }
 0x7c8   :  { %7708 = vmatprep.subr.bf16.mxu1 %v11509_v19  ;;  %7749 = vmatprep.subr.bf16.mxu0 %v11512_v36  ;;  %v11585_v19 = vld [vmem:[%s14366_s11 + $0x6dc] ss:$28 sps:$4 sm:$0xff]  }
 0x7c9   :  { %v11583_v36 = vld [vmem:[%s14366_s11 + $0x6d8] ss:$28 sps:$4 sm:$0xff]  }
 0x7ca   :  { %7298 = vmatmul.mubr.bf16.vlgmr.msra.gmra.mrb[252].mxu1 %v13876_v49  ;;  %11018 = vmatmul.mubr.bf16.vlgmr.msra.gmra.mrb[0].mxu0 %v13876_v49  ;;  %v11565_v49 = vld [vmem:[%s14366_s11 + $0x5c4] ss:$28 sps:$4 sm:$0xff]  }
 0x7cb   :  { %7709 = vmatpush1.bf16.msra.mxu1 %v11507_v46  ;;  %7750 = vmatpush1.bf16.msra.mxu0 %v11510_v47  ;;  %v11586_v46 = vld [vmem:[%s14366_s11 + $0x6e0] ss:$28 sps:$4 sm:$0xff]  }
 0x7cc   :  { %7710 = vmatprep.subr.bf16.mxu1 %v11515_v50  ;;  %7751 = vmatprep.subr.bf16.mxu0 %v11518_v61 }
 0x7cd   :  { %7740 = vmatprep.mubr.bf16.mxu1 %v11644_v59  ;;  %7781 = vmatprep.mubr.bf16.mxu0 %v11644_v59 }
 0x7cf   :  { %7711 = vmatpush1.bf16.msra.mxu1 %v11513_v29  ;;  %7752 = vmatpush1.bf16.msra.mxu0 %v11516_v39 }
 0x7d0   :  { %7712 = vmatprep.subr.bf16.mxu1 %v11521_v42  ;;  %7753 = vmatprep.subr.bf16.mxu0 %v11524_v5 }
 0x7d3   :  { %7713 = vmatpush1.bf16.msra.mxu1 %v11519_v56  ;;  %7754 = vmatpush1.bf16.msra.mxu0 %v11522_v14  ;;  %v11587_v14 = vld [vmem:[%s14368_s13 + $0x40] sm:$0xff]  }
 0x7d4   :  { %7714 = vmatprep.subr.bf16.mxu1 %v11527_v18  ;;  %7755 = vmatprep.subr.bf16.mxu0 %v11530_v63  ;;  %v11588_v18 = vld [vmem:[%s14368_s13 + $0xc0] sm:$0xff]  }
 0x7d5   :  { %v11589_v63 = vld [vmem:[%s14368_s13] sm:$0xff]  }
 0x7d7   :  { %7715 = vmatpush1.bf16.msra.mxu1 %v11525_v28  ;;  %7756 = vmatpush1.bf16.msra.mxu0 %v11528_v16  ;;  %v11590_v28 = vld [vmem:[%s14368_s13 + $0x80] sm:$0xff]   ;;  %v11591_v16 = vld [vmem:[%s14368_s13 + $0x48] sm:$0xff]  }
 0x7d8   :  { %7716 = vmatprep.subr.bf16.mxu1 %v11533_v30  ;;  %7757 = vmatprep.subr.bf16.mxu0 %v11536_v24  ;;  %v11592_v30 = vld [vmem:[%s14368_s13 + $0xc8] sm:$0xff]  }
 0x7d9   :  { %v11593_v24 = vld [vmem:[%s14368_s13 + $0x8] sm:$0xff]  }
 0x7db   :  { %7717 = vmatpush1.bf16.msra.mxu1 %v11531_v32  ;;  %7758 = vmatpush1.bf16.msra.mxu0 %v11534_v7  ;;  %v11594_v32 = vld [vmem:[%s14368_s13 + $0x88] sm:$0xff]   ;;  %v11595_v7 = vld [vmem:[%s14368_s13 + $0x50] sm:$0xff]  }
 0x7dc   :  { %7718 = vmatprep.subr.bf16.mxu1 %v11539_v20  ;;  %7759 = vmatprep.subr.bf16.mxu0 %v11542_v27  ;;  %v11596_v20 = vld [vmem:[%s14368_s13 + $0xd0] sm:$0xff]  }
 0x7dd   :  { %v11597_v27 = vld [vmem:[%s14368_s13 + $0x10] sm:$0xff]  }
 0x7df   :  { %7719 = vmatpush1.bf16.msra.mxu1 %v11537_v55  ;;  %7760 = vmatpush1.bf16.msra.mxu0 %v11540_v43  ;;  %v11598_v55 = vld [vmem:[%s14368_s13 + $0x90] sm:$0xff]   ;;  %v11599_v43 = vld [vmem:[%s14368_s13 + $0x58] sm:$0xff]  }
 0x7e0   :  { %7720 = vmatprep.subr.bf16.mxu1 %v11545_v37  ;;  %7761 = vmatprep.subr.bf16.mxu0 %v11548_v31  ;;  %v11600_v37 = vld [vmem:[%s14368_s13 + $0xd8] sm:$0xff]  }
 0x7e1   :  { %v11601_v31 = vld [vmem:[%s14368_s13 + $0x18] sm:$0xff]  }
 0x7e3   :  { %7721 = vmatpush1.bf16.msra.mxu1 %v11543_v21  ;;  %7762 = vmatpush1.bf16.msra.mxu0 %v11546_v8  ;;  %v11602_v21 = vld [vmem:[%s14368_s13 + $0x98] sm:$0xff]   ;;  %v11603_v8 = vld [vmem:[%s14368_s13 + $0x60] sm:$0xff]  }
 0x7e4   :  { %7722 = vmatprep.subr.bf16.mxu1 %v11551_v11  ;;  %7763 = vmatprep.subr.bf16.mxu0 %v11554_v0  ;;  %v11604_v11 = vld [vmem:[%s14368_s13 + $0xe0] sm:$0xff]  }
 0x7e5   :  { %v11605_v0 = vld [vmem:[%s14368_s13 + $0x20] sm:$0xff]  }
 0x7e7   :  { %7723 = vmatpush1.bf16.msra.mxu1 %v11549_v41  ;;  %7764 = vmatpush1.bf16.msra.mxu0 %v11552_v6  ;;  %v11606_v41 = vld [vmem:[%s14368_s13 + $0xa0] sm:$0xff]   ;;  %v11607_v6 = vld [vmem:[%s14368_s13 + $0x68] sm:$0xff]  }
 0x7e8   :  { %7790 = vmatprep.subr.bf16.mxu1 %v11557_v17  ;;  %11021 = vmatprep.subr.bf16.mxu0 %v13878_v3  ;;  %v11608_v17 = vld [vmem:[%s14368_s13 + $0xe8] sm:$0xff]  }
 0x7ea   :  { %7741 = vmatmul.mubr.bf16.vlgmr.msra.gmra.mrb[0].mxu1 %v14066_v57  ;;  %7782 = vmatmul.mubr.bf16.vlgmr.msra.gmra.mrb[4].mxu0 %v14066_v57 }
 0x7eb   :  { %7791 = vmatpush1.bf16.msra.mxu1 %v11555_v12  ;;  %11022 = vmatpush3.bf16.msra.mxu0 %v11558_v45 }
 0x7ec   :  { %7792 = vmatprep.subr.bf16.mxu1 %v11561_v35  ;;  %11023 = vmatprep.subr.bf16.mxu0 %v13878_v3 }
 0x7ed   :  { %7822 = vmatprep.mubr.bf16.mxu1 %v11644_v59  ;;  %11037 = vmatprep.mubr.msk.bf16.mxu0 %vm11643_vm2, %v13878_v3  ;;  %v11569_v59 = vld [vmem:[%s14366_s11 + $0x5fc] ss:$28 sps:$4 sm:$0xff]  }
 0x7ef   :  { %7793 = vmatpush1.bf16.msra.mxu1 %v11559_v53  ;;  %11024 = vmatpush3.bf16.msra.mxu0 %v11562_v26 }
 0x7f0   :  { %7794 = vmatprep.subr.bf16.mxu1 %v11565_v49  ;;  %11025 = vmatprep.subr.bf16.mxu0 %v13878_v3  ;;  %v11609_v49 = vld [vmem:[%s14368_s13 + $0x28] sm:$0xff]  }
 0x7f3   :  { %7795 = vmatpush1.bf16.msra.mxu1 %v11563_v23  ;;  %11026 = vmatpush3.bf16.msra.mxu0 %v11566_v44 }
 0x7f4   :  { %7796 = vmatprep.subr.bf16.mxu1 %v11569_v59  ;;  %11027 = vmatprep.subr.bf16.mxu0 %v13878_v3 }
 0x7f7   :  { %7797 = vmatpush1.bf16.msra.mxu1 %v11567_v22  ;;  %11028 = vmatpush3.bf16.msra.mxu0 %v11570_v58  ;;  %v11610_v58 = vld [vmem:[%s14368_s13 + $0xa8] sm:$0xff]  }
 0x7f8   :  { %7798 = vmatprep.subr.bf16.mxu1 %v11573_v60  ;;  %11029 = vmatprep.subr.bf16.mxu0 %v13878_v3 }
 0x7fb   :  { %7799 = vmatpush1.bf16.msra.mxu1 %v11571_v13  ;;  %11030 = vmatpush3.bf16.msra.mxu0 %v11574_v38  ;;  %v11611_v38 = vld [vmem:[%s14368_s13 + $0x70] sm:$0xff]  }
 0x7fc   :  { %7800 = vmatprep.subr.bf16.mxu1 %v11577_v48  ;;  %11031 = vmatprep.subr.bf16.mxu0 %v13878_v3  ;;  %v11612_v48 = vld [vmem:[%s14368_s13 + $0xf0] sm:$0xff]  }
 0x7fd   :  { %v14127_v34 = vpop.f32.mrb[232].mxu1  ;;  %v14129_v33 = vpop.f32.mrb[236].mxu0 }
 0x7fe   :  { %v14131_v10 = vpop.f32.mrb[233].mxu1  ;;  %v14133_v51 = vpop.f32.mrb[237].mxu0 }
 0x7ff   :  { %7801 = vmatpush1.bf16.msra.mxu1 %v11575_v40  ;;  %11032 = vmatpush3.bf16.msra.mxu0 %v11578_v54  ;;  %v6251_v2 = vpop.f32.mrb[234].mxu1  ;;  %v6292_v25 = vpop.f32.mrb[238].mxu0  ;;  %v11613_v40 = vld [vmem:[%s14368_s13 + $0x30] sm:$0xff]  }
 0x800   :  { %v6252_v1 = vpop.f32.mrb[235].mxu1  ;;  %v6293_v15 = vpop.f32.mrb[239].mxu0  ;;  %7802 = vmatprep.subr.bf16.mxu1 %v11581_v52  ;;  %11033 = vmatprep.subr.bf16.mxu0 %v13878_v3  ;;  %v11614_v54 = vld [vmem:[%s14368_s13 + $0xb0] sm:$0xff]   ;;  %v11615_v52 = vld [vmem:[%s14368_s13 + $0x78] sm:$0xff]  }
 0x803   :  { %7803 = vmatpush1.bf16.msra.mxu1 %v11579_v4  ;;  %11034 = vmatpush3.bf16.msra.mxu0 %v11582_v62 }
 0x804   :  { %7804 = vmatprep.subr.bf16.mxu1 %v11585_v19  ;;  %11035 = vmatprep.subr.bf16.mxu0 %v13878_v3 }
 0x807   :  { %7805 = vmatpush1.bf16.msra.mxu1 %v11583_v36  ;;  %11036 = vmatpush3.bf16.msra.mxu0 %v11586_v46 }
 0x808   :  { %10028 = vmatprep.subr.bf16.mxu1 %v11587_v14  ;;  %10050 = vmatprep.subr.bf16.mxu0 %v11588_v18 }
 0x80a   :  { %7823 = vmatmul.mubr.bf16.vlgmr.msra.gmra.mrb[4].mxu1 %v14066_v57  ;;  %11038 = vmatmul.mubr.bf16.vlgmr.msra.gmra.mrb[8].mxu0 %v14066_v57 }
 0x80b   :  { %10029 = vmatpush3.bf16.msra.mxu1 %v11589_v63  ;;  %10051 = vmatpush3.bf16.msra.mxu0 %v11590_v28 }
 0x80c   :  { %10030 = vmatprep.subr.bf16.mxu1 %v11591_v16  ;;  %10052 = vmatprep.subr.bf16.mxu0 %v11592_v30 }
 0x80f   :  { %10031 = vmatpush3.bf16.msra.mxu1 %v11593_v24  ;;  %10053 = vmatpush3.bf16.msra.mxu0 %v11594_v32 }
 0x810   :  { %10032 = vmatprep.subr.bf16.mxu1 %v11595_v7  ;;  %10054 = vmatprep.subr.bf16.mxu0 %v11596_v20 }
 0x813   :  { %10033 = vmatpush3.bf16.msra.mxu1 %v11597_v27  ;;  %10055 = vmatpush3.bf16.msra.mxu0 %v11598_v55 }
 0x814   :  { %10034 = vmatprep.subr.bf16.mxu1 %v11599_v43  ;;  %10056 = vmatprep.subr.bf16.mxu0 %v11600_v37 }
 0x817   :  { %10035 = vmatpush3.bf16.msra.mxu1 %v11601_v31  ;;  %10057 = vmatpush3.bf16.msra.mxu0 %v11602_v21 }
 0x818   :  { %10036 = vmatprep.subr.bf16.mxu1 %v11603_v8  ;;  %10058 = vmatprep.subr.bf16.mxu0 %v11604_v11  ;;  %v7882_v11 = vsub.s32 0, %v12074_v9 }
 0x81b   :  { %10037 = vmatpush3.bf16.msra.mxu1 %v11605_v0  ;;  %10059 = vmatpush3.bf16.msra.mxu0 %v11606_v41  ;;  %v7890_v0 = vsub.s32 2, %v12074_v9  ;;  %v14278_v41 = vld [vmem:[%s14369_s12] sm:$0x7f] }
 0x81c   :  { %10038 = vmatprep.subr.bf16.mxu1 %v11607_v6  ;;  %10060 = vmatprep.subr.bf16.mxu0 %v11608_v17  ;;  %v7886_v6 = vsub.s32 1, %v12074_v9  ;;  %v7894_v17 = vsub.s32 3, %v12074_v9 }
 0x81d   :  { %v14154_v47 = vpop.f32.mrb[236].mxu1  ;;  %v14156_v50 = vpop.f32.mrb[240].mxu0 }
 0x81e   :  { %v14158_v61 = vpop.f32.mrb[237].mxu1  ;;  %v10979_v29 = vpop.f32.mrb[241].mxu0 }
 0x81f   :  { %v6333_v39 = vpop.f32.mrb[238].mxu1  ;;  %v6373_v42 = vpop.f32.mrb[242].mxu0  ;;  %10039 = vmatpush3.bf16.msra.mxu1 %v11609_v49  ;;  %10061 = vmatpush3.bf16.msra.mxu0 %v11610_v58 }
 0x820   :  { %v6334_v5 = vpop.f32.mrb[239].mxu1  ;;  %v10980_v56 = vpop.f32.mrb[243].mxu0  ;;  %10040 = vmatprep.subr.bf16.mxu1 %v11611_v38  ;;  %10062 = vmatprep.subr.bf16.mxu0 %v11612_v48 }
 0x823   :  { %10041 = vmatpush3.bf16.msra.mxu1 %v11613_v40  ;;  %10063 = vmatpush3.bf16.msra.mxu0 %v11614_v54 }
 0x824   :  { %10042 = vmatprep.subr.bf16.mxu1 %v11615_v52 }
 0x83d   :  { %v6698_v12 = vpop.f32.mrb[240].mxu1  ;;  %v6739_v45 = vpop.f32.mrb[244].mxu0 }
 0x83e   :  { %v6699_v57 = vadd.f32 %v6698_v12, %v14127_v34  ;;  %v6740_v35 = vadd.f32 %v6739_v45, %v14129_v33  ;;  %v6700_v53 = vpop.f32.mrb[241].mxu1  ;;  %v6741_v26 = vpop.f32.mrb[245].mxu0  ;;  %v11616_v34 = vld [vmem:[%s14368_s13 + $0xf8] sm:$0xff]   ;;  %v7883_v12 = vrot.slane %v14278_v41, %v7882_v11  ;;  %v7891_v45 = vrot.slane %v14278_v41, %v7890_v0 }
 0x83f   :  { %v6701_v23 = vadd.f32 %v6700_v53, %v14131_v10  ;;  %v6742_v44 = vadd.f32 %v6741_v26, %v14133_v51  ;;  %v6702_v59 = vpop.f32.mrb[242].mxu1  ;;  %v6743_v22 = vpop.f32.mrb[246].mxu0  ;;  %v11617_v33 = vld [vmem:[%s14368_s13 + $0x38] sm:$0xff]   ;;  %10064 = vmatprep.subr.bf16.mxu0 %v11616_v34  ;;  %v11619_v51 = vld [vmem:[%s14368_s13 + $0x140] sm:$0xff]   ;;  %v7887_v53 = vrot.slane %v14278_v41, %v7886_v6  ;;  %v7895_v26 = vrot.slane %v14278_v41, %v7894_v17 }
 0x840   :  { %v6703_v60 = vpop.f32.mrb[243].mxu1  ;;  %v6744_v13 = vpop.f32.mrb[247].mxu0  ;;  %v11618_v10 = vld [vmem:[%s14368_s13 + $0xb8] sm:$0xff]   ;;  %10043 = vmatpush3.bf16.msra.mxu1 %v11617_v33 }
 0x841   :  { %10065 = vmatpush3.bf16.msra.mxu0 %v11618_v10  ;;  %10072 = vmatprep.subr.bf16.mxu1 %v11619_v51 }
 0x842   :  { %11041 = vmatprep.subr.bf16.mxu0 %v13878_v3 }
 0x85d   :  { %v6780_v2 = vpop.f32.mrb[244].mxu1  ;;  %v6821_v25 = vpop.f32.mrb[248].mxu0 }
 0x85e   :  { %v6781_v4 = vadd.f32 %v6780_v2, %v14154_v47  ;;  %v6822_v62 = vadd.f32 %v6821_v25, %v14156_v50  ;;  %v6782_v1 = vpop.f32.mrb[245].mxu1  ;;  %v10999_v15 = vpop.f32.mrb[249].mxu0 }
 0x85f   :  { %v6783_v19 = vadd.f32 %v6782_v1, %v14158_v61  ;;  %v6784_v36 = vpop.f32.mrb[246].mxu1  ;;  %v6824_v46 = vpop.f32.mrb[250].mxu0  ;;  %v11631_v1 = vld [vmem:[%s14368_s13 + $0x180] sm:$0xff]  }
 0x860   :  { %v6785_v29 = vpop.f32.mrb[247].mxu1  ;;  %v11000_v39 = vpop.f32.mrb[251].mxu0  ;;  %v11621_v36 = vld [vmem:[%s14368_s13 + $0x148] sm:$0xff]  }
 0x861   :  { %v11622_v46 = vld [vmem:[%s14368_s13 + $0x108] sm:$0xff]   ;;  %v11623_v39 = vld [vmem:[%s14368_s13 + $0x150] sm:$0xff]  }
 0x862   :  { %v11634_v29 = vld [vmem:[%s14368_s13 + $0x188] sm:$0xff]  }
 0x87d   :  { %v7217_v42 = vpop.f32.mrb[248].mxu1  ;;  %v7258_v5 = vpop.f32.mrb[252].mxu0 }
 0x87e   :  { %v7346_v56 = vadd.f32 %v7217_v42, %v6699_v57  ;;  %v7348_v14 = vadd.f32 %v7258_v5, %v6740_v35  ;;  %v7219_v18 = vpop.f32.mrb[249].mxu1  ;;  %v7260_v63 = vpop.f32.mrb[253].mxu0  ;;  %v11624_v42 = vld [vmem:[%s14368_s13 + $0x110] sm:$0xff]   ;;  %v11625_v5 = vld [vmem:[%s14368_s13 + $0x158] sm:$0xff]  }
 0x87f   :  { %v7347_v28 = vadd.f32 %v7219_v18, %v6701_v23  ;;  %v7349_v16 = vadd.f32 %v7260_v63, %v6742_v44  ;;  %v7221_v30 = vpop.f32.mrb[250].mxu1  ;;  %v7262_v47 = vpop.f32.mrb[254].mxu0  ;;  %v11629_v18 = vld [vmem:[%s14368_s13 + $0x168] sm:$0xff]   ;;  %v7898_v63 = vsub.s32 4, %v12074_v9 }
 0x880   :  { %v7222_v24 = vpop.f32.mrb[251].mxu1  ;;  %v7263_v50 = vpop.f32.mrb[255].mxu0  ;;  %v7902_v30 = vsub.s32 5, %v12074_v9  ;;  %v11632_v47 = vld [vmem:[%s14368_s13 + $0x170] sm:$0xff]  }
 0x881   :  { %v7899_v24 = vrot.slane %v14278_v41, %v7898_v63 }
 0x89d   :  { %v7299_v32 = vpop.f32.mrb[252].mxu1  ;;  %v7340_v7 = vpop.f32.mrb[0].mxu0 }
 0x89e   :  { %v14267_v20 = vadd.f32 %v7299_v32, %v6781_v4  ;;  %v14269_v61 = vadd.f32 %v7340_v7, %v6822_v62  ;;  %v7301_v27 = vpop.f32.mrb[253].mxu1  ;;  %v11019_v55 = vpop.f32.mrb[1].mxu0  ;;  %v11620_v62 = vld [vmem:[%s14368_s13 + $0x100] sm:$0xff]  }
 0x89f   :  { %v14271_v43 = vadd.f32 %v7301_v27, %v6783_v19  ;;  %v7303_v37 = vpop.f32.mrb[254].mxu1  ;;  %v7343_v31 = vpop.f32.mrb[2].mxu0  ;;  %v7903_v27 = vrot.slane %v14278_v41, %v7902_v30  ;;  %v11633_v55 = vld [vmem:[%s14368_s13 + $0x130] sm:$0xff]  }
 0x8a0   :  { %v7304_v21 = vpop.f32.mrb[255].mxu1  ;;  %v11020_v8 = vpop.f32.mrb[3].mxu0 }
 0x8a1   :  { %v11635_v8 = vld [vmem:[%s14368_s13 + $0x178] sm:$0xff]  }
 0x8bd   :  { %v7742_v57 = vpop.f32.mrb[0].mxu1  ;;  %v7783_v35 = vpop.f32.mrb[4].mxu0 }
 0x8be   :  { %v7871_v49 = vadd.f32 %v7742_v57, %v7346_v56  ;;  %v7873_v23 = vadd.f32 %v7783_v35, %v7348_v14  ;;  %v7744_v44 = vpop.f32.mrb[1].mxu1  ;;  %v7785_v59 = vpop.f32.mrb[5].mxu0  ;;  %v11626_v56 = vld [vmem:[%s14368_s13 + $0x118] sm:$0xff]   ;;  %v11628_v14 = vld [vmem:[%s14368_s13 + $0x120] sm:$0xff]  }
 0x8bf   :  { %v7872_v22 = vadd.f32 %v7744_v44, %v7347_v28  ;;  %v7874_v58 = vadd.f32 %v7785_v59, %v7349_v16  ;;  %v7746_v60 = vpop.f32.mrb[2].mxu1  ;;  %v7787_v13 = vpop.f32.mrb[6].mxu0  ;;  %v7906_v28 = vsub.s32 6, %v12074_v9  ;;  %v11630_v16 = vld [vmem:[%s14368_s13 + $0x128] sm:$0xff]   ;;  %v8036_v59 = vld [vmem:[%s14370_s14] sm:$0x1] }
 0x8c0   :  { %v7915_v38 = vadd.f32 %v7883_v12, %v7871_v49  ;;  %v7917_v48 = vadd.f32 %v7891_v45, %v7873_v23  ;;  %v7747_v40 = vpop.f32.mrb[3].mxu1  ;;  %v7788_v54 = vpop.f32.mrb[7].mxu0 }
 0x8c1   :  { %v7916_v52 = vadd.f32 %v7887_v53, %v7872_v22  ;;  %v7918_v34 = vadd.f32 %v7895_v26, %v7874_v58  ;;  %v7907_v50 = vrot.slane %v14278_v41, %v7906_v28 }
 0x8c2   :  { %v7922_v33 = vmax.f32 %v7915_v38, 0.0  ;;  %v7924_v10 = vmax.f32 %v7917_v48, 0.0 }
 0x8c3   :  { %v7923_v51 = vmax.f32 %v7916_v52, 0.0  ;;  %v7925_v2 = vmax.f32 %v7918_v34, 0.0 }
 0x8c4   :  { %v7929_v15 = vpack.c.bf16 %v7922_v33, %v7922_v33  ;;  %v7931_v19 = vpack.c.bf16 %v7924_v10, %v7924_v10 }
 0x8c5   :  { %v7930_v25 = vpack.c.bf16 %v7923_v51, %v7923_v51  ;;  %v7932_v4 = vpack.c.bf16 %v7925_v2, %v7925_v2 }
 0x8c7   :  { %8373 = vmatprep.mubr.bf16.mxu1 %v7930_v25  ;;  %8413 = vmatprep.mubr.bf16.mxu0 %v7932_v4 }
 0x8c8   :  { %8374 = vmatmul.mubr.bf16.vlgmr.msra.gmra.mrb[8].mxu1 %v7929_v15  ;;  %8414 = vmatmul.mubr.bf16.vlgmr.msra.gmra.mrb[12].mxu0 %v7931_v19 }
 0x8c9   :  { %10073 = vmatpush3.bf16.msra.mxu1 %v11620_v62  ;;  %11042 = vmatpush3.bf16.msra.mxu0 %v11631_v1 }
 0x8ca   :  { %10074 = vmatprep.subr.bf16.mxu1 %v11621_v36  ;;  %11043 = vmatprep.subr.bf16.mxu0 %v13878_v3 }
 0x8cb   :  { %11045 = vmatprep.mubr.msk.bf16.mxu0 %vm11643_vm2, %v13878_v3  ;;  %v11627_v3 = vld [vmem:[%s14368_s13 + $0x160] sm:$0xff]   ;;  %vm8337_vm2 = vcmask 261120  }
 0x8cd   :  { %10075 = vmatpush3.bf16.msra.mxu1 %v11622_v46  ;;  %11044 = vmatpush3.bf16.msra.mxu0 %v11634_v29 }
 0x8ce   :  { %10076 = vmatprep.subr.bf16.mxu1 %v11623_v39 }
 0x8d1   :  { %10077 = vmatpush3.bf16.msra.mxu1 %v11624_v42 }
 0x8d2   :  { %10078 = vmatprep.subr.bf16.mxu1 %v11625_v5 }
 0x8d5   :  { %10079 = vmatpush3.bf16.msra.mxu1 %v11626_v56 }
 0x8d6   :  { %10080 = vmatprep.subr.bf16.mxu1 %v11627_v3 }
 0x8d9   :  { %10081 = vmatpush3.bf16.msra.mxu1 %v11628_v14 }
 0x8da   :  { %10082 = vmatprep.subr.bf16.mxu1 %v11629_v18 }
 0x8dd   :  { %v7824_v32 = vpop.f32.mrb[4].mxu1  ;;  %v7865_v7 = vpop.f32.mrb[8].mxu0  ;;  %10083 = vmatpush3.bf16.msra.mxu1 %v11630_v16 }
 0x8de   :  { %v7875_v9 = vadd.f32 %v7824_v32, %v14267_v20  ;;  %v7877_v37 = vadd.f32 %v7865_v7, %v14269_v61  ;;  %v7826_v31 = vpop.f32.mrb[5].mxu1  ;;  %v11039_v21 = vpop.f32.mrb[9].mxu0  ;;  %10084 = vmatprep.subr.bf16.mxu1 %v11632_v47  ;;  %v11636_v20 = vld [vmem:[%s14368_s13 + $0x138] sm:$0xff]  }
 0x8df   :  { %v7876_v11 = vadd.f32 %v7826_v31, %v14271_v43  ;;  %v7828_v0 = vpop.f32.mrb[6].mxu1  ;;  %v7868_v6 = vpop.f32.mrb[10].mxu0 }
 0x8e0   :  { %v7919_v41 = vadd.f32 %v7899_v24, %v7875_v9  ;;  %v7921_v17 = vadd.f32 %v7907_v50, %v7877_v37  ;;  %v7829_v12 = vpop.f32.mrb[7].mxu1  ;;  %v11040_v45 = vpop.f32.mrb[11].mxu0 }
 0x8e1   :  { %v7920_v57 = vadd.f32 %v7903_v27, %v7876_v11  ;;  %10085 = vmatpush3.bf16.msra.mxu1 %v11633_v55 }
 0x8e2   :  { %v7926_v61 = vmax.f32 %v7919_v41, 0.0  ;;  %v7928_v35 = vmax.f32 %v7921_v17, 0.0  ;;  %10086 = vmatprep.subr.bf16.mxu1 %v11635_v8 }
 0x8e3   :  { %v7927_v53 = vmax.f32 %v7920_v57, 0.0 }
 0x8e4   :  { %v7935_v26 = vpack.c.bf16 %v7928_v35, %v7928_v35  ;;  %v7933_v43 = vpack.c.bf16 %v7926_v61, %v7926_v61 }
 0x8e5   :  { %v7934_v49 = vpack.c.bf16 %v7927_v53, %v7927_v53  ;;  %10087 = vmatpush3.bf16.msra.mxu1 %v11636_v20 }
 0x8e6   :  { %11046 = vmatmul.mubr.msk.bf16.vlgmr.msra.gmra.mrb[16].mxu0 %vm8337_vm2, %v7935_v26 }
 0x8e7   :  { %8453 = vmatprep.mubr.bf16.mxu1 %v7934_v49 }
 0x8e8   :  { %8454 = vmatmul.mubr.bf16.vlgmr.msra.gmra.mrb[12].mxu1 %v7933_v43 }
 0x99b   :  { %v10044_v23 = vpop.f32.mrb[8].mxu1  ;;  %v10066_v44 = vpop.f32.mrb[12].mxu0 }
 0x99c   :  { %v10045_v22 = vpop.f32.mrb[9].mxu1  ;;  %v10067_v58 = vpop.f32.mrb[13].mxu0 }
 0x99d   :  { %v10046_v60 = vadd.f32 %v10045_v22, %v10044_v23  ;;  %v10068_v13 = vadd.f32 %v10067_v58, %v10066_v44  ;;  %v10047_v38 = vpop.f32.mrb[10].mxu1  ;;  %v10069_v48 = vpop.f32.mrb[14].mxu0 }
 0x99e   :  { %v10048_v40 = vpop.f32.mrb[11].mxu1  ;;  %v10070_v54 = vpop.f32.mrb[15].mxu0 }
 0x99f   :  { %v8376_v52 = vadd.f32 %v10046_v60, %v8036_v59 }
 0x9a1   :  { %v8416_v34 = vadd.f32 %v10068_v13, %v8376_v52 }
 0x9b9   :  { %v8495_v33 = vpop.f32.mrb[16].mxu0 }
 0x9ba   :  { %v11047_v10 = vpop.f32.mrb[17].mxu0 }
 0x9bb   :  { %v10088_v51 = vpop.f32.mrb[12].mxu1  ;;  %v8498_v2 = vpop.f32.mrb[18].mxu0 }
 0x9bc   :  { %v10089_v25 = vpop.f32.mrb[13].mxu1  ;;  %v11048_v4 = vpop.f32.mrb[19].mxu0 }
 0x9bd   :  { %v10090_v62 = vadd.f32 %v10089_v25, %v10088_v51  ;;  %v10091_v1 = vpop.f32.mrb[14].mxu1 }
 0x9be   :  { %v10092_v15 = vpop.f32.mrb[15].mxu1 }
 0x9bf   :  { %v8456_v19 = vadd.f32 %v10090_v62, %v8416_v34 }
 0x9c1   :  { %v8496_v36 = vadd.f32 %v8495_v33, %v8456_v19 }
 0x9c3   :  { %8501 = vst.msk [vmem:[%s14371_s15] sm:$0x1] %vm81_vm5, %v8496_v36 }

</bundles_post_ra>
